<compile_context>
chip_gen: v7x
topology: tpu7x:2x2x1
jax: 0.10.0
libtpu: 0.0.40
codegen_flags: <defaults>
</compile_context>

<pallas_src>
import functools

import numpy as np
import jax
import jax.numpy as jnp
from jax.experimental import pallas as pl
from jax.experimental.pallas import tpu as pltpu

_BN_EPS = 1e-5
_NUM_SEGMENTS = 8

# ---------------------------------------------------------------------------
# pltpu.roll direction probe (cached).  A tiny kernel tells us whether pltpu.roll
# matches jnp.roll semantics (out[i] = in[i - shift]) or the opposite; if it
# misbehaves we fall back to concat-based rotation (still only a handful per conv).
# ---------------------------------------------------------------------------
_ROLL_MODE = None


def _probe_roll_mode():
    global _ROLL_MODE
    if _ROLL_MODE is not None:
        return _ROLL_MODE
    try:
        def probe(x_ref, o_ref):
            o_ref[...] = pltpu.roll(x_ref[...], 1, axis=1)

        x = jnp.tile(jnp.arange(256, dtype=jnp.float32)[None, :], (8, 1))
        out = np.asarray(
            pl.pallas_call(probe, out_shape=jax.ShapeDtypeStruct((8, 256), jnp.float32))(x))
        if out[0, 1] == 0.0 and out[0, 0] == 255.0:
            _ROLL_MODE = "jnp"        # pltpu.roll == jnp.roll
        elif out[0, 0] == 1.0 and out[0, 255] == 0.0:
            _ROLL_MODE = "flipped"    # rotates the other way
        else:
            _ROLL_MODE = "concat"
    except Exception:                 # conservative fallback
        _ROLL_MODE = "concat"
    return _ROLL_MODE


def _make_roll_lane(mode):
    """Returns roll_lane(a, s) with jnp.roll semantics along the last (lane) axis."""
    def roll_lane(a, s):
        length = a.shape[-1]
        s = s % length
        if s == 0:
            return a
        if mode == "concat":
            return jnp.concatenate([a[..., length - s:], a[..., :length - s]], axis=-1)
        if mode == "flipped":
            s = length - s
        return pltpu.roll(a, s, axis=a.ndim - 1)
    return roll_lane


# ---------------------------------------------------------------------------
# Factored 3x3x3 conv (2 in-channels -> 1 out-channel, padding=1, no bias).
# `wgt` is a Python list of 54 pre-read SMEM scalars, layout (ci, k_lead, k_mid,
# k_inner); the BN scale is already folded in.
# ---------------------------------------------------------------------------
def _conv2to1_flat(ch_max, ch_mean, wgt, masks, d_in, roll_lane):
    """Operands flattened as (R, d_mid*d_in); conv over (leading=R, middle, inner).

    masks = (m_ip, m_im, m_mp, m_mm): (1, L) f32 boundary masks,
      m_ip: inner index != d_in-1 (valid for inner +1 tap)
      m_im: inner index != 0      (inner -1 tap)
      m_mp: middle index != last  (middle +1 tap)
      m_mm: middle index != 0     (middle -1 tap)
    """
    m_ip, m_im, m_mp, m_mm = masks
    length = ch_max.shape[-1]
    zrow = jnp.zeros((1, length), ch_max.dtype)

    def lead_shift(a, off):
        if off == 0:
            return a
        if off > 0:
            return jnp.concatenate([a[off:, :], zrow], axis=0)
        return jnp.concatenate([zrow, a[:off, :]], axis=0)

    planes = [lead_shift(ch, off) for ch in (ch_max, ch_mean) for off in (-1, 0, 1)]

    out = None
    for k_in in range(3):
        q = None
        for k_mid in range(3):
            p = None
            for idx, plane in enumerate(planes):
                ci, k_lead = divmod(idx, 3)
                wv = wgt[((ci * 3 + k_lead) * 3 + k_mid) * 3 + k_in]
                term = wv * plane
                p = term if p is None else p + term
            if k_mid == 0:          # middle offset -1: read m-1
                p = roll_lane(p, d_in) * m_mm
            elif k_mid == 2:        # middle offset +1: read m+1
                p = roll_lane(p, -d_in) * m_mp
            q = p if q is None else q + p
        if k_in == 0:               # inner offset -1: read i-1
            q = roll_lane(q, 1) * m_im
        elif k_in == 2:             # inner offset +1: read i+1
            q = roll_lane(q, -1) * m_ip
        out = q if out is None else out + q
    return out


def _conv2to1_3d(ch_max, ch_mean, wgt):
    """Same conv on small pooled (D0, D1, D2) operands, concat-based zero-fill shifts."""
    # TODO(synk): pooled-conv operands are only ~16 lanes wide; a lane-dense repack
    # would cut their op count further, but they are tiny compared to the main slab.
    def shift(a, off, axis):
        if off == 0:
            return a
        zshape = list(a.shape)
        zshape[axis] = 1
        z = jnp.zeros(zshape, a.dtype)
        idx = [slice(None)] * a.ndim
        if off > 0:
            idx[axis] = slice(off, None)
            return jnp.concatenate([a[tuple(idx)], z], axis=axis)
        idx[axis] = slice(None, off)
        return jnp.concatenate([z, a[tuple(idx)]], axis=axis)

    planes = [shift(ch, off, 0) for ch in (ch_max, ch_mean) for off in (-1, 0, 1)]
    out = None
    for k2 in range(3):
        q = None
        for k1 in range(3):
            p = None
            for idx, plane in enumerate(planes):
                ci, k0 = divmod(idx, 3)
                wv = wgt[((ci * 3 + k0) * 3 + k1) * 3 + k2]
                term = wv * plane
                p = term if p is None else p + term
            p = shift(p, k1 - 1, 1)
            q = p if q is None else q + p
        q = shift(q, k2 - 1, 2)
        out = q if out is None else out + q
    return out


# ---------------------------------------------------------------------------
# Kernel.
# ---------------------------------------------------------------------------
def _make_cinst_kernel(nb, t, c, h, w, roll_mode):
    hw = h * w
    roll_lane = _make_roll_lane(roll_mode)
    pow2 = (h & (h - 1)) == 0 and (w & (w - 1)) == 0

    def kernel(x_ref, m_ref, e_ref, g_ref, wc_ref, wt_ref, wh_ref, ww_ref, o_ref):
        # -- hoisted grid-step invariants (NOT re-read per packed slab) --
        masks = (m_ref[0:1, :], m_ref[1:2, :], m_ref[2:3, :], m_ref[3:4, :])
        e_mat = e_ref[...]                                  # (w+h, hw) expansion one-hots
        g_mat = g_ref[...]                                  # (hw, h)  strided-lane gather
        wc_s = [wc_ref[i] for i in range(54)]
        wt_s = [wt_ref[i] for i in range(54)]
        wh_s = [wh_ref[i] for i in range(54)]
        ww_s = [ww_ref[i] for i in range(54)]

        def sig(v):
            # 1/(1+e^-v) with the divide pushed onto the (otherwise idle) EUP slot.
            return pl.reciprocal(1.0 + jnp.exp(-v), approx=True)

        def process(bi):
            x3 = x_ref[bi]                                  # (c, t, hw), minor tile (t, hw)

            # --- channel attention: pool over C (leading axis), conv over (T; H, W) ---
            cmax = jnp.max(x3, axis=0)                      # (t, hw)
            cmean = jnp.sum(x3, axis=0) * (1.0 / c)
            yc = sig(_conv2to1_flat(cmax, cmean, wc_s, masks, w, roll_lane))
            xm = x3 * yc[None, :, :]                        # (c, t, hw)

            # --- temporal attention: pool over T (sublane axis), conv over (C; H, W) ---
            tmax = jnp.max(xm, axis=1)                      # (c, hw)
            tmean = jnp.sum(xm, axis=1) * (1.0 / t)
            yt = sig(_conv2to1_flat(tmax, tmean, wt_s, masks, w, roll_lane))

            # --- H / W pooled statistics (lane layout: l = h_idx*w + w_idx) ---
            xm2d = xm.reshape(c * t, hw)
            if pow2:
                # H-pool: log2 roll-tree over lane strides {h/2*w, ..., w}; the lanes we
                # keep (0..w-1) never read wrapped data, so no masking is needed.
                hm = xm2d
                hs = xm2d
                s = (h // 2) * w
                while s >= w:
                    hm = jnp.maximum(hm, roll_lane(hm, -s))
                    hs = hs + roll_lane(hs, -s)
                    s //= 2
                hmax2 = hm[:, :w]                           # (c*t, w)
                hmean2 = hs[:, :w] * (1.0 / h)
                # W-pool: roll-tree inside each w-lane group; result lands at lane h_idx*w.
                wm = xm2d
                ws = xm2d
                s = w // 2
                while s >= 1:
                    wm = jnp.maximum(wm, roll_lane(wm, -s))
                    ws = ws + roll_lane(ws, -s)
                    s //= 2
                # Compact the strided lanes with a one-hot gather matmul (idle MXU).
                wstk = jnp.concatenate([wm, ws * (1.0 / w)], axis=0)      # (2*c*t, hw)
                wg = jnp.dot(wstk, g_mat, preferred_element_type=jnp.float32)
                wmax2 = wg[:c * t]                          # (c*t, h)
                wmean2 = wg[c * t:]
            else:
                # Non-power-of-two fallback: per-row slice loop (correct, slower).
                sl0 = xm2d[:, 0:w]
                hmx, hsm = sl0, sl0
                wmax_parts = [jnp.max(sl0, axis=-1, keepdims=True)]
                wsum_parts = [jnp.sum(sl0, axis=-1, keepdims=True)]
                for i in range(1, h):
                    sl = xm2d[:, i * w:(i + 1) * w]
                    hmx = jnp.maximum(hmx, sl)
                    hsm = hsm + sl
                    wmax_parts.append(jnp.max(sl, axis=-1, keepdims=True))
                    wsum_parts.append(jnp.sum(sl, axis=-1, keepdims=True))
                hmax2 = hmx
                hmean2 = hsm * (1.0 / h)
                wmax2 = jnp.concatenate(wmax_parts, axis=-1)
                wmean2 = jnp.concatenate(wsum_parts, axis=-1) * (1.0 / w)

            # --- H attention: conv over (c, t, w) with host-permuted weights ---
            yh = sig(_conv2to1_3d(hmax2.reshape(c, t, w), hmean2.reshape(c, t, w), wh_s))
            # --- W attention: conv over (c, t, h) with host-permuted weights ---
            yw = sig(_conv2to1_3d(wmax2.reshape(c, t, h), wmean2.reshape(c, t, h), ww_s))

            # Expand yh over H and yw over W back to the lane-dense (.., hw) layout with
            # a single one-hot matmul:  att_hw[r, l] = yh[r, l % w] + yw[r, l // w].
            yhw = jnp.concatenate([yh.reshape(c * t, w), yw.reshape(c * t, h)], axis=-1)
            att_hw = jnp.dot(yhw, e_mat, preferred_element_type=jnp.float32)  # (c*t, hw)

            att = yt[:, None, :] + att_hw.reshape(c, t, hw)
            o_ref[bi] = x3 * att * (1.0 / 3.0)

        if nb == 1:
            process(0)
        else:
            def body(bi, carry):
                process(bi)
                return carry
            jax.lax.fori_loop(0, nb, body, 0)

    return kernel


# ---------------------------------------------------------------------------
# Wrapper.
# ---------------------------------------------------------------------------
def cinst_forward(x, wc, wt, wh, ww, num_segments=_NUM_SEGMENTS):
    return _cinst_forward(x, wc, wt, wh, ww, num_segments, _probe_roll_mode())


@functools.partial(jax.jit, static_argnums=(5, 6))
def _cinst_forward(x, wc, wt, wh, ww, num_segments, roll_mode):
    """x: (B*T, C, H, W).  wc/wt/wh/ww: (2, 3, 3, 3) Conv3d weights (out-channel squeezed)."""
    bn, c, h, w = x.shape
    if bn % num_segments != 0:
        raise ValueError(f"batch {bn} not divisible by num_segments {num_segments}")
    b = bn // num_segments
    t = num_segments
    hw = h * w

    # Sublane-packed, lane-dense layout: (b, c, t, hw) so the minor tile is (t, hw).
    x4 = jnp.transpose(x.reshape(b, t, c, hw).astype(jnp.float32), (0, 2, 1, 3))

    # Fold the inference-mode BatchNorm scale into the conv weights; permute the H / W
    # conv kernels so they match the kernel's (c, t, w) / (c, t, h) pooled layouts.
    bn_scale = float(1.0 / np.sqrt(1.0 + _BN_EPS))
    wc_f = (wc.astype(jnp.float32) * bn_scale).reshape(-1)                         # (ci,kt,kh,kw)
    wt_f = (wt.astype(jnp.float32) * bn_scale).reshape(-1)                         # (ci,kc,kh,kw)
    wh_f = (jnp.transpose(wh.astype(jnp.float32), (0, 2, 1, 3)) * bn_scale).reshape(-1)  # ->(ci,kc,kt,kw)
    ww_f = (jnp.transpose(ww.astype(jnp.float32), (0, 3, 1, 2)) * bn_scale).reshape(-1)  # ->(ci,kc,kt,kh)

    # Boundary masks for the flattened H*W lane axis (interior W boundaries need masking
    # after a lane rotation; H boundaries are the ends of the flat axis).
    lane = np.arange(hw, dtype=np.int64)
    inner = lane % w
    mid = lane // w
    masks = jnp.asarray(np.stack([
        inner != (w - 1),    # ok to read w+1
        inner != 0,          # ok to read w-1
        mid != (h - 1),      # ok to read h+1
        mid != 0,            # ok to read h-1
    ]).astype(np.float32))   # (4, hw)

    # One-hot expansion matrix: first w rows tile a (.., w) map over H, next h rows
    # broadcast a (.., h) map over W.  One-hot gather matrix picks lanes {h_idx*w}.
    e_np = np.zeros((w + h, hw), np.float32)
    e_np[inner, lane] = 1.0
    e_np[w + mid, lane] = 1.0
    g_np = np.zeros((hw, h), np.float32)
    g_np[np.arange(h) * w, np.arange(h)] = 1.0
    e_mat = jnp.asarray(e_np)
    g_mat = jnp.asarray(g_np)

    # Pack nb batch elements per grid step, but keep the grid length >= 2 whenever
    # possible so both v7x TensorCores get work; cap the block at ~2 MiB.
    per_batch = c * t * hw * 4
    min_grid = 2 if b >= 2 else 1
    nb = 1
    for cand in range(1, b + 1):
        if b % cand == 0 and (b // cand) >= min_grid and cand * per_batch <= (2 << 20):
            nb = cand
    grid = (b // nb,)
    block_bytes = nb * per_batch

    kernel = _make_cinst_kernel(nb, t, c, h, w, roll_mode)

    x_spec = pl.BlockSpec((nb, c, t, hw), lambda i: (i, 0, 0, 0))
    mask_spec = pl.BlockSpec((4, hw), lambda i: (0, 0))
    e_spec = pl.BlockSpec((w + h, hw), lambda i: (0, 0))
    g_spec = pl.BlockSpec((hw, h), lambda i: (0, 0))
    smem_spec = pl.BlockSpec(memory_space=pltpu.MemorySpace.SMEM)

    # Tight explicit VMEM budget: double-buffered in/out plus a few block-sized
    # temporaries; stays well under v7x's 64 MiB physical VMEM.
    vmem_limit = int(min(48 * 2**20, max(8 * 2**20, 16 * block_bytes)))

    out4 = pl.pallas_call(
        kernel,
        out_shape=jax.ShapeDtypeStruct((b, c, t, hw), jnp.float32),
        grid=grid,
        in_specs=[x_spec, mask_spec, e_spec, g_spec,
                  smem_spec, smem_spec, smem_spec, smem_spec],
        out_specs=x_spec,
        compiler_params=pltpu.CompilerParams(
            dimension_semantics=("parallel",),
            vmem_limit_bytes=vmem_limit,
        ),
    )(x4, masks, e_mat, g_mat, wc_f, wt_f, wh_f, ww_f)

    out = jnp.transpose(out4, (0, 2, 1, 3)).reshape(bn, c, h, w)
    return out.astype(x.dtype)


# ---------------------------------------------------------------------------
# Pure-JAX reference (mirrors the PyTorch module with inference-mode BN) for validation.
# ---------------------------------------------------------------------------
def _cinst_reference(x, wc, wt, wh, ww, num_segments):
    bn, c, h, w = x.shape
    b = bn // num_segments
    t = num_segments
    x5 = x.reshape(b, t, c, h, w).astype(jnp.float32)
    bn_scale = 1.0 / np.sqrt(1.0 + _BN_EPS)
    sig = jax.nn.sigmoid

    def conv3d(inp, wgt):  # inp: (b, 2, D1, D2, D3), wgt: (2, 3, 3, 3)
        out = jax.lax.conv_general_dilated(
            inp, wgt[None], window_strides=(1, 1, 1), padding=[(1, 1)] * 3,
            dimension_numbers=("NCDHW", "OIDHW", "NCDHW"),
            precision=jax.lax.Precision.HIGHEST)
        return out[:, 0]

    yc_in = jnp.stack([x5.max(axis=2), x5.mean(axis=2)], axis=1)       # (b,2,t,h,w)
    yc = sig(bn_scale * conv3d(yc_in, wc))                             # (b,t,h,w)
    xm = x5 * yc[:, :, None, :, :]

    yt_in = jnp.stack([xm.max(axis=1), xm.mean(axis=1)], axis=1)       # (b,2,c,h,w)
    yt = sig(bn_scale * conv3d(yt_in, wt))                             # (b,c,h,w)

    yh_in = jnp.stack([xm.max(axis=3), xm.mean(axis=3)], axis=1)       # (b,2,t,c,w)
    yh = sig(bn_scale * conv3d(yh_in, wh))                             # (b,t,c,w)

    yw_in = jnp.stack([xm.max(axis=4), xm.mean(axis=4)], axis=1)       # (b,2,t,c,h)
    yw_in = jnp.transpose(yw_in, (0, 1, 2, 4, 3))                      # (b,2,t,h,c)
    yw = sig(bn_scale * conv3d(yw_in, ww))                             # (b,t,h,c)
    yw = jnp.transpose(yw, (0, 1, 3, 2))                               # (b,t,c,h)

    out = (1.0 / 3.0) * x5 * (yt[:, None, :, :, :]
                              + yh[:, :, :, None, :]
                              + yw[:, :, :, :, None])
    return out.reshape(bn, c, h, w)


if __name__ == "__main__":
    key = jax.random.PRNGKey(0)
    kx, kc, kt, kh, kw = jax.random.split(key, 5)

    b_groups, t, c, h, w = 2, _NUM_SEGMENTS, 4, 16, 16
    x = jax.random.normal(kx, (b_groups * t, c, h, w), jnp.float32)

    # Deterministic synthetic weights matching the module's init scheme
    # (shapes (1,2,3,3,3) with the out-channel squeezed -> (2,3,3,3)).
    std_kaiming = (2.0 / 27.0) ** 0.5               # kaiming_normal, fan_out, relu
    std_xavier = (2.0 / (2 * 27 + 1 * 27)) ** 0.5   # xavier_normal
    wc = std_kaiming * jax.random.normal(kc, (2, 3, 3, 3), jnp.float32)
    wt = std_xavier * jax.random.normal(kt, (2, 3, 3, 3), jnp.float32)
    wh = std_xavier * jax.random.normal(kh, (2, 3, 3, 3), jnp.float32)
    ww = std_xavier * jax.random.normal(kw, (2, 3, 3, 3), jnp.float32)

    out = cinst_forward(x, wc, wt, wh, ww)
    jax.block_until_ready(out)
    assert out.shape == x.shape and out.dtype == jnp.float32

    ref = _cinst_reference(x, wc, wt, wh, ww, _NUM_SEGMENTS)
    np.testing.assert_allclose(np.asarray(out), np.asarray(ref), atol=2e-2, rtol=2e-2)
    print("KERNEL_OK")
</pallas_src>

<mosaic_0001>
module attributes {stable_mosaic.version = 11 : i64} {
  func.func @probe(%arg0: memref<8x256xf32, #tpu.memory_space<vmem>>, %arg1: memref<8x256xf32, #tpu.memory_space<vmem>>) attributes {dimension_semantics = [], scalar_prefetch = 0 : i64, scratch_operands = 0 : i64, tpu.core_type = #tpu.core_type<tc>} {
    %c0 = arith.constant 0 : index
    %c0_0 = arith.constant 0 : index
    %0 = vector.load %arg0[%c0, %c0_0] : memref<8x256xf32, #tpu.memory_space<vmem>>, vector<8x256xf32>
    %c1_i32 = arith.constant 1 : i32
    %1 = tpu.dynamic_rotate %0 by %c1_i32 dim 1 : vector<8x256xf32>, i32 -> vector<8x256xf32>
    %c0_1 = arith.constant 0 : index
    %c0_2 = arith.constant 0 : index
    %2 = vector.load %arg1[%c0_1, %c0_2] : memref<8x256xf32, #tpu.memory_space<vmem>>, vector<8x256xf32>
    tpu.vector_store %arg1[%c0_1, %c0_2], %1 {strides = array<i32>} : memref<8x256xf32, #tpu.memory_space<vmem>>, vector<8x256xf32>,
    return
  }
}

module attributes {stable_mosaic.version = 11 : i64} {
  func.func @kernel(%arg0: i32, %arg1: memref<1x4x8x256xf32, #tpu.memory_space<vmem>>, %arg2: memref<4x256xf32, #tpu.memory_space<vmem>>, %arg3: memref<32x256xf32, #tpu.memory_space<vmem>>, %arg4: memref<256x16xf32, #tpu.memory_space<vmem>>, %arg5: memref<54xf32, #tpu.memory_space<smem>>, %arg6: memref<54xf32, #tpu.memory_space<smem>>, %arg7: memref<54xf32, #tpu.memory_space<smem>>, %arg8: memref<54xf32, #tpu.memory_space<smem>>, %arg9: memref<1x4x8x256xf32, #tpu.memory_space<vmem>>) attributes {dimension_semantics = [#tpu.dimension_semantics<parallel>], iteration_bounds = array<i64: 2>, scalar_prefetch = 0 : i64, scratch_operands = 0 : i64, tpu.core_type = #tpu.core_type<tc>, window_params = [{transform_indices = @transform_0, window_bounds = array<i64: 1, 4, 8, 256>}, {pipeline_mode = #tpu.pipeline_mode<synchronous>, transform_indices = @transform_1, window_bounds = array<i64: 4, 256>}, {pipeline_mode = #tpu.pipeline_mode<synchronous>, transform_indices = @transform_2, window_bounds = array<i64: 32, 256>}, {pipeline_mode = #tpu.pipeline_mode<synchronous>, transform_indices = @transform_3, window_bounds = array<i64: 256, 16>}, {transform_indices = @transform_4, window_bounds = array<i64: 54>}, {transform_indices = @transform_5, window_bounds = array<i64: 54>}, {transform_indices = @transform_6, window_bounds = array<i64: 54>}, {transform_indices = @transform_7, window_bounds = array<i64: 54>}, {transform_indices = @transform_8, window_bounds = array<i64: 1, 4, 8, 256>}]} {
    %c0 = arith.constant 0 : index
    %c0_0 = arith.constant 0 : index
    %0 = vector.load %arg2[%c0, %c0_0] : memref<4x256xf32, #tpu.memory_space<vmem>>, vector<1x256xf32>
    %c1 = arith.constant 1 : index
    %c0_1 = arith.constant 0 : index
    %1 = vector.load %arg2[%c1, %c0_1] : memref<4x256xf32, #tpu.memory_space<vmem>>, vector<1x256xf32>
    %c2 = arith.constant 2 : index
    %c0_2 = arith.constant 0 : index
    %2 = vector.load %arg2[%c2, %c0_2] : memref<4x256xf32, #tpu.memory_space<vmem>>, vector<1x256xf32>
    %c3 = arith.constant 3 : index
    %c0_3 = arith.constant 0 : index
    %3 = vector.load %arg2[%c3, %c0_3] : memref<4x256xf32, #tpu.memory_space<vmem>>, vector<1x256xf32>
    %c0_4 = arith.constant 0 : index
    %c0_5 = arith.constant 0 : index
    %4 = vector.load %arg3[%c0_4, %c0_5] : memref<32x256xf32, #tpu.memory_space<vmem>>, vector<32x256xf32>
    %c0_6 = arith.constant 0 : index
    %c0_7 = arith.constant 0 : index
    %5 = vector.load %arg4[%c0_6, %c0_7] : memref<256x16xf32, #tpu.memory_space<vmem>>, vector<256x16xf32>
    %c0_8 = arith.constant 0 : index
    %6 = memref.load %arg5[%c0_8] : memref<54xf32, #tpu.memory_space<smem>>
    %c1_9 = arith.constant 1 : index
    %7 = memref.load %arg5[%c1_9] : memref<54xf32, #tpu.memory_space<smem>>
    %c2_10 = arith.constant 2 : index
    %8 = memref.load %arg5[%c2_10] : memref<54xf32, #tpu.memory_space<smem>>
    %c3_11 = arith.constant 3 : index
    %9 = memref.load %arg5[%c3_11] : memref<54xf32, #tpu.memory_space<smem>>
    %c4 = arith.constant 4 : index
    %10 = memref.load %arg5[%c4] : memref<54xf32, #tpu.memory_space<smem>>
    %c5 = arith.constant 5 : index
    %11 = memref.load %arg5[%c5] : memref<54xf32, #tpu.memory_space<smem>>
    %c6 = arith.constant 6 : index
    %12 = memref.load %arg5[%c6] : memref<54xf32, #tpu.memory_space<smem>>
    %c7 = arith.constant 7 : index
    %13 = memref.load %arg5[%c7] : memref<54xf32, #tpu.memory_space<smem>>
    %c8 = arith.constant 8 : index
    %14 = memref.load %arg5[%c8] : memref<54xf32, #tpu.memory_space<smem>>
    %c9 = arith.constant 9 : index
    %15 = memref.load %arg5[%c9] : memref<54xf32, #tpu.memory_space<smem>>
    %c10 = arith.constant 10 : index
    %16 = memref.load %arg5[%c10] : memref<54xf32, #tpu.memory_space<smem>>
    %c11 = arith.constant 11 : index
    %17 = memref.load %arg5[%c11] : memref<54xf32, #tpu.memory_space<smem>>
    %c12 = arith.constant 12 : index
    %18 = memref.load %arg5[%c12] : memref<54xf32, #tpu.memory_space<smem>>
    %c13 = arith.constant 13 : index
    %19 = memref.load %arg5[%c13] : memref<54xf32, #tpu.memory_space<smem>>
    %c14 = arith.constant 14 : index
    %20 = memref.load %arg5[%c14] : memref<54xf32, #tpu.memory_space<smem>>
    %c15 = arith.constant 15 : index
    %21 = memref.load %arg5[%c15] : memref<54xf32, #tpu.memory_space<smem>>
    %c16 = arith.constant 16 : index
    %22 = memref.load %arg5[%c16] : memref<54xf32, #tpu.memory_space<smem>>
    %c17 = arith.constant 17 : index
    %23 = memref.load %arg5[%c17] : memref<54xf32, #tpu.memory_space<smem>>
    %c18 = arith.constant 18 : index
    %24 = memref.load %arg5[%c18] : memref<54xf32, #tpu.memory_space<smem>>
    %c19 = arith.constant 19 : index
    %25 = memref.load %arg5[%c19] : memref<54xf32, #tpu.memory_space<smem>>
    %c20 = arith.constant 20 : index
    %26 = memref.load %arg5[%c20] : memref<54xf32, #tpu.memory_space<smem>>
    %c21 = arith.constant 21 : index
    %27 = memref.load %arg5[%c21] : memref<54xf32, #tpu.memory_space<smem>>
    %c22 = arith.constant 22 : index
    %28 = memref.load %arg5[%c22] : memref<54xf32, #tpu.memory_space<smem>>
    %c23 = arith.constant 23 : index
    %29 = memref.load %arg5[%c23] : memref<54xf32, #tpu.memory_space<smem>>
    %c24 = arith.constant 24 : index
    %30 = memref.load %arg5[%c24] : memref<54xf32, #tpu.memory_space<smem>>
    %c25 = arith.constant 25 : index
    %31 = memref.load %arg5[%c25] : memref<54xf32, #tpu.memory_space<smem>>
    %c26 = arith.constant 26 : index
    %32 = memref.load %arg5[%c26] : memref<54xf32, #tpu.memory_space<smem>>
    %c27 = arith.constant 27 : index
    %33 = memref.load %arg5[%c27] : memref<54xf32, #tpu.memory_space<smem>>
    %c28 = arith.constant 28 : index
    %34 = memref.load %arg5[%c28] : memref<54xf32, #tpu.memory_space<smem>>
    %c29 = arith.constant 29 : index
    %35 = memref.load %arg5[%c29] : memref<54xf32, #tpu.memory_space<smem>>
    %c30 = arith.constant 30 : index
    %36 = memref.load %arg5[%c30] : memref<54xf32, #tpu.memory_space<smem>>
    %c31 = arith.constant 31 : index
    %37 = memref.load %arg5[%c31] : memref<54xf32, #tpu.memory_space<smem>>
    %c32 = arith.constant 32 : index
    %38 = memref.load %arg5[%c32] : memref<54xf32, #tpu.memory_space<smem>>
    %c33 = arith.constant 33 : index
    %39 = memref.load %arg5[%c33] : memref<54xf32, #tpu.memory_space<smem>>
    %c34 = arith.constant 34 : index
    %40 = memref.load %arg5[%c34] : memref<54xf32, #tpu.memory_space<smem>>
    %c35 = arith.constant 35 : index
    %41 = memref.load %arg5[%c35] : memref<54xf32, #tpu.memory_space<smem>>
    %c36 = arith.constant 36 : index
    %42 = memref.load %arg5[%c36] : memref<54xf32, #tpu.memory_space<smem>>
    %c37 = arith.constant 37 : index
    %43 = memref.load %arg5[%c37] : memref<54xf32, #tpu.memory_space<smem>>
    %c38 = arith.constant 38 : index
    %44 = memref.load %arg5[%c38] : memref<54xf32, #tpu.memory_space<smem>>
    %c39 = arith.constant 39 : index
    %45 = memref.load %arg5[%c39] : memref<54xf32, #tpu.memory_space<smem>>
    %c40 = arith.constant 40 : index
    %46 = memref.load %arg5[%c40] : memref<54xf32, #tpu.memory_space<smem>>
    %c41 = arith.constant 41 : index
    %47 = memref.load %arg5[%c41] : memref<54xf32, #tpu.memory_space<smem>>
    %c42 = arith.constant 42 : index
    %48 = memref.load %arg5[%c42] : memref<54xf32, #tpu.memory_space<smem>>
    %c43 = arith.constant 43 : index
    %49 = memref.load %arg5[%c43] : memref<54xf32, #tpu.memory_space<smem>>
    %c44 = arith.constant 44 : index
    %50 = memref.load %arg5[%c44] : memref<54xf32, #tpu.memory_space<smem>>
    %c45 = arith.constant 45 : index
    %51 = memref.load %arg5[%c45] : memref<54xf32, #tpu.memory_space<smem>>
    %c46 = arith.constant 46 : index
    %52 = memref.load %arg5[%c46] : memref<54xf32, #tpu.memory_space<smem>>
    %c47 = arith.constant 47 : index
    %53 = memref.load %arg5[%c47] : memref<54xf32, #tpu.memory_space<smem>>
    %c48 = arith.constant 48 : index
    %54 = memref.load %arg5[%c48] : memref<54xf32, #tpu.memory_space<smem>>
    %c49 = arith.constant 49 : index
    %55 = memref.load %arg5[%c49] : memref<54xf32, #tpu.memory_space<smem>>
    %c50 = arith.constant 50 : index
    %56 = memref.load %arg5[%c50] : memref<54xf32, #tpu.memory_space<smem>>
    %c51 = arith.constant 51 : index
    %57 = memref.load %arg5[%c51] : memref<54xf32, #tpu.memory_space<smem>>
    %c52 = arith.constant 52 : index
    %58 = memref.load %arg5[%c52] : memref<54xf32, #tpu.memory_space<smem>>
    %c53 = arith.constant 53 : index
    %59 = memref.load %arg5[%c53] : memref<54xf32, #tpu.memory_space<smem>>
    %c0_12 = arith.constant 0 : index
    %60 = memref.load %arg6[%c0_12] : memref<54xf32, #tpu.memory_space<smem>>
    %c1_13 = arith.constant 1 : index
    %61 = memref.load %arg6[%c1_13] : memref<54xf32, #tpu.memory_space<smem>>
    %c2_14 = arith.constant 2 : index
    %62 = memref.load %arg6[%c2_14] : memref<54xf32, #tpu.memory_space<smem>>
    %c3_15 = arith.constant 3 : index
    %63 = memref.load %arg6[%c3_15] : memref<54xf32, #tpu.memory_space<smem>>
    %c4_16 = arith.constant 4 : index
    %64 = memref.load %arg6[%c4_16] : memref<54xf32, #tpu.memory_space<smem>>
    %c5_17 = arith.constant 5 : index
    %65 = memref.load %arg6[%c5_17] : memref<54xf32, #tpu.memory_space<smem>>
    %c6_18 = arith.constant 6 : index
    %66 = memref.load %arg6[%c6_18] : memref<54xf32, #tpu.memory_space<smem>>
    %c7_19 = arith.constant 7 : index
    %67 = memref.load %arg6[%c7_19] : memref<54xf32, #tpu.memory_space<smem>>
    %c8_20 = arith.constant 8 : index
    %68 = memref.load %arg6[%c8_20] : memref<54xf32, #tpu.memory_space<smem>>
    %c9_21 = arith.constant 9 : index
    %69 = memref.load %arg6[%c9_21] : memref<54xf32, #tpu.memory_space<smem>>
    %c10_22 = arith.constant 10 : index
    %70 = memref.load %arg6[%c10_22] : memref<54xf32, #tpu.memory_space<smem>>
    %c11_23 = arith.constant 11 : index
    %71 = memref.load %arg6[%c11_23] : memref<54xf32, #tpu.memory_space<smem>>
    %c12_24 = arith.constant 12 : index
    %72 = memref.load %arg6[%c12_24] : memref<54xf32, #tpu.memory_space<smem>>
    %c13_25 = arith.constant 13 : index
    %73 = memref.load %arg6[%c13_25] : memref<54xf32, #tpu.memory_space<smem>>
    %c14_26 = arith.constant 14 : index
    %74 = memref.load %arg6[%c14_26] : memref<54xf32, #tpu.memory_space<smem>>
    %c15_27 = arith.constant 15 : index
    %75 = memref.load %arg6[%c15_27] : memref<54xf32, #tpu.memory_space<smem>>
    %c16_28 = arith.constant 16 : index
    %76 = memref.load %arg6[%c16_28] : memref<54xf32, #tpu.memory_space<smem>>
    %c17_29 = arith.constant 17 : index
    %77 = memref.load %arg6[%c17_29] : memref<54xf32, #tpu.memory_space<smem>>
    %c18_30 = arith.constant 18 : index
    %78 = memref.load %arg6[%c18_30] : memref<54xf32, #tpu.memory_space<smem>>
    %c19_31 = arith.constant 19 : index
    %79 = memref.load %arg6[%c19_31] : memref<54xf32, #tpu.memory_space<smem>>
    %c20_32 = arith.constant 20 : index
    %80 = memref.load %arg6[%c20_32] : memref<54xf32, #tpu.memory_space<smem>>
    %c21_33 = arith.constant 21 : index
    %81 = memref.load %arg6[%c21_33] : memref<54xf32, #tpu.memory_space<smem>>
    %c22_34 = arith.constant 22 : index
    %82 = memref.load %arg6[%c22_34] : memref<54xf32, #tpu.memory_space<smem>>
    %c23_35 = arith.constant 23 : index
    %83 = memref.load %arg6[%c23_35] : memref<54xf32, #tpu.memory_space<smem>>
    %c24_36 = arith.constant 24 : index
    %84 = memref.load %arg6[%c24_36] : memref<54xf32, #tpu.memory_space<smem>>
    %c25_37 = arith.constant 25 : index
    %85 = memref.load %arg6[%c25_37] : memref<54xf32, #tpu.memory_space<smem>>
    %c26_38 = arith.constant 26 : index
    %86 = memref.load %arg6[%c26_38] : memref<54xf32, #tpu.memory_space<smem>>
    %c27_39 = arith.constant 27 : index
    %87 = memref.load %arg6[%c27_39] : memref<54xf32, #tpu.memory_space<smem>>
    %c28_40 = arith.constant 28 : index
    %88 = memref.load %arg6[%c28_40] : memref<54xf32, #tpu.memory_space<smem>>
    %c29_41 = arith.constant 29 : index
    %89 = memref.load %arg6[%c29_41] : memref<54xf32, #tpu.memory_space<smem>>
    %c30_42 = arith.constant 30 : index
    %90 = memref.load %arg6[%c30_42] : memref<54xf32, #tpu.memory_space<smem>>
    %c31_43 = arith.constant 31 : index
    %91 = memref.load %arg6[%c31_43] : memref<54xf32, #tpu.memory_space<smem>>
    %c32_44 = arith.constant 32 : index
    %92 = memref.load %arg6[%c32_44] : memref<54xf32, #tpu.memory_space<smem>>
    %c33_45 = arith.constant 33 : index
    %93 = memref.load %arg6[%c33_45] : memref<54xf32, #tpu.memory_space<smem>>
    %c34_46 = arith.constant 34 : index
    %94 = memref.load %arg6[%c34_46] : memref<54xf32, #tpu.memory_space<smem>>
    %c35_47 = arith.constant 35 : index
    %95 = memref.load %arg6[%c35_47] : memref<54xf32, #tpu.memory_space<smem>>
    %c36_48 = arith.constant 36 : index
    %96 = memref.load %arg6[%c36_48] : memref<54xf32, #tpu.memory_space<smem>>
    %c37_49 = arith.constant 37 : index
    %97 = memref.load %arg6[%c37_49] : memref<54xf32, #tpu.memory_space<smem>>
    %c38_50 = arith.constant 38 : index
    %98 = memref.load %arg6[%c38_50] : memref<54xf32, #tpu.memory_space<smem>>
    %c39_51 = arith.constant 39 : index
    %99 = memref.load %arg6[%c39_51] : memref<54xf32, #tpu.memory_space<smem>>
    %c40_52 = arith.constant 40 : index
    %100 = memref.load %arg6[%c40_52] : memref<54xf32, #tpu.memory_space<smem>>
    %c41_53 = arith.constant 41 : index
    %101 = memref.load %arg6[%c41_53] : memref<54xf32, #tpu.memory_space<smem>>
    %c42_54 = arith.constant 42 : index
    %102 = memref.load %arg6[%c42_54] : memref<54xf32, #tpu.memory_space<smem>>
    %c43_55 = arith.constant 43 : index
    %103 = memref.load %arg6[%c43_55] : memref<54xf32, #tpu.memory_space<smem>>
    %c44_56 = arith.constant 44 : index
    %104 = memref.load %arg6[%c44_56] : memref<54xf32, #tpu.memory_space<smem>>
    %c45_57 = arith.constant 45 : index
    %105 = memref.load %arg6[%c45_57] : memref<54xf32, #tpu.memory_space<smem>>
    %c46_58 = arith.constant 46 : index
    %106 = memref.load %arg6[%c46_58] : memref<54xf32, #tpu.memory_space<smem>>
    %c47_59 = arith.constant 47 : index
    %107 = memref.load %arg6[%c47_59] : memref<54xf32, #tpu.memory_space<smem>>
    %c48_60 = arith.constant 48 : index
    %108 = memref.load %arg6[%c48_60] : memref<54xf32, #tpu.memory_space<smem>>
    %c49_61 = arith.constant 49 : index
    %109 = memref.load %arg6[%c49_61] : memref<54xf32, #tpu.memory_space<smem>>
    %c50_62 = arith.constant 50 : index
    %110 = memref.load %arg6[%c50_62] : memref<54xf32, #tpu.memory_space<smem>>
    %c51_63 = arith.constant 51 : index
    %111 = memref.load %arg6[%c51_63] : memref<54xf32, #tpu.memory_space<smem>>
    %c52_64 = arith.constant 52 : index
    %112 = memref.load %arg6[%c52_64] : memref<54xf32, #tpu.memory_space<smem>>
    %c53_65 = arith.constant 53 : index
    %113 = memref.load %arg6[%c53_65] : memref<54xf32, #tpu.memory_space<smem>>
    %c0_66 = arith.constant 0 : index
    %114 = memref.load %arg7[%c0_66] : memref<54xf32, #tpu.memory_space<smem>>
    %c1_67 = arith.constant 1 : index
    %115 = memref.load %arg7[%c1_67] : memref<54xf32, #tpu.memory_space<smem>>
    %c2_68 = arith.constant 2 : index
    %116 = memref.load %arg7[%c2_68] : memref<54xf32, #tpu.memory_space<smem>>
    %c3_69 = arith.constant 3 : index
    %117 = memref.load %arg7[%c3_69] : memref<54xf32, #tpu.memory_space<smem>>
    %c4_70 = arith.constant 4 : index
    %118 = memref.load %arg7[%c4_70] : memref<54xf32, #tpu.memory_space<smem>>
    %c5_71 = arith.constant 5 : index
    %119 = memref.load %arg7[%c5_71] : memref<54xf32, #tpu.memory_space<smem>>
    %c6_72 = arith.constant 6 : index
    %120 = memref.load %arg7[%c6_72] : memref<54xf32, #tpu.memory_space<smem>>
    %c7_73 = arith.constant 7 : index
    %121 = memref.load %arg7[%c7_73] : memref<54xf32, #tpu.memory_space<smem>>
    %c8_74 = arith.constant 8 : index
    %122 = memref.load %arg7[%c8_74] : memref<54xf32, #tpu.memory_space<smem>>
    %c9_75 = arith.constant 9 : index
    %123 = memref.load %arg7[%c9_75] : memref<54xf32, #tpu.memory_space<smem>>
    %c10_76 = arith.constant 10 : index
    %124 = memref.load %arg7[%c10_76] : memref<54xf32, #tpu.memory_space<smem>>
    %c11_77 = arith.constant 11 : index
    %125 = memref.load %arg7[%c11_77] : memref<54xf32, #tpu.memory_space<smem>>
    %c12_78 = arith.constant 12 : index
    %126 = memref.load %arg7[%c12_78] : memref<54xf32, #tpu.memory_space<smem>>
    %c13_79 = arith.constant 13 : index
    %127 = memref.load %arg7[%c13_79] : memref<54xf32, #tpu.memory_space<smem>>
    %c14_80 = arith.constant 14 : index
    %128 = memref.load %arg7[%c14_80] : memref<54xf32, #tpu.memory_space<smem>>
    %c15_81 = arith.constant 15 : index
    %129 = memref.load %arg7[%c15_81] : memref<54xf32, #tpu.memory_space<smem>>
    %c16_82 = arith.constant 16 : index
    %130 = memref.load %arg7[%c16_82] : memref<54xf32, #tpu.memory_space<smem>>
    %c17_83 = arith.constant 17 : index
    %131 = memref.load %arg7[%c17_83] : memref<54xf32, #tpu.memory_space<smem>>
    %c18_84 = arith.constant 18 : index
    %132 = memref.load %arg7[%c18_84] : memref<54xf32, #tpu.memory_space<smem>>
    %c19_85 = arith.constant 19 : index
    %133 = memref.load %arg7[%c19_85] : memref<54xf32, #tpu.memory_space<smem>>
    %c20_86 = arith.constant 20 : index
    %134 = memref.load %arg7[%c20_86] : memref<54xf32, #tpu.memory_space<smem>>
    %c21_87 = arith.constant 21 : index
    %135 = memref.load %arg7[%c21_87] : memref<54xf32, #tpu.memory_space<smem>>
    %c22_88 = arith.constant 22 : index
    %136 = memref.load %arg7[%c22_88] : memref<54xf32, #tpu.memory_space<smem>>
    %c23_89 = arith.constant 23 : index
    %137 = memref.load %arg7[%c23_89] : memref<54xf32, #tpu.memory_space<smem>>
    %c24_90 = arith.constant 24 : index
    %138 = memref.load %arg7[%c24_90] : memref<54xf32, #tpu.memory_space<smem>>
    %c25_91 = arith.constant 25 : index
    %139 = memref.load %arg7[%c25_91] : memref<54xf32, #tpu.memory_space<smem>>
    %c26_92 = arith.constant 26 : index
    %140 = memref.load %arg7[%c26_92] : memref<54xf32, #tpu.memory_space<smem>>
    %c27_93 = arith.constant 27 : index
    %141 = memref.load %arg7[%c27_93] : memref<54xf32, #tpu.memory_space<smem>>
    %c28_94 = arith.constant 28 : index
    %142 = memref.load %arg7[%c28_94] : memref<54xf32, #tpu.memory_space<smem>>
    %c29_95 = arith.constant 29 : index
    %143 = memref.load %arg7[%c29_95] : memref<54xf32, #tpu.memory_space<smem>>
    %c30_96 = arith.constant 30 : index
    %144 = memref.load %arg7[%c30_96] : memref<54xf32, #tpu.memory_space<smem>>
    %c31_97 = arith.constant 31 : index
    %145 = memref.load %arg7[%c31_97] : memref<54xf32, #tpu.memory_space<smem>>
    %c32_98 = arith.constant 32 : index
    %146 = memref.load %arg7[%c32_98] : memref<54xf32, #tpu.memory_space<smem>>
    %c33_99 = arith.constant 33 : index
    %147 = memref.load %arg7[%c33_99] : memref<54xf32, #tpu.memory_space<smem>>
    %c34_100 = arith.constant 34 : index
    %148 = memref.load %arg7[%c34_100] : memref<54xf32, #tpu.memory_space<smem>>
    %c35_101 = arith.constant 35 : index
    %149 = memref.load %arg7[%c35_101] : memref<54xf32, #tpu.memory_space<smem>>
    %c36_102 = arith.constant 36 : index
    %150 = memref.load %arg7[%c36_102] : memref<54xf32, #tpu.memory_space<smem>>
    %c37_103 = arith.constant 37 : index
    %151 = memref.load %arg7[%c37_103] : memref<54xf32, #tpu.memory_space<smem>>
    %c38_104 = arith.constant 38 : index
    %152 = memref.load %arg7[%c38_104] : memref<54xf32, #tpu.memory_space<smem>>
    %c39_105 = arith.constant 39 : index
    %153 = memref.load %arg7[%c39_105] : memref<54xf32, #tpu.memory_space<smem>>
    %c40_106 = arith.constant 40 : index
    %154 = memref.load %arg7[%c40_106] : memref<54xf32, #tpu.memory_space<smem>>
    %c41_107 = arith.constant 41 : index
    %155 = memref.load %arg7[%c41_107] : memref<54xf32, #tpu.memory_space<smem>>
    %c42_108 = arith.constant 42 : index
    %156 = memref.load %arg7[%c42_108] : memref<54xf32, #tpu.memory_space<smem>>
    %c43_109 = arith.constant 43 : index
    %157 = memref.load %arg7[%c43_109] : memref<54xf32, #tpu.memory_space<smem>>
    %c44_110 = arith.constant 44 : index
    %158 = memref.load %arg7[%c44_110] : memref<54xf32, #tpu.memory_space<smem>>
    %c45_111 = arith.constant 45 : index
    %159 = memref.load %arg7[%c45_111] : memref<54xf32, #tpu.memory_space<smem>>
    %c46_112 = arith.constant 46 : index
    %160 = memref.load %arg7[%c46_112] : memref<54xf32, #tpu.memory_space<smem>>
    %c47_113 = arith.constant 47 : index
    %161 = memref.load %arg7[%c47_113] : memref<54xf32, #tpu.memory_space<smem>>
    %c48_114 = arith.constant 48 : index
    %162 = memref.load %arg7[%c48_114] : memref<54xf32, #tpu.memory_space<smem>>
    %c49_115 = arith.constant 49 : index
    %163 = memref.load %arg7[%c49_115] : memref<54xf32, #tpu.memory_space<smem>>
    %c50_116 = arith.constant 50 : index
    %164 = memref.load %arg7[%c50_116] : memref<54xf32, #tpu.memory_space<smem>>
    %c51_117 = arith.constant 51 : index
    %165 = memref.load %arg7[%c51_117] : memref<54xf32, #tpu.memory_space<smem>>
    %c52_118 = arith.constant 52 : index
    %166 = memref.load %arg7[%c52_118] : memref<54xf32, #tpu.memory_space<smem>>
    %c53_119 = arith.constant 53 : index
    %167 = memref.load %arg7[%c53_119] : memref<54xf32, #tpu.memory_space<smem>>
    %c0_120 = arith.constant 0 : index
    %168 = memref.load %arg8[%c0_120] : memref<54xf32, #tpu.memory_space<smem>>
    %c1_121 = arith.constant 1 : index
    %169 = memref.load %arg8[%c1_121] : memref<54xf32, #tpu.memory_space<smem>>
    %c2_122 = arith.constant 2 : index
    %170 = memref.load %arg8[%c2_122] : memref<54xf32, #tpu.memory_space<smem>>
    %c3_123 = arith.constant 3 : index
    %171 = memref.load %arg8[%c3_123] : memref<54xf32, #tpu.memory_space<smem>>
    %c4_124 = arith.constant 4 : index
    %172 = memref.load %arg8[%c4_124] : memref<54xf32, #tpu.memory_space<smem>>
    %c5_125 = arith.constant 5 : index
    %173 = memref.load %arg8[%c5_125] : memref<54xf32, #tpu.memory_space<smem>>
    %c6_126 = arith.constant 6 : index
    %174 = memref.load %arg8[%c6_126] : memref<54xf32, #tpu.memory_space<smem>>
    %c7_127 = arith.constant 7 : index
    %175 = memref.load %arg8[%c7_127] : memref<54xf32, #tpu.memory_space<smem>>
    %c8_128 = arith.constant 8 : index
    %176 = memref.load %arg8[%c8_128] : memref<54xf32, #tpu.memory_space<smem>>
    %c9_129 = arith.constant 9 : index
    %177 = memref.load %arg8[%c9_129] : memref<54xf32, #tpu.memory_space<smem>>
    %c10_130 = arith.constant 10 : index
    %178 = memref.load %arg8[%c10_130] : memref<54xf32, #tpu.memory_space<smem>>
    %c11_131 = arith.constant 11 : index
    %179 = memref.load %arg8[%c11_131] : memref<54xf32, #tpu.memory_space<smem>>
    %c12_132 = arith.constant 12 : index
    %180 = memref.load %arg8[%c12_132] : memref<54xf32, #tpu.memory_space<smem>>
    %c13_133 = arith.constant 13 : index
    %181 = memref.load %arg8[%c13_133] : memref<54xf32, #tpu.memory_space<smem>>
    %c14_134 = arith.constant 14 : index
    %182 = memref.load %arg8[%c14_134] : memref<54xf32, #tpu.memory_space<smem>>
    %c15_135 = arith.constant 15 : index
    %183 = memref.load %arg8[%c15_135] : memref<54xf32, #tpu.memory_space<smem>>
    %c16_136 = arith.constant 16 : index
    %184 = memref.load %arg8[%c16_136] : memref<54xf32, #tpu.memory_space<smem>>
    %c17_137 = arith.constant 17 : index
    %185 = memref.load %arg8[%c17_137] : memref<54xf32, #tpu.memory_space<smem>>
    %c18_138 = arith.constant 18 : index
    %186 = memref.load %arg8[%c18_138] : memref<54xf32, #tpu.memory_space<smem>>
    %c19_139 = arith.constant 19 : index
    %187 = memref.load %arg8[%c19_139] : memref<54xf32, #tpu.memory_space<smem>>
    %c20_140 = arith.constant 20 : index
    %188 = memref.load %arg8[%c20_140] : memref<54xf32, #tpu.memory_space<smem>>
    %c21_141 = arith.constant 21 : index
    %189 = memref.load %arg8[%c21_141] : memref<54xf32, #tpu.memory_space<smem>>
    %c22_142 = arith.constant 22 : index
    %190 = memref.load %arg8[%c22_142] : memref<54xf32, #tpu.memory_space<smem>>
    %c23_143 = arith.constant 23 : index
    %191 = memref.load %arg8[%c23_143] : memref<54xf32, #tpu.memory_space<smem>>
    %c24_144 = arith.constant 24 : index
    %192 = memref.load %arg8[%c24_144] : memref<54xf32, #tpu.memory_space<smem>>
    %c25_145 = arith.constant 25 : index
    %193 = memref.load %arg8[%c25_145] : memref<54xf32, #tpu.memory_space<smem>>
    %c26_146 = arith.constant 26 : index
    %194 = memref.load %arg8[%c26_146] : memref<54xf32, #tpu.memory_space<smem>>
    %c27_147 = arith.constant 27 : index
    %195 = memref.load %arg8[%c27_147] : memref<54xf32, #tpu.memory_space<smem>>
    %c28_148 = arith.constant 28 : index
    %196 = memref.load %arg8[%c28_148] : memref<54xf32, #tpu.memory_space<smem>>
    %c29_149 = arith.constant 29 : index
    %197 = memref.load %arg8[%c29_149] : memref<54xf32, #tpu.memory_space<smem>>
    %c30_150 = arith.constant 30 : index
    %198 = memref.load %arg8[%c30_150] : memref<54xf32, #tpu.memory_space<smem>>
    %c31_151 = arith.constant 31 : index
    %199 = memref.load %arg8[%c31_151] : memref<54xf32, #tpu.memory_space<smem>>
    %c32_152 = arith.constant 32 : index
    %200 = memref.load %arg8[%c32_152] : memref<54xf32, #tpu.memory_space<smem>>
    %c33_153 = arith.constant 33 : index
    %201 = memref.load %arg8[%c33_153] : memref<54xf32, #tpu.memory_space<smem>>
    %c34_154 = arith.constant 34 : index
    %202 = memref.load %arg8[%c34_154] : memref<54xf32, #tpu.memory_space<smem>>
    %c35_155 = arith.constant 35 : index
    %203 = memref.load %arg8[%c35_155] : memref<54xf32, #tpu.memory_space<smem>>
    %c36_156 = arith.constant 36 : index
    %204 = memref.load %arg8[%c36_156] : memref<54xf32, #tpu.memory_space<smem>>
    %c37_157 = arith.constant 37 : index
    %205 = memref.load %arg8[%c37_157] : memref<54xf32, #tpu.memory_space<smem>>
    %c38_158 = arith.constant 38 : index
    %206 = memref.load %arg8[%c38_158] : memref<54xf32, #tpu.memory_space<smem>>
    %c39_159 = arith.constant 39 : index
    %207 = memref.load %arg8[%c39_159] : memref<54xf32, #tpu.memory_space<smem>>
    %c40_160 = arith.constant 40 : index
    %208 = memref.load %arg8[%c40_160] : memref<54xf32, #tpu.memory_space<smem>>
    %c41_161 = arith.constant 41 : index
    %209 = memref.load %arg8[%c41_161] : memref<54xf32, #tpu.memory_space<smem>>
    %c42_162 = arith.constant 42 : index
    %210 = memref.load %arg8[%c42_162] : memref<54xf32, #tpu.memory_space<smem>>
    %c43_163 = arith.constant 43 : index
    %211 = memref.load %arg8[%c43_163] : memref<54xf32, #tpu.memory_space<smem>>
    %c44_164 = arith.constant 44 : index
    %212 = memref.load %arg8[%c44_164] : memref<54xf32, #tpu.memory_space<smem>>
    %c45_165 = arith.constant 45 : index
    %213 = memref.load %arg8[%c45_165] : memref<54xf32, #tpu.memory_space<smem>>
    %c46_166 = arith.constant 46 : index
    %214 = memref.load %arg8[%c46_166] : memref<54xf32, #tpu.memory_space<smem>>
    %c47_167 = arith.constant 47 : index
    %215 = memref.load %arg8[%c47_167] : memref<54xf32, #tpu.memory_space<smem>>
    %c48_168 = arith.constant 48 : index
    %216 = memref.load %arg8[%c48_168] : memref<54xf32, #tpu.memory_space<smem>>
    %c49_169 = arith.constant 49 : index
    %217 = memref.load %arg8[%c49_169] : memref<54xf32, #tpu.memory_space<smem>>
    %c50_170 = arith.constant 50 : index
    %218 = memref.load %arg8[%c50_170] : memref<54xf32, #tpu.memory_space<smem>>
    %c51_171 = arith.constant 51 : index
    %219 = memref.load %arg8[%c51_171] : memref<54xf32, #tpu.memory_space<smem>>
    %c52_172 = arith.constant 52 : index
    %220 = memref.load %arg8[%c52_172] : memref<54xf32, #tpu.memory_space<smem>>
    %c53_173 = arith.constant 53 : index
    %221 = memref.load %arg8[%c53_173] : memref<54xf32, #tpu.memory_space<smem>>
    %c0_174 = arith.constant 0 : index
    %c0_175 = arith.constant 0 : index
    %c0_176 = arith.constant 0 : index
    %c0_177 = arith.constant 0 : index
    %222 = vector.load %arg1[%c0_174, %c0_175, %c0_176, %c0_177] : memref<1x4x8x256xf32, #tpu.memory_space<vmem>>, vector<1x4x8x256xf32>
    %223 = vector.shape_cast %222 : vector<1x4x8x256xf32> to vector<4x8x256xf32>
    %cst = arith.constant dense<0xFF800000> : vector<8x256xf32>
    %224 = vector.multi_reduction <maximumf>, %223, %cst [0] : vector<4x8x256xf32> to vector<8x256xf32>
    %cst_178 = arith.constant dense<0.000000e+00> : vector<8x256xf32>
    %225 = vector.multi_reduction <add>, %223, %cst_178 [0] : vector<4x8x256xf32> to vector<8x256xf32>
    %cst_179 = arith.constant 2.500000e-01 : f32
    %226 = vector.broadcast %cst_179 : f32 to vector<8x256xf32>
    %227 = arith.mulf %225, %226 : vector<8x256xf32>
    %cst_180 = arith.constant 0.000000e+00 : f32
    %228 = vector.broadcast %cst_180 : f32 to vector<1x256xf32>
    %229 = vector.extract_strided_slice %224 {offsets = [0, 0], sizes = [7, 256], strides = [1, 1]} : vector<8x256xf32> to vector<7x256xf32>
    %230 = tpu.concatenate %228, %229 in 0 : vector<1x256xf32>, vector<7x256xf32> -> vector<8x256xf32>
    %231 = vector.extract_strided_slice %224 {offsets = [1, 0], sizes = [7, 256], strides = [1, 1]} : vector<8x256xf32> to vector<7x256xf32>
    %232 = tpu.concatenate %231, %228 in 0 : vector<7x256xf32>, vector<1x256xf32> -> vector<8x256xf32>
    %233 = vector.extract_strided_slice %227 {offsets = [0, 0], sizes = [7, 256], strides = [1, 1]} : vector<8x256xf32> to vector<7x256xf32>
    %234 = tpu.concatenate %228, %233 in 0 : vector<1x256xf32>, vector<7x256xf32> -> vector<8x256xf32>
    %235 = vector.extract_strided_slice %227 {offsets = [1, 0], sizes = [7, 256], strides = [1, 1]} : vector<8x256xf32> to vector<7x256xf32>
    %236 = tpu.concatenate %235, %228 in 0 : vector<7x256xf32>, vector<1x256xf32> -> vector<8x256xf32>
    %237 = vector.broadcast %6 : f32 to vector<8x256xf32>
    %238 = arith.mulf %237, %230 : vector<8x256xf32>
    %239 = vector.broadcast %15 : f32 to vector<8x256xf32>
    %240 = arith.mulf %239, %224 : vector<8x256xf32>
    %241 = arith.addf %238, %240 : vector<8x256xf32>
    %242 = vector.broadcast %24 : f32 to vector<8x256xf32>
    %243 = arith.mulf %242, %232 : vector<8x256xf32>
    %244 = arith.addf %241, %243 : vector<8x256xf32>
    %245 = vector.broadcast %33 : f32 to vector<8x256xf32>
    %246 = arith.mulf %245, %234 : vector<8x256xf32>
    %247 = arith.addf %244, %246 : vector<8x256xf32>
    %248 = vector.broadcast %42 : f32 to vector<8x256xf32>
    %249 = arith.mulf %248, %227 : vector<8x256xf32>
    %250 = arith.addf %247, %249 : vector<8x256xf32>
    %251 = vector.broadcast %51 : f32 to vector<8x256xf32>
    %252 = arith.mulf %251, %236 : vector<8x256xf32>
    %253 = arith.addf %250, %252 : vector<8x256xf32>
    %254 = vector.extract_strided_slice %253 {offsets = [0, 240], sizes = [8, 16], strides = [1, 1]} : vector<8x256xf32> to vector<8x16xf32>
    %255 = vector.extract_strided_slice %253 {offsets = [0, 0], sizes = [8, 240], strides = [1, 1]} : vector<8x256xf32> to vector<8x240xf32>
    %256 = tpu.concatenate %254, %255 in 1 : vector<8x16xf32>, vector<8x240xf32> -> vector<8x256xf32>
    %257 = vector.broadcast %3 : vector<1x256xf32> to vector<8x256xf32>
    %258 = arith.mulf %256, %257 : vector<8x256xf32>
    %259 = vector.broadcast %9 : f32 to vector<8x256xf32>
    %260 = arith.mulf %259, %230 : vector<8x256xf32>
    %261 = vector.broadcast %18 : f32 to vector<8x256xf32>
    %262 = arith.mulf %261, %224 : vector<8x256xf32>
    %263 = arith.addf %260, %262 : vector<8x256xf32>
    %264 = vector.broadcast %27 : f32 to vector<8x256xf32>
    %265 = arith.mulf %264, %232 : vector<8x256xf32>
    %266 = arith.addf %263, %265 : vector<8x256xf32>
    %267 = vector.broadcast %36 : f32 to vector<8x256xf32>
    %268 = arith.mulf %267, %234 : vector<8x256xf32>
    %269 = arith.addf %266, %268 : vector<8x256xf32>
    %270 = vector.broadcast %45 : f32 to vector<8x256xf32>
    %271 = arith.mulf %270, %227 : vector<8x256xf32>
    %272 = arith.addf %269, %271 : vector<8x256xf32>
    %273 = vector.broadcast %54 : f32 to vector<8x256xf32>
    %274 = arith.mulf %273, %236 : vector<8x256xf32>
    %275 = arith.addf %272, %274 : vector<8x256xf32>
    %276 = arith.addf %258, %275 : vector<8x256xf32>
    %277 = vector.broadcast %12 : f32 to vector<8x256xf32>
    %278 = arith.mulf %277, %230 : vector<8x256xf32>
    %279 = vector.broadcast %21 : f32 to vector<8x256xf32>
    %280 = arith.mulf %279, %224 : vector<8x256xf32>
    %281 = arith.addf %278, %280 : vector<8x256xf32>
    %282 = vector.broadcast %30 : f32 to vector<8x256xf32>
    %283 = arith.mulf %282, %232 : vector<8x256xf32>
    %284 = arith.addf %281, %283 : vector<8x256xf32>
    %285 = vector.broadcast %39 : f32 to vector<8x256xf32>
    %286 = arith.mulf %285, %234 : vector<8x256xf32>
    %287 = arith.addf %284, %286 : vector<8x256xf32>
    %288 = vector.broadcast %48 : f32 to vector<8x256xf32>
    %289 = arith.mulf %288, %227 : vector<8x256xf32>
    %290 = arith.addf %287, %289 : vector<8x256xf32>
    %291 = vector.broadcast %57 : f32 to vector<8x256xf32>
    %292 = arith.mulf %291, %236 : vector<8x256xf32>
    %293 = arith.addf %290, %292 : vector<8x256xf32>
    %294 = vector.extract_strided_slice %293 {offsets = [0, 16], sizes = [8, 240], strides = [1, 1]} : vector<8x256xf32> to vector<8x240xf32>
    %295 = vector.extract_strided_slice %293 {offsets = [0, 0], sizes = [8, 16], strides = [1, 1]} : vector<8x256xf32> to vector<8x16xf32>
    %296 = tpu.concatenate %294, %295 in 1 : vector<8x240xf32>, vector<8x16xf32> -> vector<8x256xf32>
    %297 = vector.broadcast %2 : vector<1x256xf32> to vector<8x256xf32>
    %298 = arith.mulf %296, %297 : vector<8x256xf32>
    %299 = arith.addf %276, %298 : vector<8x256xf32>
    %300 = vector.extract_strided_slice %299 {offsets = [0, 255], sizes = [8, 1], strides = [1, 1]} : vector<8x256xf32> to vector<8x1xf32>
    %301 = vector.extract_strided_slice %299 {offsets = [0, 0], sizes = [8, 255], strides = [1, 1]} : vector<8x256xf32> to vector<8x255xf32>
    %302 = tpu.concatenate %300, %301 in 1 : vector<8x1xf32>, vector<8x255xf32> -> vector<8x256xf32>
    %303 = vector.broadcast %1 : vector<1x256xf32> to vector<8x256xf32>
    %304 = arith.mulf %302, %303 : vector<8x256xf32>
    %305 = vector.broadcast %7 : f32 to vector<8x256xf32>
    %306 = arith.mulf %305, %230 : vector<8x256xf32>
    %307 = vector.broadcast %16 : f32 to vector<8x256xf32>
    %308 = arith.mulf %307, %224 : vector<8x256xf32>
    %309 = arith.addf %306, %308 : vector<8x256xf32>
    %310 = vector.broadcast %25 : f32 to vector<8x256xf32>
    %311 = arith.mulf %310, %232 : vector<8x256xf32>
    %312 = arith.addf %309, %311 : vector<8x256xf32>
    %313 = vector.broadcast %34 : f32 to vector<8x256xf32>
    %314 = arith.mulf %313, %234 : vector<8x256xf32>
    %315 = arith.addf %312, %314 : vector<8x256xf32>
    %316 = vector.broadcast %43 : f32 to vector<8x256xf32>
    %317 = arith.mulf %316, %227 : vector<8x256xf32>
    %318 = arith.addf %315, %317 : vector<8x256xf32>
    %319 = vector.broadcast %52 : f32 to vector<8x256xf32>
    %320 = arith.mulf %319, %236 : vector<8x256xf32>
    %321 = arith.addf %318, %320 : vector<8x256xf32>
    %322 = vector.extract_strided_slice %321 {offsets = [0, 240], sizes = [8, 16], strides = [1, 1]} : vector<8x256xf32> to vector<8x16xf32>
    %323 = vector.extract_strided_slice %321 {offsets = [0, 0], sizes = [8, 240], strides = [1, 1]} : vector<8x256xf32> to vector<8x240xf32>
    %324 = tpu.concatenate %322, %323 in 1 : vector<8x16xf32>, vector<8x240xf32> -> vector<8x256xf32>
    %325 = vector.broadcast %3 : vector<1x256xf32> to vector<8x256xf32>
    %326 = arith.mulf %324, %325 : vector<8x256xf32>
    %327 = vector.broadcast %10 : f32 to vector<8x256xf32>
    %328 = arith.mulf %327, %230 : vector<8x256xf32>
    %329 = vector.broadcast %19 : f32 to vector<8x256xf32>
    %330 = arith.mulf %329, %224 : vector<8x256xf32>
    %331 = arith.addf %328, %330 : vector<8x256xf32>
    %332 = vector.broadcast %28 : f32 to vector<8x256xf32>
    %333 = arith.mulf %332, %232 : vector<8x256xf32>
    %334 = arith.addf %331, %333 : vector<8x256xf32>
    %335 = vector.broadcast %37 : f32 to vector<8x256xf32>
    %336 = arith.mulf %335, %234 : vector<8x256xf32>
    %337 = arith.addf %334, %336 : vector<8x256xf32>
    %338 = vector.broadcast %46 : f32 to vector<8x256xf32>
    %339 = arith.mulf %338, %227 : vector<8x256xf32>
    %340 = arith.addf %337, %339 : vector<8x256xf32>
    %341 = vector.broadcast %55 : f32 to vector<8x256xf32>
    %342 = arith.mulf %341, %236 : vector<8x256xf32>
    %343 = arith.addf %340, %342 : vector<8x256xf32>
    %344 = arith.addf %326, %343 : vector<8x256xf32>
    %345 = vector.broadcast %13 : f32 to vector<8x256xf32>
    %346 = arith.mulf %345, %230 : vector<8x256xf32>
    %347 = vector.broadcast %22 : f32 to vector<8x256xf32>
    %348 = arith.mulf %347, %224 : vector<8x256xf32>
    %349 = arith.addf %346, %348 : vector<8x256xf32>
    %350 = vector.broadcast %31 : f32 to vector<8x256xf32>
    %351 = arith.mulf %350, %232 : vector<8x256xf32>
    %352 = arith.addf %349, %351 : vector<8x256xf32>
    %353 = vector.broadcast %40 : f32 to vector<8x256xf32>
    %354 = arith.mulf %353, %234 : vector<8x256xf32>
    %355 = arith.addf %352, %354 : vector<8x256xf32>
    %356 = vector.broadcast %49 : f32 to vector<8x256xf32>
    %357 = arith.mulf %356, %227 : vector<8x256xf32>
    %358 = arith.addf %355, %357 : vector<8x256xf32>
    %359 = vector.broadcast %58 : f32 to vector<8x256xf32>
    %360 = arith.mulf %359, %236 : vector<8x256xf32>
    %361 = arith.addf %358, %360 : vector<8x256xf32>
    %362 = vector.extract_strided_slice %361 {offsets = [0, 16], sizes = [8, 240], strides = [1, 1]} : vector<8x256xf32> to vector<8x240xf32>
    %363 = vector.extract_strided_slice %361 {offsets = [0, 0], sizes = [8, 16], strides = [1, 1]} : vector<8x256xf32> to vector<8x16xf32>
    %364 = tpu.concatenate %362, %363 in 1 : vector<8x240xf32>, vector<8x16xf32> -> vector<8x256xf32>
    %365 = vector.broadcast %2 : vector<1x256xf32> to vector<8x256xf32>
    %366 = arith.mulf %364, %365 : vector<8x256xf32>
    %367 = arith.addf %344, %366 : vector<8x256xf32>
    %368 = arith.addf %304, %367 : vector<8x256xf32>
    %369 = vector.broadcast %8 : f32 to vector<8x256xf32>
    %370 = arith.mulf %369, %230 : vector<8x256xf32>
    %371 = vector.broadcast %17 : f32 to vector<8x256xf32>
    %372 = arith.mulf %371, %224 : vector<8x256xf32>
    %373 = arith.addf %370, %372 : vector<8x256xf32>
    %374 = vector.broadcast %26 : f32 to vector<8x256xf32>
    %375 = arith.mulf %374, %232 : vector<8x256xf32>
    %376 = arith.addf %373, %375 : vector<8x256xf32>
    %377 = vector.broadcast %35 : f32 to vector<8x256xf32>
    %378 = arith.mulf %377, %234 : vector<8x256xf32>
    %379 = arith.addf %376, %378 : vector<8x256xf32>
    %380 = vector.broadcast %44 : f32 to vector<8x256xf32>
    %381 = arith.mulf %380, %227 : vector<8x256xf32>
    %382 = arith.addf %379, %381 : vector<8x256xf32>
    %383 = vector.broadcast %53 : f32 to vector<8x256xf32>
    %384 = arith.mulf %383, %236 : vector<8x256xf32>
    %385 = arith.addf %382, %384 : vector<8x256xf32>
    %386 = vector.extract_strided_slice %385 {offsets = [0, 240], sizes = [8, 16], strides = [1, 1]} : vector<8x256xf32> to vector<8x16xf32>
    %387 = vector.extract_strided_slice %385 {offsets = [0, 0], sizes = [8, 240], strides = [1, 1]} : vector<8x256xf32> to vector<8x240xf32>
    %388 = tpu.concatenate %386, %387 in 1 : vector<8x16xf32>, vector<8x240xf32> -> vector<8x256xf32>
    %389 = vector.broadcast %3 : vector<1x256xf32> to vector<8x256xf32>
    %390 = arith.mulf %388, %389 : vector<8x256xf32>
    %391 = vector.broadcast %11 : f32 to vector<8x256xf32>
    %392 = arith.mulf %391, %230 : vector<8x256xf32>
    %393 = vector.broadcast %20 : f32 to vector<8x256xf32>
    %394 = arith.mulf %393, %224 : vector<8x256xf32>
    %395 = arith.addf %392, %394 : vector<8x256xf32>
    %396 = vector.broadcast %29 : f32 to vector<8x256xf32>
    %397 = arith.mulf %396, %232 : vector<8x256xf32>
    %398 = arith.addf %395, %397 : vector<8x256xf32>
    %399 = vector.broadcast %38 : f32 to vector<8x256xf32>
    %400 = arith.mulf %399, %234 : vector<8x256xf32>
    %401 = arith.addf %398, %400 : vector<8x256xf32>
    %402 = vector.broadcast %47 : f32 to vector<8x256xf32>
    %403 = arith.mulf %402, %227 : vector<8x256xf32>
    %404 = arith.addf %401, %403 : vector<8x256xf32>
    %405 = vector.broadcast %56 : f32 to vector<8x256xf32>
    %406 = arith.mulf %405, %236 : vector<8x256xf32>
    %407 = arith.addf %404, %406 : vector<8x256xf32>
    %408 = arith.addf %390, %407 : vector<8x256xf32>
    %409 = vector.broadcast %14 : f32 to vector<8x256xf32>
    %410 = arith.mulf %409, %230 : vector<8x256xf32>
    %411 = vector.broadcast %23 : f32 to vector<8x256xf32>
    %412 = arith.mulf %411, %224 : vector<8x256xf32>
    %413 = arith.addf %410, %412 : vector<8x256xf32>
    %414 = vector.broadcast %32 : f32 to vector<8x256xf32>
    %415 = arith.mulf %414, %232 : vector<8x256xf32>
    %416 = arith.addf %413, %415 : vector<8x256xf32>
    %417 = vector.broadcast %41 : f32 to vector<8x256xf32>
    %418 = arith.mulf %417, %234 : vector<8x256xf32>
    %419 = arith.addf %416, %418 : vector<8x256xf32>
    %420 = vector.broadcast %50 : f32 to vector<8x256xf32>
    %421 = arith.mulf %420, %227 : vector<8x256xf32>
    %422 = arith.addf %419, %421 : vector<8x256xf32>
    %423 = vector.broadcast %59 : f32 to vector<8x256xf32>
    %424 = arith.mulf %423, %236 : vector<8x256xf32>
    %425 = arith.addf %422, %424 : vector<8x256xf32>
    %426 = vector.extract_strided_slice %425 {offsets = [0, 16], sizes = [8, 240], strides = [1, 1]} : vector<8x256xf32> to vector<8x240xf32>
    %427 = vector.extract_strided_slice %425 {offsets = [0, 0], sizes = [8, 16], strides = [1, 1]} : vector<8x256xf32> to vector<8x16xf32>
    %428 = tpu.concatenate %426, %427 in 1 : vector<8x240xf32>, vector<8x16xf32> -> vector<8x256xf32>
    %429 = vector.broadcast %2 : vector<1x256xf32> to vector<8x256xf32>
    %430 = arith.mulf %428, %429 : vector<8x256xf32>
    %431 = arith.addf %408, %430 : vector<8x256xf32>
    %432 = vector.extract_strided_slice %431 {offsets = [0, 1], sizes = [8, 255], strides = [1, 1]} : vector<8x256xf32> to vector<8x255xf32>
    %433 = vector.extract_strided_slice %431 {offsets = [0, 0], sizes = [8, 1], strides = [1, 1]} : vector<8x256xf32> to vector<8x1xf32>
    %434 = tpu.concatenate %432, %433 in 1 : vector<8x255xf32>, vector<8x1xf32> -> vector<8x256xf32>
    %435 = vector.broadcast %0 : vector<1x256xf32> to vector<8x256xf32>
    %436 = arith.mulf %434, %435 : vector<8x256xf32>
    %437 = arith.addf %368, %436 : vector<8x256xf32>
    %cst_181 = arith.constant 0.000000e+00 : f32
    %438 = vector.broadcast %cst_181 : f32 to vector<8x256xf32>
    %439 = arith.subf %438, %437 : vector<8x256xf32>
    %440 = math.exp %439 : vector<8x256xf32>
    %cst_182 = arith.constant 1.000000e+00 : f32
    %441 = vector.broadcast %cst_182 : f32 to vector<8x256xf32>
    %442 = arith.addf %441, %440 : vector<8x256xf32>
    %443 = tpu.reciprocal %442 {approx = true} : vector<8x256xf32> -> vector<8x256xf32>
    %444 = vector.shape_cast %443 : vector<8x256xf32> to vector<1x8x256xf32>
    %445 = vector.broadcast %444 : vector<1x8x256xf32> to vector<4x8x256xf32>
    %446 = arith.mulf %223, %445 : vector<4x8x256xf32>
    %cst_183 = arith.constant dense<0xFF800000> : vector<4x256xf32>
    %447 = vector.multi_reduction <maximumf>, %446, %cst_183 [1] : vector<4x8x256xf32> to vector<4x256xf32>
    %cst_184 = arith.constant dense<0.000000e+00> : vector<4x256xf32>
    %448 = vector.multi_reduction <add>, %446, %cst_184 [1] : vector<4x8x256xf32> to vector<4x256xf32>
    %cst_185 = arith.constant 1.250000e-01 : f32
    %449 = vector.broadcast %cst_185 : f32 to vector<4x256xf32>
    %450 = arith.mulf %448, %449 : vector<4x256xf32>
    %cst_186 = arith.constant 0.000000e+00 : f32
    %451 = vector.broadcast %cst_186 : f32 to vector<1x256xf32>
    %452 = vector.extract_strided_slice %447 {offsets = [0, 0], sizes = [3, 256], strides = [1, 1]} : vector<4x256xf32> to vector<3x256xf32>
    %453 = tpu.concatenate %451, %452 in 0 : vector<1x256xf32>, vector<3x256xf32> -> vector<4x256xf32>
    %454 = vector.extract_strided_slice %447 {offsets = [1, 0], sizes = [3, 256], strides = [1, 1]} : vector<4x256xf32> to vector<3x256xf32>
    %455 = tpu.concatenate %454, %451 in 0 : vector<3x256xf32>, vector<1x256xf32> -> vector<4x256xf32>
    %456 = vector.extract_strided_slice %450 {offsets = [0, 0], sizes = [3, 256], strides = [1, 1]} : vector<4x256xf32> to vector<3x256xf32>
    %457 = tpu.concatenate %451, %456 in 0 : vector<1x256xf32>, vector<3x256xf32> -> vector<4x256xf32>
    %458 = vector.extract_strided_slice %450 {offsets = [1, 0], sizes = [3, 256], strides = [1, 1]} : vector<4x256xf32> to vector<3x256xf32>
    %459 = tpu.concatenate %458, %451 in 0 : vector<3x256xf32>, vector<1x256xf32> -> vector<4x256xf32>
    %460 = vector.broadcast %60 : f32 to vector<4x256xf32>
    %461 = arith.mulf %460, %453 : vector<4x256xf32>
    %462 = vector.broadcast %69 : f32 to vector<4x256xf32>
    %463 = arith.mulf %462, %447 : vector<4x256xf32>
    %464 = arith.addf %461, %463 : vector<4x256xf32>
    %465 = vector.broadcast %78 : f32 to vector<4x256xf32>
    %466 = arith.mulf %465, %455 : vector<4x256xf32>
    %467 = arith.addf %464, %466 : vector<4x256xf32>
    %468 = vector.broadcast %87 : f32 to vector<4x256xf32>
    %469 = arith.mulf %468, %457 : vector<4x256xf32>
    %470 = arith.addf %467, %469 : vector<4x256xf32>
    %471 = vector.broadcast %96 : f32 to vector<4x256xf32>
    %472 = arith.mulf %471, %450 : vector<4x256xf32>
    %473 = arith.addf %470, %472 : vector<4x256xf32>
    %474 = vector.broadcast %105 : f32 to vector<4x256xf32>
    %475 = arith.mulf %474, %459 : vector<4x256xf32>
    %476 = arith.addf %473, %475 : vector<4x256xf32>
    %477 = vector.extract_strided_slice %476 {offsets = [0, 240], sizes = [4, 16], strides = [1, 1]} : vector<4x256xf32> to vector<4x16xf32>
    %478 = vector.extract_strided_slice %476 {offsets = [0, 0], sizes = [4, 240], strides = [1, 1]} : vector<4x256xf32> to vector<4x240xf32>
    %479 = tpu.concatenate %477, %478 in 1 : vector<4x16xf32>, vector<4x240xf32> -> vector<4x256xf32>
    %480 = vector.broadcast %3 : vector<1x256xf32> to vector<4x256xf32>
    %481 = arith.mulf %479, %480 : vector<4x256xf32>
    %482 = vector.broadcast %63 : f32 to vector<4x256xf32>
    %483 = arith.mulf %482, %453 : vector<4x256xf32>
    %484 = vector.broadcast %72 : f32 to vector<4x256xf32>
    %485 = arith.mulf %484, %447 : vector<4x256xf32>
    %486 = arith.addf %483, %485 : vector<4x256xf32>
    %487 = vector.broadcast %81 : f32 to vector<4x256xf32>
    %488 = arith.mulf %487, %455 : vector<4x256xf32>
    %489 = arith.addf %486, %488 : vector<4x256xf32>
    %490 = vector.broadcast %90 : f32 to vector<4x256xf32>
    %491 = arith.mulf %490, %457 : vector<4x256xf32>
    %492 = arith.addf %489, %491 : vector<4x256xf32>
    %493 = vector.broadcast %99 : f32 to vector<4x256xf32>
    %494 = arith.mulf %493, %450 : vector<4x256xf32>
    %495 = arith.addf %492, %494 : vector<4x256xf32>
    %496 = vector.broadcast %108 : f32 to vector<4x256xf32>
    %497 = arith.mulf %496, %459 : vector<4x256xf32>
    %498 = arith.addf %495, %497 : vector<4x256xf32>
    %499 = arith.addf %481, %498 : vector<4x256xf32>
    %500 = vector.broadcast %66 : f32 to vector<4x256xf32>
    %501 = arith.mulf %500, %453 : vector<4x256xf32>
    %502 = vector.broadcast %75 : f32 to vector<4x256xf32>
    %503 = arith.mulf %502, %447 : vector<4x256xf32>
    %504 = arith.addf %501, %503 : vector<4x256xf32>
    %505 = vector.broadcast %84 : f32 to vector<4x256xf32>
    %506 = arith.mulf %505, %455 : vector<4x256xf32>
    %507 = arith.addf %504, %506 : vector<4x256xf32>
    %508 = vector.broadcast %93 : f32 to vector<4x256xf32>
    %509 = arith.mulf %508, %457 : vector<4x256xf32>
    %510 = arith.addf %507, %509 : vector<4x256xf32>
    %511 = vector.broadcast %102 : f32 to vector<4x256xf32>
    %512 = arith.mulf %511, %450 : vector<4x256xf32>
    %513 = arith.addf %510, %512 : vector<4x256xf32>
    %514 = vector.broadcast %111 : f32 to vector<4x256xf32>
    %515 = arith.mulf %514, %459 : vector<4x256xf32>
    %516 = arith.addf %513, %515 : vector<4x256xf32>
    %517 = vector.extract_strided_slice %516 {offsets = [0, 16], sizes = [4, 240], strides = [1, 1]} : vector<4x256xf32> to vector<4x240xf32>
    %518 = vector.extract_strided_slice %516 {offsets = [0, 0], sizes = [4, 16], strides = [1, 1]} : vector<4x256xf32> to vector<4x16xf32>
    %519 = tpu.concatenate %517, %518 in 1 : vector<4x240xf32>, vector<4x16xf32> -> vector<4x256xf32>
    %520 = vector.broadcast %2 : vector<1x256xf32> to vector<4x256xf32>
    %521 = arith.mulf %519, %520 : vector<4x256xf32>
    %522 = arith.addf %499, %521 : vector<4x256xf32>
    %523 = vector.extract_strided_slice %522 {offsets = [0, 255], sizes = [4, 1], strides = [1, 1]} : vector<4x256xf32> to vector<4x1xf32>
    %524 = vector.extract_strided_slice %522 {offsets = [0, 0], sizes = [4, 255], strides = [1, 1]} : vector<4x256xf32> to vector<4x255xf32>
    %525 = tpu.concatenate %523, %524 in 1 : vector<4x1xf32>, vector<4x255xf32> -> vector<4x256xf32>
    %526 = vector.broadcast %1 : vector<1x256xf32> to vector<4x256xf32>
    %527 = arith.mulf %525, %526 : vector<4x256xf32>
    %528 = vector.broadcast %61 : f32 to vector<4x256xf32>
    %529 = arith.mulf %528, %453 : vector<4x256xf32>
    %530 = vector.broadcast %70 : f32 to vector<4x256xf32>
    %531 = arith.mulf %530, %447 : vector<4x256xf32>
    %532 = arith.addf %529, %531 : vector<4x256xf32>
    %533 = vector.broadcast %79 : f32 to vector<4x256xf32>
    %534 = arith.mulf %533, %455 : vector<4x256xf32>
    %535 = arith.addf %532, %534 : vector<4x256xf32>
    %536 = vector.broadcast %88 : f32 to vector<4x256xf32>
    %537 = arith.mulf %536, %457 : vector<4x256xf32>
    %538 = arith.addf %535, %537 : vector<4x256xf32>
    %539 = vector.broadcast %97 : f32 to vector<4x256xf32>
    %540 = arith.mulf %539, %450 : vector<4x256xf32>
    %541 = arith.addf %538, %540 : vector<4x256xf32>
    %542 = vector.broadcast %106 : f32 to vector<4x256xf32>
    %543 = arith.mulf %542, %459 : vector<4x256xf32>
    %544 = arith.addf %541, %543 : vector<4x256xf32>
    %545 = vector.extract_strided_slice %544 {offsets = [0, 240], sizes = [4, 16], strides = [1, 1]} : vector<4x256xf32> to vector<4x16xf32>
    %546 = vector.extract_strided_slice %544 {offsets = [0, 0], sizes = [4, 240], strides = [1, 1]} : vector<4x256xf32> to vector<4x240xf32>
    %547 = tpu.concatenate %545, %546 in 1 : vector<4x16xf32>, vector<4x240xf32> -> vector<4x256xf32>
    %548 = vector.broadcast %3 : vector<1x256xf32> to vector<4x256xf32>
    %549 = arith.mulf %547, %548 : vector<4x256xf32>
    %550 = vector.broadcast %64 : f32 to vector<4x256xf32>
    %551 = arith.mulf %550, %453 : vector<4x256xf32>
    %552 = vector.broadcast %73 : f32 to vector<4x256xf32>
    %553 = arith.mulf %552, %447 : vector<4x256xf32>
    %554 = arith.addf %551, %553 : vector<4x256xf32>
    %555 = vector.broadcast %82 : f32 to vector<4x256xf32>
    %556 = arith.mulf %555, %455 : vector<4x256xf32>
    %557 = arith.addf %554, %556 : vector<4x256xf32>
    %558 = vector.broadcast %91 : f32 to vector<4x256xf32>
    %559 = arith.mulf %558, %457 : vector<4x256xf32>
    %560 = arith.addf %557, %559 : vector<4x256xf32>
    %561 = vector.broadcast %100 : f32 to vector<4x256xf32>
    %562 = arith.mulf %561, %450 : vector<4x256xf32>
    %563 = arith.addf %560, %562 : vector<4x256xf32>
    %564 = vector.broadcast %109 : f32 to vector<4x256xf32>
    %565 = arith.mulf %564, %459 : vector<4x256xf32>
    %566 = arith.addf %563, %565 : vector<4x256xf32>
    %567 = arith.addf %549, %566 : vector<4x256xf32>
    %568 = vector.broadcast %67 : f32 to vector<4x256xf32>
    %569 = arith.mulf %568, %453 : vector<4x256xf32>
    %570 = vector.broadcast %76 : f32 to vector<4x256xf32>
    %571 = arith.mulf %570, %447 : vector<4x256xf32>
    %572 = arith.addf %569, %571 : vector<4x256xf32>
    %573 = vector.broadcast %85 : f32 to vector<4x256xf32>
    %574 = arith.mulf %573, %455 : vector<4x256xf32>
    %575 = arith.addf %572, %574 : vector<4x256xf32>
    %576 = vector.broadcast %94 : f32 to vector<4x256xf32>
    %577 = arith.mulf %576, %457 : vector<4x256xf32>
    %578 = arith.addf %575, %577 : vector<4x256xf32>
    %579 = vector.broadcast %103 : f32 to vector<4x256xf32>
    %580 = arith.mulf %579, %450 : vector<4x256xf32>
    %581 = arith.addf %578, %580 : vector<4x256xf32>
    %582 = vector.broadcast %112 : f32 to vector<4x256xf32>
    %583 = arith.mulf %582, %459 : vector<4x256xf32>
    %584 = arith.addf %581, %583 : vector<4x256xf32>
    %585 = vector.extract_strided_slice %584 {offsets = [0, 16], sizes = [4, 240], strides = [1, 1]} : vector<4x256xf32> to vector<4x240xf32>
    %586 = vector.extract_strided_slice %584 {offsets = [0, 0], sizes = [4, 16], strides = [1, 1]} : vector<4x256xf32> to vector<4x16xf32>
    %587 = tpu.concatenate %585, %586 in 1 : vector<4x240xf32>, vector<4x16xf32> -> vector<4x256xf32>
    %588 = vector.broadcast %2 : vector<1x256xf32> to vector<4x256xf32>
    %589 = arith.mulf %587, %588 : vector<4x256xf32>
    %590 = arith.addf %567, %589 : vector<4x256xf32>
    %591 = arith.addf %527, %590 : vector<4x256xf32>
    %592 = vector.broadcast %62 : f32 to vector<4x256xf32>
    %593 = arith.mulf %592, %453 : vector<4x256xf32>
    %594 = vector.broadcast %71 : f32 to vector<4x256xf32>
    %595 = arith.mulf %594, %447 : vector<4x256xf32>
    %596 = arith.addf %593, %595 : vector<4x256xf32>
    %597 = vector.broadcast %80 : f32 to vector<4x256xf32>
    %598 = arith.mulf %597, %455 : vector<4x256xf32>
    %599 = arith.addf %596, %598 : vector<4x256xf32>
    %600 = vector.broadcast %89 : f32 to vector<4x256xf32>
    %601 = arith.mulf %600, %457 : vector<4x256xf32>
    %602 = arith.addf %599, %601 : vector<4x256xf32>
    %603 = vector.broadcast %98 : f32 to vector<4x256xf32>
    %604 = arith.mulf %603, %450 : vector<4x256xf32>
    %605 = arith.addf %602, %604 : vector<4x256xf32>
    %606 = vector.broadcast %107 : f32 to vector<4x256xf32>
    %607 = arith.mulf %606, %459 : vector<4x256xf32>
    %608 = arith.addf %605, %607 : vector<4x256xf32>
    %609 = vector.extract_strided_slice %608 {offsets = [0, 240], sizes = [4, 16], strides = [1, 1]} : vector<4x256xf32> to vector<4x16xf32>
    %610 = vector.extract_strided_slice %608 {offsets = [0, 0], sizes = [4, 240], strides = [1, 1]} : vector<4x256xf32> to vector<4x240xf32>
    %611 = tpu.concatenate %609, %610 in 1 : vector<4x16xf32>, vector<4x240xf32> -> vector<4x256xf32>
    %612 = vector.broadcast %3 : vector<1x256xf32> to vector<4x256xf32>
    %613 = arith.mulf %611, %612 : vector<4x256xf32>
    %614 = vector.broadcast %65 : f32 to vector<4x256xf32>
    %615 = arith.mulf %614, %453 : vector<4x256xf32>
    %616 = vector.broadcast %74 : f32 to vector<4x256xf32>
    %617 = arith.mulf %616, %447 : vector<4x256xf32>
    %618 = arith.addf %615, %617 : vector<4x256xf32>
    %619 = vector.broadcast %83 : f32 to vector<4x256xf32>
    %620 = arith.mulf %619, %455 : vector<4x256xf32>
    %621 = arith.addf %618, %620 : vector<4x256xf32>
    %622 = vector.broadcast %92 : f32 to vector<4x256xf32>
    %623 = arith.mulf %622, %457 : vector<4x256xf32>
    %624 = arith.addf %621, %623 : vector<4x256xf32>
    %625 = vector.broadcast %101 : f32 to vector<4x256xf32>
    %626 = arith.mulf %625, %450 : vector<4x256xf32>
    %627 = arith.addf %624, %626 : vector<4x256xf32>
    %628 = vector.broadcast %110 : f32 to vector<4x256xf32>
    %629 = arith.mulf %628, %459 : vector<4x256xf32>
    %630 = arith.addf %627, %629 : vector<4x256xf32>
    %631 = arith.addf %613, %630 : vector<4x256xf32>
    %632 = vector.broadcast %68 : f32 to vector<4x256xf32>
    %633 = arith.mulf %632, %453 : vector<4x256xf32>
    %634 = vector.broadcast %77 : f32 to vector<4x256xf32>
    %635 = arith.mulf %634, %447 : vector<4x256xf32>
    %636 = arith.addf %633, %635 : vector<4x256xf32>
    %637 = vector.broadcast %86 : f32 to vector<4x256xf32>
    %638 = arith.mulf %637, %455 : vector<4x256xf32>
    %639 = arith.addf %636, %638 : vector<4x256xf32>
    %640 = vector.broadcast %95 : f32 to vector<4x256xf32>
    %641 = arith.mulf %640, %457 : vector<4x256xf32>
    %642 = arith.addf %639, %641 : vector<4x256xf32>
    %643 = vector.broadcast %104 : f32 to vector<4x256xf32>
    %644 = arith.mulf %643, %450 : vector<4x256xf32>
    %645 = arith.addf %642, %644 : vector<4x256xf32>
    %646 = vector.broadcast %113 : f32 to vector<4x256xf32>
    %647 = arith.mulf %646, %459 : vector<4x256xf32>
    %648 = arith.addf %645, %647 : vector<4x256xf32>
    %649 = vector.extract_strided_slice %648 {offsets = [0, 16], sizes = [4, 240], strides = [1, 1]} : vector<4x256xf32> to vector<4x240xf32>
    %650 = vector.extract_strided_slice %648 {offsets = [0, 0], sizes = [4, 16], strides = [1, 1]} : vector<4x256xf32> to vector<4x16xf32>
    %651 = tpu.concatenate %649, %650 in 1 : vector<4x240xf32>, vector<4x16xf32> -> vector<4x256xf32>
    %652 = vector.broadcast %2 : vector<1x256xf32> to vector<4x256xf32>
    %653 = arith.mulf %651, %652 : vector<4x256xf32>
    %654 = arith.addf %631, %653 : vector<4x256xf32>
    %655 = vector.extract_strided_slice %654 {offsets = [0, 1], sizes = [4, 255], strides = [1, 1]} : vector<4x256xf32> to vector<4x255xf32>
    %656 = vector.extract_strided_slice %654 {offsets = [0, 0], sizes = [4, 1], strides = [1, 1]} : vector<4x256xf32> to vector<4x1xf32>
    %657 = tpu.concatenate %655, %656 in 1 : vector<4x255xf32>, vector<4x1xf32> -> vector<4x256xf32>
    %658 = vector.broadcast %0 : vector<1x256xf32> to vector<4x256xf32>
    %659 = arith.mulf %657, %658 : vector<4x256xf32>
    %660 = arith.addf %591, %659 : vector<4x256xf32>
    %cst_187 = arith.constant 0.000000e+00 : f32
    %661 = vector.broadcast %cst_187 : f32 to vector<4x256xf32>
    %662 = arith.subf %661, %660 : vector<4x256xf32>
    %663 = math.exp %662 : vector<4x256xf32>
    %cst_188 = arith.constant 1.000000e+00 : f32
    %664 = vector.broadcast %cst_188 : f32 to vector<4x256xf32>
    %665 = arith.addf %664, %663 : vector<4x256xf32>
    %666 = tpu.reciprocal %665 {approx = true} : vector<4x256xf32> -> vector<4x256xf32>
    %667 = vector.shape_cast %446 : vector<4x8x256xf32> to vector<32x256xf32>
    %668 = vector.extract_strided_slice %667 {offsets = [0, 128], sizes = [32, 128], strides = [1, 1]} : vector<32x256xf32> to vector<32x128xf32>
    %669 = vector.extract_strided_slice %667 {offsets = [0, 0], sizes = [32, 128], strides = [1, 1]} : vector<32x256xf32> to vector<32x128xf32>
    %670 = tpu.concatenate %668, %669 in 1 : vector<32x128xf32>, vector<32x128xf32> -> vector<32x256xf32>
    %671 = arith.maximumf %667, %670 : vector<32x256xf32>
    %672 = vector.extract_strided_slice %667 {offsets = [0, 128], sizes = [32, 128], strides = [1, 1]} : vector<32x256xf32> to vector<32x128xf32>
    %673 = vector.extract_strided_slice %667 {offsets = [0, 0], sizes = [32, 128], strides = [1, 1]} : vector<32x256xf32> to vector<32x128xf32>
    %674 = tpu.concatenate %672, %673 in 1 : vector<32x128xf32>, vector<32x128xf32> -> vector<32x256xf32>
    %675 = arith.addf %667, %674 : vector<32x256xf32>
    %676 = vector.extract_strided_slice %671 {offsets = [0, 64], sizes = [32, 192], strides = [1, 1]} : vector<32x256xf32> to vector<32x192xf32>
    %677 = vector.extract_strided_slice %671 {offsets = [0, 0], sizes = [32, 64], strides = [1, 1]} : vector<32x256xf32> to vector<32x64xf32>
    %678 = tpu.concatenate %676, %677 in 1 : vector<32x192xf32>, vector<32x64xf32> -> vector<32x256xf32>
    %679 = arith.maximumf %671, %678 : vector<32x256xf32>
    %680 = vector.extract_strided_slice %675 {offsets = [0, 64], sizes = [32, 192], strides = [1, 1]} : vector<32x256xf32> to vector<32x192xf32>
    %681 = vector.extract_strided_slice %675 {offsets = [0, 0], sizes = [32, 64], strides = [1, 1]} : vector<32x256xf32> to vector<32x64xf32>
    %682 = tpu.concatenate %680, %681 in 1 : vector<32x192xf32>, vector<32x64xf32> -> vector<32x256xf32>
    %683 = arith.addf %675, %682 : vector<32x256xf32>
    %684 = vector.extract_strided_slice %679 {offsets = [0, 32], sizes = [32, 224], strides = [1, 1]} : vector<32x256xf32> to vector<32x224xf32>
    %685 = vector.extract_strided_slice %679 {offsets = [0, 0], sizes = [32, 32], strides = [1, 1]} : vector<32x256xf32> to vector<32x32xf32>
    %686 = tpu.concatenate %684, %685 in 1 : vector<32x224xf32>, vector<32x32xf32> -> vector<32x256xf32>
    %687 = arith.maximumf %679, %686 : vector<32x256xf32>
    %688 = vector.extract_strided_slice %683 {offsets = [0, 32], sizes = [32, 224], strides = [1, 1]} : vector<32x256xf32> to vector<32x224xf32>
    %689 = vector.extract_strided_slice %683 {offsets = [0, 0], sizes = [32, 32], strides = [1, 1]} : vector<32x256xf32> to vector<32x32xf32>
    %690 = tpu.concatenate %688, %689 in 1 : vector<32x224xf32>, vector<32x32xf32> -> vector<32x256xf32>
    %691 = arith.addf %683, %690 : vector<32x256xf32>
    %692 = vector.extract_strided_slice %687 {offsets = [0, 16], sizes = [32, 240], strides = [1, 1]} : vector<32x256xf32> to vector<32x240xf32>
    %693 = vector.extract_strided_slice %687 {offsets = [0, 0], sizes = [32, 16], strides = [1, 1]} : vector<32x256xf32> to vector<32x16xf32>
    %694 = tpu.concatenate %692, %693 in 1 : vector<32x240xf32>, vector<32x16xf32> -> vector<32x256xf32>
    %695 = arith.maximumf %687, %694 : vector<32x256xf32>
    %696 = vector.extract_strided_slice %691 {offsets = [0, 16], sizes = [32, 240], strides = [1, 1]} : vector<32x256xf32> to vector<32x240xf32>
    %697 = vector.extract_strided_slice %691 {offsets = [0, 0], sizes = [32, 16], strides = [1, 1]} : vector<32x256xf32> to vector<32x16xf32>
    %698 = tpu.concatenate %696, %697 in 1 : vector<32x240xf32>, vector<32x16xf32> -> vector<32x256xf32>
    %699 = arith.addf %691, %698 : vector<32x256xf32>
    %700 = vector.extract_strided_slice %695 {offsets = [0, 0], sizes = [32, 16], strides = [1, 1]} : vector<32x256xf32> to vector<32x16xf32>
    %701 = vector.extract_strided_slice %699 {offsets = [0, 0], sizes = [32, 16], strides = [1, 1]} : vector<32x256xf32> to vector<32x16xf32>
    %cst_189 = arith.constant 6.250000e-02 : f32
    %702 = vector.broadcast %cst_189 : f32 to vector<32x16xf32>
    %703 = arith.mulf %701, %702 : vector<32x16xf32>
    %704 = vector.extract_strided_slice %667 {offsets = [0, 8], sizes = [32, 248], strides = [1, 1]} : vector<32x256xf32> to vector<32x248xf32>
    %705 = vector.extract_strided_slice %667 {offsets = [0, 0], sizes = [32, 8], strides = [1, 1]} : vector<32x256xf32> to vector<32x8xf32>
    %706 = tpu.concatenate %704, %705 in 1 : vector<32x248xf32>, vector<32x8xf32> -> vector<32x256xf32>
    %707 = arith.maximumf %667, %706 : vector<32x256xf32>
    %708 = vector.extract_strided_slice %667 {offsets = [0, 8], sizes = [32, 248], strides = [1, 1]} : vector<32x256xf32> to vector<32x248xf32>
    %709 = vector.extract_strided_slice %667 {offsets = [0, 0], sizes = [32, 8], strides = [1, 1]} : vector<32x256xf32> to vector<32x8xf32>
    %710 = tpu.concatenate %708, %709 in 1 : vector<32x248xf32>, vector<32x8xf32> -> vector<32x256xf32>
    %711 = arith.addf %667, %710 : vector<32x256xf32>
    %712 = vector.extract_strided_slice %707 {offsets = [0, 4], sizes = [32, 252], strides = [1, 1]} : vector<32x256xf32> to vector<32x252xf32>
    %713 = vector.extract_strided_slice %707 {offsets = [0, 0], sizes = [32, 4], strides = [1, 1]} : vector<32x256xf32> to vector<32x4xf32>
    %714 = tpu.concatenate %712, %713 in 1 : vector<32x252xf32>, vector<32x4xf32> -> vector<32x256xf32>
    %715 = arith.maximumf %707, %714 : vector<32x256xf32>
    %716 = vector.extract_strided_slice %711 {offsets = [0, 4], sizes = [32, 252], strides = [1, 1]} : vector<32x256xf32> to vector<32x252xf32>
    %717 = vector.extract_strided_slice %711 {offsets = [0, 0], sizes = [32, 4], strides = [1, 1]} : vector<32x256xf32> to vector<32x4xf32>
    %718 = tpu.concatenate %716, %717 in 1 : vector<32x252xf32>, vector<32x4xf32> -> vector<32x256xf32>
    %719 = arith.addf %711, %718 : vector<32x256xf32>
    %720 = vector.extract_strided_slice %715 {offsets = [0, 2], sizes = [32, 254], strides = [1, 1]} : vector<32x256xf32> to vector<32x254xf32>
    %721 = vector.extract_strided_slice %715 {offsets = [0, 0], sizes = [32, 2], strides = [1, 1]} : vector<32x256xf32> to vector<32x2xf32>
    %722 = tpu.concatenate %720, %721 in 1 : vector<32x254xf32>, vector<32x2xf32> -> vector<32x256xf32>
    %723 = arith.maximumf %715, %722 : vector<32x256xf32>
    %724 = vector.extract_strided_slice %719 {offsets = [0, 2], sizes = [32, 254], strides = [1, 1]} : vector<32x256xf32> to vector<32x254xf32>
    %725 = vector.extract_strided_slice %719 {offsets = [0, 0], sizes = [32, 2], strides = [1, 1]} : vector<32x256xf32> to vector<32x2xf32>
    %726 = tpu.concatenate %724, %725 in 1 : vector<32x254xf32>, vector<32x2xf32> -> vector<32x256xf32>
    %727 = arith.addf %719, %726 : vector<32x256xf32>
    %728 = vector.extract_strided_slice %723 {offsets = [0, 1], sizes = [32, 255], strides = [1, 1]} : vector<32x256xf32> to vector<32x255xf32>
    %729 = vector.extract_strided_slice %723 {offsets = [0, 0], sizes = [32, 1], strides = [1, 1]} : vector<32x256xf32> to vector<32x1xf32>
    %730 = tpu.concatenate %728, %729 in 1 : vector<32x255xf32>, vector<32x1xf32> -> vector<32x256xf32>
    %731 = arith.maximumf %723, %730 : vector<32x256xf32>
    %732 = vector.extract_strided_slice %727 {offsets = [0, 1], sizes = [32, 255], strides = [1, 1]} : vector<32x256xf32> to vector<32x255xf32>
    %733 = vector.extract_strided_slice %727 {offsets = [0, 0], sizes = [32, 1], strides = [1, 1]} : vector<32x256xf32> to vector<32x1xf32>
    %734 = tpu.concatenate %732, %733 in 1 : vector<32x255xf32>, vector<32x1xf32> -> vector<32x256xf32>
    %735 = arith.addf %727, %734 : vector<32x256xf32>
    %cst_190 = arith.constant 6.250000e-02 : f32
    %736 = vector.broadcast %cst_190 : f32 to vector<32x256xf32>
    %737 = arith.mulf %735, %736 : vector<32x256xf32>
    %738 = tpu.concatenate %731, %737 in 0 : vector<32x256xf32>, vector<32x256xf32> -> vector<64x256xf32>
    %cst_191 = arith.constant dense<0.000000e+00> : vector<64x16xf32>
    %739 = tpu.matmul %738, %5, %cst_191 {dimension_numbers = #tpu.dot_dimension_numbers<[1], [0], [0], [1], [0, 0, 1, 1], [], []>} : vector<64x256xf32>, vector<256x16xf32>, vector<64x16xf32> -> vector<64x16xf32>
    %740 = vector.extract_strided_slice %739 {offsets = [0, 0], sizes = [32, 16], strides = [1, 1]} : vector<64x16xf32> to vector<32x16xf32>
    %741 = vector.extract_strided_slice %739 {offsets = [32, 0], sizes = [32, 16], strides = [1, 1]} : vector<64x16xf32> to vector<32x16xf32>
    %742 = vector.shape_cast %700 : vector<32x16xf32> to vector<4x8x16xf32>
    %743 = vector.shape_cast %703 : vector<32x16xf32> to vector<4x8x16xf32>
    %cst_192 = arith.constant 0.000000e+00 : f32
    %744 = vector.broadcast %cst_192 : f32 to vector<1x8x16xf32>
    %745 = vector.extract_strided_slice %742 {offsets = [0, 0, 0], sizes = [3, 8, 16], strides = [1, 1, 1]} : vector<4x8x16xf32> to vector<3x8x16xf32>
    %746 = tpu.concatenate %744, %745 in 0 : vector<1x8x16xf32>, vector<3x8x16xf32> -> vector<4x8x16xf32>
    %cst_193 = arith.constant 0.000000e+00 : f32
    %747 = vector.broadcast %cst_193 : f32 to vector<1x8x16xf32>
    %748 = vector.extract_strided_slice %742 {offsets = [1, 0, 0], sizes = [3, 8, 16], strides = [1, 1, 1]} : vector<4x8x16xf32> to vector<3x8x16xf32>
    %749 = tpu.concatenate %748, %747 in 0 : vector<3x8x16xf32>, vector<1x8x16xf32> -> vector<4x8x16xf32>
    %cst_194 = arith.constant 0.000000e+00 : f32
    %750 = vector.broadcast %cst_194 : f32 to vector<1x8x16xf32>
    %751 = vector.extract_strided_slice %743 {offsets = [0, 0, 0], sizes = [3, 8, 16], strides = [1, 1, 1]} : vector<4x8x16xf32> to vector<3x8x16xf32>
    %752 = tpu.concatenate %750, %751 in 0 : vector<1x8x16xf32>, vector<3x8x16xf32> -> vector<4x8x16xf32>
    %cst_195 = arith.constant 0.000000e+00 : f32
    %753 = vector.broadcast %cst_195 : f32 to vector<1x8x16xf32>
    %754 = vector.extract_strided_slice %743 {offsets = [1, 0, 0], sizes = [3, 8, 16], strides = [1, 1, 1]} : vector<4x8x16xf32> to vector<3x8x16xf32>
    %755 = tpu.concatenate %754, %753 in 0 : vector<3x8x16xf32>, vector<1x8x16xf32> -> vector<4x8x16xf32>
    %756 = vector.broadcast %114 : f32 to vector<4x8x16xf32>
    %757 = arith.mulf %756, %746 : vector<4x8x16xf32>
    %758 = vector.broadcast %123 : f32 to vector<4x8x16xf32>
    %759 = arith.mulf %758, %742 : vector<4x8x16xf32>
    %760 = arith.addf %757, %759 : vector<4x8x16xf32>
    %761 = vector.broadcast %132 : f32 to vector<4x8x16xf32>
    %762 = arith.mulf %761, %749 : vector<4x8x16xf32>
    %763 = arith.addf %760, %762 : vector<4x8x16xf32>
    %764 = vector.broadcast %141 : f32 to vector<4x8x16xf32>
    %765 = arith.mulf %764, %752 : vector<4x8x16xf32>
    %766 = arith.addf %763, %765 : vector<4x8x16xf32>
    %767 = vector.broadcast %150 : f32 to vector<4x8x16xf32>
    %768 = arith.mulf %767, %743 : vector<4x8x16xf32>
    %769 = arith.addf %766, %768 : vector<4x8x16xf32>
    %770 = vector.broadcast %159 : f32 to vector<4x8x16xf32>
    %771 = arith.mulf %770, %755 : vector<4x8x16xf32>
    %772 = arith.addf %769, %771 : vector<4x8x16xf32>
    %cst_196 = arith.constant 0.000000e+00 : f32
    %773 = vector.broadcast %cst_196 : f32 to vector<4x1x16xf32>
    %774 = vector.extract_strided_slice %772 {offsets = [0, 0, 0], sizes = [4, 7, 16], strides = [1, 1, 1]} : vector<4x8x16xf32> to vector<4x7x16xf32>
    %775 = tpu.concatenate %773, %774 in 1 : vector<4x1x16xf32>, vector<4x7x16xf32> -> vector<4x8x16xf32>
    %776 = vector.broadcast %117 : f32 to vector<4x8x16xf32>
    %777 = arith.mulf %776, %746 : vector<4x8x16xf32>
    %778 = vector.broadcast %126 : f32 to vector<4x8x16xf32>
    %779 = arith.mulf %778, %742 : vector<4x8x16xf32>
    %780 = arith.addf %777, %779 : vector<4x8x16xf32>
    %781 = vector.broadcast %135 : f32 to vector<4x8x16xf32>
    %782 = arith.mulf %781, %749 : vector<4x8x16xf32>
    %783 = arith.addf %780, %782 : vector<4x8x16xf32>
    %784 = vector.broadcast %144 : f32 to vector<4x8x16xf32>
    %785 = arith.mulf %784, %752 : vector<4x8x16xf32>
    %786 = arith.addf %783, %785 : vector<4x8x16xf32>
    %787 = vector.broadcast %153 : f32 to vector<4x8x16xf32>
    %788 = arith.mulf %787, %743 : vector<4x8x16xf32>
    %789 = arith.addf %786, %788 : vector<4x8x16xf32>
    %790 = vector.broadcast %162 : f32 to vector<4x8x16xf32>
    %791 = arith.mulf %790, %755 : vector<4x8x16xf32>
    %792 = arith.addf %789, %791 : vector<4x8x16xf32>
    %793 = arith.addf %775, %792 : vector<4x8x16xf32>
    %794 = vector.broadcast %120 : f32 to vector<4x8x16xf32>
    %795 = arith.mulf %794, %746 : vector<4x8x16xf32>
    %796 = vector.broadcast %129 : f32 to vector<4x8x16xf32>
    %797 = arith.mulf %796, %742 : vector<4x8x16xf32>
    %798 = arith.addf %795, %797 : vector<4x8x16xf32>
    %799 = vector.broadcast %138 : f32 to vector<4x8x16xf32>
    %800 = arith.mulf %799, %749 : vector<4x8x16xf32>
    %801 = arith.addf %798, %800 : vector<4x8x16xf32>
    %802 = vector.broadcast %147 : f32 to vector<4x8x16xf32>
    %803 = arith.mulf %802, %752 : vector<4x8x16xf32>
    %804 = arith.addf %801, %803 : vector<4x8x16xf32>
    %805 = vector.broadcast %156 : f32 to vector<4x8x16xf32>
    %806 = arith.mulf %805, %743 : vector<4x8x16xf32>
    %807 = arith.addf %804, %806 : vector<4x8x16xf32>
    %808 = vector.broadcast %165 : f32 to vector<4x8x16xf32>
    %809 = arith.mulf %808, %755 : vector<4x8x16xf32>
    %810 = arith.addf %807, %809 : vector<4x8x16xf32>
    %cst_197 = arith.constant 0.000000e+00 : f32
    %811 = vector.broadcast %cst_197 : f32 to vector<4x1x16xf32>
    %812 = vector.extract_strided_slice %810 {offsets = [0, 1, 0], sizes = [4, 7, 16], strides = [1, 1, 1]} : vector<4x8x16xf32> to vector<4x7x16xf32>
    %813 = tpu.concatenate %812, %811 in 1 : vector<4x7x16xf32>, vector<4x1x16xf32> -> vector<4x8x16xf32>
    %814 = arith.addf %793, %813 : vector<4x8x16xf32>
    %cst_198 = arith.constant 0.000000e+00 : f32
    %815 = vector.broadcast %cst_198 : f32 to vector<4x8x1xf32>
    %816 = vector.extract_strided_slice %814 {offsets = [0, 0, 0], sizes = [4, 8, 15], strides = [1, 1, 1]} : vector<4x8x16xf32> to vector<4x8x15xf32>
    %817 = tpu.concatenate %815, %816 in 2 : vector<4x8x1xf32>, vector<4x8x15xf32> -> vector<4x8x16xf32>
    %818 = vector.broadcast %115 : f32 to vector<4x8x16xf32>
    %819 = arith.mulf %818, %746 : vector<4x8x16xf32>
    %820 = vector.broadcast %124 : f32 to vector<4x8x16xf32>
    %821 = arith.mulf %820, %742 : vector<4x8x16xf32>
    %822 = arith.addf %819, %821 : vector<4x8x16xf32>
    %823 = vector.broadcast %133 : f32 to vector<4x8x16xf32>
    %824 = arith.mulf %823, %749 : vector<4x8x16xf32>
    %825 = arith.addf %822, %824 : vector<4x8x16xf32>
    %826 = vector.broadcast %142 : f32 to vector<4x8x16xf32>
    %827 = arith.mulf %826, %752 : vector<4x8x16xf32>
    %828 = arith.addf %825, %827 : vector<4x8x16xf32>
    %829 = vector.broadcast %151 : f32 to vector<4x8x16xf32>
    %830 = arith.mulf %829, %743 : vector<4x8x16xf32>
    %831 = arith.addf %828, %830 : vector<4x8x16xf32>
    %832 = vector.broadcast %160 : f32 to vector<4x8x16xf32>
    %833 = arith.mulf %832, %755 : vector<4x8x16xf32>
    %834 = arith.addf %831, %833 : vector<4x8x16xf32>
    %cst_199 = arith.constant 0.000000e+00 : f32
    %835 = vector.broadcast %cst_199 : f32 to vector<4x1x16xf32>
    %836 = vector.extract_strided_slice %834 {offsets = [0, 0, 0], sizes = [4, 7, 16], strides = [1, 1, 1]} : vector<4x8x16xf32> to vector<4x7x16xf32>
    %837 = tpu.concatenate %835, %836 in 1 : vector<4x1x16xf32>, vector<4x7x16xf32> -> vector<4x8x16xf32>
    %838 = vector.broadcast %118 : f32 to vector<4x8x16xf32>
    %839 = arith.mulf %838, %746 : vector<4x8x16xf32>
    %840 = vector.broadcast %127 : f32 to vector<4x8x16xf32>
    %841 = arith.mulf %840, %742 : vector<4x8x16xf32>
    %842 = arith.addf %839, %841 : vector<4x8x16xf32>
    %843 = vector.broadcast %136 : f32 to vector<4x8x16xf32>
    %844 = arith.mulf %843, %749 : vector<4x8x16xf32>
    %845 = arith.addf %842, %844 : vector<4x8x16xf32>
    %846 = vector.broadcast %145 : f32 to vector<4x8x16xf32>
    %847 = arith.mulf %846, %752 : vector<4x8x16xf32>
    %848 = arith.addf %845, %847 : vector<4x8x16xf32>
    %849 = vector.broadcast %154 : f32 to vector<4x8x16xf32>
    %850 = arith.mulf %849, %743 : vector<4x8x16xf32>
    %851 = arith.addf %848, %850 : vector<4x8x16xf32>
    %852 = vector.broadcast %163 : f32 to vector<4x8x16xf32>
    %853 = arith.mulf %852, %755 : vector<4x8x16xf32>
    %854 = arith.addf %851, %853 : vector<4x8x16xf32>
    %855 = arith.addf %837, %854 : vector<4x8x16xf32>
    %856 = vector.broadcast %121 : f32 to vector<4x8x16xf32>
    %857 = arith.mulf %856, %746 : vector<4x8x16xf32>
    %858 = vector.broadcast %130 : f32 to vector<4x8x16xf32>
    %859 = arith.mulf %858, %742 : vector<4x8x16xf32>
    %860 = arith.addf %857, %859 : vector<4x8x16xf32>
    %861 = vector.broadcast %139 : f32 to vector<4x8x16xf32>
    %862 = arith.mulf %861, %749 : vector<4x8x16xf32>
    %863 = arith.addf %860, %862 : vector<4x8x16xf32>
    %864 = vector.broadcast %148 : f32 to vector<4x8x16xf32>
    %865 = arith.mulf %864, %752 : vector<4x8x16xf32>
    %866 = arith.addf %863, %865 : vector<4x8x16xf32>
    %867 = vector.broadcast %157 : f32 to vector<4x8x16xf32>
    %868 = arith.mulf %867, %743 : vector<4x8x16xf32>
    %869 = arith.addf %866, %868 : vector<4x8x16xf32>
    %870 = vector.broadcast %166 : f32 to vector<4x8x16xf32>
    %871 = arith.mulf %870, %755 : vector<4x8x16xf32>
    %872 = arith.addf %869, %871 : vector<4x8x16xf32>
    %cst_200 = arith.constant 0.000000e+00 : f32
    %873 = vector.broadcast %cst_200 : f32 to vector<4x1x16xf32>
    %874 = vector.extract_strided_slice %872 {offsets = [0, 1, 0], sizes = [4, 7, 16], strides = [1, 1, 1]} : vector<4x8x16xf32> to vector<4x7x16xf32>
    %875 = tpu.concatenate %874, %873 in 1 : vector<4x7x16xf32>, vector<4x1x16xf32> -> vector<4x8x16xf32>
    %876 = arith.addf %855, %875 : vector<4x8x16xf32>
    %877 = arith.addf %817, %876 : vector<4x8x16xf32>
    %878 = vector.broadcast %116 : f32 to vector<4x8x16xf32>
    %879 = arith.mulf %878, %746 : vector<4x8x16xf32>
    %880 = vector.broadcast %125 : f32 to vector<4x8x16xf32>
    %881 = arith.mulf %880, %742 : vector<4x8x16xf32>
    %882 = arith.addf %879, %881 : vector<4x8x16xf32>
    %883 = vector.broadcast %134 : f32 to vector<4x8x16xf32>
    %884 = arith.mulf %883, %749 : vector<4x8x16xf32>
    %885 = arith.addf %882, %884 : vector<4x8x16xf32>
    %886 = vector.broadcast %143 : f32 to vector<4x8x16xf32>
    %887 = arith.mulf %886, %752 : vector<4x8x16xf32>
    %888 = arith.addf %885, %887 : vector<4x8x16xf32>
    %889 = vector.broadcast %152 : f32 to vector<4x8x16xf32>
    %890 = arith.mulf %889, %743 : vector<4x8x16xf32>
    %891 = arith.addf %888, %890 : vector<4x8x16xf32>
    %892 = vector.broadcast %161 : f32 to vector<4x8x16xf32>
    %893 = arith.mulf %892, %755 : vector<4x8x16xf32>
    %894 = arith.addf %891, %893 : vector<4x8x16xf32>
    %cst_201 = arith.constant 0.000000e+00 : f32
    %895 = vector.broadcast %cst_201 : f32 to vector<4x1x16xf32>
    %896 = vector.extract_strided_slice %894 {offsets = [0, 0, 0], sizes = [4, 7, 16], strides = [1, 1, 1]} : vector<4x8x16xf32> to vector<4x7x16xf32>
    %897 = tpu.concatenate %895, %896 in 1 : vector<4x1x16xf32>, vector<4x7x16xf32> -> vector<4x8x16xf32>
    %898 = vector.broadcast %119 : f32 to vector<4x8x16xf32>
    %899 = arith.mulf %898, %746 : vector<4x8x16xf32>
    %900 = vector.broadcast %128 : f32 to vector<4x8x16xf32>
    %901 = arith.mulf %900, %742 : vector<4x8x16xf32>
    %902 = arith.addf %899, %901 : vector<4x8x16xf32>
    %903 = vector.broadcast %137 : f32 to vector<4x8x16xf32>
    %904 = arith.mulf %903, %749 : vector<4x8x16xf32>
    %905 = arith.addf %902, %904 : vector<4x8x16xf32>
    %906 = vector.broadcast %146 : f32 to vector<4x8x16xf32>
    %907 = arith.mulf %906, %752 : vector<4x8x16xf32>
    %908 = arith.addf %905, %907 : vector<4x8x16xf32>
    %909 = vector.broadcast %155 : f32 to vector<4x8x16xf32>
    %910 = arith.mulf %909, %743 : vector<4x8x16xf32>
    %911 = arith.addf %908, %910 : vector<4x8x16xf32>
    %912 = vector.broadcast %164 : f32 to vector<4x8x16xf32>
    %913 = arith.mulf %912, %755 : vector<4x8x16xf32>
    %914 = arith.addf %911, %913 : vector<4x8x16xf32>
    %915 = arith.addf %897, %914 : vector<4x8x16xf32>
    %916 = vector.broadcast %122 : f32 to vector<4x8x16xf32>
    %917 = arith.mulf %916, %746 : vector<4x8x16xf32>
    %918 = vector.broadcast %131 : f32 to vector<4x8x16xf32>
    %919 = arith.mulf %918, %742 : vector<4x8x16xf32>
    %920 = arith.addf %917, %919 : vector<4x8x16xf32>
    %921 = vector.broadcast %140 : f32 to vector<4x8x16xf32>
    %922 = arith.mulf %921, %749 : vector<4x8x16xf32>
    %923 = arith.addf %920, %922 : vector<4x8x16xf32>
    %924 = vector.broadcast %149 : f32 to vector<4x8x16xf32>
    %925 = arith.mulf %924, %752 : vector<4x8x16xf32>
    %926 = arith.addf %923, %925 : vector<4x8x16xf32>
    %927 = vector.broadcast %158 : f32 to vector<4x8x16xf32>
    %928 = arith.mulf %927, %743 : vector<4x8x16xf32>
    %929 = arith.addf %926, %928 : vector<4x8x16xf32>
    %930 = vector.broadcast %167 : f32 to vector<4x8x16xf32>
    %931 = arith.mulf %930, %755 : vector<4x8x16xf32>
    %932 = arith.addf %929, %931 : vector<4x8x16xf32>
    %cst_202 = arith.constant 0.000000e+00 : f32
    %933 = vector.broadcast %cst_202 : f32 to vector<4x1x16xf32>
    %934 = vector.extract_strided_slice %932 {offsets = [0, 1, 0], sizes = [4, 7, 16], strides = [1, 1, 1]} : vector<4x8x16xf32> to vector<4x7x16xf32>
    %935 = tpu.concatenate %934, %933 in 1 : vector<4x7x16xf32>, vector<4x1x16xf32> -> vector<4x8x16xf32>
    %936 = arith.addf %915, %935 : vector<4x8x16xf32>
    %cst_203 = arith.constant 0.000000e+00 : f32
    %937 = vector.broadcast %cst_203 : f32 to vector<4x8x1xf32>
    %938 = vector.extract_strided_slice %936 {offsets = [0, 0, 1], sizes = [4, 8, 15], strides = [1, 1, 1]} : vector<4x8x16xf32> to vector<4x8x15xf32>
    %939 = tpu.concatenate %938, %937 in 2 : vector<4x8x15xf32>, vector<4x8x1xf32> -> vector<4x8x16xf32>
    %940 = arith.addf %877, %939 : vector<4x8x16xf32>
    %cst_204 = arith.constant 0.000000e+00 : f32
    %941 = vector.broadcast %cst_204 : f32 to vector<4x8x16xf32>
    %942 = arith.subf %941, %940 : vector<4x8x16xf32>
    %943 = math.exp %942 : vector<4x8x16xf32>
    %cst_205 = arith.constant 1.000000e+00 : f32
    %944 = vector.broadcast %cst_205 : f32 to vector<4x8x16xf32>
    %945 = arith.addf %944, %943 : vector<4x8x16xf32>
    %946 = tpu.reciprocal %945 {approx = true} : vector<4x8x16xf32> -> vector<4x8x16xf32>
    %947 = vector.shape_cast %740 : vector<32x16xf32> to vector<4x8x16xf32>
    %948 = vector.shape_cast %741 : vector<32x16xf32> to vector<4x8x16xf32>
    %cst_206 = arith.constant 0.000000e+00 : f32
    %949 = vector.broadcast %cst_206 : f32 to vector<1x8x16xf32>
    %950 = vector.extract_strided_slice %947 {offsets = [0, 0, 0], sizes = [3, 8, 16], strides = [1, 1, 1]} : vector<4x8x16xf32> to vector<3x8x16xf32>
    %951 = tpu.concatenate %949, %950 in 0 : vector<1x8x16xf32>, vector<3x8x16xf32> -> vector<4x8x16xf32>
    %cst_207 = arith.constant 0.000000e+00 : f32
    %952 = vector.broadcast %cst_207 : f32 to vector<1x8x16xf32>
    %953 = vector.extract_strided_slice %947 {offsets = [1, 0, 0], sizes = [3, 8, 16], strides = [1, 1, 1]} : vector<4x8x16xf32> to vector<3x8x16xf32>
    %954 = tpu.concatenate %953, %952 in 0 : vector<3x8x16xf32>, vector<1x8x16xf32> -> vector<4x8x16xf32>
    %cst_208 = arith.constant 0.000000e+00 : f32
    %955 = vector.broadcast %cst_208 : f32 to vector<1x8x16xf32>
    %956 = vector.extract_strided_slice %948 {offsets = [0, 0, 0], sizes = [3, 8, 16], strides = [1, 1, 1]} : vector<4x8x16xf32> to vector<3x8x16xf32>
    %957 = tpu.concatenate %955, %956 in 0 : vector<1x8x16xf32>, vector<3x8x16xf32> -> vector<4x8x16xf32>
    %cst_209 = arith.constant 0.000000e+00 : f32
    %958 = vector.broadcast %cst_209 : f32 to vector<1x8x16xf32>
    %959 = vector.extract_strided_slice %948 {offsets = [1, 0, 0], sizes = [3, 8, 16], strides = [1, 1, 1]} : vector<4x8x16xf32> to vector<3x8x16xf32>
    %960 = tpu.concatenate %959, %958 in 0 : vector<3x8x16xf32>, vector<1x8x16xf32> -> vector<4x8x16xf32>
    %961 = vector.broadcast %168 : f32 to vector<4x8x16xf32>
    %962 = arith.mulf %961, %951 : vector<4x8x16xf32>
    %963 = vector.broadcast %177 : f32 to vector<4x8x16xf32>
    %964 = arith.mulf %963, %947 : vector<4x8x16xf32>
    %965 = arith.addf %962, %964 : vector<4x8x16xf32>
    %966 = vector.broadcast %186 : f32 to vector<4x8x16xf32>
    %967 = arith.mulf %966, %954 : vector<4x8x16xf32>
    %968 = arith.addf %965, %967 : vector<4x8x16xf32>
    %969 = vector.broadcast %195 : f32 to vector<4x8x16xf32>
    %970 = arith.mulf %969, %957 : vector<4x8x16xf32>
    %971 = arith.addf %968, %970 : vector<4x8x16xf32>
    %972 = vector.broadcast %204 : f32 to vector<4x8x16xf32>
    %973 = arith.mulf %972, %948 : vector<4x8x16xf32>
    %974 = arith.addf %971, %973 : vector<4x8x16xf32>
    %975 = vector.broadcast %213 : f32 to vector<4x8x16xf32>
    %976 = arith.mulf %975, %960 : vector<4x8x16xf32>
    %977 = arith.addf %974, %976 : vector<4x8x16xf32>
    %cst_210 = arith.constant 0.000000e+00 : f32
    %978 = vector.broadcast %cst_210 : f32 to vector<4x1x16xf32>
    %979 = vector.extract_strided_slice %977 {offsets = [0, 0, 0], sizes = [4, 7, 16], strides = [1, 1, 1]} : vector<4x8x16xf32> to vector<4x7x16xf32>
    %980 = tpu.concatenate %978, %979 in 1 : vector<4x1x16xf32>, vector<4x7x16xf32> -> vector<4x8x16xf32>
    %981 = vector.broadcast %171 : f32 to vector<4x8x16xf32>
    %982 = arith.mulf %981, %951 : vector<4x8x16xf32>
    %983 = vector.broadcast %180 : f32 to vector<4x8x16xf32>
    %984 = arith.mulf %983, %947 : vector<4x8x16xf32>
    %985 = arith.addf %982, %984 : vector<4x8x16xf32>
    %986 = vector.broadcast %189 : f32 to vector<4x8x16xf32>
    %987 = arith.mulf %986, %954 : vector<4x8x16xf32>
    %988 = arith.addf %985, %987 : vector<4x8x16xf32>
    %989 = vector.broadcast %198 : f32 to vector<4x8x16xf32>
    %990 = arith.mulf %989, %957 : vector<4x8x16xf32>
    %991 = arith.addf %988, %990 : vector<4x8x16xf32>
    %992 = vector.broadcast %207 : f32 to vector<4x8x16xf32>
    %993 = arith.mulf %992, %948 : vector<4x8x16xf32>
    %994 = arith.addf %991, %993 : vector<4x8x16xf32>
    %995 = vector.broadcast %216 : f32 to vector<4x8x16xf32>
    %996 = arith.mulf %995, %960 : vector<4x8x16xf32>
    %997 = arith.addf %994, %996 : vector<4x8x16xf32>
    %998 = arith.addf %980, %997 : vector<4x8x16xf32>
    %999 = vector.broadcast %174 : f32 to vector<4x8x16xf32>
    %1000 = arith.mulf %999, %951 : vector<4x8x16xf32>
    %1001 = vector.broadcast %183 : f32 to vector<4x8x16xf32>
    %1002 = arith.mulf %1001, %947 : vector<4x8x16xf32>
    %1003 = arith.addf %1000, %1002 : vector<4x8x16xf32>
    %1004 = vector.broadcast %192 : f32 to vector<4x8x16xf32>
    %1005 = arith.mulf %1004, %954 : vector<4x8x16xf32>
    %1006 = arith.addf %1003, %1005 : vector<4x8x16xf32>
    %1007 = vector.broadcast %201 : f32 to vector<4x8x16xf32>
    %1008 = arith.mulf %1007, %957 : vector<4x8x16xf32>
    %1009 = arith.addf %1006, %1008 : vector<4x8x16xf32>
    %1010 = vector.broadcast %210 : f32 to vector<4x8x16xf32>
    %1011 = arith.mulf %1010, %948 : vector<4x8x16xf32>
    %1012 = arith.addf %1009, %1011 : vector<4x8x16xf32>
    %1013 = vector.broadcast %219 : f32 to vector<4x8x16xf32>
    %1014 = arith.mulf %1013, %960 : vector<4x8x16xf32>
    %1015 = arith.addf %1012, %1014 : vector<4x8x16xf32>
    %cst_211 = arith.constant 0.000000e+00 : f32
    %1016 = vector.broadcast %cst_211 : f32 to vector<4x1x16xf32>
    %1017 = vector.extract_strided_slice %1015 {offsets = [0, 1, 0], sizes = [4, 7, 16], strides = [1, 1, 1]} : vector<4x8x16xf32> to vector<4x7x16xf32>
    %1018 = tpu.concatenate %1017, %1016 in 1 : vector<4x7x16xf32>, vector<4x1x16xf32> -> vector<4x8x16xf32>
    %1019 = arith.addf %998, %1018 : vector<4x8x16xf32>
    %cst_212 = arith.constant 0.000000e+00 : f32
    %1020 = vector.broadcast %cst_212 : f32 to vector<4x8x1xf32>
    %1021 = vector.extract_strided_slice %1019 {offsets = [0, 0, 0], sizes = [4, 8, 15], strides = [1, 1, 1]} : vector<4x8x16xf32> to vector<4x8x15xf32>
    %1022 = tpu.concatenate %1020, %1021 in 2 : vector<4x8x1xf32>, vector<4x8x15xf32> -> vector<4x8x16xf32>
    %1023 = vector.broadcast %169 : f32 to vector<4x8x16xf32>
    %1024 = arith.mulf %1023, %951 : vector<4x8x16xf32>
    %1025 = vector.broadcast %178 : f32 to vector<4x8x16xf32>
    %1026 = arith.mulf %1025, %947 : vector<4x8x16xf32>
    %1027 = arith.addf %1024, %1026 : vector<4x8x16xf32>
    %1028 = vector.broadcast %187 : f32 to vector<4x8x16xf32>
    %1029 = arith.mulf %1028, %954 : vector<4x8x16xf32>
    %1030 = arith.addf %1027, %1029 : vector<4x8x16xf32>
    %1031 = vector.broadcast %196 : f32 to vector<4x8x16xf32>
    %1032 = arith.mulf %1031, %957 : vector<4x8x16xf32>
    %1033 = arith.addf %1030, %1032 : vector<4x8x16xf32>
    %1034 = vector.broadcast %205 : f32 to vector<4x8x16xf32>
    %1035 = arith.mulf %1034, %948 : vector<4x8x16xf32>
    %1036 = arith.addf %1033, %1035 : vector<4x8x16xf32>
    %1037 = vector.broadcast %214 : f32 to vector<4x8x16xf32>
    %1038 = arith.mulf %1037, %960 : vector<4x8x16xf32>
    %1039 = arith.addf %1036, %1038 : vector<4x8x16xf32>
    %cst_213 = arith.constant 0.000000e+00 : f32
    %1040 = vector.broadcast %cst_213 : f32 to vector<4x1x16xf32>
    %1041 = vector.extract_strided_slice %1039 {offsets = [0, 0, 0], sizes = [4, 7, 16], strides = [1, 1, 1]} : vector<4x8x16xf32> to vector<4x7x16xf32>
    %1042 = tpu.concatenate %1040, %1041 in 1 : vector<4x1x16xf32>, vector<4x7x16xf32> -> vector<4x8x16xf32>
    %1043 = vector.broadcast %172 : f32 to vector<4x8x16xf32>
    %1044 = arith.mulf %1043, %951 : vector<4x8x16xf32>
    %1045 = vector.broadcast %181 : f32 to vector<4x8x16xf32>
    %1046 = arith.mulf %1045, %947 : vector<4x8x16xf32>
    %1047 = arith.addf %1044, %1046 : vector<4x8x16xf32>
    %1048 = vector.broadcast %190 : f32 to vector<4x8x16xf32>
    %1049 = arith.mulf %1048, %954 : vector<4x8x16xf32>
    %1050 = arith.addf %1047, %1049 : vector<4x8x16xf32>
    %1051 = vector.broadcast %199 : f32 to vector<4x8x16xf32>
    %1052 = arith.mulf %1051, %957 : vector<4x8x16xf32>
    %1053 = arith.addf %1050, %1052 : vector<4x8x16xf32>
    %1054 = vector.broadcast %208 : f32 to vector<4x8x16xf32>
    %1055 = arith.mulf %1054, %948 : vector<4x8x16xf32>
    %1056 = arith.addf %1053, %1055 : vector<4x8x16xf32>
    %1057 = vector.broadcast %217 : f32 to vector<4x8x16xf32>
    %1058 = arith.mulf %1057, %960 : vector<4x8x16xf32>
    %1059 = arith.addf %1056, %1058 : vector<4x8x16xf32>
    %1060 = arith.addf %1042, %1059 : vector<4x8x16xf32>
    %1061 = vector.broadcast %175 : f32 to vector<4x8x16xf32>
    %1062 = arith.mulf %1061, %951 : vector<4x8x16xf32>
    %1063 = vector.broadcast %184 : f32 to vector<4x8x16xf32>
    %1064 = arith.mulf %1063, %947 : vector<4x8x16xf32>
    %1065 = arith.addf %1062, %1064 : vector<4x8x16xf32>
    %1066 = vector.broadcast %193 : f32 to vector<4x8x16xf32>
    %1067 = arith.mulf %1066, %954 : vector<4x8x16xf32>
    %1068 = arith.addf %1065, %1067 : vector<4x8x16xf32>
    %1069 = vector.broadcast %202 : f32 to vector<4x8x16xf32>
    %1070 = arith.mulf %1069, %957 : vector<4x8x16xf32>
    %1071 = arith.addf %1068, %1070 : vector<4x8x16xf32>
    %1072 = vector.broadcast %211 : f32 to vector<4x8x16xf32>
    %1073 = arith.mulf %1072, %948 : vector<4x8x16xf32>
    %1074 = arith.addf %1071, %1073 : vector<4x8x16xf32>
    %1075 = vector.broadcast %220 : f32 to vector<4x8x16xf32>
    %1076 = arith.mulf %1075, %960 : vector<4x8x16xf32>
    %1077 = arith.addf %1074, %1076 : vector<4x8x16xf32>
    %cst_214 = arith.constant 0.000000e+00 : f32
    %1078 = vector.broadcast %cst_214 : f32 to vector<4x1x16xf32>
    %1079 = vector.extract_strided_slice %1077 {offsets = [0, 1, 0], sizes = [4, 7, 16], strides = [1, 1, 1]} : vector<4x8x16xf32> to vector<4x7x16xf32>
    %1080 = tpu.concatenate %1079, %1078 in 1 : vector<4x7x16xf32>, vector<4x1x16xf32> -> vector<4x8x16xf32>
    %1081 = arith.addf %1060, %1080 : vector<4x8x16xf32>
    %1082 = arith.addf %1022, %1081 : vector<4x8x16xf32>
    %1083 = vector.broadcast %170 : f32 to vector<4x8x16xf32>
    %1084 = arith.mulf %1083, %951 : vector<4x8x16xf32>
    %1085 = vector.broadcast %179 : f32 to vector<4x8x16xf32>
    %1086 = arith.mulf %1085, %947 : vector<4x8x16xf32>
    %1087 = arith.addf %1084, %1086 : vector<4x8x16xf32>
    %1088 = vector.broadcast %188 : f32 to vector<4x8x16xf32>
    %1089 = arith.mulf %1088, %954 : vector<4x8x16xf32>
    %1090 = arith.addf %1087, %1089 : vector<4x8x16xf32>
    %1091 = vector.broadcast %197 : f32 to vector<4x8x16xf32>
    %1092 = arith.mulf %1091, %957 : vector<4x8x16xf32>
    %1093 = arith.addf %1090, %1092 : vector<4x8x16xf32>
    %1094 = vector.broadcast %206 : f32 to vector<4x8x16xf32>
    %1095 = arith.mulf %1094, %948 : vector<4x8x16xf32>
    %1096 = arith.addf %1093, %1095 : vector<4x8x16xf32>
    %1097 = vector.broadcast %215 : f32 to vector<4x8x16xf32>
    %1098 = arith.mulf %1097, %960 : vector<4x8x16xf32>
    %1099 = arith.addf %1096, %1098 : vector<4x8x16xf32>
    %cst_215 = arith.constant 0.000000e+00 : f32
    %1100 = vector.broadcast %cst_215 : f32 to vector<4x1x16xf32>
    %1101 = vector.extract_strided_slice %1099 {offsets = [0, 0, 0], sizes = [4, 7, 16], strides = [1, 1, 1]} : vector<4x8x16xf32> to vector<4x7x16xf32>
    %1102 = tpu.concatenate %1100, %1101 in 1 : vector<4x1x16xf32>, vector<4x7x16xf32> -> vector<4x8x16xf32>
    %1103 = vector.broadcast %173 : f32 to vector<4x8x16xf32>
    %1104 = arith.mulf %1103, %951 : vector<4x8x16xf32>
    %1105 = vector.broadcast %182 : f32 to vector<4x8x16xf32>
    %1106 = arith.mulf %1105, %947 : vector<4x8x16xf32>
    %1107 = arith.addf %1104, %1106 : vector<4x8x16xf32>
    %1108 = vector.broadcast %191 : f32 to vector<4x8x16xf32>
    %1109 = arith.mulf %1108, %954 : vector<4x8x16xf32>
    %1110 = arith.addf %1107, %1109 : vector<4x8x16xf32>
    %1111 = vector.broadcast %200 : f32 to vector<4x8x16xf32>
    %1112 = arith.mulf %1111, %957 : vector<4x8x16xf32>
    %1113 = arith.addf %1110, %1112 : vector<4x8x16xf32>
    %1114 = vector.broadcast %209 : f32 to vector<4x8x16xf32>
    %1115 = arith.mulf %1114, %948 : vector<4x8x16xf32>
    %1116 = arith.addf %1113, %1115 : vector<4x8x16xf32>
    %1117 = vector.broadcast %218 : f32 to vector<4x8x16xf32>
    %1118 = arith.mulf %1117, %960 : vector<4x8x16xf32>
    %1119 = arith.addf %1116, %1118 : vector<4x8x16xf32>
    %1120 = arith.addf %1102, %1119 : vector<4x8x16xf32>
    %1121 = vector.broadcast %176 : f32 to vector<4x8x16xf32>
    %1122 = arith.mulf %1121, %951 : vector<4x8x16xf32>
    %1123 = vector.broadcast %185 : f32 to vector<4x8x16xf32>
    %1124 = arith.mulf %1123, %947 : vector<4x8x16xf32>
    %1125 = arith.addf %1122, %1124 : vector<4x8x16xf32>
    %1126 = vector.broadcast %194 : f32 to vector<4x8x16xf32>
    %1127 = arith.mulf %1126, %954 : vector<4x8x16xf32>
    %1128 = arith.addf %1125, %1127 : vector<4x8x16xf32>
    %1129 = vector.broadcast %203 : f32 to vector<4x8x16xf32>
    %1130 = arith.mulf %1129, %957 : vector<4x8x16xf32>
    %1131 = arith.addf %1128, %1130 : vector<4x8x16xf32>
    %1132 = vector.broadcast %212 : f32 to vector<4x8x16xf32>
    %1133 = arith.mulf %1132, %948 : vector<4x8x16xf32>
    %1134 = arith.addf %1131, %1133 : vector<4x8x16xf32>
    %1135 = vector.broadcast %221 : f32 to vector<4x8x16xf32>
    %1136 = arith.mulf %1135, %960 : vector<4x8x16xf32>
    %1137 = arith.addf %1134, %1136 : vector<4x8x16xf32>
    %cst_216 = arith.constant 0.000000e+00 : f32
    %1138 = vector.broadcast %cst_216 : f32 to vector<4x1x16xf32>
    %1139 = vector.extract_strided_slice %1137 {offsets = [0, 1, 0], sizes = [4, 7, 16], strides = [1, 1, 1]} : vector<4x8x16xf32> to vector<4x7x16xf32>
    %1140 = tpu.concatenate %1139, %1138 in 1 : vector<4x7x16xf32>, vector<4x1x16xf32> -> vector<4x8x16xf32>
    %1141 = arith.addf %1120, %1140 : vector<4x8x16xf32>
    %cst_217 = arith.constant 0.000000e+00 : f32
    %1142 = vector.broadcast %cst_217 : f32 to vector<4x8x1xf32>
    %1143 = vector.extract_strided_slice %1141 {offsets = [0, 0, 1], sizes = [4, 8, 15], strides = [1, 1, 1]} : vector<4x8x16xf32> to vector<4x8x15xf32>
    %1144 = tpu.concatenate %1143, %1142 in 2 : vector<4x8x15xf32>, vector<4x8x1xf32> -> vector<4x8x16xf32>
    %1145 = arith.addf %1082, %1144 : vector<4x8x16xf32>
    %cst_218 = arith.constant 0.000000e+00 : f32
    %1146 = vector.broadcast %cst_218 : f32 to vector<4x8x16xf32>
    %1147 = arith.subf %1146, %1145 : vector<4x8x16xf32>
    %1148 = math.exp %1147 : vector<4x8x16xf32>
    %cst_219 = arith.constant 1.000000e+00 : f32
    %1149 = vector.broadcast %cst_219 : f32 to vector<4x8x16xf32>
    %1150 = arith.addf %1149, %1148 : vector<4x8x16xf32>
    %1151 = tpu.reciprocal %1150 {approx = true} : vector<4x8x16xf32> -> vector<4x8x16xf32>
    %1152 = vector.shape_cast %946 : vector<4x8x16xf32> to vector<32x16xf32>
    %1153 = vector.shape_cast %1151 : vector<4x8x16xf32> to vector<32x16xf32>
    %1154 = tpu.concatenate %1152, %1153 in 1 : vector<32x16xf32>, vector<32x16xf32> -> vector<32x32xf32>
    %cst_220 = arith.constant dense<0.000000e+00> : vector<32x256xf32>
    %1155 = tpu.matmul %1154, %4, %cst_220 {dimension_numbers = #tpu.dot_dimension_numbers<[1], [0], [0], [1], [0, 0, 1, 1], [], []>} : vector<32x32xf32>, vector<32x256xf32>, vector<32x256xf32> -> vector<32x256xf32>
    %1156 = vector.shape_cast %666 : vector<4x256xf32> to vector<4x1x256xf32>
    %1157 = vector.shape_cast %1155 : vector<32x256xf32> to vector<4x8x256xf32>
    %1158 = vector.broadcast %1156 : vector<4x1x256xf32> to vector<4x8x256xf32>
    %1159 = arith.addf %1158, %1157 : vector<4x8x256xf32>
    %1160 = arith.mulf %223, %1159 : vector<4x8x256xf32>
    %cst_221 = arith.constant 0.333333343 : f32
    %1161 = vector.broadcast %cst_221 : f32 to vector<4x8x256xf32>
    %1162 = arith.mulf %1160, %1161 : vector<4x8x256xf32>
    %c0_222 = arith.constant 0 : index
    %c0_223 = arith.constant 0 : index
    %c0_224 = arith.constant 0 : index
    %c0_225 = arith.constant 0 : index
    %1163 = vector.load %arg9[%c0_222, %c0_223, %c0_224, %c0_225] : memref<1x4x8x256xf32, #tpu.memory_space<vmem>>, vector<1x4x8x256xf32>
    %1164 = vector.shape_cast %1163 : vector<1x4x8x256xf32> to vector<4x8x256xf32>
    %1165 = vector.shape_cast %1162 : vector<4x8x256xf32> to vector<1x4x8x256xf32>
    tpu.vector_store %arg9[%c0_222, %c0_223, %c0_224, %c0_225], %1165 {strides = array<i32>} : memref<1x4x8x256xf32, #tpu.memory_space<vmem>>, vector<1x4x8x256xf32>,
    return
  }
  func.func @transform_0(%arg0: i32) -> (i32, i32, i32, i32) {
    %c0_i32 = arith.constant 0 : i32
    %c0_i32_0 = arith.constant 0 : i32
    %c0_i32_1 = arith.constant 0 : i32
    %c0_i32_2 = arith.constant 0 : i32
    return %arg0, %c0_i32, %c0_i32_0, %c0_i32_1 : i32, i32, i32, i32
  }
  func.func @transform_1(%arg0: i32) -> (i32, i32) {
    %c0_i32 = arith.constant 0 : i32
    %c0_i32_0 = arith.constant 0 : i32
    %c0_i32_1 = arith.constant 0 : i32
    return %c0_i32, %c0_i32_0 : i32, i32
  }
  func.func @transform_2(%arg0: i32) -> (i32, i32) {
    %c0_i32 = arith.constant 0 : i32
    %c0_i32_0 = arith.constant 0 : i32
    %c0_i32_1 = arith.constant 0 : i32
    return %c0_i32, %c0_i32_0 : i32, i32
  }
  func.func @transform_3(%arg0: i32) -> (i32, i32) {
    %c0_i32 = arith.constant 0 : i32
    %c0_i32_0 = arith.constant 0 : i32
    %c0_i32_1 = arith.constant 0 : i32
    return %c0_i32, %c0_i32_0 : i32, i32
  }
  func.func @transform_4(%arg0: i32) -> i32 {
    %c0_i32 = arith.constant 0 : i32
    %c0_i32_0 = arith.constant 0 : i32
    return %c0_i32 : i32
  }
  func.func @transform_5(%arg0: i32) -> i32 {
    %c0_i32 = arith.constant 0 : i32
    %c0_i32_0 = arith.constant 0 : i32
    return %c0_i32 : i32
  }
  func.func @transform_6(%arg0: i32) -> i32 {
    %c0_i32 = arith.constant 0 : i32
    %c0_i32_0 = arith.constant 0 : i32
    return %c0_i32 : i32
  }
  func.func @transform_7(%arg0: i32) -> i32 {
    %c0_i32 = arith.constant 0 : i32
    %c0_i32_0 = arith.constant 0 : i32
    return %c0_i32 : i32
  }
  func.func @transform_8(%arg0: i32) -> (i32, i32, i32, i32) {
    %c0_i32 = arith.constant 0 : i32
    %c0_i32_0 = arith.constant 0 : i32
    %c0_i32_1 = arith.constant 0 : i32
    %c0_i32_2 = arith.constant 0 : i32
    return %arg0, %c0_i32, %c0_i32_0, %c0_i32_1 : i32, i32, i32, i32
  }
}

</mosaic_0001>

<bundles_post_ra>
// kernel: tpu_custom_call.1
= control target key start
LH: loop header
LB: loop body
LE: loop exit
PB: predicated region body
PF: predicated region fallthrough
CT: control target
= control target key end

     0   :  { %6 = vsyncpa [#allocation3], 0  ;;  %s137_s0 = inlined_call_operand.hbm [shape: f32[8,256], index: 0, kind: input, shape index: {}]   ;;  %s138_s1 = inlined_call_operand.hbm [shape: f32[8,256], index: 1, kind: output, shape index: {}]  }
   0x1   :  { %7 = vsyncpa [#allocation4], 0  ;;  %s100_s6 = smov [#allocation2]   ;;  %s52_s10 = scalar_lea.hbm %s137_s0, 256 }
   0x2   :  { %s14_s7 = sshll.u32 %s100_s6, 4  ;;  %p53_p0 = scmp.ne.s32.totalorder %s137_s0, %s52_s10  ;;  %s15_s7 = int_to_ptr.vmem [resolvable:$true] %s14_s7 }
   0x3   :  { %p56_p1 = scmp.lt.u32.totalorder %s52_s10, %s137_s0 }
   0x5   :  { %p58_p2 = pnand %p56_p1, %p53_p0 }
   0x7   :  { %61 = shalt.err (!%p58_p2)
}
   0x8   :  { %s62_s15 = scalar_lea.vmem %s15_s7, 256  ;;  %p67_p4 = scmp.lt.s32.totalorder %s15_s7, %s15_s7 }
   0x9   :  { %p63_p3 = scmp.ne.s32.totalorder %s15_s7, %s62_s15  ;;  %p68_p5 = scmp.lt.s32.totalorder %s62_s15, %s62_s15 }
   0xb   :  { %p69_p6 = por %p68_p5, %p67_p4 }
   0xd   :  { %p70_p7 = pnand %p69_p6, %p63_p3 }
   0xf   :  { %73 = shalt.err (!%p70_p7)
}
  0x10   :  { %17 = dma.hbm_to_vmem [thread:$0]  %s137_s0, 256, %s15_s7, [#allocation3]  }
  0x11   :  { %96 = dma.done.wait [#allocation3], 256  }
  0x12   :  { %97 = vsyncadd [#allocation3], 4294967040  ;;  %v21_v0 = vld [vmem:[#allocation2] sm:$0xff]  ;;  %s101_s18 = smov 1   ;;  %v22_v1 = vld [vmem:[#allocation2 + $0x8] sm:$0xff]  ;;  %v27_v2 = vlaneseq  ;;  %s102_s19 = smov [#allocation5]  }
  0x13   :  { %23 = vrot.lane.b32.xlu0 %v21_v0, %s101_s18  ;;  %s40_s20 = sshll.u32 %s102_s19, 4  ;;  %s41_s20 = int_to_ptr.vmem [resolvable:$true] %s40_s20 }
  0x14   :  { %v28_v3 = vand.u32 127, %v27_v2  ;;  %s74_s0 = scalar_lea.vmem %s41_s20, 256  ;;  %p79_p9 = scmp.lt.s32.totalorder %s41_s20, %s41_s20 }
  0x15   :  { %p75_p8 = scmp.ne.s32.totalorder %s41_s20, %s74_s0  ;;  %p80_p10 = scmp.lt.s32.totalorder %s74_s0, %s74_s0 }
  0x16   :  { %vm29_vm0 = vcmp.lt.s32.totalorder %v28_v3, 1 }
  0x17   :  { %25 = vrot.lane.b32.xlu0 %v22_v1, %s101_s18  ;;  %p81_p11 = por %p80_p10, %p79_p9 }
  0x19   :  { %p82_p12 = pnand %p81_p11, %p75_p8 }
  0x85   :  { %v24_v4 = vpop.permute.xlu0 %23 }
  0x89   :  { %v26_v5 = vpop.permute.xlu0 %25 }
  0x8a   :  { %v30_v6 = vsel %vm29_vm0, %v24_v4, %v26_v5  ;;  %v31_v7 = vsel %vm29_vm0, %v26_v5, %v24_v4 }
  0x8b   :  { %32 = vst [vmem:[#allocation5] sm:$0xff] %v31_v7  ;;  %33 = vst [vmem:[#allocation5 + $0x8] sm:$0xff] %v30_v6 }
  0x8c   :  { %85 = shalt.err (!%p82_p12)
}
  0x8d   :  { %s86_s23 = scalar_lea.hbm %s138_s1, 256 }
  0x8e   :  { %p87_p13 = scmp.ne.s32.totalorder %s138_s1, %s86_s23  ;;  %p90_p0 = scmp.lt.u32.totalorder %s86_s23, %s138_s1 }
  0x90   :  { %p92_p1 = pnand %p90_p0, %p87_p13 }
  0x92   :  { %95 = shalt.err (!%p92_p1)
}
  0x93   :  { %43 = dma.vmem_to_hbm [thread:$0]  %s41_s20, 256, %s138_s1, [#allocation4]  }
  0x94   :  { %98 = dma.done.wait [#allocation4], 256  }
  0x95   :  { %99 = vsyncadd [#allocation4], 4294967040 }
  0x96   :  { %47 = vsyncpa [#allocation3], 1 }
  0x97   :  { %48 = vsyncpa [#allocation4], 1 }

// kernel: _cinst_forward.1
= control target key start
LH: loop header
LB: loop body
LE: loop exit
PB: predicated region body
PF: predicated region fallthrough
CT: control target
= control target key end

     0   :  { %s8675_s0 = inlined_call_operand.vmem [shape: f32[2,4,8,256], index: 0, kind: input, shape index: {}]   ;;  %s8676_s1 = inlined_call_operand.vmem [shape: f32[4,256], index: 1, kind: input, shape index: {}]   ;;  %s8677_s2 = inlined_call_operand.vmem [shape: f32[32,256], index: 2, kind: input, shape index: {}]   ;;  %s8678_s3 = inlined_call_operand.vmem [shape: f32[256,16], index: 3, kind: input, shape index: {}]   ;;  %s8679_s4 = inlined_call_operand.vmem [shape: f32[54], index: 4, kind: input, shape index: {}]   ;;  %s8680_s5 = inlined_call_operand.vmem [shape: f32[54], index: 5, kind: input, shape index: {}]   ;;  %s8681_s6 = inlined_call_operand.vmem [shape: f32[54], index: 6, kind: input, shape index: {}]   ;;  %s8682_s7 = inlined_call_operand.vmem [shape: f32[54], index: 7, kind: input, shape index: {}]   ;;  %s8683_s8 = inlined_call_operand.vmem [shape: f32[2,4,8,256], index: 8, kind: output, shape index: {}]  }
   0x1   :  { %8930 = sst [smem:[#allocation174_spill]] %s8675_s0 }
   0x2   :  { %8931 = sst [smem:[#allocation175_spill]] %s8676_s1 }
   0x3   :  { %8932 = sst [smem:[#allocation176_spill]] %s8677_s2 }
   0x4   :  { %8933 = sst [smem:[#allocation177_spill]] %s8678_s3 }
   0x5   :  { %8934 = sst [smem:[#allocation178_spill]] %s8679_s4 }
   0x6   :  { %8935 = sst [smem:[#allocation179_spill]] %s8680_s5 }
   0x7   :  { %8936 = sst [smem:[#allocation180_spill]] %s8681_s6 }
   0x8   :  { %8937 = sst [smem:[#allocation181_spill]] %s8682_s7 }
   0x9   :  { %8938 = sst [smem:[#allocation182_spill]] %s8683_s8 }
   0xa   :  { %13 = vsyncpa [#allocation3], 0 }
   0xb   :  { %14 = vsyncpa [#allocation5], 0 }
   0xc   :  { %15 = vsyncpa [#allocation8], 0  ;;  %s4992_s27 = smov 0  }
   0xd LB: > { %8939 = sst [smem:[#allocation12_spill]] %s4930_s27  ;;  %s8940_s5 = sld [smem:[#allocation179_spill]]  ;;  %s4930_s27 = sphi %s4992_s27, %s21_s27  }
   0xe   : > { %s5001_s9 = sadd.s32 4294967295, %s4930_s27   ;;  %p4326_p0 = scmp.ge.s32.totalorder %s4930_s27, 1 }
   0xf   : > { %p225_p1 = scmp.lt.s32.totalorder %s4930_s27, 3  ;;  %p4705_p2 = scmp.eq.s32.totalorder %s5001_s9, 0 }
  0x10   : > { %s8942_s4 = sld [smem:[#allocation178_spill]]  ;;  %s8943_s6 = sld [smem:[#allocation180_spill]] }
  0x11   : > { %p5006_p3 = pnand %p4326_p0, %p225_p1  ;;  %s8945_s7 = sld [smem:[#allocation181_spill]] }
  0x13   : > { %s258_s30 = sshll.u32 %s8940_s5, 4  ;;  %p4692_p4 = pneg %p5006_p3  ;;  %s259_s30 = int_to_ptr.vmem [resolvable:$true] %s258_s30 }
  0x14   : > { %s4852_s21 = scalar_lea.vmem %s259_s30, 16  ;;  %p4860_p10 = scmp.lt.s32.totalorder %s259_s30, %s259_s30 }
  0x15   : > { %p5024_p5 = pnand %p4705_p2, %p4692_p4  ;;  %p4853_p6 = scmp.ne.s32.totalorder %s259_s30, %s4852_s21 }
  0x16   : > { %s247_s13 = sshll.u32 %s8942_s4, 4  ;;  %s269_s16 = sshll.u32 %s8943_s6, 4  ;;  %s5013_s13 = int_to_ptr.vmem [resolvable:$true] %s247_s13  ;;  %s5020_s16 = int_to_ptr.vmem [resolvable:$true] %s269_s16 }
  0x17   : > { %s280_s20 = sshll.u32 %s8945_s7, 4  ;;  %p4854_p7 = pneg %p5024_p5  ;;  %s5031_s20 = int_to_ptr.vmem [resolvable:$true] %s280_s20 }
  0x18   : > { %p4861_p11 = scmp.lt.s32.totalorder %s4852_s21, %s4852_s21 }
  0x19   : > { %p4855_p8 = pnand %p4854_p7, %p4853_p6 }
  0x1a   : > { %p4862_p12 = por %p4861_p11, %p4860_p10 }
  0x1b   : > { %p4856_p9 = pneg %p4855_p8 }
  0x1d   : > { %p4863_p13 = pnand %p4862_p12, %p4856_p9 }
  0x1f   : > { %4866 = shalt.err (!%p4863_p13)
}
  0x20   : > { %s4932_s22 = smov [#allocation4]   ;;  %s4867_s23 = scalar_lea.vmem %s5013_s13, 16 }
  0x21   : > { %4698 = dma.vmem_to_smem (!%p5024_p5), %s259_s30, 16, %s4932_s22, [#allocation5]  }
  0x22   : > { %p4868_p0 = scmp.ne.s32.totalorder %s5013_s13, %s4867_s23  ;;  %p4875_p6 = scmp.lt.s32.totalorder %s5013_s13, %s5013_s13 }
  0x23   : > { %p4876_p8 = scmp.lt.s32.totalorder %s4867_s23, %s4867_s23 }
  0x24   : > { %p4870_p1 = pnand %p4868_p0, %p4854_p7 }
  0x25   : > { %p4877_p10 = por %p4876_p8, %p4875_p6 }
  0x26   : > { %p4871_p4 = pneg %p4870_p1 }
  0x28   : > { %p4878_p9 = pnand %p4877_p10, %p4871_p4 }
  0x2a   : > { %4881 = shalt.err (!%p4878_p9)
}
  0x2b   : > { %s4933_s24 = smov [#allocation2]   ;;  %s4882_s25 = scalar_lea.vmem %s5020_s16, 16 }
  0x2c   : > { %4695 = dma.vmem_to_smem (!%p5024_p5), %s5013_s13, 16, %s4933_s24, [#allocation3]  }
  0x2d   : > { %p4883_p11 = scmp.ne.s32.totalorder %s5020_s16, %s4882_s25  ;;  %p4890_p0 = scmp.lt.s32.totalorder %s5020_s16, %s5020_s16 }
  0x2e   : > { %p4891_p1 = scmp.lt.s32.totalorder %s4882_s25, %s4882_s25 }
  0x2f   : > { %p4885_p12 = pnand %p4883_p11, %p4854_p7 }
  0x30   : > { %p4892_p4 = por %p4891_p1, %p4890_p0 }
  0x31   : > { %p4886_p13 = pneg %p4885_p12 }
  0x33   : > { %p4893_p6 = pnand %p4892_p4, %p4886_p13 }
  0x35   : > { %4896 = shalt.err (!%p4893_p6)
}
  0x36   : > { %s4934_s26 = smov [#allocation6]   ;;  %s4897_s28 = scalar_lea.vmem %s5031_s20, 16 }
  0x37   : > { %4701 = dma.vmem_to_smem (!%p5024_p5), %s5020_s16, 16, %s4934_s26, [#allocation5]  }
  0x38   : > { %p4898_p8 = scmp.ne.s32.totalorder %s5031_s20, %s4897_s28  ;;  %p4905_p11 = scmp.lt.s32.totalorder %s5031_s20, %s5031_s20 }
  0x39   : > { %p4906_p12 = scmp.lt.s32.totalorder %s4897_s28, %s4897_s28 }
  0x3a   : > { %p4900_p10 = pnand %p4898_p8, %p4854_p7 }
  0x3b   : > { %p4907_p13 = por %p4906_p12, %p4905_p11 }
  0x3c   : > { %p4901_p9 = pneg %p4900_p10 }
  0x3e   : > { %p4908_p0 = pnand %p4907_p13, %p4901_p9 }
  0x40   : > { %4911 = shalt.err (!%p4908_p0)
}
  0x41   : > { %s4935_s29 = smov [#allocation7]   ;;  %301 = sbr.rel (%p5006_p3) target bundleno = 1694 (0x69e), region = 52 }
  0x42   : > { %4704 = dma.vmem_to_smem (!%p5024_p5), %s5031_s20, 16, %s4935_s29, [#allocation8]  }
  0x48   : > { %4917 = dma.done.wait (%p4705_p2), [#allocation3], 16  }
  0x49   : > { %4919 = vsyncadd (%p4705_p2), [#allocation3], 4294967280 }
  0x4a   : > { %4921 = dma.done.wait (%p4705_p2), [#allocation5], 32  }
  0x4b   : > { %4923 = vsyncadd (%p4705_p2), [#allocation5], 4294967264 }
  0x4c   : > { %4925 = dma.done.wait (%p4705_p2), [#allocation8], 16  }
  0x4d   : > { %4927 = vsyncadd (%p4705_p2), [#allocation8], 4294967280 }
  0x4e   : > { %319 = sfence }
  0x4f   : > { %p348_p3 = scmp.lt.s32.totalorder %s5001_s9, 1  ;;  %s5085_s30 = sld [smem:[#allocation2]]  ;;  %vm649_vm0 = vcmask 1040384   ;;  %vm656_vm1 = vcmask 1046528   ;;  %vm708_vm2 = vcmask 130048   ;;  %vm790_vm3 = vcmask 916480  }
  0x50   : > { %s5087_s10 = sld [smem:[#allocation2 + $0x9]]  ;;  %s5089_s11 = sld [smem:[#allocation2 + $0x12]]  ;;  %vm818_vm4 = vcmask 7168   ;;  %vm1072_vm5 = vcmask 1039360   ;;  %vm2266_vm6 = vcmask 982016   ;;  %vm2327_vm7 = vcmask 1014784  }
  0x51   : > { %s9332_s9 = smov (!%p348_p3, %s5001_s9), 1  ;;  %s5094_s12 = sld [smem:[#allocation2 + $0x1b]]  ;;  %vm2432_vm8 = vcmask 1031168   ;;  %vm1221_vm9 = vcmask 1042434   ;;  %vm1233_vm10 = vcmask 1041409   ;;  %vm1223_vm11 = vcmask 1043459  }
  0x52   : > { %8946 = sst [smem:[#allocation13_spill]] %s9332_s9  ;;  %s5096_s13 = sld [smem:[#allocation2 + $0x24]]  ;;  %vm1240_vm12 = vcmask 1042432   ;;  %vm3340_vm13 = vcmask 121856   ;;  %vm4027_vm14 = vcmask 261120  }
  0x53   : > { %s8695_s14 = sshll.u32 %s9332_s9, 6  ;;  %s5099_s15 = sld [smem:[#allocation2 + $0x2d]] }
  0x54   : > { %s8947_s0 = sld [smem:[#allocation174_spill]]  ;;  %s5117_s19 = sld [smem:[#allocation2 + $0x6]] }
  0x55   : > { %v673_v13 = vstv %s5085_s30  ;;  %s5159_s20 = sld [smem:[#allocation2 + $0xf]]  ;;  %s5165_s21 = sld [smem:[#allocation2 + $0x18]] }
  0x56   : > { %v676_v14 = vstv %s5087_s10  ;;  %v681_v19 = vstv %s5089_s11  ;;  %s5172_s22 = sld [smem:[#allocation2 + $0x21]]  ;;  %s5182_s23 = sld [smem:[#allocation2 + $0x2a]] }
  0x57   : > { %v686_v20 = vstv %s5094_s12  ;;  %s5199_s24 = sld [smem:[#allocation2 + $0x33]]  ;;  %s5212_s25 = sld [smem:[#allocation2 + $0x2]] }
  0x58   : > { %v691_v21 = vstv %s5096_s13  ;;  %s5214_s26 = sld [smem:[#allocation2 + $0xb]]  ;;  %s5221_s28 = sld [smem:[#allocation2 + $0x14]] }
  0x59   : > { %v696_v22 = vstv %s5099_s15  ;;  %s5229_s29 = sld [smem:[#allocation2 + $0x1d]]  ;;  %s5234_s30 = sld [smem:[#allocation2 + $0x26]] }
  0x5a   : > { %s5106_s18 = scalar_lea.vmem %s8947_s0, %s8695_s14  ;;  %v756_v28 = vstv %s5117_s19  ;;  %s5240_s10 = sld [smem:[#allocation2 + $0x2f]] }
  0x5b   : > { %8948 = sst [smem:[#allocation14_spill]] %s5106_s18  ;;  %v5109_v0 = vld [vmem:[%s5106_s18 + $0x8] sm:$0xff]  ;;  %v5112_v1 = vld [vmem:[%s5106_s18 + $0x10] sm:$0xff]  ;;  %v5115_v2 = vld [vmem:[%s5106_s18 + $0x18] sm:$0xff]  ;;  %v759_v59 = vstv %s5159_s20  ;;  %s5251_s11 = sld [smem:[#allocation2 + $0x8]] }
  0x5c   : > { %v5120_v3 = vld [vmem:[%s5106_s18 + $0x20] sm:$0xff]  ;;  %v5123_v4 = vld [vmem:[%s5106_s18 + $0x28] sm:$0xff]  ;;  %v5126_v5 = vld [vmem:[%s5106_s18 + $0x30] sm:$0xff]  ;;  %v638_v6 = vadd.f32 %v5115_v2, %v5109_v0  ;;  %v764_v60 = vstv %s5165_s21  ;;  %s5253_s12 = sld [smem:[#allocation2 + $0x11]]  ;;  %s8698_s13 = smov 16  }
  0x5d   : > { %v5131_v7 = vld [vmem:[%s5106_s18 + $0x38] sm:$0xff]  ;;  %v630_v8 = vmax.f32 %v5112_v1, %v5126_v5  ;;  %v632_v9 = vmax.f32 %v5109_v0, %v5123_v4  ;;  %v5138_v10 = vld [vmem:[%s5106_s18] sm:$0xff]  ;;  %s5259_s16 = sld [smem:[#allocation2 + $0x1a]]  ;;  %s5263_s17 = sld [smem:[#allocation2 + $0x23]] }
  0x5e   : > { %v633_v11 = vmax.f32 %v5115_v2, %v5131_v7  ;;  %v639_v12 = vadd.f32 %v638_v6, %v5123_v4  ;;  %v629_v15 = vmax.f32 %v5138_v10, %v5120_v3  ;;  %v635_v16 = vadd.f32 %v5112_v1, %v5138_v10  ;;  %s5265_s19 = sld [smem:[#allocation2 + $0x2c]]  ;;  %s5273_s20 = sld [smem:[#allocation2 + $0x35]] }
  0x5f   : > { %s5280_s15 = sld [smem:[#allocation2 + $0x1]]  ;;  %s8696_s21 = smov 112  }
  0x60   : > { %v5149_v17 = vmax.f32 %v632_v9, %v633_v11  ;;  %v640_v18 = vadd.f32 %v639_v12, %v5131_v7  ;;  %v5156_v23 = vmax.f32 %v629_v15, %v630_v8  ;;  %v636_v24 = vadd.f32 %v635_v16, %v5120_v3  ;;  %s8952_s1 = sld [smem:[#allocation175_spill]]  ;;  %s8961_s3 = sld [smem:[#allocation177_spill]] }
  0x61   : > { %v769_v11 = vstv %s5172_s22  ;;  %v774_v12 = vstv %s5182_s23  ;;  %s5285_s22 = sld [smem:[#allocation2 + $0xa]]  ;;  %s5287_s23 = sld [smem:[#allocation2 + $0x13]] }
  0x62   : > { %v5161_v25 = vmul.f32 0.25, %v640_v18  ;;  %v646_v26 = vrot.slane %v5149_v17, 7  ;;  %v653_v27 = vrot.slane %v5149_v17, 1  ;;  %v678_v29 = vmul.f32 %v676_v14, %v5149_v17  ;;  %s6353_s14 = sld [smem:[#allocation7 + $0x2]]  ;;  %s6381_s0 = sld [smem:[#allocation7 + $0x3]] }
  0x63   : > { %v637_v30 = vadd.f32 %v636_v24, %v5126_v5  ;;  %v645_v31 = vrot.slane %v5156_v23, 7  ;;  %v652_v32 = vrot.slane %v5156_v23, 1  ;;  %v677_v40 = vmul.f32 %v676_v14, %v5156_v23  ;;  %s6401_s4 = sld [smem:[#allocation7 + $0x1a]]  ;;  %s6403_s5 = sld [smem:[#allocation7 + $0x6]] }
  0x64   : > { %v5175_v33 = vsel %vm649_vm0, 0.0, %v646_v26  ;;  %v5178_v34 = vsel %vm656_vm1, %v653_v27, 0.0  ;;  %v662_v35 = vrot.slane %v5161_v25, 7  ;;  %v668_v36 = vrot.slane %v5161_v25, 1  ;;  %s6411_s6 = sld [smem:[#allocation7 + $0x1d]]  ;;  %s6413_s7 = sld [smem:[#allocation7 + $0x20]] }
  0x65   : > { %v675_v37 = vmul.f32 %v673_v13, %v5175_v33  ;;  %v683_v38 = vmul.f32 %v681_v19, %v5178_v34  ;;  %v5186_v39 = vmul.f32 0.25, %v637_v30  ;;  %v693_v43 = vmul.f32 %v691_v21, %v5161_v25  ;;  %s6419_s27 = sld [smem:[#allocation7 + $0x9]]  ;;  %s6428_s8 = sld [smem:[#allocation7 + $0xc]] }
  0x66   : > { %v5190_v41 = vsel %vm649_vm0, 0.0, %v662_v35  ;;  %v5193_v42 = vsel %vm656_vm1, %v668_v36, 0.0  ;;  %v5197_v44 = vsel %vm649_vm0, 0.0, %v645_v31  ;;  %v5203_v47 = vsel %vm656_vm1, %v652_v32, 0.0  ;;  %s6430_s9 = sld [smem:[#allocation7 + $0xf]]  ;;  %s6441_s18 = sld [smem:[#allocation7 + $0x12]] }
  0x67   : > { %v680_v45 = vadd.f32 %v678_v29, %v675_v37  ;;  %v688_v46 = vmul.f32 %v686_v20, %v5190_v41  ;;  %v661_v48 = vrot.slane %v5186_v39, 7  ;;  %v698_v49 = vmul.f32 %v696_v22, %v5193_v42  ;;  %s6443_s2 = sld [smem:[#allocation7 + $0x15]] }
  0x68   : > { %v667_v50 = vrot.slane %v5186_v39, 1  ;;  %v674_v51 = vmul.f32 %v673_v13, %v5197_v44  ;;  %v682_v52 = vmul.f32 %v681_v19, %v5203_v47  ;;  %v692_v55 = vmul.f32 %v691_v21, %v5186_v39 }
  0x69   : > { %v685_v53 = vadd.f32 %v683_v38, %v680_v45  ;;  %v5217_v54 = vsel %vm649_vm0, 0.0, %v661_v48  ;;  %v757_v56 = vmul.f32 %v756_v28, %v5197_v44  ;;  %v758_v58 = vmul.f32 %v756_v28, %v5175_v33 }
  0x6a   : > { %v5224_v57 = vsel %vm656_vm1, %v667_v50, 0.0  ;;  %v687_v62 = vmul.f32 %v686_v20, %v5217_v54  ;;  %v760_v63 = vmul.f32 %v759_v59, %v5156_v23  ;;  %v761_v6 = vmul.f32 %v759_v59, %v5149_v17 }
  0x6b   : > { %v690_v61 = vadd.f32 %v688_v46, %v685_v53  ;;  %v765_v8 = vmul.f32 %v764_v60, %v5203_v47  ;;  %v766_v9 = vmul.f32 %v764_v60, %v5178_v34  ;;  %v770_v15 = vmul.f32 %v769_v11, %v5217_v54 }
  0x6c   : > { %v762_v14 = vadd.f32 %v760_v63, %v757_v56  ;;  %v771_v16 = vmul.f32 %v769_v11, %v5190_v41  ;;  %v775_v18 = vmul.f32 %v774_v12, %v5186_v39  ;;  %v776_v19 = vmul.f32 %v774_v12, %v5161_v25 }
  0x6d   : > { %v695_v13 = vadd.f32 %v693_v43, %v690_v61  ;;  %v779_v20 = vstv %s5199_s24  ;;  %v763_v21 = vadd.f32 %v761_v6, %v758_v58  ;;  %v679_v30 = vadd.f32 %v677_v40, %v674_v51  ;;  %s5294_s24 = sld [smem:[#allocation2 + $0x1c]]  ;;  %9009 = sst [smem:[#allocation66_spill]] %s6443_s2 }
  0x6e   : > { %v767_v26 = vadd.f32 %v765_v8, %v762_v14  ;;  %v780_v27 = vmul.f32 %v779_v20, %v5224_v57  ;;  %v781_v28 = vmul.f32 %v779_v20, %v5193_v42  ;;  %v952_v31 = vstv %s5212_s25  ;;  %s5296_s25 = sld [smem:[#allocation2 + $0x25]] }
  0x6f   : > { %v700_v24 = vadd.f32 %v698_v49, %v695_v13  ;;  %v768_v29 = vadd.f32 %v766_v9, %v763_v21  ;;  %v955_v32 = vstv %s5214_s26  ;;  %v953_v36 = vmul.f32 %v952_v31, %v5197_v44  ;;  %s5305_s26 = sld [smem:[#allocation2 + $0x2e]]  ;;  %s6475_s2 = sld [smem:[#allocation7 + $0x35]] }
  0x70   : > { %v772_v35 = vadd.f32 %v770_v15, %v767_v26  ;;  %v956_v37 = vmul.f32 %v955_v32, %v5156_v23  ;;  %v960_v38 = vstv %s5221_s28  ;;  %v684_v43 = vadd.f32 %v682_v52, %v679_v30  ;;  %s5319_s28 = sld [smem:[#allocation2 + $0x7]] }
  0x71   : > { %702 = vrot.lane.b32.xlu0 %v700_v24, %s8698_s13  ;;  %v773_v40 = vadd.f32 %v771_v16, %v768_v29  ;;  %v961_v45 = vmul.f32 %v960_v38, %v5203_v47  ;;  %v965_v46 = vstv %s5229_s29  ;;  %v970_v51 = vstv %s5234_s30  ;;  %s5323_s29 = sld [smem:[#allocation2 + $0x10]]  ;;  %s5325_s30 = sld [smem:[#allocation2 + $0x19]] }
  0x72   : > { %v777_v48 = vadd.f32 %v775_v18, %v772_v35  ;;  %v958_v49 = vadd.f32 %v956_v37, %v953_v36  ;;  %v966_v50 = vmul.f32 %v965_v46, %v5217_v54  ;;  %v697_v53 = vmul.f32 %v696_v22, %v5224_v57 }
  0x73   : > { %v778_v56 = vadd.f32 %v776_v19, %v773_v40  ;;  %v689_v58 = vadd.f32 %v687_v62, %v684_v43  ;;  %v975_v59 = vstv %s5240_s10  ;;  %v971_v61 = vmul.f32 %v970_v51, %v5186_v39  ;;  %s5334_s10 = sld [smem:[#allocation2 + $0x22]] }
  0x74   : > { %v782_v52 = vadd.f32 %v780_v27, %v777_v48  ;;  %v963_v60 = vadd.f32 %v961_v45, %v958_v49  ;;  %v954_v63 = vmul.f32 %v952_v31, %v5175_v33  ;;  %v976_v8 = vmul.f32 %v975_v59, %v5224_v57 }
  0x75   : > { %v694_v6 = vadd.f32 %v692_v55, %v689_v58  ;;  %v957_v9 = vmul.f32 %v955_v32, %v5149_v17  ;;  %v962_v22 = vmul.f32 %v960_v38, %v5178_v34  ;;  %v783_v62 = vadd.f32 %v781_v28, %v778_v56 }
  0x76   : > { %786 = vrot.lane.b32.xlu1 %v782_v52, %s8696_s21  ;;  %v968_v11 = vadd.f32 %v966_v50, %v963_v60  ;;  %v967_v12 = vmul.f32 %v965_v46, %v5190_v41  ;;  %v972_v13 = vmul.f32 %v970_v51, %v5161_v25  ;;  %v1023_v15 = vstv %s5251_s11  ;;  %s5336_s11 = sld [smem:[#allocation2 + $0x2b]] }
  0x77   : > { %v699_v55 = vadd.f32 %v697_v53, %v694_v6  ;;  %v959_v14 = vadd.f32 %v957_v9, %v954_v63  ;;  %v1026_v16 = vstv %s5253_s12  ;;  %v1025_v19 = vmul.f32 %v1023_v15, %v5175_v33  ;;  %s5340_s12 = sld [smem:[#allocation2 + $0x34]] }
  0x78   : > { %v973_v18 = vadd.f32 %v971_v61, %v968_v11  ;;  %v1028_v20 = vmul.f32 %v1026_v16, %v5149_v17  ;;  %v1031_v21 = vstv %s5259_s16  ;;  %v1036_v27 = vstv %s5263_s17  ;;  %s5347_s16 = sld [smem:[#allocation2 + $0x3]]  ;;  %s5353_s17 = sld [smem:[#allocation2 + $0xc]] }
  0x79   : > { %706 = vrot.lane.b32.xlu0 %v699_v55, %s8698_s13  ;;  %v964_v24 = vadd.f32 %v962_v22, %v959_v14  ;;  %v1033_v26 = vmul.f32 %v1031_v21, %v5178_v34  ;;  %v1041_v28 = vstv %s5265_s19  ;;  %v977_v30 = vmul.f32 %v975_v59, %v5193_v42  ;;  %s5355_s19 = sld [smem:[#allocation2 + $0x15]] }
  0x7a   : > { %788 = vrot.lane.b32.xlu1 %v783_v62, %s8696_s21  ;;  %v978_v29 = vadd.f32 %v976_v8, %v973_v18  ;;  %v1030_v31 = vadd.f32 %v1028_v20, %v1025_v19  ;;  %v1038_v32 = vmul.f32 %v1036_v27, %v5190_v41  ;;  %v1046_v36 = vstv %s5273_s20  ;;  %s5358_s20 = sld [smem:[#allocation2 + $0x1e]] }
  0x7b   : > { %v969_v35 = vadd.f32 %v967_v12, %v964_v24  ;;  %v1024_v37 = vmul.f32 %v1023_v15, %v5197_v44  ;;  %v1027_v38 = vmul.f32 %v1026_v16, %v5156_v23  ;;  %v1043_v43 = vmul.f32 %v1041_v28, %v5161_v25 }
  0x7c   : > { %v1035_v40 = vadd.f32 %v1033_v26, %v1030_v31  ;;  %v1048_v45 = vmul.f32 %v1046_v36, %v5193_v42  ;;  %v1032_v46 = vmul.f32 %v1031_v21, %v5203_v47  ;;  %v1037_v50 = vmul.f32 %v1036_v27, %v5217_v54 }
  0x7d   : > { %v974_v48 = vadd.f32 %v972_v13, %v969_v35  ;;  %v1029_v49 = vadd.f32 %v1027_v38, %v1024_v37  ;;  %v1042_v51 = vmul.f32 %v1041_v28, %v5186_v39  ;;  %v836_v56 = vstv %s5280_s15  ;;  %s5363_s15 = sld [smem:[#allocation2 + $0x27]] }
  0x7e   : > { %985 = vrot.lane.b32.xlu1 %v978_v29, %s8698_s13  ;;  %v1040_v53 = vadd.f32 %v1038_v32, %v1035_v40  ;;  %v839_v58 = vstv %s5285_s22  ;;  %v844_v59 = vstv %s5287_s23  ;;  %v837_v61 = vmul.f32 %v836_v56, %v5197_v44  ;;  %s5365_s22 = sld [smem:[#allocation2 + $0x30]]  ;;  %s5379_s23 = sld [smem:[#allocation2 + $0x5]] }
  0x7f   : > { %v979_v52 = vadd.f32 %v977_v30, %v974_v48  ;;  %v1034_v60 = vadd.f32 %v1032_v46, %v1029_v49  ;;  %v840_v63 = vmul.f32 %v839_v58, %v5156_v23  ;;  %v845_v8 = vmul.f32 %v844_v59, %v5203_v47 }
  0x80   : > { %v1045_v6 = vadd.f32 %v1043_v43, %v1040_v53  ;;  %v849_v9 = vstv %s5294_s24  ;;  %v854_v22 = vstv %s5296_s25  ;;  %v1047_v11 = vmul.f32 %v1046_v36, %v5224_v57  ;;  %s5381_s24 = sld [smem:[#allocation2 + $0xe]]  ;;  %s5385_s25 = sld [smem:[#allocation2 + $0x17]] }
  0x81   : > { %981 = vrot.lane.b32.xlu0 %v979_v52, %s8698_s13  ;;  %v1039_v62 = vadd.f32 %v1037_v50, %v1034_v60  ;;  %v842_v12 = vadd.f32 %v840_v63, %v837_v61  ;;  %v850_v13 = vmul.f32 %v849_v9, %v5217_v54  ;;  %v859_v14 = vstv %s5305_s26  ;;  %s5390_s26 = sld [smem:[#allocation2 + $0x20]] }
  0x82   : > { %v1050_v55 = vadd.f32 %v1048_v45, %v1045_v6  ;;  %v855_v18 = vmul.f32 %v854_v22, %v5186_v39  ;;  %v838_v19 = vmul.f32 %v836_v56, %v5175_v33  ;;  %v841_v20 = vmul.f32 %v839_v58, %v5149_v17 }
  0x83   : > { %v1044_v15 = vadd.f32 %v1042_v51, %v1039_v62  ;;  %v847_v16 = vadd.f32 %v845_v8, %v842_v12  ;;  %v846_v21 = vmul.f32 %v844_v59, %v5178_v34  ;;  %v860_v27 = vmul.f32 %v859_v14, %v5224_v57 }
  0x84   : > { %1055 = vrot.lane.b32.xlu1 %v1050_v55, %s8696_s21  ;;  %v843_v28 = vadd.f32 %v841_v20, %v838_v19  ;;  %v851_v29 = vmul.f32 %v849_v9, %v5190_v41  ;;  %v907_v31 = vstv %s5319_s28  ;;  %v910_v32 = vstv %s5323_s29  ;;  %s5392_s28 = sld [smem:[#allocation2 + $0x29]]  ;;  %s5401_s29 = sld [smem:[#allocation2 + $0x32]] }
  0x85   : > { %v1049_v24 = vadd.f32 %v1047_v11, %v1044_v15  ;;  %v852_v26 = vadd.f32 %v850_v13, %v847_v16  ;;  %v915_v35 = vstv %s5325_s30  ;;  %v856_v37 = vmul.f32 %v854_v22, %v5161_v25  ;;  %s5410_s30 = sld [smem:[#allocation2 + $0x4]] }
  0x86   : > { %v848_v36 = vadd.f32 %v846_v21, %v843_v28  ;;  %v861_v40 = vmul.f32 %v859_v14, %v5193_v42  ;;  %v909_v43 = vmul.f32 %v907_v31, %v5175_v33  ;;  %v912_v45 = vmul.f32 %v910_v32, %v5149_v17 }
  0x87   : > { %1053 = vrot.lane.b32.xlu0 %v1049_v24, %s8696_s21  ;;  %v857_v30 = vadd.f32 %v855_v18, %v852_v26  ;;  %v917_v48 = vmul.f32 %v915_v35, %v5178_v34  ;;  %v920_v49 = vstv %s5334_s10  ;;  %v925_v50 = vstv %s5336_s11  ;;  %s5416_s10 = sld [smem:[#allocation2 + $0xd]]  ;;  %s5420_s11 = sld [smem:[#allocation2 + $0x16]] }
  0x88   : > { %v853_v46 = vadd.f32 %v851_v29, %v848_v36  ;;  %v914_v51 = vadd.f32 %v912_v45, %v909_v43  ;;  %v922_v53 = vmul.f32 %v920_v49, %v5190_v41  ;;  %v930_v56 = vstv %s5340_s12  ;;  %s5425_s12 = sld [smem:[#allocation2 + $0x1f]] }
  0x89   : > { %v862_v38 = vadd.f32 %v860_v27, %v857_v30  ;;  %v927_v59 = vmul.f32 %v925_v50, %v5161_v25  ;;  %v908_v52 = vmul.f32 %v907_v31, %v5197_v44  ;;  %v911_v60 = vmul.f32 %v910_v32, %v5156_v23 }
  0x8a   : > { %v858_v58 = vadd.f32 %v856_v37, %v853_v46  ;;  %v919_v61 = vadd.f32 %v917_v48, %v914_v51  ;;  %v932_v63 = vmul.f32 %v930_v56, %v5193_v42  ;;  %v916_v6 = vmul.f32 %v915_v35, %v5203_v47 }
  0x8b   : > { %869 = vrot.lane.b32.xlu1 %v862_v38, %s8698_s13  ;;  %v921_v8 = vmul.f32 %v920_v49, %v5217_v54  ;;  %v913_v22 = vadd.f32 %v911_v60, %v908_v52  ;;  %v926_v62 = vmul.f32 %v925_v50, %v5186_v39  ;;  %v726_v11 = vstv %s5347_s16  ;;  %s5427_s16 = sld [smem:[#allocation2 + $0x28]] }
  0x8c   : > { %v863_v9 = vadd.f32 %v861_v40, %v858_v58  ;;  %v924_v12 = vadd.f32 %v922_v53, %v919_v61  ;;  %v727_v13 = vmul.f32 %v726_v11, %v5197_v44  ;;  %v729_v55 = vstv %s5353_s17  ;;  %s5439_s17 = sld [smem:[#allocation2 + $0x31]] }
  0x8d   : > { %v734_v14 = vstv %s5355_s19  ;;  %v918_v15 = vadd.f32 %v916_v6, %v913_v22  ;;  %v730_v16 = vmul.f32 %v729_v55, %v5156_v23  ;;  %v739_v19 = vstv %s5358_s20  ;;  %s6146_s19 = sld [smem:[#allocation4 + $0x6]]  ;;  %s6148_s20 = sld [smem:[#allocation4 + $0xb]] }
  0x8e   : > { %865 = vrot.lane.b32.xlu0 %v863_v9, %s8698_s13  ;;  %v735_v18 = vmul.f32 %v734_v14, %v5203_v47  ;;  %v929_v20 = vadd.f32 %v927_v59, %v924_v12  ;;  %v931_v21 = vmul.f32 %v930_v56, %v5224_v57  ;;  %v744_v24 = vstv %s5363_s15  ;;  %s6160_s15 = sld [smem:[#allocation4 + $0x2a]]  ;;  %s6362_s13 = sld [smem:[#allocation7 + $0xb]] }
  0x8f   : > { %v749_v26 = vstv %s5365_s22  ;;  %v923_v27 = vadd.f32 %v921_v8, %v918_v15  ;;  %v732_v28 = vadd.f32 %v730_v16, %v727_v13  ;;  %v740_v29 = vmul.f32 %v739_v19, %v5217_v54  ;;  %s6189_s22 = sld [smem:[#allocation4 + $0x18]] }
  0x90   : > { %v745_v30 = vmul.f32 %v744_v24, %v5186_v39  ;;  %v934_v31 = vadd.f32 %v932_v63, %v929_v20  ;;  %v728_v32 = vmul.f32 %v726_v11, %v5175_v33  ;;  %v731_v35 = vmul.f32 %v729_v55, %v5149_v17 }
  0x91   : > { %v736_v36 = vmul.f32 %v734_v14, %v5178_v34  ;;  %v928_v37 = vadd.f32 %v926_v62, %v923_v27  ;;  %v737_v38 = vadd.f32 %v735_v18, %v732_v28  ;;  %v750_v40 = vmul.f32 %v749_v26, %v5224_v57 }
  0x92   : > { %v741_v43 = vmul.f32 %v739_v19, %v5190_v41  ;;  %939 = vrot.lane.b32.xlu1 %v934_v31, %s8696_s21  ;;  %v733_v45 = vadd.f32 %v731_v35, %v728_v32  ;;  %v746_v46 = vmul.f32 %v744_v24, %v5161_v25  ;;  %v993_v48 = vstv %s5379_s23  ;;  %s8705_s23 = smov 1  }
  0x93   : > { %v996_v49 = vstv %s5381_s24  ;;  %v933_v50 = vadd.f32 %v931_v21, %v928_v37  ;;  %v742_v51 = vadd.f32 %v740_v29, %v737_v38  ;;  %v995_v53 = vmul.f32 %v993_v48, %v5175_v33  ;;  %s8707_s24 = smov 127  }
  0x94   : > { %v998_v56 = vmul.f32 %v996_v49, %v5149_v17  ;;  %v738_v58 = vadd.f32 %v736_v36, %v733_v45  ;;  %v1001_v59 = vstv %s5385_s25  ;;  %v1006_v52 = vstv %s5390_s26  ;;  %s4943_s26 = smov 64   ;;  %s6225_s25 = sld [smem:[#allocation4 + $0x21]] }
  0x95   : > { %v1011_v60 = vstv %s5392_s28  ;;  %937 = vrot.lane.b32.xlu0 %v933_v50, %s8696_s21  ;;  %v747_v61 = vadd.f32 %v745_v30, %v742_v51  ;;  %v1003_v6 = vmul.f32 %v1001_v59, %v5178_v34  ;;  %v1008_v8 = vmul.f32 %v1006_v52, %v5190_v41  ;;  %s4944_s28 = smov 96  }
  0x96   : > { %v1000_v63 = vadd.f32 %v998_v56, %v995_v53  ;;  %v743_v9 = vadd.f32 %v741_v43, %v738_v58  ;;  %v751_v22 = vmul.f32 %v749_v26, %v5193_v42  ;;  %v1016_v62 = vstv %s5401_s29  ;;  %s6032_s29 = sld [smem:[#allocation4 + $0x9]] }
  0x97   : > { %v994_v11 = vmul.f32 %v993_v48, %v5197_v44  ;;  %v5435_v12 = vadd.f32 %v750_v40, %v747_v61  ;;  %v1013_v55 = vmul.f32 %v1011_v60, %v5161_v25  ;;  %v997_v14 = vmul.f32 %v996_v49, %v5156_v23 }
  0x98   : > { %v1005_v13 = vadd.f32 %v1003_v6, %v1000_v63  ;;  %v748_v15 = vadd.f32 %v746_v46, %v743_v9  ;;  %v1018_v16 = vmul.f32 %v1016_v62, %v5193_v42  ;;  %v1002_v18 = vmul.f32 %v1001_v59, %v5203_v47 }
  0x99   : > { %v1007_v19 = vmul.f32 %v1006_v52, %v5217_v54  ;;  %v999_v21 = vadd.f32 %v997_v14, %v994_v11  ;;  %v1012_v24 = vmul.f32 %v1011_v60, %v5186_v39  ;;  %v877_v26 = vstv %s5410_s30  ;;  %s4940_s30 = smov 120  }
  0x9a   : > { %v1010_v20 = vadd.f32 %v1008_v8, %v1005_v13  ;;  %v753_v27 = vadd.f32 %v751_v22, %v748_v15  ;;  %v878_v28 = vmul.f32 %v877_v26, %v5197_v44  ;;  %v879_v29 = vmul.f32 %v877_v26, %v5175_v33 }
  0x9b   : > { %v880_v30 = vstv %s5416_s10  ;;  %v1004_v32 = vadd.f32 %v1002_v18, %v999_v21  ;;  %v1017_v37 = vmul.f32 %v1016_v62, %v5224_v57  ;;  %v885_v38 = vstv %s5420_s11  ;;  %v4342_v62 = vld [vmem:[%s8952_s1 + $0x2] ss:$4 sm:$0x3]  ;;  %s4941_s10 = smov 124   ;;  %s4942_s11 = smov 126  }
  0x9c   : > { %v1015_v31 = vadd.f32 %v1013_v55, %v1010_v20  ;;  %v881_v35 = vmul.f32 %v880_v30, %v5156_v23  ;;  %v882_v36 = vmul.f32 %v880_v30, %v5149_v17  ;;  %v890_v40 = vstv %s5425_s12  ;;  %s6073_s12 = sld [smem:[#allocation4 + $0x12]] }
  0x9d   : > { %v895_v43 = vstv %s5427_s16  ;;  %v1009_v46 = vadd.f32 %v1007_v19, %v1004_v32  ;;  %v886_v33 = vmul.f32 %v885_v38, %v5203_v47  ;;  %v887_v49 = vmul.f32 %v885_v38, %v5178_v34  ;;  %s6075_s16 = sld [smem:[#allocation4 + $0x1b]] }
  0x9e   : > { %v5455_v45 = vadd.f32 %v1018_v16, %v1015_v31  ;;  %v883_v48 = vadd.f32 %v881_v35, %v878_v28  ;;  %v884_v44 = vadd.f32 %v882_v36, %v879_v29  ;;  %v891_v50 = vmul.f32 %v890_v40, %v5217_v54 }
  0x9f   : > { %v892_v23 = vmul.f32 %v890_v40, %v5190_v41  ;;  %v1014_v51 = vadd.f32 %v1012_v24, %v1009_v46  ;;  %v900_v17 = vstv %s5439_s17  ;;  %v896_v58 = vmul.f32 %v895_v43, %v5186_v39  ;;  %s6125_s17 = sld [smem:[#allocation4 + $0x2d]] }
  0xa0   : > { %v888_v53 = vadd.f32 %v886_v33, %v883_v48  ;;  %v889_v56 = vadd.f32 %v887_v49, %v884_v44  ;;  %v897_v59 = vmul.f32 %v895_v43, %v5161_v25  ;;  %v901_v63 = vmul.f32 %v900_v17, %v5224_v57 }
  0xa1   : > { %v1019_v52 = vadd.f32 %v1017_v37, %v1014_v51  ;;  %v902_v47 = vmul.f32 %v900_v17, %v5193_v42  ;;  %v714_v8 = vlaneseq  ;;  %v4343_v42 = vld [vmem:[%s8952_s1 + $0x3] ss:$4 sm:$0x3] }
  0xa2   : > { %v893_v60 = vadd.f32 %v891_v50, %v888_v53  ;;  %v894_v61 = vadd.f32 %v892_v23, %v889_v56 }
  0xa3   : > { %v5470_v9 = vshrl.u32 %v714_v8, 7 }
  0xa4   : > { %v898_v34 = vadd.f32 %v896_v58, %v893_v60  ;;  %v899_v6 = vadd.f32 %v897_v59, %v894_v61 }
  0xa5   : > { %8949 = vst [vmem:[#allocation15_spill] sm:$0xff] %v5470_v9  ;;  %v5473_v39 = vsub.s32 0, %v5470_v9  ;;  %v5476_v25 = vsub.s32 1, %v5470_v9  ;;  %v8991_v9 = vstv %s6146_s19 }
  0xa6   : > { %v5466_v54 = vadd.f32 %v901_v63, %v898_v34  ;;  %v5468_v41 = vadd.f32 %v902_v47, %v899_v6 }
  0xa7   : > { %8950 = vst [vmem:[#allocation16_spill] sm:$0xff] %v5473_v39  ;;  %8951 = vst [vmem:[#allocation17_spill] sm:$0xff] %v5476_v25  ;;  %v5485_v11 = vrot.slane %v4343_v42, %v5473_v39  ;;  %v5488_v13 = vrot.slane %v4343_v42, %v5476_v25  ;;  %v5491_v55 = vrot.slane %v4342_v62, %v5473_v39 }
  0xa8   : > { %v5494_v14 = vrot.slane %v4342_v62, %v5476_v25 }
  0xa9   : > { %8953 = vst [vmem:[#allocation18_spill] sm:$0xff] %v5485_v11  ;;  %8954 = vst [vmem:[#allocation19_spill] sm:$0xff] %v5488_v13 }
  0xaa   : > { %8955 = vst [vmem:[#allocation20_spill] sm:$0xff] %v5491_v55  ;;  %8956 = vst [vmem:[#allocation21_spill] sm:$0xff] %v5494_v14 }
  0xe3   : > { %v703_v22 = vpop.permute.xlu0 %702 }
  0xe8   : > { %v787_v57 = vpop.permute.xlu1 %786 }
  0xeb   : > { %v707_v15 = vpop.permute.xlu0 %706 }
  0xec   : > { %v789_v16 = vpop.permute.xlu1 %788  ;;  %v709_v18 = vsel %vm708_vm2, %v707_v15, %v703_v22  ;;  %v712_v19 = vsel %vm708_vm2, %v703_v22, %v707_v15  ;;  %v358_v15 = vld [vmem:[%s8952_s1] ss:$4 sm:$0x3] }
  0xed   : > { %v791_v20 = vsel %vm790_vm3, %v787_v57, %v789_v16  ;;  %v795_v21 = vsel %vm790_vm3, %v789_v16, %v787_v57  ;;  %v724_v24 = vmul.f32 %v5485_v11, %v712_v19  ;;  %v725_v26 = vmul.f32 %v5488_v13, %v709_v18 }
  0xee   : > { %v807_v28 = vmul.f32 %v5491_v55, %v791_v20  ;;  %v808_v29 = vmul.f32 %v5494_v14, %v795_v21 }
  0xef   : > { %v754_v30 = vadd.f32 %v5435_v12, %v724_v24  ;;  %v755_v31 = vadd.f32 %v753_v27, %v725_v26  ;;  %v5545_v26 = vrot.slane %v358_v15, %v5473_v39 }
  0xf0   : > { %v986_v32 = vpop.permute.xlu1 %985 }
  0xf1   : > { %v809_v35 = vadd.f32 %v807_v28, %v754_v30  ;;  %v810_v36 = vadd.f32 %v808_v29, %v755_v31  ;;  %8959 = vst [vmem:[#allocation24_spill] sm:$0xff] %v5545_v26  ;;  %v5548_v28 = vrot.slane %v358_v15, %v5476_v25 }
  0xf3   : > { %v982_v37 = vpop.permute.xlu0 %981  ;;  %816 = vrot.lane.b32.xlu1 %v809_v35, %s8705_s23  ;;  %812 = vrot.lane.b32.xlu0 %v810_v36, %s8705_s23  ;;  %8960 = vst [vmem:[#allocation25_spill] sm:$0xff] %v5548_v28  ;;  %s6369_s23 = sld [smem:[#allocation7 + $0xe]] }
  0xf4   : > { %v987_v38 = vsel %vm708_vm2, %v986_v32, %v982_v37  ;;  %v990_v40 = vsel %vm708_vm2, %v982_v37, %v986_v32 }
  0xf5   : > { %v991_v43 = vmul.f32 %v990_v40, %v5485_v11  ;;  %v992_v46 = vmul.f32 %v987_v38, %v5488_v13 }
  0xf6   : > { %v1056_v48 = vpop.permute.xlu1 %1055 }
  0xf7   : > { %v1022_v50 = vadd.f32 %v5455_v45, %v992_v46  ;;  %v1021_v23 = vadd.f32 %v1019_v52, %v991_v43  ;;  %v4341_v45 = vld [vmem:[%s8952_s1 + $0x1] ss:$4 sm:$0x3]  ;;  %s6390_s1 = sld [smem:[#allocation7 + $0x14]] }
  0xf8   : > { %v5528_v22 = vrot.slane %v4341_v45, %v5473_v39  ;;  %v5531_v42 = vrot.slane %v4341_v45, %v5476_v25 }
  0xf9   : > { %v1054_v12 = vpop.permute.xlu0 %1053 }
  0xfa   : > { %v1057_v27 = vsel %vm790_vm3, %v1054_v12, %v1056_v48  ;;  %v1061_v44 = vsel %vm790_vm3, %v1056_v48, %v1054_v12  ;;  %8957 = vst [vmem:[#allocation22_spill] sm:$0xff] %v5528_v22  ;;  %8958 = vst [vmem:[#allocation23_spill] sm:$0xff] %v5531_v42 }
  0xfb   : > { %v1062_v33 = vmul.f32 %v1057_v27, %v5491_v55  ;;  %v1063_v49 = vmul.f32 %v1061_v44, %v5494_v14 }
  0xfd   : > { %v1065_v51 = vadd.f32 %v1063_v49, %v1022_v50  ;;  %v1064_v17 = vadd.f32 %v1062_v33, %v1021_v23  ;;  %v870_v53 = vpop.permute.xlu1 %869 }
  0xff   : > { %1070 = vrot.lane.b32.xlu1 %v1065_v51, %s8707_s24  ;;  %1068 = vrot.lane.b32.xlu0 %v1064_v17, %s8707_s24 }
 0x100   : > { %v866_v56 = vpop.permute.xlu0 %865 }
 0x101   : > { %v871_v60 = vsel %vm708_vm2, %v870_v53, %v866_v56  ;;  %v874_v61 = vsel %vm708_vm2, %v866_v56, %v870_v53 }
 0x102   : > { %v875_v52 = vmul.f32 %v874_v61, %v5485_v11  ;;  %v876_v63 = vmul.f32 %v871_v60, %v5488_v13  ;;  %v6586_v13 = vstv %s6413_s7  ;;  %v6599_v11 = vstv %s6390_s1  ;;  %s6612_s7 = sld [smem:[#allocation6 + $0x11]]  ;;  %s6626_s1 = sld [smem:[#allocation6 + $0x14]] }
 0x104   : > { %v940_v58 = vpop.permute.xlu1 %939  ;;  %v905_v16 = vadd.f32 %v5466_v54, %v875_v52  ;;  %v906_v18 = vadd.f32 %v5468_v41, %v876_v63 }
 0x107   : > { %v938_v59 = vpop.permute.xlu0 %937 }
 0x108   : > { %v941_v6 = vsel %vm790_vm3, %v938_v59, %v940_v58  ;;  %v945_v8 = vsel %vm790_vm3, %v940_v58, %v938_v59 }
 0x109   : > { %v946_v19 = vmul.f32 %v941_v6, %v5491_v55  ;;  %v947_v20 = vmul.f32 %v945_v8, %v5494_v14  ;;  %v6583_v55 = vstv %s6369_s23  ;;  %s9038_s23 = sld [smem:[#allocation66_spill]] }
 0x10a   : > { %9036 = vst [vmem:[#allocation90_spill] sm:$0xff] %v6583_v55 }
 0x10b   : > { %v948_v29 = vadd.f32 %v946_v19, %v905_v16  ;;  %v949_v30 = vadd.f32 %v947_v20, %v906_v18 }
 0x165   : > { %v817_v47 = vpop.permute.xlu1 %816  ;;  %v813_v34 = vpop.permute.xlu0 %812 }
 0x166   : > { %v819_v57 = vsel %vm818_vm4, %v817_v47, %v813_v34  ;;  %v822_v62 = vsel %vm818_vm4, %v813_v34, %v817_v47 }
 0x167   : > { %v834_v21 = vmul.f32 %v5528_v22, %v822_v62  ;;  %v835_v24 = vmul.f32 %v5531_v42, %v819_v57 }
 0x169   : > { %v950_v35 = vadd.f32 %v948_v29, %v834_v21  ;;  %v951_v36 = vadd.f32 %v949_v30, %v835_v24 }
 0x171   : > { %v1071_v54 = vpop.permute.xlu1 %1070  ;;  %v1069_v31 = vpop.permute.xlu0 %1068 }
 0x172   : > { %v1073_v41 = vsel %vm1072_vm5, %v1069_v31, %v1071_v54  ;;  %v1077_v32 = vsel %vm1072_vm5, %v1071_v54, %v1069_v31 }
 0x173   : > { %v1089_v37 = vmul.f32 %v5545_v26, %v1073_v41  ;;  %v1090_v38 = vmul.f32 %v5548_v28, %v1077_v32 }
 0x175   : > { %v1091_v40 = vadd.f32 %v1089_v37, %v950_v35  ;;  %v1092_v43 = vadd.f32 %v1090_v38, %v951_v36 }
 0x177   : > { %v1093_v46 = vsub.f32 0.0, %v1091_v40  ;;  %v1094_v48 = vsub.f32 0.0, %v1092_v43 }
 0x179   : > { %v1095_v12 = vmul.f32 1.442695, %v1093_v46  ;;  %v1097_v27 = vmul.f32 1.442695, %v1094_v48 }
 0x17b   : > { %4796 = vpow2.f32 %v1095_v12 }
 0x17c   : > { %4798 = vpow2.f32 %v1097_v27 }
 0x185   : > { %v4797_v44 = vpop.eup %4796 }
 0x186   : > { %v4799_v33 = vpop.eup %4798  ;;  %v1099_v49 = vadd.f32 1.0, %v4797_v44 }
 0x187   : > { %v1100_v50 = vadd.f32 1.0, %v4799_v33 }
 0x188   : > { %4800 = vrcp.f32 %v1099_v49 }
 0x189   : > { %4802 = vrcp.f32 %v1100_v50 }
 0x192   : > { %v4801_v23 = vpop.eup %4800 }
 0x193   : > { %v4803_v51 = vpop.eup %4802  ;;  %v5555_v17 = vmul.f32 %v4801_v23, %v5138_v10  ;;  %v5563_v56 = vmul.f32 %v4801_v23, %v5112_v1  ;;  %v5571_v10 = vmul.f32 %v4801_v23, %v5120_v3  ;;  %v5579_v1 = vmul.f32 %v4801_v23, %v5126_v5 }
 0x194   : > { %v5558_v53 = vmul.f32 %v4803_v51, %v5109_v0  ;;  %v5566_v58 = vmul.f32 %v4803_v51, %v5115_v2  ;;  %v5574_v0 = vmul.f32 %v4803_v51, %v5123_v4  ;;  %v5582_v2 = vmul.f32 %v4803_v51, %v5131_v7 }
 0x195   : > { %2250 = vrot.lane.b32.xlu0 %v5555_v17, %s4940_s30 }
 0x196   : > { %2252 = vrot.lane.b32.xlu1 %v5558_v53, %s4940_s30 }
 0x199   : > { %2254 = vrot.lane.b32.xlu0 %v5563_v56, %s4940_s30 }
 0x19a   : > { %2256 = vrot.lane.b32.xlu1 %v5566_v58, %s4940_s30 }
 0x19d   : > { %2258 = vrot.lane.b32.xlu0 %v5571_v10, %s4940_s30 }
 0x19e   : > { %2260 = vrot.lane.b32.xlu1 %v5574_v0, %s4940_s30 }
 0x1a1   : > { %2262 = vrot.lane.b32.xlu0 %v5579_v1, %s4940_s30 }
 0x1a2   : > { %2264 = vrot.lane.b32.xlu1 %v5582_v2, %s4940_s30  ;;  %s6053_s30 = sld [smem:[#allocation4]] }
 0x207   : > { %v2251_v3 = vpop.permute.xlu0 %2250 }
 0x208   : > { %v2253_v59 = vpop.permute.xlu1 %2252 }
 0x209   : > { %v2267_v4 = vsel %vm2266_vm6, %v2251_v3, %v2253_v59  ;;  %v2283_v60 = vsel %vm2266_vm6, %v2253_v59, %v2251_v3 }
 0x20a   : > { %v2287_v61 = vmax.f32 %v5555_v17, %v2267_v4  ;;  %v2288_v45 = vmax.f32 %v5558_v53, %v2283_v60  ;;  %v2295_v41 = vadd.f32 %v2267_v4, %v5555_v17  ;;  %v2296_v36 = vadd.f32 %v2283_v60, %v5558_v53 }
 0x20b   : > { %v2255_v5 = vpop.permute.xlu0 %2254 }
 0x20c   : > { %v2257_v52 = vpop.permute.xlu1 %2256  ;;  %v4736_v63 = vpack.i.bf16 %v2288_v45, %v2287_v61 }
 0x20d   : > { %v2268_v7 = vsel %vm2266_vm6, %v2255_v5, %v2257_v52  ;;  %v2284_v47 = vsel %vm2266_vm6, %v2257_v52, %v2255_v5 }
 0x20e   : > { %v2289_v34 = vmax.f32 %v5563_v56, %v2268_v7  ;;  %v2290_v6 = vmax.f32 %v5566_v58, %v2284_v47  ;;  %4737 = vrot.lane.b32.xlu0 %v4736_v63, %s4941_s10  ;;  %v2297_v35 = vadd.f32 %v2268_v7, %v5563_v56  ;;  %v5616_v38 = vadd.f32 %v2284_v47, %v5566_v58 }
 0x20f   : > { %v2259_v8 = vpop.permute.xlu0 %2258 }
 0x210   : > { %v2261_v57 = vpop.permute.xlu1 %2260  ;;  %v4741_v62 = vpack.i.bf16 %v2290_v6, %v2289_v34 }
 0x211   : > { %v2269_v15 = vsel %vm2266_vm6, %v2259_v8, %v2261_v57  ;;  %v2285_v16 = vsel %vm2266_vm6, %v2261_v57, %v2259_v8 }
 0x212   : > { %v2291_v18 = vmax.f32 %v5571_v10, %v2269_v15  ;;  %v2292_v19 = vmax.f32 %v5574_v0, %v2285_v16  ;;  %4742 = vrot.lane.b32.xlu1 %v4741_v62, %s4941_s10  ;;  %v5613_v37 = vadd.f32 %v2269_v15, %v5571_v10  ;;  %v5626_v43 = vadd.f32 %v2285_v16, %v5574_v0 }
 0x213   : > { %v2263_v20 = vpop.permute.xlu0 %2262 }
 0x214   : > { %v2265_v21 = vpop.permute.xlu1 %2264  ;;  %v4746_v24 = vpack.i.bf16 %v2292_v19, %v2291_v18 }
 0x215   : > { %v2270_v29 = vsel %vm2266_vm6, %v2263_v20, %v2265_v21  ;;  %v2286_v30 = vsel %vm2266_vm6, %v2265_v21, %v2263_v20 }
 0x216   : > { %v2293_v54 = vmax.f32 %v5579_v1, %v2270_v29  ;;  %v2294_v31 = vmax.f32 %v5582_v2, %v2286_v30  ;;  %4747 = vrot.lane.b32.xlu0 %v4746_v24, %s4941_s10  ;;  %v5623_v40 = vadd.f32 %v2270_v29, %v5579_v1  ;;  %v5633_v46 = vadd.f32 %v2286_v30, %v5582_v2 }
 0x218   : > { %v4751_v32 = vpack.i.bf16 %v2294_v31, %v2293_v54 }
 0x21a   : > { %2364 = vrot.lane.b32.xlu0 %v2295_v41, %s4941_s10  ;;  %4752 = vrot.lane.b32.xlu1 %v4751_v32, %s4941_s10 }
 0x21e   : > { %2368 = vrot.lane.b32.xlu0 %v2297_v35, %s4941_s10  ;;  %2366 = vrot.lane.b32.xlu1 %v2296_v36, %s4941_s10 }
 0x222   : > { %2372 = vrot.lane.b32.xlu0 %v5613_v37, %s4941_s10  ;;  %2370 = vrot.lane.b32.xlu1 %v5616_v38, %s4941_s10 }
 0x226   : > { %2376 = vrot.lane.b32.xlu0 %v5623_v40, %s4941_s10  ;;  %2374 = vrot.lane.b32.xlu1 %v5626_v43, %s4941_s10 }
 0x22a   : > { %2378 = vrot.lane.b32.xlu1 %v5633_v46, %s4941_s10  ;;  %s6058_s10 = sld [smem:[#allocation4 + $0xf]] }
 0x280   : > { %v4738_v48 = vpop.permute.xlu0 %4737 }
 0x281   : > { %v4740_v12 = vunpack.i.h.bf16 %v4738_v48  ;;  %v4739_v27 = vunpack.i.l.bf16 %v4738_v48 }
 0x283   : > { %v2328_v44 = vsel %vm2327_vm7, %v4739_v27, %v4740_v12  ;;  %v2344_v33 = vsel %vm2327_vm7, %v4740_v12, %v4739_v27 }
 0x284   : > { %v4743_v49 = vpop.permute.xlu1 %4742  ;;  %v5639_v50 = vmax.f32 %v2287_v61, %v2328_v44  ;;  %v5641_v23 = vmax.f32 %v2288_v45, %v2344_v33 }
 0x285   : > { %v4745_v51 = vunpack.i.h.bf16 %v4743_v49  ;;  %v4744_v3 = vunpack.i.l.bf16 %v4743_v49 }
 0x286   : > { %v4756_v59 = vpack.i.bf16 %v5641_v23, %v5639_v50 }
 0x287   : > { %v2329_v4 = vsel %vm2327_vm7, %v4744_v3, %v4745_v51  ;;  %v2345_v60 = vsel %vm2327_vm7, %v4745_v51, %v4744_v3 }
 0x288   : > { %v4748_v5 = vpop.permute.xlu0 %4747  ;;  %4757 = vrot.lane.b32.xlu0 %v4756_v59, %s4942_s11  ;;  %v5648_v52 = vmax.f32 %v2289_v34, %v2329_v4  ;;  %v5650_v63 = vmax.f32 %v2290_v6, %v2345_v60 }
 0x289   : > { %v4750_v61 = vunpack.i.h.bf16 %v4748_v5  ;;  %v4749_v45 = vunpack.i.l.bf16 %v4748_v5 }
 0x28a   : > { %v4761_v7 = vpack.i.bf16 %v5650_v63, %v5648_v52 }
 0x28b   : > { %v2330_v47 = vsel %vm2327_vm7, %v4749_v45, %v4750_v61  ;;  %v2346_v8 = vsel %vm2327_vm7, %v4750_v61, %v4749_v45 }
 0x28c   : > { %4762 = vrot.lane.b32.xlu1 %v4761_v7, %s4942_s11  ;;  %v4753_v57 = vpop.permute.xlu1 %4752  ;;  %v2365_v62 = vpop.permute.xlu0 %2364  ;;  %v5657_v15 = vmax.f32 %v2291_v18, %v2330_v47  ;;  %v5659_v16 = vmax.f32 %v2292_v19, %v2346_v8  ;;  %v373_v7 = vld [vmem:[%s8961_s3] sm:$0xff]  ;;  %v391_v8 = vld [vmem:[%s8961_s3 + $0x90] sm:$0xff] }
 0x28d   : > { %v4755_v34 = vunpack.i.h.bf16 %v4753_v57  ;;  %v4754_v6 = vunpack.i.l.bf16 %v4753_v57  ;;  %v392_v57 = vld [vmem:[%s8961_s3 + $0x98] sm:$0xff] }
 0x28e   : > { %v4766_v20 = vpack.i.bf16 %v5659_v16, %v5657_v15 }
 0x28f   : > { %v2331_v21 = vsel %vm2327_vm7, %v4754_v6, %v4755_v34  ;;  %v2347_v24 = vsel %vm2327_vm7, %v4755_v34, %v4754_v6  ;;  %v4624_v34 = vpack.c.bf16 %v392_v57, %v391_v8  ;;  %v375_v6 = vld [vmem:[%s8961_s3 + $0x10] sm:$0xff]  ;;  %v384_v8 = vld [vmem:[%s8961_s3 + $0x58] sm:$0xff]  ;;  %v401_v57 = vld [vmem:[%s8961_s3 + $0xe0] sm:$0xff] }
 0x290   : > { %v2367_v29 = vpop.permute.xlu1 %2366  ;;  %v2369_v30 = vpop.permute.xlu0 %2368  ;;  %4767 = vrot.lane.b32.xlu0 %v4766_v20, %s4942_s11  ;;  %v5666_v32 = vmax.f32 %v2293_v54, %v2331_v21  ;;  %v5668_v48 = vmax.f32 %v2294_v31, %v2347_v24  ;;  %v376_v20 = vld [vmem:[%s8961_s3 + $0x18] sm:$0xff]  ;;  %v393_v21 = vld [vmem:[%s8961_s3 + $0xa0] sm:$0xff]  ;;  %v394_v24 = vld [vmem:[%s8961_s3 + $0xa8] sm:$0xff] }
 0x291   : > { %v2380_v18 = vsel %vm2327_vm7, %v2365_v62, %v2367_v29  ;;  %v2396_v27 = vsel %vm2327_vm7, %v2367_v29, %v2365_v62  ;;  %v4626_v29 = vpack.c.bf16 %v376_v20, %v375_v6  ;;  %v385_v20 = vld [vmem:[%s8961_s3 + $0x60] sm:$0xff] }
 0x292   : > { %v4771_v19 = vpack.i.bf16 %v5668_v48, %v5666_v32  ;;  %v5673_v12 = vadd.f32 %v2380_v18, %v2295_v41  ;;  %v5682_v49 = vadd.f32 %v2396_v27, %v2296_v36  ;;  %v377_v18 = vld [vmem:[%s8961_s3 + $0x20] sm:$0xff]  ;;  %v395_v27 = vld [vmem:[%s8961_s3 + $0xb0] sm:$0xff] }
 0x294   : > { %v2371_v44 = vpop.permute.xlu1 %2370  ;;  %4772 = vrot.lane.b32.xlu1 %v4771_v19, %s4942_s11  ;;  %2469 = vrot.lane.b32.xlu0 %v5673_v12, %s4942_s11  ;;  %v2373_v31 = vpop.permute.xlu0 %2372  ;;  %v378_v19 = vld [vmem:[%s8961_s3 + $0x28] sm:$0xff] }
 0x295   : > { %v2381_v54 = vsel %vm2327_vm7, %v2369_v30, %v2371_v44  ;;  %v2397_v51 = vsel %vm2327_vm7, %v2371_v44, %v2369_v30  ;;  %v4628_v30 = vpack.c.bf16 %v394_v24, %v393_v21  ;;  %v396_v44 = vld [vmem:[%s8961_s3 + $0xb8] sm:$0xff]  ;;  %v386_v21 = vld [vmem:[%s8961_s3 + $0x68] sm:$0xff] }
 0x296   : > { %v5680_v33 = vadd.f32 %v2381_v54, %v2297_v35  ;;  %v5691_v59 = vadd.f32 %v2397_v51, %v5616_v38  ;;  %v4630_v54 = vpack.c.bf16 %v378_v19, %v377_v18  ;;  %v379_v51 = vld [vmem:[%s8961_s3 + $0x30] sm:$0xff]  ;;  %v4646_v24 = vpack.c.bf16 %v386_v21, %v385_v20 }
 0x297   : > { %v387_v18 = vld [vmem:[%s8961_s3 + $0x70] sm:$0xff] }
 0x298   : > { %v2375_v3 = vpop.permute.xlu1 %2374  ;;  %2471 = vrot.lane.b32.xlu1 %v5682_v49, %s4942_s11  ;;  %2473 = vrot.lane.b32.xlu0 %v5680_v33, %s4942_s11  ;;  %v2377_v4 = vpop.permute.xlu0 %2376 }
 0x299   : > { %v2382_v41 = vsel %vm2327_vm7, %v2373_v31, %v2375_v3  ;;  %v2398_v36 = vsel %vm2327_vm7, %v2375_v3, %v2373_v31  ;;  %v4632_v31 = vpack.c.bf16 %v396_v44, %v395_v27  ;;  %v380_v3 = vld [vmem:[%s8961_s3 + $0x38] sm:$0xff] }
 0x29a   : > { %v5694_v35 = vadd.f32 %v2382_v41, %v5613_v37  ;;  %v5703_v61 = vadd.f32 %v2398_v36, %v5626_v43  ;;  %v389_v43 = vld [vmem:[%s8961_s3 + $0x80] sm:$0xff]  ;;  %v398_v36 = vld [vmem:[%s8961_s3 + $0xc8] sm:$0xff]  ;;  %v388_v27 = vld [vmem:[%s8961_s3 + $0x78] sm:$0xff] }
 0x29b   : > { %v397_v41 = vld [vmem:[%s8961_s3 + $0xc0] sm:$0xff]  ;;  %v4650_v44 = vpack.c.bf16 %v388_v27, %v387_v18 }
 0x29c   : > { %v2379_v60 = vpop.permute.xlu1 %2378  ;;  %2475 = vrot.lane.b32.xlu1 %v5691_v59, %s4942_s11  ;;  %2477 = vrot.lane.b32.xlu0 %v5694_v35, %s4942_s11 }
 0x29d   : > { %v2383_v5 = vsel %vm2327_vm7, %v2377_v4, %v2379_v60  ;;  %v2399_v37 = vsel %vm2327_vm7, %v2379_v60, %v2377_v4  ;;  %v4634_v4 = vpack.c.bf16 %v380_v3, %v379_v51  ;;  %v4636_v60 = vpack.c.bf16 %v398_v36, %v397_v41 }
 0x29e   : > { %v5706_v38 = vadd.f32 %v2383_v5, %v5623_v40  ;;  %v5714_v45 = vadd.f32 %v2399_v37, %v5633_v46  ;;  %v390_v40 = vld [vmem:[%s8961_s3 + $0x88] sm:$0xff]  ;;  %v381_v5 = vld [vmem:[%s8961_s3 + $0x40] sm:$0xff] }
 0x29f   : > { %v4620_v47 = vpack.c.bf16 %v390_v40, %v389_v43  ;;  %v374_v46 = vld [vmem:[%s8961_s3 + $0x8] sm:$0xff]  ;;  %v399_v43 = vld [vmem:[%s8961_s3 + $0xd0] sm:$0xff]  ;;  %v400_v40 = vld [vmem:[%s8961_s3 + $0xd8] sm:$0xff] }
 0x2a0   : > { %2479 = vrot.lane.b32.xlu1 %v5703_v61, %s4942_s11  ;;  %2481 = vrot.lane.b32.xlu0 %v5706_v38, %s4942_s11  ;;  %v4622_v62 = vpack.c.bf16 %v374_v46, %v373_v7  ;;  %v382_v37 = vld [vmem:[%s8961_s3 + $0x48] sm:$0xff]  ;;  %v383_v46 = vld [vmem:[%s8961_s3 + $0x50] sm:$0xff] }
 0x2a1   : > { %4621 = vmatprep.subr.bf16.mxu0 %v4620_v47  ;;  %4660 = vmatprep.subr.bf16.mxu1 %v4620_v47  ;;  %v4638_v7 = vpack.c.bf16 %v382_v37, %v381_v5  ;;  %v4640_v47 = vpack.c.bf16 %v400_v40, %v399_v43 }
 0x2a2   : > { %4623 = vmatpush3.bf16.msra.mxu0 %v4622_v62  ;;  %4668 = vmatpush3.bf16.msra.mxu1 %v4622_v62  ;;  %v402_v62 = vld [vmem:[%s8961_s3 + $0xe8] sm:$0xff] }
 0x2a3   : > { %4625 = vmatprep.subr.bf16.mxu0 %v4624_v34  ;;  %4661 = vmatprep.subr.bf16.mxu1 %v4624_v34  ;;  %v4642_v34 = vpack.c.bf16 %v384_v8, %v383_v46  ;;  %v4644_v6 = vpack.c.bf16 %v402_v62, %v401_v57 }
 0x2a4   : > { %2483 = vrot.lane.b32.xlu1 %v5714_v45, %s4942_s11  ;;  %s6066_s11 = sld [smem:[#allocation4 + $0x24]] }
 0x2a6   : > { %4627 = vmatpush3.bf16.msra.mxu0 %v4626_v29  ;;  %4669 = vmatpush3.bf16.msra.mxu1 %v4626_v29  ;;  %v403_v29 = vld [vmem:[%s8961_s3 + $0xf0] sm:$0xff] }
 0x2a7   : > { %4629 = vmatprep.subr.bf16.mxu0 %v4628_v30  ;;  %4662 = vmatprep.subr.bf16.mxu1 %v4628_v30  ;;  %v404_v30 = vld [vmem:[%s8961_s3 + $0xf8] sm:$0xff]  ;;  %s6392_s3 = sld [smem:[#allocation7 + $0x17]] }
 0x2a8   : > { %v4648_v19 = vpack.c.bf16 %v404_v30, %v403_v29 }
 0x2aa   : > { %4631 = vmatpush3.bf16.msra.mxu0 %v4630_v54  ;;  %4670 = vmatpush3.bf16.msra.mxu1 %v4630_v54 }
 0x2ab   : > { %4633 = vmatprep.subr.bf16.mxu0 %v4632_v31  ;;  %4663 = vmatprep.subr.bf16.mxu1 %v4632_v31 }
 0x2ae   : > { %4635 = vmatpush3.bf16.msra.mxu0 %v4634_v4  ;;  %4671 = vmatpush3.bf16.msra.mxu1 %v4634_v4 }
 0x2af   : > { %4637 = vmatprep.subr.bf16.mxu0 %v4636_v60  ;;  %4664 = vmatprep.subr.bf16.mxu1 %v4636_v60 }
 0x2b2   : > { %4639 = vmatpush3.bf16.msra.mxu0 %v4638_v7  ;;  %4672 = vmatpush3.bf16.msra.mxu1 %v4638_v7 }
 0x2b3   : > { %4641 = vmatprep.subr.bf16.mxu0 %v4640_v47  ;;  %4665 = vmatprep.subr.bf16.mxu1 %v4640_v47 }
 0x2b6   : > { %4643 = vmatpush3.bf16.msra.mxu0 %v4642_v34  ;;  %4673 = vmatpush3.bf16.msra.mxu1 %v4642_v34 }
 0x2b7   : > { %4645 = vmatprep.subr.bf16.mxu0 %v4644_v6  ;;  %4666 = vmatprep.subr.bf16.mxu1 %v4644_v6 }
 0x2ba   : > { %4647 = vmatpush3.bf16.msra.mxu0 %v4646_v24  ;;  %4674 = vmatpush3.bf16.msra.mxu1 %v4646_v24 }
 0x2bb   : > { %4649 = vmatprep.subr.bf16.mxu0 %v4648_v19  ;;  %4667 = vmatprep.subr.bf16.mxu1 %v4648_v19 }
 0x2be   : > { %4651 = vmatpush3.bf16.msra.mxu0 %v4650_v44  ;;  %4675 = vmatpush3.bf16.msra.mxu1 %v4650_v44 }
 0x2fa   : > { %v4758_v54 = vpop.permute.xlu0 %4757 }
 0x2fb   : > { %v4760_v31 = vunpack.i.h.bf16 %v4758_v54  ;;  %v4759_v51 = vunpack.i.l.bf16 %v4758_v54 }
 0x2fd   : > { %v2433_v3 = vsel %vm2432_vm8, %v4759_v51, %v4760_v31  ;;  %v2449_v41 = vsel %vm2432_vm8, %v4760_v31, %v4759_v51 }
 0x2fe   : > { %v4763_v36 = vpop.permute.xlu1 %4762  ;;  %v5817_v4 = vmax.f32 %v5639_v50, %v2433_v3  ;;  %v5820_v60 = vmax.f32 %v5641_v23, %v2449_v41 }
 0x2ff   : > { %v4765_v5 = vunpack.i.h.bf16 %v4763_v36  ;;  %v4764_v37 = vunpack.i.l.bf16 %v4763_v36 }
 0x300   : > { %v4776_v43 = vpack.i.bf16 %v5820_v60, %v5817_v4 }
 0x301   : > { %v2434_v40 = vsel %vm2432_vm8, %v4764_v37, %v4765_v5  ;;  %v2450_v7 = vsel %vm2432_vm8, %v4765_v5, %v4764_v37 }
 0x302   : > { %v4768_v47 = vpop.permute.xlu0 %4767  ;;  %4777 = vrot.lane.b32.xlu0 %v4776_v43, %s8707_s24  ;;  %v5828_v46 = vmax.f32 %v5648_v52, %v2434_v40  ;;  %v5831_v50 = vmax.f32 %v5650_v63, %v2450_v7 }
 0x303   : > { %v4770_v23 = vunpack.i.h.bf16 %v4768_v47  ;;  %v4769_v8 = vunpack.i.l.bf16 %v4768_v47 }
 0x304   : > { %v4781_v57 = vpack.i.bf16 %v5831_v50, %v5828_v46 }
 0x305   : > { %v2435_v62 = vsel %vm2432_vm8, %v4769_v8, %v4770_v23  ;;  %v2451_v34 = vsel %vm2432_vm8, %v4770_v23, %v4769_v8 }
 0x306   : > { %v4773_v6 = vpop.permute.xlu1 %4772  ;;  %4782 = vrot.lane.b32.xlu1 %v4781_v57, %s8707_s24  ;;  %v2470_v20 = vpop.permute.xlu0 %2469  ;;  %v5839_v21 = vmax.f32 %v5657_v15, %v2435_v62  ;;  %v5842_v52 = vmax.f32 %v5659_v16, %v2451_v34  ;;  %v5906_v57 = vmax.f32 %v5555_v17, %v5558_v53  ;;  %v5927_v62 = vadd.f32 %v5566_v58, %v5563_v56 }
 0x307   : > { %v4775_v63 = vunpack.i.h.bf16 %v4773_v6  ;;  %v4774_v24 = vunpack.i.l.bf16 %v4773_v6  ;;  %v5933_v34 = vmax.f32 %v5579_v1, %v5582_v2  ;;  %v5937_v6 = vadd.f32 %v5574_v0, %v5571_v10 }
 0x308   : > { %v4786_v29 = vpack.i.bf16 %v5842_v52, %v5839_v21 }
 0x309   : > { %v2436_v30 = vsel %vm2432_vm8, %v4774_v24, %v4775_v63  ;;  %v2452_v18 = vsel %vm2432_vm8, %v4775_v63, %v4774_v24 }
 0x30a   : > { %v2472_v19 = vpop.permute.xlu1 %2471  ;;  %v2474_v27 = vpop.permute.xlu0 %2473  ;;  %4787 = vrot.lane.b32.xlu0 %v4786_v29, %s8707_s24  ;;  %v5850_v44 = vmax.f32 %v5666_v32, %v2436_v30  ;;  %v5853_v15 = vmax.f32 %v5668_v48, %v2452_v18 }
 0x30b   : > { %v2485_v16 = vsel %vm2432_vm8, %v2470_v20, %v2472_v19  ;;  %v2501_v51 = vsel %vm2432_vm8, %v2472_v19, %v2470_v20  ;;  %v5943_v20 = vadd.f32 %v5582_v2, %v5579_v1 }
 0x30c   : > { %v5857_v54 = vadd.f32 %v2485_v16, %v5673_v12  ;;  %v4791_v31 = vpack.i.bf16 %v5853_v15, %v5850_v44  ;;  %v5867_v48 = vadd.f32 %v2501_v51, %v5682_v49 }
 0x30e   : > { %v2476_v3 = vpop.permute.xlu1 %2475  ;;  %4792 = vrot.lane.b32.xlu1 %v4791_v31, %s8707_s24  ;;  %2573 = vrot.lane.b32.xlu0 %v5857_v54, %s8707_s24  ;;  %v2478_v12 = vpop.permute.xlu0 %2477 }
 0x30f   : > { %v2486_v32 = vsel %vm2432_vm8, %v2474_v27, %v2476_v3  ;;  %v2502_v36 = vsel %vm2432_vm8, %v2476_v3, %v2474_v27 }
 0x310   : > { %v5870_v41 = vadd.f32 %v2486_v32, %v5680_v33  ;;  %v5879_v43 = vadd.f32 %v2502_v36, %v5691_v59 }
 0x312   : > { %v2480_v5 = vpop.permute.xlu1 %2479  ;;  %2575 = vrot.lane.b32.xlu1 %v5867_v48, %s8707_s24  ;;  %2577 = vrot.lane.b32.xlu0 %v5870_v41, %s8707_s24  ;;  %v2482_v40 = vpop.permute.xlu0 %2481 }
 0x313   : > { %v2487_v37 = vsel %vm2432_vm8, %v2478_v12, %v2480_v5  ;;  %v2503_v33 = vsel %vm2432_vm8, %v2480_v5, %v2478_v12 }
 0x314   : > { %v5882_v49 = vadd.f32 %v2487_v37, %v5694_v35  ;;  %v5891_v23 = vadd.f32 %v2503_v33, %v5703_v61  ;;  %v5913_v61 = vmax.f32 %v5563_v56, %v5566_v58 }
 0x316   : > { %v2484_v7 = vpop.permute.xlu1 %2483  ;;  %2579 = vrot.lane.b32.xlu1 %v5879_v43, %s8707_s24  ;;  %2581 = vrot.lane.b32.xlu0 %v5882_v49, %s8707_s24 }
 0x317   : > { %v2488_v47 = vsel %vm2432_vm8, %v2482_v40, %v2484_v7  ;;  %v2504_v35 = vsel %vm2432_vm8, %v2484_v7, %v2482_v40 }
 0x318   : > { %v5894_v59 = vadd.f32 %v2488_v47, %v5706_v38  ;;  %v5902_v8 = vadd.f32 %v2504_v35, %v5714_v45  ;;  %v5917_v38 = vadd.f32 %v5558_v53, %v5555_v17  ;;  %v5923_v45 = vmax.f32 %v5571_v10, %v5574_v0 }
 0x31a   : > { %2583 = vrot.lane.b32.xlu1 %v5891_v23, %s8707_s24  ;;  %2585 = vrot.lane.b32.xlu0 %v5894_v59, %s8707_s24 }
 0x31e   : > { %2587 = vrot.lane.b32.xlu1 %v5902_v8, %s8707_s24  ;;  %2057 = vrot.lane.b32.xlu0 %v5906_v57, %s4943_s26  ;;  %s6371_s24 = sld [smem:[#allocation7 + $0x11]] }
 0x322   : > { %2059 = vrot.lane.b32.xlu1 %v5913_v61, %s4943_s26  ;;  %2077 = vrot.lane.b32.xlu0 %v5917_v38, %s4943_s26 }
 0x326   : > { %2061 = vrot.lane.b32.xlu1 %v5923_v45, %s4943_s26  ;;  %2079 = vrot.lane.b32.xlu0 %v5927_v62, %s4943_s26 }
 0x32a   : > { %2063 = vrot.lane.b32.xlu1 %v5933_v34, %s4943_s26  ;;  %2081 = vrot.lane.b32.xlu0 %v5937_v6, %s4943_s26 }
 0x32e   : > { %2083 = vrot.lane.b32.xlu1 %v5943_v20, %s4943_s26  ;;  %s6234_s26 = sld [smem:[#allocation4 + $0x2]] }
 0x334   : > { %8989 = sst [smem:[#allocation53_spill]] %s6234_s26 }
 0x374   : > { %v4778_v63 = vpop.permute.xlu0 %4777 }
 0x375   : > { %v4780_v24 = vunpack.i.h.bf16 %v4778_v63  ;;  %v4779_v29 = vunpack.i.l.bf16 %v4778_v63 }
 0x377   : > { %v2553_v30 = vsel %vm1072_vm5, %v4780_v24, %v4779_v29  ;;  %v2537_v18 = vsel %vm1072_vm5, %v4779_v29, %v4780_v24 }
 0x378   : > { %v4783_v19 = vpop.permute.xlu1 %4782  ;;  %v2558_v27 = vmax.f32 %v5820_v60, %v2553_v30  ;;  %v2557_v16 = vmax.f32 %v5817_v4, %v2537_v18 }
 0x379   : > { %v4785_v31 = vunpack.i.h.bf16 %v4783_v19  ;;  %v4784_v51 = vunpack.i.l.bf16 %v4783_v19 }
 0x37a   : > { %2689 = vmatprep.mubr.f32.mxu0 %v2558_v27 }
 0x37b   : > { %2690 = vmatmul.mubr.f32.vlgmr.msra.gmra.mrb[0].mxu0 %v2557_v16  ;;  %v2554_v3 = vsel %vm1072_vm5, %v4785_v31, %v4784_v51  ;;  %v2538_v32 = vsel %vm1072_vm5, %v4784_v51, %v4785_v31 }
 0x37c   : > { %v4788_v12 = vpop.permute.xlu0 %4787  ;;  %v2560_v36 = vmax.f32 %v5831_v50, %v2554_v3  ;;  %v2559_v5 = vmax.f32 %v5828_v46, %v2538_v32 }
 0x37d   : > { %v4790_v37 = vunpack.i.h.bf16 %v4788_v12  ;;  %v4789_v33 = vunpack.i.l.bf16 %v4788_v12 }
 0x37e   : > { %2694 = vmatprep.mubr.f32.mxu0 %v2560_v36 }
 0x37f   : > { %2695 = vmatmul.mubr.f32.gmra.mrb[2].mxu0 %v2559_v5  ;;  %v2555_v60 = vsel %vm1072_vm5, %v4790_v37, %v4789_v33  ;;  %v2539_v4 = vsel %vm1072_vm5, %v4789_v33, %v4790_v37 }
 0x380   : > { %v4793_v40 = vpop.permute.xlu1 %4792  ;;  %v2574_v7 = vpop.permute.xlu0 %2573  ;;  %v2562_v47 = vmax.f32 %v5842_v52, %v2555_v60  ;;  %v2561_v35 = vmax.f32 %v5839_v21, %v2539_v4 }
 0x381   : > { %v4795_v63 = vunpack.i.h.bf16 %v4793_v40  ;;  %v4794_v24 = vunpack.i.l.bf16 %v4793_v40 }
 0x382   : > { %2699 = vmatprep.mubr.f32.mxu0 %v2562_v47 }
 0x383   : > { %2700 = vmatmul.mubr.f32.gmra.mrb[4].mxu0 %v2561_v35  ;;  %v2556_v46 = vsel %vm1072_vm5, %v4795_v63, %v4794_v24  ;;  %v2540_v50 = vsel %vm1072_vm5, %v4794_v24, %v4795_v63 }
 0x384   : > { %v2576_v29 = vpop.permute.xlu1 %2575  ;;  %v2578_v30 = vpop.permute.xlu0 %2577  ;;  %v2564_v18 = vmax.f32 %v5853_v15, %v2556_v46  ;;  %v2563_v19 = vmax.f32 %v5850_v44, %v2540_v50 }
 0x385   : > { %v2589_v27 = vsel %vm1072_vm5, %v2574_v7, %v2576_v29  ;;  %v2605_v52 = vsel %vm1072_vm5, %v2576_v29, %v2574_v7 }
 0x386   : > { %v2609_v21 = vadd.f32 %v2589_v27, %v5857_v54  ;;  %v2610_v16 = vadd.f32 %v2605_v52, %v5867_v48  ;;  %2704 = vmatprep.mubr.f32.mxu0 %v2564_v18 }
 0x387   : > { %2705 = vmatmul.mubr.f32.gmra.mrb[6].mxu0 %v2563_v19 }
 0x388   : > { %v2617_v31 = vmul.f32 0.0625, %v2609_v21  ;;  %v2618_v51 = vmul.f32 0.0625, %v2610_v16  ;;  %v2580_v3 = vpop.permute.xlu1 %2579  ;;  %v2582_v32 = vpop.permute.xlu0 %2581  ;;  %v1117_v16 = vrot.slane %v5558_v53, 4 }
 0x389   : > { %v2590_v12 = vsel %vm1072_vm5, %v2578_v30, %v2580_v3  ;;  %v2606_v15 = vsel %vm1072_vm5, %v2580_v3, %v2578_v30 }
 0x38a   : > { %v2611_v44 = vadd.f32 %v2590_v12, %v5870_v41  ;;  %v2612_v36 = vadd.f32 %v2606_v15, %v5879_v43  ;;  %2709 = vmatprep.mubr.f32.mxu0 %v2618_v51  ;;  %v1123_v51 = vrot.slane %v5563_v56, 4 }
 0x38b   : > { %2710 = vmatmul.mubr.f32.gmra.mrb[8].mxu0 %v2617_v31  ;;  %v1129_v31 = vrot.slane %v5566_v58, 4 }
 0x38c   : > { %v2619_v5 = vmul.f32 0.0625, %v2611_v44  ;;  %v2620_v54 = vmul.f32 0.0625, %v2612_v36  ;;  %v2584_v37 = vpop.permute.xlu1 %2583  ;;  %v2586_v48 = vpop.permute.xlu0 %2585  ;;  %v1124_v15 = vmax.f32 %v5563_v56, %v1123_v51  ;;  %v1118_v44 = vmax.f32 %v5558_v53, %v1117_v16 }
 0x38d   : > { %v2591_v33 = vsel %vm1072_vm5, %v2582_v32, %v2584_v37  ;;  %v2607_v60 = vsel %vm1072_vm5, %v2584_v37, %v2582_v32  ;;  %v1178_v3 = vadd.f32 %v1129_v31, %v5566_v58  ;;  %v1141_v32 = vrot.slane %v5574_v0, 4 }
 0x38e   : > { %v2613_v4 = vadd.f32 %v2591_v33, %v5882_v49  ;;  %2714 = vmatprep.mubr.f32.mxu0 %v2620_v54  ;;  %v2614_v40 = vadd.f32 %v2607_v60, %v5891_v23  ;;  %v1153_v54 = vrot.slane %v5582_v2, 4 }
 0x38f   : > { %2715 = vmatmul.mubr.f32.gmra.mrb[10].mxu0 %v2619_v5  ;;  %v1130_v5 = vmax.f32 %v5566_v58, %v1129_v31  ;;  %v1179_v37 = vrot.slane %v1178_v3, 2  ;;  %v1142_v33 = vmax.f32 %v5574_v0, %v1141_v32  ;;  %v1190_v60 = vadd.f32 %v1141_v32, %v5574_v0 }
 0x390   : > { %v2621_v7 = vmul.f32 0.0625, %v2613_v4  ;;  %v2588_v41 = vpop.permute.xlu1 %2587  ;;  %v2058_v47 = vpop.permute.xlu0 %2057  ;;  %v2622_v43 = vmul.f32 0.0625, %v2614_v40  ;;  %v1202_v58 = vadd.f32 %v1153_v54, %v5582_v2 }
 0x391   : > { %v2592_v35 = vsel %vm1072_vm5, %v2586_v48, %v2588_v41  ;;  %v2608_v63 = vsel %vm1072_vm5, %v2588_v41, %v2586_v48  ;;  %v5977_v24 = vmax.f32 %v5906_v57, %v2058_v47  ;;  %v1172_v48 = vadd.f32 %v1123_v51, %v5563_v56 }
 0x392   : > { %v2615_v46 = vadd.f32 %v2592_v35, %v5894_v59  ;;  %v2616_v50 = vadd.f32 %v2608_v63, %v5902_v8  ;;  %2719 = vmatprep.mubr.f32.mxu1 %v2622_v43  ;;  %v1119_v41 = vrot.slane %v1118_v44, 2  ;;  %v1154_v43 = vmax.f32 %v5582_v2, %v1153_v54 }
 0x393   : > { %2720 = vmatmul.mubr.f32.vlgmr.msra.gmra.mrb[0].mxu1 %v2621_v7  ;;  %2097 = vrot.lane.b32.xlu0 %v5977_v24, %s4944_s28  ;;  %v1125_v7 = vrot.slane %v1124_v15, 2  ;;  %v1180_v35 = vadd.f32 %v1179_v37, %v1178_v3  ;;  %v1173_v63 = vrot.slane %v1172_v48, 2  ;;  %v1191_v56 = vrot.slane %v1190_v60, 2 }
 0x394   : > { %v2623_v49 = vmul.f32 0.0625, %v2615_v46  ;;  %v2624_v23 = vmul.f32 0.0625, %v2616_v50  ;;  %v2060_v29 = vpop.permute.xlu1 %2059  ;;  %v2078_v30 = vpop.permute.xlu0 %2077  ;;  %v1143_v46 = vrot.slane %v1142_v33, 2 }
 0x395   : > { %v5983_v18 = vmax.f32 %v5913_v61, %v2060_v29  ;;  %v5986_v19 = vadd.f32 %v2078_v30, %v5917_v38  ;;  %v1120_v29 = vmax.f32 %v1118_v44, %v1119_v41  ;;  %v1174_v2 = vadd.f32 %v1173_v63, %v1172_v48 }
 0x396   : > { %2724 = vmatprep.mubr.f32.mxu1 %v2624_v23  ;;  %v1126_v23 = vmax.f32 %v1124_v15, %v1125_v7  ;;  %v1144_v31 = vmax.f32 %v1142_v33, %v1143_v46 }
 0x397   : > { %2099 = vrot.lane.b32.xlu1 %v5983_v18, %s4944_s28  ;;  %2725 = vmatmul.mubr.f32.gmra.mrb[2].mxu1 %v2623_v49  ;;  %v1175_v37 = vrot.slane %v1174_v2, 1 }
 0x398   : > { %2134 = vrot.lane.b32.xlu0 %v5986_v19, %s4944_s28  ;;  %v2062_v59 = vpop.permute.xlu1 %2061  ;;  %v2080_v8 = vpop.permute.xlu0 %2079  ;;  %v1127_v3 = vrot.slane %v1126_v23, 1 }
 0x399   : > { %v5991_v57 = vmax.f32 %v5923_v45, %v2062_v59  ;;  %v5994_v27 = vadd.f32 %v2080_v8, %v5927_v62  ;;  %v1147_v59 = vrot.slane %v5579_v1, 4 }
 0x39b   : > { %2101 = vrot.lane.b32.xlu1 %v5991_v57, %s4944_s28 }
 0x39c   : > { %2136 = vrot.lane.b32.xlu0 %v5994_v27, %s4944_s28  ;;  %v2064_v61 = vpop.permute.xlu1 %2063  ;;  %v2082_v38 = vpop.permute.xlu0 %2081 }
 0x39d   : > { %v5999_v52 = vmax.f32 %v5933_v34, %v2064_v61  ;;  %v6002_v21 = vadd.f32 %v2082_v38, %v5937_v6  ;;  %v1111_v34 = vrot.slane %v5555_v17, 4  ;;  %v1166_v6 = vadd.f32 %v1117_v16, %v5558_v53 }
 0x39e   : > { %v1131_v53 = vrot.slane %v1130_v5, 2  ;;  %v1155_v38 = vrot.slane %v1154_v43, 2  ;;  %v1181_v16 = vrot.slane %v1180_v35, 1 }
 0x39f   : > { %2103 = vrot.lane.b32.xlu1 %v5999_v52, %s4944_s28  ;;  %v1112_v12 = vmax.f32 %v5555_v17, %v1111_v34  ;;  %v1167_v36 = vrot.slane %v1166_v6, 2 }
 0x3a0   : > { %2138 = vrot.lane.b32.xlu0 %v6002_v21, %s4944_s28  ;;  %v2084_v45 = vpop.permute.xlu1 %2083  ;;  %v1132_v61 = vmax.f32 %v1130_v5, %v1131_v53  ;;  %v1182_v54 = vadd.f32 %v1181_v16, %v1180_v35 }
 0x3a1   : > { %v6007_v62 = vadd.f32 %v2084_v45, %v5943_v20  ;;  %v1160_v20 = vadd.f32 %v1111_v34, %v5555_v17  ;;  %v1113_v4 = vrot.slane %v1112_v12, 2  ;;  %v1135_v17 = vrot.slane %v5571_v10, 4 }
 0x3a2   : > { %v1168_v47 = vadd.f32 %v1167_v36, %v1166_v6  ;;  %v1203_v45 = vrot.slane %v1202_v58, 2  ;;  %v1192_v34 = vadd.f32 %v1191_v56, %v1190_v60  ;;  %v1133_v44 = vrot.slane %v1132_v61, 1 }
 0x3a3   : > { %2140 = vrot.lane.b32.xlu1 %v6007_v62, %s4944_s28  ;;  %v1161_v40 = vrot.slane %v1160_v20, 2  ;;  %v1114_v50 = vmax.f32 %v1112_v12, %v1113_v4  ;;  %v1184_v0 = vadd.f32 %v1135_v17, %v5571_v10  ;;  %v1136_v30 = vmax.f32 %v5571_v10, %v1135_v17  ;;  %s6271_s28 = sld [smem:[#allocation4 + $0x26]] }
 0x3a4   : > { %v1169_v8 = vrot.slane %v1168_v47, 1  ;;  %v1121_v12 = vrot.slane %v1120_v29, 1  ;;  %v1148_v10 = vmax.f32 %v5579_v1, %v1147_v59  ;;  %v1156_v36 = vmax.f32 %v1154_v43, %v1155_v38 }
 0x3a5   : > { %v1162_v49 = vadd.f32 %v1161_v40, %v1160_v20  ;;  %v1115_v51 = vrot.slane %v1114_v50, 1  ;;  %v1185_v32 = vrot.slane %v1184_v0, 2  ;;  %v1137_v20 = vrot.slane %v1136_v30, 2 }
 0x3a6   : > { %v1170_v15 = vadd.f32 %v1169_v8, %v1168_v47  ;;  %v1204_v5 = vadd.f32 %v1203_v45, %v1202_v58  ;;  %v1145_v4 = vrot.slane %v1144_v31, 1  ;;  %v1193_v48 = vrot.slane %v1192_v34, 1 }
 0x3a7   : > { %v1163_v6 = vrot.slane %v1162_v49, 1  ;;  %v6035_v33 = vmax.f32 %v1114_v50, %v1115_v51  ;;  %v6037_v40 = vmax.f32 %v1126_v23, %v1127_v3  ;;  %v1186_v7 = vadd.f32 %v1185_v32, %v1184_v0 }
 0x3a8   : > { %v6039_v17 = vmax.f32 %v1120_v29, %v1121_v12  ;;  %v1138_v41 = vmax.f32 %v1136_v30, %v1137_v20  ;;  %v1149_v53 = vrot.slane %v1148_v10, 2  ;;  %v1196_v47 = vadd.f32 %v1147_v59, %v5579_v1 }
 0x3a9   : > { %8962 = vst [vmem:[#allocation26_spill] sm:$0xff] %v6035_v33  ;;  %v1164_v60 = vadd.f32 %v1163_v6, %v1162_v49  ;;  %8963 = vst [vmem:[#allocation27_spill] sm:$0xff] %v6037_v40  ;;  %v6042_v63 = vmul.f32 0.125, %v1170_v15  ;;  %v6044_v43 = vmax.f32 %v1132_v61, %v1133_v44  ;;  %v1157_v58 = vrot.slane %v1156_v36, 1 }
 0x3aa   : > { %8964 = vst [vmem:[#allocation28_spill] sm:$0xff] %v6039_v17  ;;  %v1205_v35 = vrot.slane %v1204_v5, 1  ;;  %v6046_v46 = vmul.f32 0.125, %v1182_v54  ;;  %v6048_v56 = vmax.f32 %v1144_v31, %v1145_v4  ;;  %v1194_v50 = vadd.f32 %v1193_v48, %v1192_v34 }
 0x3ab   : > { %8965 = vst [vmem:[#allocation29_spill] sm:$0xff] %v6042_v63  ;;  %8966 = vst [vmem:[#allocation30_spill] sm:$0xff] %v6044_v43  ;;  %v1187_v23 = vrot.slane %v1186_v7, 1  ;;  %v6056_v1 = vstv %s6032_s29  ;;  %v1176_v29 = vadd.f32 %v1175_v37, %v1174_v2  ;;  %v1139_v30 = vrot.slane %v1138_v41, 1  ;;  %s6289_s29 = sld [smem:[#allocation4 + $0x14]] }
 0x3ac   : > { %8967 = vst [vmem:[#allocation31_spill] sm:$0xff] %v6046_v46  ;;  %8968 = vst [vmem:[#allocation32_spill] sm:$0xff] %v6048_v56  ;;  %v1150_v59 = vmax.f32 %v1148_v10, %v1149_v53  ;;  %v1197_v8 = vrot.slane %v1196_v47, 2  ;;  %v6060_v61 = vmax.f32 %v1156_v36, %v1157_v58  ;;  %v1225_v38 = vsel %vm1221_vm9, %v6044_v43, %v6039_v17 }
 0x3ad   : > { %v6071_v45 = vmul.f32 0.125, %v1194_v50  ;;  %v1236_v2 = vsel %vm1233_vm10, %v6048_v56, %v6044_v43  ;;  %v1272_v31 = vmul.f32 %v6056_v1, %v6039_v17  ;;  %v1274_v34 = vmul.f32 %v6056_v1, %v6044_v43 }
 0x3ae   : > { %8970 = vst [vmem:[#allocation34_spill] sm:$0xff] %v6060_v61  ;;  %v6084_v51 = vmul.f32 0.125, %v1164_v60  ;;  %v1188_v6 = vadd.f32 %v1187_v23, %v1186_v7  ;;  %v1251_v32 = vsel %vm1221_vm9, %v6046_v46, %v6042_v63  ;;  %v6092_v12 = vmul.f32 0.125, %v1176_v29 }
 0x3af   : > { %8971 = vst [vmem:[#allocation35_spill] sm:$0xff] %v6071_v45  ;;  %v1151_v20 = vrot.slane %v1150_v59, 1  ;;  %v1198_v10 = vadd.f32 %v1197_v8, %v1196_v47  ;;  %v1226_v44 = vsel %vm1223_vm11, %v6048_v56, %v1225_v38  ;;  %v1237_v36 = vsel %vm1221_vm9, %v6060_v61, %v1236_v2 }
 0x3b0   : > { %8972 = vst [vmem:[#allocation36_spill] sm:$0xff] %v6084_v51  ;;  %8974 = vst [vmem:[#allocation38_spill] sm:$0xff] %v6092_v12  ;;  %v6106_v54 = vmax.f32 %v1138_v41, %v1139_v30  ;;  %v1252_v37 = vsel %vm1223_vm11, %v6071_v45, %v1251_v32  ;;  %v1261_v4 = vsel %vm1233_vm10, %v6071_v45, %v6046_v46  ;;  %v6114_v60 = vmul.f32 0.125, %v1188_v6 }
 0x3b1   : > { %v1290_v48 = vsel %vm1233_vm10, %v1274_v34, %v1272_v31  ;;  %v6120_v53 = vsel %vm649_vm0, 0.0, %v1226_v44  ;;  %v8686_v41 = vstv %s6053_s30  ;;  %v6123_v47 = vmax.f32 %v1150_v59, %v1151_v20  ;;  %8996 = sst [smem:[#allocation57_spill]] %s6289_s29 }
 0x3b2   : > { %8976 = vst [vmem:[#allocation40_spill] sm:$0xff] %v6106_v54  ;;  %8977 = vst [vmem:[#allocation41_spill] sm:$0xff] %v6114_v60  ;;  %v1199_v50 = vrot.slane %v1198_v10, 1  ;;  %v6144_v30 = vstv %s6066_s11  ;;  %v1269_v59 = vmul.f32 %v8686_v41, %v6120_v53  ;;  %v1278_v8 = vmul.f32 %v6056_v1, %v6060_v61  ;;  %s6322_s11 = sld [smem:[#allocation4 + $0x1d]] }
 0x3b3   : > { %8979 = vst [vmem:[#allocation43_spill] sm:$0xff] %v6120_v53  ;;  %8980 = vst [vmem:[#allocation44_spill] sm:$0xff] %v6123_v47  ;;  %v8684_v38 = vstv %s6075_s16  ;;  %v1222_v2 = vsel %vm1221_vm9, %v6037_v40, %v6035_v33  ;;  %v1309_v20 = vmul.f32 %v6144_v30, %v6042_v63  ;;  %v8721_v14 = vstv %s6289_s29  ;;  %s6451_s29 = sld [smem:[#allocation7 + $0x26]] }
 0x3b8   : > { %9000 = sst [smem:[#allocation60_spill]] %s6322_s11 }
 0x405   : > { %v2098_v49 = vpop.permute.xlu0 %2097 }
 0x406   : > { %v6051_v0 = vmax.f32 %v5977_v24, %v2098_v49  ;;  %v1206_v24 = vadd.f32 %v1205_v35, %v1204_v5  ;;  %v1276_v5 = vmul.f32 %v6056_v1, %v6048_v56  ;;  %v6128_v35 = vsel %vm1240_vm12, %v1237_v36, 0.0 }
 0x407   : > { %8981 = vst [vmem:[#allocation45_spill] sm:$0xff] %v6128_v35  ;;  %v6131_v49 = vstv %s6058_s10  ;;  %s6316_s10 = sld [smem:[#allocation4 + $0x11]] }
 0x408   : > { %8969 = vst [vmem:[#allocation33_spill] sm:$0xff] %v6051_v0  ;;  %2176 = vrot.lane.b32.xlu1 %v6051_v0, %s8696_s21  ;;  %2174 = vrot.lane.b32.xlu0 %v6051_v0, %s8696_s21  ;;  %v1291_v29 = vsel %vm1221_vm9, %v1276_v5, %v1290_v48  ;;  %v1430_v31 = vmul.f32 %v6131_v49, %v6035_v33 }
 0x409   : > { %v2100_v16 = vpop.permute.xlu1 %2099  ;;  %v1432_v34 = vmul.f32 %v6131_v49, %v6037_v40  ;;  %v1292_v32 = vsel %vm1223_vm11, %v1278_v8, %v1291_v29  ;;  %v1271_v48 = vmul.f32 %v6056_v1, %v6035_v33  ;;  %v1234_v29 = vsel %vm1233_vm10, %v6106_v54, %v6037_v40 }
 0x40a   : > { %v6087_v3 = vmax.f32 %v5983_v18, %v2100_v16  ;;  %v2135_v15 = vpop.permute.xlu0 %2134  ;;  %v6100_v18 = vmul.f32 0.125, %v1206_v24  ;;  %v8685_v24 = vstv %s6073_s12  ;;  %v1436_v41 = vmul.f32 %v6131_v49, %v6123_v47 }
 0x40b   : > { %v6117_v7 = vadd.f32 %v2135_v15, %v5986_v19  ;;  %v6138_v19 = vsel %vm649_vm0, 0.0, %v1252_v37  ;;  %v1200_v15 = vadd.f32 %v1199_v50, %v1198_v10  ;;  %v1299_v36 = vmul.f32 %v8685_v24, %v6128_v35 }
 0x40c   : > { %8973 = vst [vmem:[#allocation37_spill] sm:$0xff] %v6087_v3  ;;  %2180 = vrot.lane.b32.xlu1 %v6087_v3, %s8696_s21  ;;  %2178 = vrot.lane.b32.xlu0 %v6087_v3, %s8696_s21  ;;  %8975 = vst [vmem:[#allocation39_spill] sm:$0xff] %v6100_v18  ;;  %v1262_v23 = vsel %vm1221_vm9, %v6100_v18, %v1261_v4  ;;  %v1304_v5 = vmul.f32 %v8684_v38, %v6138_v19 }
 0x40d   : > { %8978 = vst [vmem:[#allocation42_spill] sm:$0xff] %v6117_v7  ;;  %v2102_v58 = vpop.permute.xlu1 %2101  ;;  %8982 = vst [vmem:[#allocation46_spill] sm:$0xff] %v6138_v19  ;;  %v6179_v44 = vsel %vm1240_vm12, %v1262_v23, 0.0  ;;  %v1313_v37 = vmul.f32 %v6144_v30, %v6071_v45  ;;  %v1224_v10 = vsel %vm1223_vm11, %v6106_v54, %v1222_v2  ;;  %v1434_v4 = vmul.f32 %v6131_v49, %v6106_v54 }
 0x40e   : > { %v6158_v16 = vmax.f32 %v5991_v57, %v2102_v58  ;;  %v2137_v6 = vpop.permute.xlu0 %2136  ;;  %v1311_v57 = vmul.f32 %v6144_v30, %v6046_v46  ;;  %8984 = vst [vmem:[#allocation48_spill] sm:$0xff] %v6179_v44  ;;  %v1273_v58 = vmul.f32 %v6056_v1, %v6037_v40  ;;  %v1296_v23 = vadd.f32 %v1292_v32, %v1269_v59 }
 0x40f   : > { %v6200_v50 = vadd.f32 %v2137_v6, %v5994_v27  ;;  %v1446_v8 = vsel %vm1233_vm10, %v1432_v34, %v1430_v31  ;;  %v1315_v38 = vmul.f32 %v6144_v30, %v6100_v18  ;;  %v6210_v25 = vmul.f32 0.125, %v1200_v15 }
 0x410   : > { %2212 = vrot.lane.b32.xlu1 %v6117_v7, %s8696_s21  ;;  %2210 = vrot.lane.b32.xlu0 %v6117_v7, %s8696_s21  ;;  %8983 = vst [vmem:[#allocation47_spill] sm:$0xff] %v6158_v16  ;;  %v1327_v24 = vsel %vm1233_vm10, %v1311_v57, %v1309_v20  ;;  %v6217_v27 = vsel %vm649_vm0, 0.0, %v1224_v10  ;;  %v1275_v31 = vmul.f32 %v6056_v1, %v6106_v54  ;;  %v6223_v34 = vstv %s6148_s20  ;;  %s6336_s20 = sld [smem:[#allocation4 + $0x2f]] }
 0x411   : > { %8985 = vst [vmem:[#allocation49_spill] sm:$0xff] %v6200_v50  ;;  %v2104_v2 = vpop.permute.xlu1 %2103  ;;  %8986 = vst [vmem:[#allocation50_spill] sm:$0xff] %v6210_v25  ;;  %v1235_v6 = vsel %vm1221_vm9, %v6123_v47, %v1234_v29  ;;  %v1249_v32 = vsel %vm1221_vm9, %v6092_v12, %v6084_v51  ;;  %v1447_v20 = vsel %vm1221_vm9, %v1434_v4, %v1446_v8  ;;  %v6242_v59 = vstv %s6160_s15  ;;  %s6349_s15 = sld [smem:[#allocation4 + $0x8]] }
 0x412   : > { %8987 = vst [vmem:[#allocation51_spill] sm:$0xff] %v6217_v27  ;;  %8988 = vst [vmem:[#allocation52_spill] sm:$0xff] %v6223_v34  ;;  %v1287_v57 = vsel %vm1233_vm10, %v1273_v58, %v1271_v48  ;;  %v6237_v15 = vmax.f32 %v5999_v52, %v2104_v2  ;;  %v1301_v10 = vadd.f32 %v1299_v36, %v1296_v23  ;;  %v2139_v29 = vpop.permute.xlu0 %2138  ;;  %v6257_v36 = vsel %vm1240_vm12, %v1235_v6, 0.0 }
 0x413   : > { %v1328_v39 = vsel %vm1221_vm9, %v1313_v37, %v1327_v24  ;;  %v1427_v4 = vmul.f32 %v8991_v9, %v6217_v27  ;;  %v1779_v48 = vmul.f32 %v6223_v34, %v6039_v17  ;;  %v1781_v52 = vmul.f32 %v6223_v34, %v6044_v43  ;;  %8992 = vst [vmem:[#allocation55_spill] sm:$0xff] %v6257_v36 }
 0x414   : > { %2184 = vrot.lane.b32.xlu1 %v6158_v16, %s8696_s21  ;;  %2182 = vrot.lane.b32.xlu0 %v6158_v16, %s8696_s21  ;;  %8990 = vst [vmem:[#allocation54_spill] sm:$0xff] %v6237_v15  ;;  %v1250_v9 = vsel %vm1223_vm11, %v6114_v60, %v1249_v32  ;;  %v1448_v24 = vsel %vm1223_vm11, %v1436_v41, %v1447_v20  ;;  %v8995_v23 = vstv %s6125_s17 }
 0x415   : > { %v1288_v37 = vsel %vm1221_vm9, %v1275_v31, %v1287_v57  ;;  %v1259_v58 = vsel %vm1233_vm10, %v6114_v60, %v6092_v12  ;;  %v1467_v8 = vmul.f32 %v6242_v59, %v6084_v51  ;;  %v1277_v2 = vmul.f32 %v6056_v1, %v6123_v47  ;;  %v2141_v57 = vpop.permute.xlu1 %2140 }
 0x416   : > { %v6274_v6 = vadd.f32 %v2139_v29, %v6002_v21  ;;  %v1469_v41 = vmul.f32 %v6242_v59, %v6092_v12  ;;  %v8994_v31 = vstv %s6053_s30  ;;  %v1783_v20 = vmul.f32 %v6223_v34, %v6048_v56  ;;  %s6302_s30 = sld [smem:[#allocation4 + $0x33]]  ;;  %9002 = sst [smem:[#allocation61_spill]] %s6336_s20 }
 0x417   : > { %v1268_v32 = vmul.f32 %v8994_v31, %v6217_v27  ;;  %v6286_v1 = vmul.f32 %v8995_v23, %v6179_v44  ;;  %v1454_v28 = vadd.f32 %v1448_v24, %v1427_v4  ;;  %v1289_v21 = vsel %vm1223_vm11, %v1277_v2, %v1288_v37 }
 0x418   : > { %2216 = vrot.lane.b32.xlu1 %v6200_v50, %s8696_s21  ;;  %2214 = vrot.lane.b32.xlu0 %v6200_v50, %s8696_s21  ;;  %8993 = vst [vmem:[#allocation56_spill] sm:$0xff] %v6274_v6  ;;  %v1797_v29 = vsel %vm1233_vm10, %v1781_v52, %v1779_v48  ;;  %v1306_v31 = vadd.f32 %v1304_v5, %v1301_v10  ;;  %v6298_v42 = vsel %vm649_vm0, 0.0, %v1250_v9  ;;  %v8998_v24 = vstv %s6189_s22 }
 0x419   : > { %v1329_v26 = vsel %vm1223_vm11, %v1315_v38, %v1328_v39  ;;  %8997 = vst [vmem:[#allocation58_spill] sm:$0xff] %v6298_v42  ;;  %v1260_v4 = vsel %vm1221_vm9, %v6210_v25, %v1259_v58  ;;  %v1457_v48 = vmul.f32 %v8998_v24, %v6257_v36  ;;  %v8701_v52 = vstv %s6225_s25 }
 0x41a   : > { %v1471_v37 = vmul.f32 %v6242_v59, %v6114_v60  ;;  %v8700_v5 = vstv %s6234_s26  ;;  %v6312_v39 = vadd.f32 %v2141_v57, %v6007_v62  ;;  %v1483_v38 = vsel %vm1233_vm10, %v1469_v41, %v1467_v8  ;;  %s6464_s26 = sld [smem:[#allocation7 + $0x2f]] }
 0x41b   : > { %v1295_v10 = vadd.f32 %v1289_v21, %v1268_v32  ;;  %v1798_v9 = vsel %vm1221_vm9, %v1783_v20, %v1797_v29  ;;  %v1459_v58 = vadd.f32 %v1457_v48, %v1454_v28  ;;  %v1308_v23 = vmul.f32 %v6144_v30, %v6084_v51 }
 0x41c   : > { %2188 = vrot.lane.b32.xlu1 %v6237_v15, %s8696_s21  ;;  %2186 = vrot.lane.b32.xlu0 %v6237_v15, %s8696_s21  ;;  %8999 = vst [vmem:[#allocation59_spill] sm:$0xff] %v6312_v39  ;;  %v1310_v2 = vmul.f32 %v6144_v30, %v6092_v12  ;;  %v1785_v62 = vmul.f32 %v6223_v34, %v6060_v61  ;;  %v9001_v8 = vstv %s6073_s12  ;;  %v6343_v57 = vstv %s6271_s28  ;;  %s6351_s12 = sld [smem:[#allocation4 + $0x2c]]  ;;  %s6360_s28 = sld [smem:[#allocation7 + $0x8]] }
 0x41d   : > { %v1462_v28 = vmul.f32 %v8701_v52, %v6298_v42  ;;  %v1298_v41 = vmul.f32 %v9001_v8, %v6257_v36  ;;  %v1776_v32 = vmul.f32 %v8700_v5, %v6120_v53  ;;  %9003 = vst [vmem:[#allocation62_spill] sm:$0xff] %v6343_v57  ;;  %v1431_v21 = vmul.f32 %v6131_v49, %v6039_v17 }
 0x41e   : > { %v1799_v20 = vsel %vm1223_vm11, %v1785_v62, %v1798_v9  ;;  %v1433_v29 = vmul.f32 %v6131_v49, %v6044_v43  ;;  %v1333_v24 = vadd.f32 %v1329_v26, %v1306_v31  ;;  %v1484_v48 = vsel %vm1221_vm9, %v1471_v37, %v1483_v38 }
 0x41f   : > { %v1300_v9 = vadd.f32 %v1298_v41, %v1295_v10  ;;  %v1312_v62 = vmul.f32 %v6144_v30, %v6114_v60  ;;  %v1464_v8 = vadd.f32 %v1462_v28, %v1459_v58  ;;  %v9004_v5 = vstv %s6075_s16  ;;  %s6379_s16 = sld [smem:[#allocation7]] }
 0x420   : > { %2220 = vrot.lane.b32.xlu1 %v6274_v6, %s8696_s21  ;;  %2218 = vrot.lane.b32.xlu0 %v6274_v6, %s8696_s21  ;;  %v1303_v52 = vmul.f32 %v9004_v5, %v6298_v42  ;;  %v1324_v22 = vsel %vm1233_vm10, %v1310_v2, %v1308_v23  ;;  %v1803_v26 = vadd.f32 %v1799_v20, %v1776_v32  ;;  %v6384_v5 = vsel %vm1240_vm12, %v1260_v4, 0.0  ;;  %9012 = sst [smem:[#allocation68_spill]] %s6464_s26  ;;  %s6487_s26 = sld [smem:[#allocation7 + $0x1b]] }
 0x421   : > { %v1816_v31 = vmul.f32 %v6343_v57, %v6042_v63  ;;  %v1818_v37 = vmul.f32 %v6343_v57, %v6046_v46  ;;  %v1435_v38 = vmul.f32 %v6131_v49, %v6048_v56  ;;  %9005 = vst [vmem:[#allocation63_spill] sm:$0xff] %v6384_v5  ;;  %v1473_v10 = vmul.f32 %v6242_v59, %v6210_v25 }
 0x422   : > { %v1493_v58 = vstv %s6302_s30  ;;  %v1449_v23 = vsel %vm1233_vm10, %v1433_v29, %v1431_v21  ;;  %v1305_v2 = vadd.f32 %v1303_v52, %v1300_v9  ;;  %v1325_v28 = vsel %vm1221_vm9, %v1312_v62, %v1324_v22  ;;  %s6553_s30 = sld [smem:[#allocation7 + $0x30]] }
 0x423   : > { %v1806_v41 = vmul.f32 %v8721_v14, %v6128_v35  ;;  %v6399_v32 = vstv %s6316_s10  ;;  %v1485_v4 = vsel %vm1223_vm11, %v1473_v10, %v1484_v48  ;;  %v1314_v20 = vmul.f32 %v6144_v30, %v6210_v25  ;;  %s6417_s10 = sld [smem:[#allocation7 + $0x23]] }
 0x424   : > { %2224 = vrot.lane.b32.xlu1 %v6312_v39, %s8696_s21  ;;  %2222 = vrot.lane.b32.xlu0 %v6312_v39, %s8696_s21  ;;  %s6355_s21 = sld [smem:[#allocation7 + $0x5]]  ;;  %9006 = vst [vmem:[#allocation64_spill] sm:$0xff] %v6399_v32  ;;  %v8720_v21 = vstv %s6322_s11  ;;  %v1820_v52 = vmul.f32 %v6343_v57, %v6071_v45  ;;  %v1491_v22 = vadd.f32 %v1485_v4, %v1464_v8  ;;  %s6453_s11 = sld [smem:[#allocation7 + $0x29]]  ;;  %v6576_v14 = vstv %s6403_s5 }
 0x425   : > { %v1808_v29 = vadd.f32 %v1806_v41, %v1803_v26  ;;  %v1834_v9 = vsel %vm1233_vm10, %v1818_v37, %v1816_v31  ;;  %v1450_v48 = vsel %vm1221_vm9, %v1435_v38, %v1449_v23  ;;  %v1326_v30 = vsel %vm1223_vm11, %v1314_v20, %v1325_v28  ;;  %9035 = vst [vmem:[#allocation89_spill] sm:$0xff] %v6576_v14  ;;  %s6596_s5 = sld [smem:[#allocation6 + $0xb]] }
 0x426   : > { %v1437_v62 = vmul.f32 %v6131_v49, %v6060_v61  ;;  %v1937_v10 = vmul.f32 %v6399_v32, %v6035_v33  ;;  %v1939_v8 = vmul.f32 %v6399_v32, %v6037_v40  ;;  %v6433_v26 = vadd.f32 %v6286_v1, %v1333_v24 }
 0x427   : > { %v1332_v31 = vadd.f32 %v1326_v30, %v1305_v2  ;;  %v1811_v37 = vmul.f32 %v8720_v21, %v6138_v19  ;;  %v9008_v49 = vstv %s6146_s19  ;;  %v1494_v23 = vmul.f32 %v1493_v58, %v6384_v5  ;;  %s6462_s19 = sld [smem:[#allocation7 + $0x2c]] }
 0x428   : > { %9007 = vst [vmem:[#allocation65_spill] sm:$0xff] %v6433_v26  ;;  %v1428_v38 = vmul.f32 %v9008_v49, %v6120_v53  ;;  %v1835_v28 = vsel %vm1221_vm9, %v1820_v52, %v1834_v9  ;;  %v8719_v41 = vstv %s6336_s20  ;;  %v1451_v1 = vsel %vm1223_vm11, %v1437_v62, %v1450_v48  ;;  %s6505_s20 = sld [smem:[#allocation7 + $0x1e]] }
 0x429   : > { %v9010_v24 = vstv %s6125_s17  ;;  %v1813_v4 = vadd.f32 %v1811_v37, %v1808_v29  ;;  %v1822_v20 = vmul.f32 %v6343_v57, %v6100_v18  ;;  %v1941_v30 = vmul.f32 %v6399_v32, %v6106_v54  ;;  %s6473_s17 = sld [smem:[#allocation7 + $0x32]] }
 0x42a   : > { %v1335_v2 = vmul.f32 %v9010_v24, %v6384_v5  ;;  %v6466_v52 = vadd.f32 %v1494_v23, %v1491_v22  ;;  %v1468_v9 = vmul.f32 %v6242_v59, %v6042_v63  ;;  %v1470_v29 = vmul.f32 %v6242_v59, %v6046_v46 }
 0x42b   : > { %v1953_v48 = vsel %vm1233_vm10, %v1939_v8, %v1937_v10  ;;  %v1836_v37 = vsel %vm1223_vm11, %v1822_v20, %v1835_v28  ;;  %v6483_v22 = vmul.f32 %v8719_v41, %v6179_v44  ;;  %v1455_v49 = vadd.f32 %v1451_v1, %v1428_v38 }
 0x42c   : > { %9013 = vst [vmem:[#allocation69_spill] sm:$0xff] %v6466_v52  ;;  %v6477_v62 = vadd.f32 %v1335_v2, %v1332_v31  ;;  %v9017_v10 = vstv %s6189_s22  ;;  %v9018_v23 = vstv %s6225_s25  ;;  %v6499_v28 = vmul.f32 %v6242_v59, %v6071_v45  ;;  %s6521_s22 = sld [smem:[#allocation7 + $0x27]]  ;;  %s6538_s25 = sld [smem:[#allocation7 + $0x2d]] }
 0x42d   : > { %9011 = sst [smem:[#allocation67_spill]] %s6462_s19  ;;  %9015 = vst [vmem:[#allocation71_spill] sm:$0xff] %v6483_v22  ;;  %v1458_v8 = vmul.f32 %v9017_v10, %v6128_v35  ;;  %v6495_v31 = vmul.f32 %v9018_v23, %v6138_v19  ;;  %v8718_v24 = vstv %s6349_s15  ;;  %v6503_v2 = vstv %s6353_s14  ;;  %s6519_s14 = sld [smem:[#allocation7 + $0x24]] }
 0x42e   : > { %9014 = vst [vmem:[#allocation70_spill] sm:$0xff] %v6477_v62  ;;  %s6485_s19 = sld [smem:[#allocation7 + $0x18]]  ;;  %9020 = vst [vmem:[#allocation74_spill] sm:$0xff] %v6499_v28  ;;  %v6509_v38 = vadd.f32 %v1836_v37, %v1813_v4  ;;  %v6513_v1 = vmul.f32 %v6242_v59, %v6100_v18  ;;  %v1954_v20 = vsel %vm1221_vm9, %v1941_v30, %v1953_v48  ;;  %v6517_v10 = vstv %s6355_s21  ;;  %s6536_s21 = sld [smem:[#allocation7 + $0x2a]] }
 0x42f   : > { %9019 = vst [vmem:[#allocation73_spill] sm:$0xff] %v6495_v31  ;;  %9021 = vst [vmem:[#allocation75_spill] sm:$0xff] %v6503_v2  ;;  %v6524_v23 = vsel %vm1233_vm10, %v1470_v29, %v1468_v9  ;;  %v6529_v4 = vmul.f32 %v1493_v58, %v6179_v44  ;;  %v1943_v59 = vmul.f32 %v6399_v32, %v6123_v47  ;;  %v6534_v30 = vstv %s6360_s28  ;;  %s6555_s28 = sld [smem:[#allocation7 + $0x33]] }
 0x430   : > { %9022 = vst [vmem:[#allocation76_spill] sm:$0xff] %v6509_v38  ;;  %9023 = vst [vmem:[#allocation77_spill] sm:$0xff] %v6513_v1  ;;  %v6540_v48 = vadd.f32 %v1458_v8, %v1455_v49  ;;  %v6545_v9 = vmul.f32 %v8718_v24, %v6217_v27  ;;  %v6548_v58 = vstv %s6351_s12  ;;  %v6551_v29 = vmul.f32 0.0, %v6503_v2  ;;  %s6578_s12 = sld [smem:[#allocation6 + $0x2]] }
 0x431   : > { %9024 = vst [vmem:[#allocation78_spill] sm:$0xff] %v6517_v10  ;;  %9025 = vst [vmem:[#allocation79_spill] sm:$0xff] %v6524_v23  ;;  %v6558_v37 = vstv %s6379_s16  ;;  %v6561_v49 = vstv %s6381_s0  ;;  %v6564_v8 = vsel %vm1223_vm11, %v1943_v59, %v1954_v20  ;;  %v6567_v24 = vstv %s6362_s13  ;;  %s6580_s16 = sld [smem:[#allocation6 + $0x5]]  ;;  %s6594_s0 = sld [smem:[#allocation6 + $0x8]] }
 0x432   : > { %9026 = vst [vmem:[#allocation80_spill] sm:$0xff] %v6529_v4  ;;  %9027 = vst [vmem:[#allocation81_spill] sm:$0xff] %v6534_v30  ;;  %v6570_v41 = vstv %s6411_s6  ;;  %v6573_v21 = vmul.f32 0.0, %v6517_v10  ;;  %v6589_v20 = vmul.f32 0.0, %v6534_v30  ;;  %v6592_v59 = vstv %s6371_s24  ;;  %s6610_s6 = sld [smem:[#allocation6 + $0xe]]  ;;  %s6628_s13 = sld [smem:[#allocation6 + $0x17]] }
 0x433   : > { %9028 = vst [vmem:[#allocation82_spill] sm:$0xff] %v6540_v48  ;;  %9029 = vst [vmem:[#allocation83_spill] sm:$0xff] %v6545_v9  ;;  %v6602_v62 = vstv %s6417_s10  ;;  %v6605_v52 = vmul.f32 0.0, %v6558_v37  ;;  %v6608_v44 = vmul.f32 0.0, %v6561_v49  ;;  %v6615_v26 = vmul.f32 0.0, %v6570_v41  ;;  %s6642_s24 = sld [smem:[#allocation6 + $0x1a]] }
 0x434   : > { %9016 = sst [smem:[#allocation72_spill]] %s6485_s19  ;;  %s6507_s19 = sld [smem:[#allocation7 + $0x21]]  ;;  %9030 = vst [vmem:[#allocation84_spill] sm:$0xff] %v6548_v58  ;;  %9031 = vst [vmem:[#allocation85_spill] sm:$0xff] %v6558_v37  ;;  %v6618_v18 = vstv %s6392_s3  ;;  %v6621_v19 = vstv %s6401_s4  ;;  %v6624_v35 = vmul.f32 0.0, %v6576_v14  ;;  %v6631_v45 = vmul.f32 0.0, %v6586_v13 }
 0x435   : > { %9032 = vst [vmem:[#allocation86_spill] sm:$0xff] %v6561_v49  ;;  %9033 = vst [vmem:[#allocation87_spill] sm:$0xff] %v6564_v8  ;;  %v6634_v46 = vstv %s6419_s27  ;;  %v6637_v63 = vstv %s6487_s26  ;;  %s9041_s3 = sld [smem:[#allocation68_spill]]  ;;  %v6640_v53 = vstv %s6505_s20  ;;  %s9043_s4 = sld [smem:[#allocation67_spill]]  ;;  %v6647_v61 = vmul.f32 0.0, %v6602_v62 }
 0x436   : > { %9034 = vst [vmem:[#allocation88_spill] sm:$0xff] %v6567_v24  ;;  %9037 = vst [vmem:[#allocation91_spill] sm:$0xff] %v6602_v62  ;;  %s6644_s10 = sld [smem:[#allocation6 + $0x1d]]  ;;  %v6650_v32 = vstv %s6428_s8  ;;  %v6653_v56 = vstv %s6430_s9  ;;  %s6658_s27 = sld [smem:[#allocation6 + $0x20]]  ;;  %v6663_v25 = vstv %s6451_s29  ;;  %v6666_v4 = vstv %s6453_s11 }
 0x437   : > { %9039 = vst [vmem:[#allocation92_spill] sm:$0xff] %v6634_v46  ;;  %9040 = vst [vmem:[#allocation93_spill] sm:$0xff] %v6637_v63  ;;  %s6660_s26 = sld [smem:[#allocation6 + $0x23]]  ;;  %v6669_v22 = vstv %s6441_s18  ;;  %v6672_v38 = vstv %s9038_s23  ;;  %s9049_s8 = sld [smem:[#allocation72_spill]]  ;;  %v6685_v57 = vmul.f32 0.0, %v6637_v63  ;;  %v6688_v42 = vmul.f32 0.0, %v6640_v53 }
 0x438   : > { %9042 = vst [vmem:[#allocation94_spill] sm:$0xff] %v6640_v53  ;;  %9044 = vst [vmem:[#allocation95_spill] sm:$0xff] %v6650_v32  ;;  %s6674_s9 = sld [smem:[#allocation6 + $0x26]]  ;;  %s6676_s20 = sld [smem:[#allocation6 + $0x29]]  ;;  %v6695_v60 = vstv %s6473_s17  ;;  %v6698_v27 = vstv %s6475_s2  ;;  %v6704_v47 = vmul.f32 0.0, %v6599_v11  ;;  %v6711_v36 = vstv %s6519_s14 }
 0x439   : > { %9045 = vst [vmem:[#allocation96_spill] sm:$0xff] %v6653_v56  ;;  %9047 = vst [vmem:[#allocation98_spill] sm:$0xff] %v6669_v22  ;;  %s6690_s18 = sld [smem:[#allocation6 + $0x2c]]  ;;  %s6692_s29 = sld [smem:[#allocation6 + $0x2f]]  ;;  %v6717_v58 = vmul.f32 0.0, %v6618_v18  ;;  %v6720_v51 = vmul.f32 0.0, %v6621_v19  ;;  %v6727_v8 = vstv %s6538_s25  ;;  %v6730_v9 = vstv %s6521_s22 }
 0x43a   : > { %v6656_v5 = vstv %s6507_s19  ;;  %9048 = vst [vmem:[#allocation99_spill] sm:$0xff] %v6672_v38  ;;  %9051 = vst [vmem:[#allocation101_spill] sm:$0xff] %v6695_v60  ;;  %s6706_s11 = sld [smem:[#allocation6 + $0x32]]  ;;  %s6708_s19 = sld [smem:[#allocation6 + $0x35]]  ;;  %v6736_v23 = vmul.f32 0.0, %v6669_v22  ;;  %v6743_v31 = vstv %s6553_s30  ;;  %v6746_v48 = vmul.f32 0.0, %v6695_v60 }
 0x43b   : > { %9046 = vst [vmem:[#allocation97_spill] sm:$0xff] %v6656_v5  ;;  %v6679_v43 = vstv %s9041_s3  ;;  %v6682_v17 = vstv %s9043_s4  ;;  %9052 = vst [vmem:[#allocation102_spill] sm:$0xff] %v6698_v27  ;;  %v6701_v1 = vmul.f32 0.0, %v6656_v5  ;;  %s6722_s2 = sld [smem:[#allocation6]]  ;;  %s6724_s17 = sld [smem:[#allocation7 + $0x1]]  ;;  %v6749_v54 = vmul.f32 0.0, %v6698_v27 }
 0x43c   : > { %9050 = vst [vmem:[#allocation100_spill] sm:$0xff] %v6679_v43  ;;  %9053 = vst [vmem:[#allocation103_spill] sm:$0xff] %v6704_v47  ;;  %v6733_v28 = vmul.f32 0.0, %v6679_v43  ;;  %s6738_s14 = sld [smem:[#allocation6 + $0x3]]  ;;  %s6740_s23 = sld [smem:[#allocation6 + $0x6]]  ;;  %v6752_v40 = vstv %s6578_s12  ;;  %v6759_v34 = vmul.f32 0.0, %v6672_v38  ;;  %v6765_v39 = vstv %s6580_s16 }
 0x43d   : > { %v6714_v12 = vstv %s9049_s8  ;;  %9055 = vst [vmem:[#allocation105_spill] sm:$0xff] %v6717_v58  ;;  %9056 = vst [vmem:[#allocation106_spill] sm:$0xff] %v6720_v51  ;;  %s6754_s22 = sld [smem:[#allocation6 + $0x9]]  ;;  %s6756_s25 = sld [smem:[#allocation6 + $0xc]]  ;;  %v6768_v6 = vstv %s6594_s0  ;;  %v6775_v15 = vstv %s6536_s21  ;;  %v6778_v16 = vstv %s6555_s28 }
 0x43e   : > { %9054 = vst [vmem:[#allocation104_spill] sm:$0xff] %v6714_v12  ;;  %9057 = vst [vmem:[#allocation107_spill] sm:$0xff] %v6727_v8  ;;  %v6762_v33 = vmul.f32 0.0, %v6714_v12  ;;  %s6770_s30 = sld [smem:[#allocation6 + $0xf]]  ;;  %s6772_s12 = sld [smem:[#allocation6 + $0x1b]]  ;;  %v6781_v50 = vmul.f32 0.0, %v6727_v8 }
 0x43f   : > { %9058 = vst [vmem:[#allocation108_spill] sm:$0xff] %v6733_v28  ;;  %9059 = vst [vmem:[#allocation109_spill] sm:$0xff] %v6736_v23  ;;  %v6784_v7 = vmul.f32 0.0, %v6743_v31  ;;  %s6786_s16 = sld [smem:[#allocation6 + $0x12]]  ;;  %s6788_s0 = sld [smem:[#allocation6 + $0x1e]]  ;;  %v6791_v3 = vmul.f32 0.0, %v6778_v16 }
 0x440   : > { %9060 = vst [vmem:[#allocation110_spill] sm:$0xff] %v6743_v31  ;;  %9061 = vst [vmem:[#allocation111_spill] sm:$0xff] %v6746_v48  ;;  %s6802_s21 = sld [smem:[#allocation6 + $0x15]]  ;;  %s6804_s28 = sld [smem:[#allocation6 + $0x21]]  ;;  %v6873_v48 = vstv %s6690_s18 }
 0x441   : > { %9062 = vst [vmem:[#allocation112_spill] sm:$0xff] %v6749_v54  ;;  %9063 = vst [vmem:[#allocation113_spill] sm:$0xff] %v6752_v40  ;;  %v6797_v54 = vstv %s6596_s5  ;;  %s6818_s5 = sld [smem:[#allocation6 + $0x18]]  ;;  %s6820_s3 = sld [smem:[#allocation6 + $0x24]] }
 0x442   : > { %9064 = vst [vmem:[#allocation114_spill] sm:$0xff] %v6759_v34  ;;  %9065 = vst [vmem:[#allocation115_spill] sm:$0xff] %v6762_v33  ;;  %v6794_v33 = vmul.f32 0.0, %v6752_v40  ;;  %v6810_v34 = vstv %s6610_s6  ;;  %v6816_v40 = vmul.f32 0.0, %v6768_v6  ;;  %s6834_s6 = sld [smem:[#allocation6 + $0x27]]  ;;  %s6836_s4 = sld [smem:[#allocation6 + $0x2a]]  ;;  %v6876_v23 = vstv %s6740_s23 }
 0x443   : > { %9066 = vst [vmem:[#allocation116_spill] sm:$0xff] %v6765_v39  ;;  %9067 = vst [vmem:[#allocation117_spill] sm:$0xff] %v6768_v6  ;;  %s7600_s8 = sld [smem:[#allocation7 + $0x1c]]  ;;  %s7655_s23 = sld [smem:[#allocation7 + $0x31]] }
 0x444   : > { %9068 = vst [vmem:[#allocation118_spill] sm:$0xff] %v6778_v16  ;;  %9069 = vst [vmem:[#allocation119_spill] sm:$0xff] %v6781_v50  ;;  %v6800_v50 = vstv %s6644_s10  ;;  %s9135_s10 = smov 1   ;;  %s7626_s18 = sld [smem:[#allocation7 + $0x4]] }
 0x445   : > { %9070 = vst [vmem:[#allocation120_spill] sm:$0xff] %v6784_v7  ;;  %9071 = vst [vmem:[#allocation121_spill] sm:$0xff] %v6791_v3  ;;  %v6807_v7 = vmul.f32 0.0, %v6765_v39  ;;  %v6813_v3 = vstv %s6658_s27  ;;  %v6826_v39 = vstv %s6628_s13  ;;  %v6839_v6 = vmul.f32 0.0, %v6800_v50  ;;  %s7100_s13 = sld [smem:[#allocation6 + $0x33]]  ;;  %s7571_s27 = sld [smem:[#allocation7 + $0xa]] }
 0x446   : > { %9072 = vst [vmem:[#allocation122_spill] sm:$0xff] %v6794_v33  ;;  %9073 = vst [vmem:[#allocation123_spill] sm:$0xff] %v6797_v54  ;;  %v6823_v33 = vstv %s6626_s1  ;;  %s6849_s1 = sld [smem:[#allocation6 + $0x30]]  ;;  %v6858_v54 = vstv %s6676_s20  ;;  %s7619_s20 = sld [smem:[#allocation7 + $0x2e]] }
 0x447   : > { %9074 = vst [vmem:[#allocation124_spill] sm:$0xff] %v6800_v50  ;;  %9075 = vst [vmem:[#allocation125_spill] sm:$0xff] %v6807_v7  ;;  %v6829_v7 = vstv %s6612_s7  ;;  %s6847_s7 = sld [smem:[#allocation6 + $0x2d]]  ;;  %v6861_v50 = vstv %s6722_s2  ;;  %v6924_v51 = vstv %s6818_s5  ;;  %s7640_s2 = sld [smem:[#allocation7 + $0x1f]] }
 0x448   : > { %9076 = vst [vmem:[#allocation126_spill] sm:$0xff] %v6810_v34  ;;  %9077 = vst [vmem:[#allocation127_spill] sm:$0xff] %v6813_v3  ;;  %v6832_v34 = vstv %s6660_s26  ;;  %s7598_s26 = sld [smem:[#allocation7 + $0x13]] }
 0x449   : > { %9078 = vst [vmem:[#allocation128_spill] sm:$0xff] %v6816_v40  ;;  %9079 = vst [vmem:[#allocation129_spill] sm:$0xff] %v6823_v33  ;;  %v6842_v40 = vstv %s6674_s9  ;;  %v6845_v33 = vstv %s6642_s24  ;;  %s9134_s24 = smov 127   ;;  %s7613_s9 = sld [smem:[#allocation7 + $0x25]] }
 0x44a   : > { %9080 = vst [vmem:[#allocation130_spill] sm:$0xff] %v6826_v39  ;;  %9081 = vst [vmem:[#allocation131_spill] sm:$0xff] %v6829_v7  ;;  %v6852_v7 = vstv %s6724_s17  ;;  %v6855_v39 = vmul.f32 0.0, %v6813_v3  ;;  %v6879_v3 = vstv %s6706_s11  ;;  %s7631_s11 = sld [smem:[#allocation7 + $0x16]]  ;;  %s7645_s17 = sld [smem:[#allocation7 + $0x28]] }
 0x44b   : > { %9082 = vst [vmem:[#allocation132_spill] sm:$0xff] %v6832_v34  ;;  %9083 = vst [vmem:[#allocation133_spill] sm:$0xff] %v6839_v6  ;;  %v6864_v6 = vstv %s6738_s14  ;;  %v6888_v28 = vmul.f32 0.0, %v6852_v7  ;;  %s7653_s14 = sld [smem:[#allocation7 + $0x10]]  ;;  %s9247_s5 = sld [smem:[#allocation53_spill]] }
 0x44c   : > { %9084 = vst [vmem:[#allocation134_spill] sm:$0xff] %v6842_v40  ;;  %9085 = vst [vmem:[#allocation135_spill] sm:$0xff] %v6845_v33  ;;  %v6867_v33 = vstv %s6692_s29  ;;  %v6870_v40 = vmul.f32 0.0, %v6832_v34  ;;  %v6891_v34 = vmul.f32 0.0, %v6861_v50  ;;  %v6941_v47 = vstv %s6849_s1  ;;  %s7629_s29 = sld [smem:[#allocation7 + $0xd]]  ;;  %s9261_s1 = smov 16  }
 0x44d   : > { %9086 = vst [vmem:[#allocation136_spill] sm:$0xff] %v6852_v7  ;;  %9087 = vst [vmem:[#allocation137_spill] sm:$0xff] %v6855_v39  ;;  %v6882_v39 = vstv %s6708_s19  ;;  %v6906_v7 = vmul.f32 0.0, %v6876_v23  ;;  %s7638_s19 = sld [smem:[#allocation7 + $0x7]] }
 0x44e   : > { %9088 = vst [vmem:[#allocation138_spill] sm:$0xff] %v6858_v54  ;;  %9089 = vst [vmem:[#allocation139_spill] sm:$0xff] %v6861_v50  ;;  %v6885_v54 = vstv %s6772_s12  ;;  %v6912_v50 = vstv %s6804_s28  ;;  %s7684_s12 = sld [smem:[#allocation7 + $0x34]]  ;;  %s7880_s28 = sld [smem:[#allocation4 + $0x35]] }
 0x44f   : > { %9090 = vst [vmem:[#allocation140_spill] sm:$0xff] %v6864_v6  ;;  %9091 = vst [vmem:[#allocation141_spill] sm:$0xff] %v6867_v33  ;;  %v6903_v33 = vstv %s6756_s25  ;;  %s7668_s25 = sld [smem:[#allocation7 + $0x22]] }
 0x450   : > { %9092 = vst [vmem:[#allocation142_spill] sm:$0xff] %v6870_v40  ;;  %9093 = vst [vmem:[#allocation143_spill] sm:$0xff] %v6873_v48  ;;  %v6894_v40 = vstv %s6754_s22  ;;  %v6897_v48 = vmul.f32 0.0, %v6864_v6  ;;  %v6918_v6 = vmul.f32 0.0, %v6885_v54  ;;  %s7658_s22 = sld [smem:[#allocation7 + $0x19]] }
 0x451   : > { %9094 = vst [vmem:[#allocation144_spill] sm:$0xff] %v6876_v23  ;;  %9095 = vst [vmem:[#allocation145_spill] sm:$0xff] %v6879_v3  ;;  %v6900_v3 = vstv %s6788_s0  ;;  %s7861_s0 = sld [smem:[#allocation4 + $0x23]] }
 0x452   : > { %9096 = vst [vmem:[#allocation146_spill] sm:$0xff] %v6882_v39  ;;  %9097 = vst [vmem:[#allocation147_spill] sm:$0xff] %v6885_v54  ;;  %v4596_v39 = vpop.f32.mrb[0].mxu0  ;;  %v6932_v23 = vmul.f32 0.0, %v6900_v3  ;;  %v6944_v54 = vmul.f32 0.0, %v6912_v50 }
 0x453   : > { %9098 = vst [vmem:[#allocation148_spill] sm:$0xff] %v6888_v28  ;;  %9099 = vst [vmem:[#allocation149_spill] sm:$0xff] %v6891_v34  ;;  %v6909_v28 = vstv %s6770_s30  ;;  %v4597_v34 = vpop.f32.mrb[1].mxu0  ;;  %s7670_s30 = sld [smem:[#allocation7 + $0x2b]] }
 0x454   : > { %9100 = vst [vmem:[#allocation150_spill] sm:$0xff] %v6894_v40  ;;  %9101 = vst [vmem:[#allocation151_spill] sm:$0xff] %v6897_v48  ;;  %v6915_v40 = vstv %s6786_s16  ;;  %v6921_v48 = vstv %s6802_s21  ;;  %v6926_v58 = vadd.f32 %v4597_v34, %v4596_v39  ;;  %s7849_s16 = sld [smem:[#allocation4 + $0x1a]] }
 0x455   : > { %9102 = vst [vmem:[#allocation152_spill] sm:$0xff] %v6900_v3  ;;  %9103 = vst [vmem:[#allocation153_spill] sm:$0xff] %v6903_v33  ;;  %v6929_v33 = vstv %s6820_s3  ;;  %s7873_s21 = sld [smem:[#allocation4 + $0xa]]  ;;  %s7909_s3 = sld [smem:[#allocation4 + $0x10]] }
 0x456   : > { %9104 = vst [vmem:[#allocation154_spill] sm:$0xff] %v6906_v7  ;;  %9105 = vst [vmem:[#allocation155_spill] sm:$0xff] %v6909_v28  ;;  %v6935_v7 = vstv %s6834_s6  ;;  %v6938_v28 = vstv %s6847_s7  ;;  %v3779_v34 = vmul.f32 %v6926_v58, %v6567_v24  ;;  %v3845_v39 = vmul.f32 %v6926_v58, %v6583_v55  ;;  %s9260_s6 = sld [smem:[#allocation57_spill]]  ;;  %s7919_s7 = sld [smem:[#allocation4 + $0x25]] }
 0x457   : > { %9106 = vst [vmem:[#allocation156_spill] sm:$0xff] %v6912_v50  ;;  %9107 = vst [vmem:[#allocation157_spill] sm:$0xff] %v6915_v40  ;;  %v3899_v3 = vmul.f32 %v6926_v58, %v6592_v59  ;;  %v3441_v50 = vmul.f32 %v6926_v58, %v6650_v32  ;;  %v3895_v63 = vmul.f32 %v6926_v58, %v6534_v30 }
 0x458   : > { %9108 = vst [vmem:[#allocation158_spill] sm:$0xff] %v6918_v6  ;;  %9109 = vst [vmem:[#allocation159_spill] sm:$0xff] %v6921_v48  ;;  %v6947_v6 = vstv %s6836_s4  ;;  %v4599_v48 = vpop.f32.mrb[2].mxu0  ;;  %s7913_s4 = sld [smem:[#allocation4 + $0x1]] }
 0x459   : > { %9110 = vst [vmem:[#allocation160_spill] sm:$0xff] %v6924_v51  ;;  %9111 = vst [vmem:[#allocation161_spill] sm:$0xff] %v6926_v58  ;;  %v4600_v51 = vpop.f32.mrb[3].mxu0  ;;  %v3903_v40 = vadd.f32 %v3899_v3, %v6589_v20  ;;  %v3445_v5 = vadd.f32 %v3441_v50, %v6608_v44 }
 0x45a   : > { %9112 = vst [vmem:[#allocation162_spill] sm:$0xff] %v6929_v33  ;;  %9113 = vst [vmem:[#allocation163_spill] sm:$0xff] %v6932_v23  ;;  %v3375_v23 = vmul.f32 %v6926_v58, %v6634_v46  ;;  %v3849_v33 = vadd.f32 %v3845_v39, %v6573_v21  ;;  %v4602_v62 = vpop.f32.mrb[4].mxu0 }
 0x45b   : > { %9114 = vst [vmem:[#allocation164_spill] sm:$0xff] %v6935_v7  ;;  %9115 = vst [vmem:[#allocation165_spill] sm:$0xff] %v6938_v28  ;;  %v6965_v7 = vadd.f32 %v4600_v51, %v4599_v48  ;;  %v3783_v28 = vadd.f32 %v3779_v34, %v6551_v29 }
 0x45c   : > { %9116 = vst [vmem:[#allocation166_spill] sm:$0xff] %v6941_v47  ;;  %9117 = vst [vmem:[#allocation167_spill] sm:$0xff] %v6944_v54  ;;  %v3495_v54 = vmul.f32 %v6926_v58, %v6653_v56  ;;  %v3841_v47 = vmul.f32 %v6926_v58, %v6517_v10  ;;  %v3379_v0 = vadd.f32 %v3375_v23, %v6605_v52  ;;  %v4603_v52 = vpop.f32.mrb[5].mxu0 }
 0x45d   : > { %9118 = vst [vmem:[#allocation168_spill] sm:$0xff] %v6947_v6  ;;  %v3775_v6 = vmul.f32 %v6926_v58, %v6503_v2  ;;  %9119 = vst [vmem:[#allocation169_spill] sm:$0xff] %v6965_v7  ;;  %v3788_v51 = vmul.f32 %v6965_v7, %v6599_v11  ;;  %v3854_v48 = vmul.f32 %v6965_v7, %v6618_v18  ;;  %v4605_v31 = vpop.f32.mrb[6].mxu0 }
 0x45e   : > { %v3499_v53 = vadd.f32 %v3495_v54, %v6624_v35  ;;  %v3908_v21 = vmul.f32 %v6965_v7, %v6621_v19  ;;  %v3384_v3 = vmul.f32 %v6965_v7, %v6669_v22  ;;  %v3450_v54 = vmul.f32 %v6965_v7, %v6672_v38 }
 0x45f   : > { %v3504_v35 = vmul.f32 %v6965_v7, %v6714_v12  ;;  %v3780_v44 = vmul.f32 %v6965_v7, %v6567_v24  ;;  %v3846_v50 = vmul.f32 %v6965_v7, %v6583_v55  ;;  %v6991_v23 = vadd.f32 %v4603_v52, %v4602_v62  ;;  %v4606_v55 = vpop.f32.mrb[7].mxu0 }
 0x460   : > { %v3792_v29 = vadd.f32 %v3788_v51, %v3783_v28  ;;  %v3858_v20 = vadd.f32 %v3854_v48, %v3849_v33  ;;  %v3912_v34 = vadd.f32 %v3908_v21, %v3903_v40  ;;  %v3388_v39 = vadd.f32 %v3384_v3, %v3379_v0 }
 0x461   : > { %9120 = vst [vmem:[#allocation170_spill] sm:$0xff] %v6991_v23  ;;  %v3454_v30 = vadd.f32 %v3450_v54, %v3445_v5  ;;  %v3508_v10 = vadd.f32 %v3504_v35, %v3499_v53  ;;  %v3784_v16 = vadd.f32 %v3780_v44, %v3775_v6  ;;  %v3789_v43 = vmul.f32 %v6991_v23, %v6599_v11 }
 0x462   : > { %v3801_v8 = vadd.f32 %v6615_v26, %v3792_v29  ;;  %v3867_v27 = vadd.f32 %v6631_v45, %v3858_v20  ;;  %v3921_v60 = vadd.f32 %v6647_v61, %v3912_v34  ;;  %v3397_v62 = vadd.f32 %v6685_v57, %v3388_v39 }
 0x463   : > { %v3463_v33 = vadd.f32 %v6688_v42, %v3454_v30  ;;  %v3517_v40 = vadd.f32 %v6701_v1, %v3508_v10  ;;  %v3850_v0 = vadd.f32 %v3846_v50, %v3841_v47  ;;  %v7001_v53 = vadd.f32 %v4606_v55, %v4605_v31  ;;  %v4608_v47 = vpop.f32.mrb[8].mxu0 }
 0x464   : > { %v3793_v6 = vadd.f32 %v3789_v43, %v3784_v16  ;;  %v3855_v5 = vmul.f32 %v6991_v23, %v6618_v18  ;;  %v3900_v61 = vmul.f32 %v6965_v7, %v6592_v59  ;;  %v3909_v45 = vmul.f32 %v6991_v23, %v6621_v19  ;;  %v4609_v28 = vpop.f32.mrb[9].mxu0 }
 0x465   : > { %9121 = vst [vmem:[#allocation171_spill] sm:$0xff] %v7001_v53  ;;  %v3371_v57 = vmul.f32 %v6926_v58, %v6558_v37  ;;  %v3376_v42 = vmul.f32 %v6965_v7, %v6634_v46  ;;  %v3385_v55 = vmul.f32 %v6991_v23, %v6669_v22  ;;  %v3437_v26 = vmul.f32 %v6926_v58, %v6561_v49  ;;  %v4611_v50 = vpop.f32.mrb[10].mxu0 }
 0x466   : > { %v3859_v43 = vadd.f32 %v3855_v5, %v3850_v0  ;;  %v3904_v16 = vadd.f32 %v3900_v61, %v3895_v63  ;;  %v3442_v31 = vmul.f32 %v6965_v7, %v6650_v32  ;;  %v7021_v10 = vmul.f32 %v6991_v23, %v6672_v38  ;;  %v4612_v0 = vpop.f32.mrb[11].mxu0 }
 0x467   : > { %v3380_v1 = vadd.f32 %v3376_v42, %v3371_v57  ;;  %v3491_v30 = vmul.f32 %v6926_v58, %v6576_v14  ;;  %v3496_v51 = vmul.f32 %v6965_v7, %v6653_v56  ;;  %v7027_v48 = vadd.f32 %v4609_v28, %v4608_v47  ;;  %v9127_v14 = vld [vmem:[#allocation107_spill] sm:$0xff] }
 0x468   : > { %v7029_v63 = vadd.f32 %v3909_v45, %v3904_v16  ;;  %v7031_v21 = vadd.f32 %v3442_v31, %v3437_v26  ;;  %v7035_v3 = vmul.f32 %v6991_v23, %v6714_v12  ;;  %v7043_v35 = vmul.f32 %v6965_v7, %v6503_v2  ;;  %v9126_v12 = vld [vmem:[#allocation102_spill] sm:$0xff] }
 0x469   : > { %9122 = vst [vmem:[#allocation172_spill] sm:$0xff] %v7027_v48  ;;  %v7037_v52 = vadd.f32 %v3385_v55, %v3380_v1  ;;  %v7039_v54 = vadd.f32 %v3496_v51, %v3491_v30  ;;  %v7047_v44 = vmul.f32 %v6991_v23, %v6567_v24  ;;  %v3806_v29 = vmul.f32 %v7027_v48, %v6663_v25  ;;  %v4614_v30 = vpop.f32.mrb[0].mxu1  ;;  %v9124_v51 = vld [vmem:[#allocation100_spill] sm:$0xff]  ;;  %v9125_v24 = vld [vmem:[#allocation101_spill] sm:$0xff] }
 0x46a   : > { %v3872_v20 = vmul.f32 %v7027_v48, %v6666_v4  ;;  %v3926_v34 = vmul.f32 %v7027_v48, %v6682_v17  ;;  %v3402_v39 = vmul.f32 %v7027_v48, %v6711_v36  ;;  %v3468_v5 = vmul.f32 %v7027_v48, %v6730_v9 }
 0x46b   : > { %v3522_v61 = vmul.f32 %v7027_v48, %v6775_v15  ;;  %v3798_v45 = vmul.f32 %v7027_v48, %v6570_v41  ;;  %v3864_v57 = vmul.f32 %v7027_v48, %v6586_v13  ;;  %v7065_v42 = vadd.f32 %v4612_v0, %v4611_v50 }
 0x46c   : > { %v3810_v55 = vadd.f32 %v3806_v29, %v3801_v8  ;;  %v3876_v47 = vadd.f32 %v3872_v20, %v3867_v27  ;;  %v3930_v16 = vadd.f32 %v3926_v34, %v3921_v60  ;;  %v3406_v26 = vadd.f32 %v3402_v39, %v3397_v62  ;;  %v4615_v8 = vpop.f32.mrb[1].mxu1  ;;  %v9128_v27 = vld [vmem:[#allocation110_spill] sm:$0xff] }
 0x46d   : > { %9123 = vst [vmem:[#allocation173_spill] sm:$0xff] %v7065_v42  ;;  %v3472_v31 = vadd.f32 %v3468_v5, %v3463_v33  ;;  %v3526_v28 = vadd.f32 %v3522_v61, %v3517_v40  ;;  %v3802_v1 = vadd.f32 %v3798_v45, %v3793_v6  ;;  %v3815_v58 = vmul.f32 %v7065_v42, %v9124_v51  ;;  %v9129_v62 = vld [vmem:[#allocation118_spill] sm:$0xff]  ;;  %v4617_v38 = vpop.f32.mrb[2].mxu1 }
 0x46e   : > { %v3881_v2 = vmul.f32 %v7065_v42, %v9125_v24  ;;  %v3935_v56 = vmul.f32 %v7065_v42, %v9126_v12  ;;  %v3411_v50 = vmul.f32 %v7065_v42, %v9127_v14  ;;  %v3477_v60 = vmul.f32 %v7065_v42, %v9128_v27  ;;  %v4618_v37 = vpop.f32.mrb[3].mxu1 }
 0x46f   : > { %v3531_v33 = vmul.f32 %v7065_v42, %v9129_v62  ;;  %v3807_v40 = vmul.f32 %v7065_v42, %v6663_v25  ;;  %v3868_v6 = vadd.f32 %v3864_v57, %v3859_v43  ;;  %v7081_v29 = vadd.f32 %v4615_v8, %v4614_v30 }
 0x470   : > { %v3819_v20 = vadd.f32 %v3815_v58, %v3810_v55  ;;  %v3885_v34 = vadd.f32 %v3881_v2, %v3876_v47  ;;  %v3939_v39 = vadd.f32 %v3935_v56, %v3930_v16  ;;  %v3415_v0 = vadd.f32 %v3411_v50, %v3406_v26  ;;  %v9131_v56 = vld [vmem:[#allocation91_spill] sm:$0xff] }
 0x471   : > { %9130 = vst [vmem:[#allocation100_spill] sm:$0xff] %v7081_v29  ;;  %v3481_v5 = vadd.f32 %v3477_v60, %v3472_v31  ;;  %v3535_v61 = vadd.f32 %v3531_v33, %v3526_v28  ;;  %v3811_v45 = vadd.f32 %v3807_v40, %v3802_v1  ;;  %v3816_v22 = vmul.f32 %v7081_v29, %v9124_v51 }
 0x472   : > { %v3827_v32 = vrot.slane %v3819_v20, 7  ;;  %v3947_v49 = vrot.slane %v3939_v39, 1  ;;  %v3873_v46 = vmul.f32 %v7065_v42, %v6666_v4  ;;  %v3423_v43 = vrot.slane %v3415_v0, 7 }
 0x473   : > { %v3543_v57 = vrot.slane %v3535_v61, 1  ;;  %v3882_v2 = vmul.f32 %v7081_v29, %v9125_v24  ;;  %v3918_v58 = vmul.f32 %v7027_v48, %v9131_v56  ;;  %v7091_v55 = vadd.f32 %v4618_v37, %v4617_v38  ;;  %v9133_v37 = vld [vmem:[#allocation93_spill] sm:$0xff]  ;;  %v9136_v61 = vld [vmem:[#allocation94_spill] sm:$0xff] }
 0x474   : > { %v3835_v47 = vsel %vm649_vm0, 0.0, %v3827_v32  ;;  %v3955_v16 = vsel %vm656_vm1, %v3947_v49, 0.0  ;;  %v3820_v26 = vadd.f32 %v3816_v22, %v3811_v45  ;;  %v3431_v28 = vsel %vm649_vm0, 0.0, %v3423_v43 }
 0x475   : > { %9132 = vst [vmem:[#allocation101_spill] sm:$0xff] %v7091_v55  ;;  %v3889_v31 = vadd.f32 %v3885_v34, %v3835_v47  ;;  %v3551_v1 = vsel %vm656_vm1, %v3543_v57, 0.0  ;;  %v3877_v30 = vadd.f32 %v3873_v46, %v3868_v6  ;;  %v3485_v50 = vadd.f32 %v3481_v5, %v3431_v28 }
 0x476   : > { %v3828_v8 = vrot.slane %v3820_v26, 7  ;;  %v3922_v60 = vadd.f32 %v3918_v58, %v7029_v63  ;;  %v3927_v33 = vmul.f32 %v7065_v42, %v6682_v17  ;;  %v3936_v22 = vmul.f32 %v7081_v29, %v9126_v12  ;;  %v9137_v58 = vld [vmem:[#allocation97_spill] sm:$0xff] }
 0x477   : > { %v3959_v38 = vadd.f32 %v3955_v16, %v3889_v31  ;;  %v3886_v32 = vadd.f32 %v3882_v2, %v3877_v30  ;;  %v3394_v49 = vmul.f32 %v7027_v48, %v9133_v37  ;;  %v3555_v40 = vadd.f32 %v3551_v1, %v3485_v50 }
 0x478   : > { %v3836_v46 = vsel %vm649_vm0, 0.0, %v3828_v8  ;;  %v3931_v6 = vadd.f32 %v3927_v33, %v3922_v60  ;;  %v3403_v63 = vmul.f32 %v7065_v42, %v6711_v36  ;;  %v3412_v39 = vmul.f32 %v7081_v29, %v9127_v14 }
 0x479   : > { %3967 = vrot.lane.b32.xlu1 %v3959_v38, %s9134_s24  ;;  %v3890_v20 = vadd.f32 %v3886_v32, %v3836_v46  ;;  %v3398_v34 = vadd.f32 %v3394_v49, %v7037_v52  ;;  %v3455_v0 = vadd.f32 %v7021_v10, %v7031_v21  ;;  %3563 = vrot.lane.b32.xlu0 %v3555_v40, %s9135_s10  ;;  %v7140_v60 = vstv %s7100_s13  ;;  %s9263_s13 = sld [smem:[#allocation60_spill]] }
 0x47a   : > { %v3940_v5 = vadd.f32 %v3936_v22, %v3931_v6  ;;  %v3460_v45 = vmul.f32 %v7027_v48, %v9136_v61  ;;  %v3469_v43 = vmul.f32 %v7065_v42, %v6730_v9  ;;  %v3478_v57 = vmul.f32 %v7081_v29, %v9128_v27  ;;  %9138 = vst [vmem:[#allocation102_spill] sm:$0xff] %v7140_v60  ;;  %v9139_v22 = vld [vmem:[#allocation78_spill] sm:$0xff] }
 0x47b   : > { %v3407_v52 = vadd.f32 %v3403_v63, %v3398_v34  ;;  %v3509_v2 = vadd.f32 %v7035_v3, %v7039_v54  ;;  %v3514_v10 = vmul.f32 %v7027_v48, %v9137_v58  ;;  %v3523_v21 = vmul.f32 %v7065_v42, %v6775_v15 }
 0x47c   : > { %v3948_v47 = vrot.slane %v3940_v5, 1  ;;  %v3464_v16 = vadd.f32 %v3460_v45, %v3455_v0  ;;  %v3532_v26 = vmul.f32 %v7081_v29, %v9129_v62  ;;  %v3785_v31 = vadd.f32 %v7047_v44, %v7043_v35 }
 0x47d   : > { %v3416_v28 = vadd.f32 %v3412_v39, %v3407_v52  ;;  %v3518_v1 = vadd.f32 %v3514_v10, %v3509_v2  ;;  %v3790_v30 = vmul.f32 %v7001_v53, %v6599_v11  ;;  %v3799_v3 = vmul.f32 %v7065_v42, %v6570_v41  ;;  %v9140_v11 = vld [vmem:[#allocation90_spill] sm:$0xff]  ;;  %v9141_v2 = vld [vmem:[#allocation81_spill] sm:$0xff] }
 0x47e   : > { %v3956_v54 = vsel %vm656_vm1, %v3948_v47, 0.0  ;;  %v3473_v50 = vadd.f32 %v3469_v43, %v3464_v16  ;;  %v3808_v8 = vmul.f32 %v7081_v29, %v6663_v25  ;;  %v3842_v49 = vmul.f32 %v6965_v7, %v9139_v22  ;;  %v2177_v43 = vpop.permute.xlu1 %2176 }
 0x47f   : > { %v3960_v33 = vadd.f32 %v3956_v54, %v3890_v20  ;;  %v3424_v38 = vrot.slane %v3416_v28, 7  ;;  %v3527_v32 = vadd.f32 %v3523_v21, %v3518_v1  ;;  %v3794_v35 = vadd.f32 %v3790_v30, %v3785_v31 }
 0x480   : > { %v3482_v44 = vadd.f32 %v3478_v57, %v3473_v50  ;;  %v3847_v40 = vmul.f32 %v6991_v23, %v9140_v11  ;;  %v3856_v46 = vmul.f32 %v7001_v53, %v6618_v18  ;;  %v3817_v20 = vmul.f32 %v7091_v55, %v9124_v51  ;;  %v2175_v57 = vpop.permute.xlu0 %2174  ;;  %v9142_v50 = vld [vmem:[#allocation85_spill] sm:$0xff] }
 0x481   : > { %3969 = vrot.lane.b32.xlu1 %v3960_v33, %s9134_s24  ;;  %v3432_v6 = vsel %vm649_vm0, 0.0, %v3424_v38  ;;  %v3536_v63 = vadd.f32 %v3532_v26, %v3527_v32  ;;  %v3803_v34 = vadd.f32 %v3799_v3, %v3794_v35  ;;  %v3865_v5 = vmul.f32 %v7065_v42, %v6586_v13  ;;  %v9143_v33 = vld [vmem:[#allocation92_spill] sm:$0xff] }
 0x482   : > { %v3486_v39 = vadd.f32 %v3482_v44, %v3432_v6  ;;  %v3851_v0 = vadd.f32 %v3847_v40, %v3842_v49  ;;  %v3874_v45 = vmul.f32 %v7081_v29, %v6666_v4  ;;  %v3896_v10 = vmul.f32 %v6965_v7, %v9141_v2  ;;  %v7173_v38 = vpop.permute.xlu1 %2180  ;;  %v9144_v49 = vld [vmem:[#allocation98_spill] sm:$0xff] }
 0x483   : > { %v3544_v18 = vrot.slane %v3536_v63, 1  ;;  %v3812_v52 = vadd.f32 %v3808_v8, %v3803_v34  ;;  %v3901_v21 = vmul.f32 %v6991_v23, %v6592_v59  ;;  %v3883_v51 = vmul.f32 %v7091_v55, %v9125_v24 }
 0x484   : > { %v3860_v47 = vadd.f32 %v3856_v46, %v3851_v0  ;;  %v3910_v16 = vmul.f32 %v7001_v53, %v6621_v19  ;;  %v3919_v26 = vmul.f32 %v7065_v42, %v9131_v56  ;;  %v3928_v30 = vmul.f32 %v7081_v29, %v6682_v17  ;;  %v7175_v19 = vpop.permute.xlu0 %2178  ;;  %v9145_v0 = vld [vmem:[#allocation86_spill] sm:$0xff] }
 0x485   : > { %v3552_v31 = vsel %vm656_vm1, %v3544_v18, 0.0  ;;  %v3821_v28 = vadd.f32 %v3817_v20, %v3812_v52  ;;  %v3905_v1 = vadd.f32 %v3901_v21, %v3896_v10  ;;  %v3372_v8 = vmul.f32 %v6965_v7, %v9142_v50  ;;  %v9147_v21 = vld [vmem:[#allocation99_spill] sm:$0xff] }
 0x486   : > { %v3556_v3 = vadd.f32 %v3552_v31, %v3486_v39  ;;  %v3869_v54 = vadd.f32 %v3865_v5, %v3860_v47  ;;  %v3377_v24 = vmul.f32 %v6991_v23, %v9143_v33  ;;  %v3937_v44 = vmul.f32 %v7091_v55, %v9126_v12  ;;  %v9146_v5 = vld [vmem:[#allocation95_spill] sm:$0xff] }
 0x487   : > { %v3829_v32 = vrot.slane %v3821_v28, 7  ;;  %v3914_v35 = vadd.f32 %v3910_v16, %v3905_v1  ;;  %v3386_v40 = vmul.f32 %v7001_v53, %v9144_v49  ;;  %v3395_v63 = vmul.f32 %v7065_v42, %v9133_v37  ;;  %v7195_v16 = vpop.permute.xlu1 %2212 }
 0x488   : > { %3565 = vrot.lane.b32.xlu0 %v3556_v3, %s9135_s10  ;;  %v3878_v46 = vadd.f32 %v3874_v45, %v3869_v54  ;;  %v3381_v6 = vadd.f32 %v3377_v24, %v3372_v8  ;;  %v3404_v34 = vmul.f32 %v7081_v29, %v6711_v36  ;;  %v3413_v39 = vmul.f32 %v7091_v55, %v9127_v14  ;;  %v7197_v31 = vpop.permute.xlu0 %2210  ;;  %v9148_v54 = vld [vmem:[#allocation89_spill] sm:$0xff]  ;;  %v9149_v24 = vld [vmem:[#allocation96_spill] sm:$0xff] }
 0x489   : > { %v3923_v20 = vadd.f32 %v3919_v26, %v3914_v35  ;;  %v3438_v12 = vmul.f32 %v6965_v7, %v9145_v0  ;;  %v3443_v18 = vmul.f32 %v6991_v23, %v9146_v5  ;;  %v3837_v52 = vsel %vm649_vm0, 0.0, %v3829_v32 }
 0x48a   : > { %v3887_v45 = vadd.f32 %v3883_v51, %v3878_v46  ;;  %v3390_v10 = vadd.f32 %v3386_v40, %v3381_v6  ;;  %v3452_v47 = vmul.f32 %v7001_v53, %v9147_v21  ;;  %v3461_v14 = vmul.f32 %v7065_v42, %v9136_v61  ;;  %v9150_v40 = vld [vmem:[#allocation104_spill] sm:$0xff] }
 0x48b   : > { %v3932_v26 = vadd.f32 %v3928_v30, %v3923_v20  ;;  %v3447_v28 = vadd.f32 %v3443_v18, %v3438_v12  ;;  %v3470_v1 = vmul.f32 %v7081_v29, %v6730_v9  ;;  %v3479_v51 = vmul.f32 %v7091_v55, %v9128_v27  ;;  %v7215_v12 = vpop.permute.xlu1 %2184 }
 0x48c   : > { %v3399_v3 = vadd.f32 %v3395_v63, %v3390_v10  ;;  %v3492_v8 = vmul.f32 %v6965_v7, %v9148_v54  ;;  %v3497_v32 = vmul.f32 %v6991_v23, %v9149_v24  ;;  %v3891_v35 = vadd.f32 %v3887_v45, %v3837_v52  ;;  %v7217_v18 = vpop.permute.xlu0 %2182 }
 0x48d   : > { %v3941_v49 = vadd.f32 %v3937_v44, %v3932_v26  ;;  %v3456_v30 = vadd.f32 %v3452_v47, %v3447_v28  ;;  %v3506_v46 = vmul.f32 %v7001_v53, %v9150_v40  ;;  %v3515_v63 = vmul.f32 %v7065_v42, %v9137_v58  ;;  %v9151_v47 = vld [vmem:[#allocation75_spill] sm:$0xff]  ;;  %v9152_v28 = vld [vmem:[#allocation88_spill] sm:$0xff]  ;;  %v9153_v40 = vld [vmem:[#allocation33_spill] sm:$0xff] }
 0x48e   : > { %v3408_v6 = vadd.f32 %v3404_v34, %v3399_v3  ;;  %v3501_v20 = vadd.f32 %v3497_v32, %v3492_v8  ;;  %v3524_v27 = vmul.f32 %v7081_v29, %v6775_v15  ;;  %v3533_v44 = vmul.f32 %v7091_v55, %v9129_v62 }
 0x48f   : > { %v3949_v10 = vrot.slane %v3941_v49, 1  ;;  %v3465_v21 = vadd.f32 %v3461_v14, %v3456_v30  ;;  %v2190_v52 = vsel %vm790_vm3, %v2175_v57, %v2177_v43  ;;  %v3777_v26 = vmul.f32 %v6991_v23, %v9151_v47  ;;  %v9156_v47 = vld [vmem:[#allocation105_spill] sm:$0xff] }
 0x490   : > { %v3417_v45 = vadd.f32 %v3413_v39, %v3408_v6  ;;  %v3510_v34 = vadd.f32 %v3506_v46, %v3501_v20  ;;  %v3782_v3 = vmul.f32 %v7001_v53, %v9152_v28  ;;  %v7228_v42 = vmax.f32 %v9153_v40, %v2190_v52  ;;  %v7232_v39 = vpop.permute.xlu1 %2216  ;;  %v7234_v30 = vpop.permute.xlu0 %2214  ;;  %v9157_v40 = vld [vmem:[#allocation106_spill] sm:$0xff] }
 0x491   : > { %v3957_v8 = vsel %vm656_vm1, %v3949_v10, 0.0  ;;  %v3474_v32 = vadd.f32 %v3470_v1, %v3465_v21  ;;  %v3800_v14 = vmul.f32 %v7081_v29, %v6570_v41  ;;  %v3809_v6 = vmul.f32 %v7091_v55, %v6663_v25 }
 0x492   : > { %9154 = vst [vmem:[#allocation107_spill] sm:$0xff] %v7228_v42  ;;  %v3961_v62 = vadd.f32 %v3957_v8, %v3891_v35  ;;  %v3425_v49 = vrot.slane %v3417_v45, 7  ;;  %v3519_v43 = vadd.f32 %v3515_v63, %v3510_v34  ;;  %v3786_v57 = vadd.f32 %v3782_v3, %v3777_v26  ;;  %v9155_v63 = vld [vmem:[#allocation103_spill] sm:$0xff] }
 0x493   : > { %v3483_v46 = vadd.f32 %v3479_v51, %v3474_v32  ;;  %v3843_v1 = vmul.f32 %v6991_v23, %v9139_v22  ;;  %v3848_v20 = vmul.f32 %v7001_v53, %v9140_v11  ;;  %v3866_v21 = vmul.f32 %v7081_v29, %v6586_v13 }
 0x494   : > { %3971 = vrot.lane.b32.xlu1 %v3961_v62, %s9134_s24  ;;  %v3433_v41 = vsel %vm649_vm0, 0.0, %v3425_v49  ;;  %v3528_v35 = vadd.f32 %v3524_v27, %v3519_v43  ;;  %v3795_v10 = vadd.f32 %v9155_v63, %v3786_v57  ;;  %v3875_v25 = vmul.f32 %v7091_v55, %v6666_v4  ;;  %v2189_v3 = vpop.permute.xlu1 %2188 }
 0x495   : > { %v3852_v51 = vadd.f32 %v3848_v20, %v3843_v1  ;;  %v3897_v22 = vmul.f32 %v6991_v23, %v9141_v2  ;;  %v3902_v11 = vmul.f32 %v7001_v53, %v6592_v59  ;;  %v3487_v52 = vadd.f32 %v3483_v46, %v3433_v41  ;;  %v2187_v2 = vpop.permute.xlu0 %2186  ;;  %v9159_v1 = vld [vmem:[#allocation109_spill] sm:$0xff] }
 0x496   : > { %v3537_v45 = vadd.f32 %v3533_v44, %v3528_v35  ;;  %v3804_v34 = vadd.f32 %v3800_v14, %v3795_v10  ;;  %v3920_v27 = vmul.f32 %v7081_v29, %v9131_v56  ;;  %v3373_v13 = vmul.f32 %v6991_v23, %v9142_v50 }
 0x497   : > { %v3861_v26 = vadd.f32 %v9156_v47, %v3852_v51  ;;  %v3906_v28 = vadd.f32 %v3902_v11, %v3897_v22  ;;  %v3378_v4 = vmul.f32 %v7001_v53, %v9143_v33  ;;  %v3929_v59 = vmul.f32 %v7091_v55, %v6682_v17  ;;  %v9158_v33 = vld [vmem:[#allocation108_spill] sm:$0xff]  ;;  %v9160_v11 = vld [vmem:[#allocation111_spill] sm:$0xff] }
 0x498   : > { %v3545_v8 = vrot.slane %v3537_v45, 1  ;;  %v3813_v32 = vadd.f32 %v3809_v6, %v3804_v34  ;;  %v3396_v44 = vmul.f32 %v7081_v29, %v9133_v37  ;;  %v3405_v50 = vmul.f32 %v7091_v55, %v6711_v36  ;;  %v2221_v51 = vpop.permute.xlu1 %2220  ;;  %v9162_v34 = vld [vmem:[#allocation112_spill] sm:$0xff] }
 0x499   : > { %v3870_v56 = vadd.f32 %v3866_v21, %v3861_v26  ;;  %v3915_v14 = vadd.f32 %v9157_v40, %v3906_v28  ;;  %v3382_v62 = vadd.f32 %v3378_v4, %v3373_v13  ;;  %v3439_v57 = vmul.f32 %v6991_v23, %v9145_v0  ;;  %v9165_v40 = vld [vmem:[#allocation37_spill] sm:$0xff] }
 0x49a   : > { %v3553_v49 = vsel %vm656_vm1, %v3545_v8, 0.0  ;;  %v3822_v43 = vadd.f32 %v9158_v33, %v3813_v32  ;;  %v3444_v17 = vmul.f32 %v7001_v53, %v9146_v5  ;;  %v3462_v36 = vmul.f32 %v7081_v29, %v9136_v61  ;;  %v9161_v61 = vld [vmem:[#allocation114_spill] sm:$0xff]  ;;  %v9163_v32 = vld [vmem:[#allocation119_spill] sm:$0xff] }
 0x49b   : > { %v3557_v46 = vadd.f32 %v3553_v49, %v3487_v52  ;;  %v3879_v6 = vadd.f32 %v3875_v25, %v3870_v56  ;;  %v3924_v37 = vadd.f32 %v3920_v27, %v3915_v14  ;;  %v3391_v20 = vadd.f32 %v9159_v1, %v3382_v62  ;;  %v2219_v25 = vpop.permute.xlu0 %2218  ;;  %v9167_v62 = vld [vmem:[#allocation42_spill] sm:$0xff]  ;;  %v9168_v49 = vld [vmem:[#allocation49_spill] sm:$0xff]  ;;  %v9171_v1 = vld [vmem:[#allocation120_spill] sm:$0xff] }
 0x49c   : > { %v3830_v41 = vrot.slane %v3822_v43, 7  ;;  %v3448_v35 = vadd.f32 %v3444_v17, %v3439_v57  ;;  %v3471_v63 = vmul.f32 %v7091_v55, %v6730_v9  ;;  %v3493_v5 = vmul.f32 %v6991_v23, %v9148_v54  ;;  %v2225_v43 = vpop.permute.xlu1 %2224 }
 0x49d   : > { %3567 = vrot.lane.b32.xlu0 %v3557_v46, %s9135_s10  ;;  %v3933_v10 = vadd.f32 %v3929_v59, %v3924_v37  ;;  %v3400_v0 = vadd.f32 %v3396_v44, %v3391_v20  ;;  %v3498_v21 = vmul.f32 %v7001_v53, %v9149_v24  ;;  %v3888_v52 = vadd.f32 %v9160_v11, %v3879_v6  ;;  %v9164_v59 = vld [vmem:[#allocation115_spill] sm:$0xff]  ;;  %v9210_v53 = vld [vmem:[#allocation113_spill] sm:$0xff] }
 0x49e   : > { %v3838_v22 = vsel %vm649_vm0, 0.0, %v3830_v41  ;;  %v3457_v45 = vadd.f32 %v9161_v61, %v3448_v35  ;;  %v3516_v9 = vmul.f32 %v7081_v29, %v9137_v58  ;;  %v3525_v54 = vmul.f32 %v7091_v55, %v6775_v15  ;;  %v9172_v41 = vld [vmem:[#allocation54_spill] sm:$0xff]  ;;  %v9212_v29 = vld [vmem:[#allocation124_spill] sm:$0xff] }
 0x49f   : > { %v3942_v27 = vadd.f32 %v9162_v34, %v3933_v10  ;;  %v3409_v47 = vadd.f32 %v3405_v50, %v3400_v0  ;;  %v3502_v26 = vadd.f32 %v3498_v21, %v3493_v5  ;;  %v3892_v28 = vadd.f32 %v3888_v52, %v3838_v22  ;;  %v2223_v57 = vpop.permute.xlu0 %2222  ;;  %v9173_v10 = vld [vmem:[#allocation123_spill] sm:$0xff]  ;;  %v9176_v22 = vld [vmem:[#allocation59_spill] sm:$0xff] }
 0x4a0   : > { %v3466_v24 = vadd.f32 %v3462_v36, %v3457_v45  ;;  %v2191_v13 = vsel %vm790_vm3, %v7175_v19, %v7173_v38  ;;  %v2226_v4 = vsel %vm790_vm3, %v7197_v31, %v7195_v16  ;;  %v2192_v56 = vsel %vm790_vm3, %v7217_v18, %v7215_v12  ;;  %v9170_v18 = vld [vmem:[#allocation47_spill] sm:$0xff]  ;;  %v9177_v52 = vld [vmem:[#allocation129_spill] sm:$0xff] }
 0x4a1   : > { %v3950_v8 = vrot.slane %v3942_v27, 1  ;;  %v3418_v58 = vadd.f32 %v9163_v32, %v3409_v47  ;;  %v3511_v44 = vadd.f32 %v9164_v59, %v3502_v26  ;;  %v7303_v14 = vmax.f32 %v9165_v40, %v2191_v13  ;;  %v9175_v5 = vld [vmem:[#allocation56_spill] sm:$0xff]  ;;  %v9179_v27 = vld [vmem:[#allocation134_spill] sm:$0xff]  ;;  %v9185_v40 = vld [vmem:[#allocation145_spill] sm:$0xff] }
 0x4a2   : > { %v3475_v15 = vadd.f32 %v3471_v63, %v3466_v24  ;;  %v2234_v50 = vadd.f32 %v2226_v4, %v9167_v62  ;;  %v2227_v38 = vsel %vm790_vm3, %v7234_v30, %v7232_v39  ;;  %v7314_v46 = vmax.f32 %v9170_v18, %v2192_v56  ;;  %v9182_v13 = vld [vmem:[#allocation130_spill] sm:$0xff]  ;;  %v9190_v18 = vld [vmem:[#allocation128_spill] sm:$0xff] }
 0x4a3   : > { %9166 = vst [vmem:[#allocation110_spill] sm:$0xff] %v7303_v14  ;;  %v3958_v19 = vsel %vm656_vm1, %v3950_v8, 0.0  ;;  %v3426_v16 = vrot.slane %v3418_v58, 7  ;;  %v3520_v31 = vadd.f32 %v3516_v9, %v3511_v44  ;;  %v2235_v33 = vadd.f32 %v2227_v38, %v9168_v49  ;;  %v9178_v9 = vld [vmem:[#allocation122_spill] sm:$0xff]  ;;  %v9183_v58 = vld [vmem:[#allocation125_spill] sm:$0xff] }
 0x4a4   : > { %v3962_v17 = vadd.f32 %v3958_v19, %v3892_v28  ;;  %v7311_v12 = vmul.f32 0.0625, %v2234_v50  ;;  %v2193_v6 = vsel %vm790_vm3, %v2187_v2, %v2189_v3  ;;  %v3484_v39 = vadd.f32 %v9171_v1, %v3475_v15  ;;  %v9174_v3 = vld [vmem:[#allocation121_spill] sm:$0xff]  ;;  %v9184_v44 = vld [vmem:[#allocation138_spill] sm:$0xff]  ;;  %v9186_v50 = vld [vmem:[#allocation131_spill] sm:$0xff] }
 0x4a5   : > { %v3434_v37 = vsel %vm649_vm0, 0.0, %v3426_v16  ;;  %v3529_v30 = vadd.f32 %v3525_v54, %v3520_v31  ;;  %v7319_v20 = vmul.f32 0.0625, %v2235_v33  ;;  %v7323_v35 = vmax.f32 %v9172_v41, %v2193_v6  ;;  %v9181_v28 = vld [vmem:[#allocation141_spill] sm:$0xff]  ;;  %v9187_v19 = vld [vmem:[#allocation135_spill] sm:$0xff] }
 0x4a6   : > { %9169 = vst [vmem:[#allocation118_spill] sm:$0xff] %v7311_v12  ;;  %3973 = vrot.lane.b32.xlu1 %v3962_v17, %s9134_s24  ;;  %v2228_v36 = vsel %vm790_vm3, %v2219_v25, %v2221_v51  ;;  %v2229_v63 = vsel %vm790_vm3, %v2223_v57, %v2225_v43  ;;  %v3140_v0 = vmul.f32 %v9173_v10, %v7228_v42  ;;  %v9180_v25 = vld [vmem:[#allocation126_spill] sm:$0xff]  ;;  %v9188_v49 = vld [vmem:[#allocation133_spill] sm:$0xff]  ;;  %v9189_v57 = vld [vmem:[#allocation143_spill] sm:$0xff] }
 0x4a7   : > { %v3538_v2 = vadd.f32 %v9174_v3, %v3529_v30  ;;  %v2236_v21 = vadd.f32 %v2228_v36, %v9175_v5  ;;  %v2237_v11 = vadd.f32 %v2229_v63, %v9176_v22  ;;  %v3149_v61 = vmul.f32 %v9177_v52, %v7303_v14  ;;  %v9193_v41 = vld [vmem:[#allocation157_spill] sm:$0xff] }
 0x4a8   : > { %v3488_v45 = vadd.f32 %v3484_v39, %v3434_v37  ;;  %v3144_v34 = vadd.f32 %v3140_v0, %v9178_v9  ;;  %v3167_v51 = vmul.f32 %v9179_v27, %v7311_v12  ;;  %v3206_v47 = vmul.f32 %v9180_v25, %v7228_v42  ;;  %v9191_v37 = vld [vmem:[#allocation146_spill] sm:$0xff]  ;;  %v9194_v0 = vld [vmem:[#allocation137_spill] sm:$0xff] }
 0x4a9   : > { %v3546_v26 = vrot.slane %v3538_v2, 1  ;;  %v7339_v54 = vmul.f32 0.0625, %v2236_v21  ;;  %v3176_v24 = vmul.f32 %v9181_v28, %v7319_v20  ;;  %v3215_v4 = vmul.f32 %v9182_v13, %v7303_v14  ;;  %v9192_v39 = vld [vmem:[#allocation150_spill] sm:$0xff]  ;;  %v9196_v21 = vld [vmem:[#allocation153_spill] sm:$0xff] }
 0x4aa   : > { %v7345_v8 = vmul.f32 0.0625, %v2237_v11  ;;  %v3153_v32 = vadd.f32 %v3149_v61, %v3144_v34  ;;  %v3210_v59 = vadd.f32 %v3206_v47, %v9183_v58  ;;  %v3233_v56 = vmul.f32 %v9184_v44, %v7311_v12  ;;  %v9195_v2 = vld [vmem:[#allocation162_spill] sm:$0xff]  ;;  %v9197_v61 = vld [vmem:[#allocation149_spill] sm:$0xff]  ;;  %v9199_v47 = vld [vmem:[#allocation159_spill] sm:$0xff] }
 0x4ab   : > { %v3554_v15 = vsel %vm656_vm1, %v3546_v26, 0.0  ;;  %v3242_v62 = vmul.f32 %v9185_v40, %v7319_v20  ;;  %v3260_v38 = vmul.f32 %v9186_v50, %v7228_v42  ;;  %v3269_v16 = vmul.f32 %v9187_v19, %v7303_v14  ;;  %v9198_v9 = vld [vmem:[#allocation165_spill] sm:$0xff] }
 0x4ac   : > { %v3558_v31 = vadd.f32 %v3554_v15, %v3488_v45  ;;  %v3162_v33 = vadd.f32 %v9188_v49, %v3153_v32  ;;  %v3219_v43 = vadd.f32 %v3215_v4, %v3210_v59  ;;  %v3287_v17 = vmul.f32 %v9189_v57, %v7311_v12  ;;  %v9201_v59 = vld [vmem:[#allocation164_spill] sm:$0xff] }
 0x4ad   : > { %v3264_v6 = vadd.f32 %v3260_v38, %v9190_v18  ;;  %v3296_v1 = vmul.f32 %v9191_v37, %v7319_v20  ;;  %v2736_v30 = vmul.f32 %v9192_v39, %v7228_v42  ;;  %v2745_v36 = vmul.f32 %v9193_v41, %v7303_v14  ;;  %v9202_v38 = vld [vmem:[#allocation142_spill] sm:$0xff] }
 0x4ae   : > { %3569 = vrot.lane.b32.xlu0 %v3558_v31, %s9135_s10  ;;  %v3171_v63 = vadd.f32 %v3167_v51, %v3162_v33  ;;  %v3228_v3 = vadd.f32 %v9194_v0, %v3219_v43  ;;  %v2763_v5 = vmul.f32 %v9195_v2, %v7311_v12  ;;  %v2802_v22 = vmul.f32 %v9196_v21, %v7228_v42  ;;  %v9200_v51 = vld [vmem:[#allocation151_spill] sm:$0xff]  ;;  %v9204_v43 = vld [vmem:[#allocation160_spill] sm:$0xff] }
 0x4af   : > { %v3273_v11 = vadd.f32 %v3269_v16, %v3264_v6  ;;  %v2740_v45 = vadd.f32 %v2736_v30, %v9197_v61  ;;  %v2772_v34 = vmul.f32 %v9198_v9, %v7319_v20  ;;  %v2811_v26 = vmul.f32 %v9199_v47, %v7303_v14  ;;  %v9203_v16 = vld [vmem:[#allocation155_spill] sm:$0xff]  ;;  %v9207_v61 = vld [vmem:[#allocation154_spill] sm:$0xff] }
 0x4b0   : > { %v3180_v4 = vadd.f32 %v3176_v24, %v3171_v63  ;;  %v3237_v32 = vadd.f32 %v3233_v56, %v3228_v3  ;;  %v2806_v58 = vadd.f32 %v2802_v22, %v9200_v51  ;;  %v2829_v15 = vmul.f32 %v9201_v59, %v7311_v12  ;;  %v9205_v24 = vld [vmem:[#allocation166_spill] sm:$0xff] }
 0x4b1   : > { %v3282_v31 = vadd.f32 %v9202_v38, %v3273_v11  ;;  %v2749_v49 = vadd.f32 %v2745_v36, %v2740_v45  ;;  %v2856_v33 = vmul.f32 %v9203_v16, %v7228_v42  ;;  %v2865_v18 = vmul.f32 %v9204_v43, %v7303_v14  ;;  %v9206_v3 = vld [vmem:[#allocation158_spill] sm:$0xff]  ;;  %v9208_v11 = vld [vmem:[#allocation168_spill] sm:$0xff]  ;;  %v9209_v38 = vld [vmem:[#allocation163_spill] sm:$0xff] }
 0x4b2   : > { %v3188_v6 = vrot.slane %v3180_v4, 7  ;;  %v3246_v30 = vadd.f32 %v3242_v62, %v3237_v32  ;;  %v2815_v0 = vadd.f32 %v2811_v26, %v2806_v58  ;;  %v2838_v56 = vmul.f32 %v9205_v24, %v7319_v20 }
 0x4b3   : > { %v3291_v63 = vadd.f32 %v3287_v17, %v3282_v31  ;;  %v2758_v22 = vadd.f32 %v9206_v3, %v2749_v49  ;;  %v2860_v51 = vadd.f32 %v2856_v33, %v9207_v61  ;;  %v2883_v36 = vmul.f32 %v9208_v11, %v7311_v12  ;;  %v9211_v61 = vld [vmem:[#allocation167_spill] sm:$0xff] }
 0x4b4   : > { %v3196_v45 = vsel %vm649_vm0, 0.0, %v3188_v6  ;;  %v2824_v55 = vadd.f32 %v9209_v38, %v2815_v0  ;;  %v3136_v4 = vmul.f32 %v9210_v53, %v7228_v42  ;;  %v3141_v62 = vmul.f32 %v9173_v10, %v7303_v14 }
 0x4b5   : > { %v3300_v26 = vadd.f32 %v3296_v1, %v3291_v63  ;;  %v2767_v32 = vadd.f32 %v2763_v5, %v2758_v22  ;;  %v2869_v17 = vadd.f32 %v2865_v18, %v2860_v51  ;;  %v2892_v58 = vmul.f32 %v7140_v60, %v7319_v20  ;;  %v9213_v18 = vld [vmem:[#allocation116_spill] sm:$0xff] }
 0x4b6   : > { %v3250_v31 = vadd.f32 %v3246_v30, %v3196_v45  ;;  %v2833_v49 = vadd.f32 %v2829_v15, %v2824_v55  ;;  %v3145_v33 = vadd.f32 %v3141_v62, %v3136_v4  ;;  %v3150_v6 = vmul.f32 %v9177_v52, %v7314_v46 }
 0x4b7   : > { %v3308_v3 = vrot.slane %v3300_v26, 1  ;;  %v2776_v0 = vadd.f32 %v2772_v34, %v2767_v32  ;;  %v2878_v38 = vadd.f32 %v9211_v61, %v2869_v17  ;;  %v3159_v23 = vmul.f32 %v9212_v29, %v7311_v12  ;;  %v9214_v32 = vld [vmem:[#allocation127_spill] sm:$0xff] }
 0x4b8   : > { %v2842_v48 = vadd.f32 %v2838_v56, %v2833_v49  ;;  %v3154_v1 = vadd.f32 %v3150_v6, %v3145_v33  ;;  %v3168_v5 = vmul.f32 %v9179_v27, %v7319_v20  ;;  %v3202_v30 = vmul.f32 %v9213_v18, %v7228_v42 }
 0x4b9   : > { %v3316_v55 = vsel %vm656_vm1, %v3308_v3, 0.0  ;;  %v2784_v15 = vrot.slane %v2776_v0, 7  ;;  %v2887_v63 = vadd.f32 %v2883_v36, %v2878_v38  ;;  %v3207_v34 = vmul.f32 %v9180_v25, %v7303_v14 }
 0x4ba   : > { %v3320_v22 = vadd.f32 %v3316_v55, %v3250_v31  ;;  %v3163_v51 = vadd.f32 %v3159_v23, %v3154_v1  ;;  %v3177_v45 = vmul.f32 %v9181_v28, %v7339_v54  ;;  %v3216_v56 = vmul.f32 %v9182_v13, %v7314_v46  ;;  %v9215_v31 = vld [vmem:[#allocation117_spill] sm:$0xff] }
 0x4bb   : > { %v2792_v4 = vsel %vm649_vm0, 0.0, %v2784_v15  ;;  %v2896_v62 = vadd.f32 %v2892_v58, %v2887_v63  ;;  %v3211_v26 = vadd.f32 %v3207_v34, %v3202_v30  ;;  %v3225_v17 = vmul.f32 %v9214_v32, %v7311_v12  ;;  %v9217_v63 = vld [vmem:[#allocation139_spill] sm:$0xff] }
 0x4bc   : > { %3328 = vrot.lane.b32.xlu1 %v3320_v22, %s9134_s24  ;;  %v2846_v36 = vadd.f32 %v2842_v48, %v2792_v4  ;;  %v3172_v49 = vadd.f32 %v3168_v5, %v3163_v51  ;;  %v3234_v23 = vmul.f32 %v9184_v44, %v7319_v20  ;;  %v3256_v33 = vmul.f32 %v9215_v31, %v7228_v42  ;;  %v9216_v48 = vld [vmem:[#allocation132_spill] sm:$0xff] }
 0x4bd   : > { %v2904_v6 = vrot.slane %v2896_v62, 1  ;;  %v3220_v3 = vadd.f32 %v3216_v56, %v3211_v26  ;;  %v3261_v0 = vmul.f32 %v9186_v50, %v7303_v14  ;;  %v3270_v58 = vmul.f32 %v9187_v19, %v7314_v46 }
 0x4be   : > { %v3181_v61 = vadd.f32 %v3177_v45, %v3172_v49  ;;  %v3243_v38 = vmul.f32 %v9185_v40, %v7339_v54  ;;  %v3279_v1 = vmul.f32 %v9216_v48, %v7311_v12  ;;  %v3288_v5 = vmul.f32 %v9189_v57, %v7319_v20  ;;  %v9218_v49 = vld [vmem:[#allocation147_spill] sm:$0xff] }
 0x4bf   : > { %v2912_v30 = vsel %vm656_vm1, %v2904_v6, 0.0  ;;  %v3229_v55 = vadd.f32 %v3225_v17, %v3220_v3  ;;  %v3265_v15 = vadd.f32 %v3261_v0, %v3256_v33  ;;  %v2732_v34 = vmul.f32 %v9217_v63, %v7228_v42  ;;  %v9219_v3 = vld [vmem:[#allocation140_spill] sm:$0xff] }
 0x4c0   : > { %v2916_v22 = vadd.f32 %v2912_v30, %v2846_v36  ;;  %v3189_v51 = vrot.slane %v3181_v61, 7  ;;  %v2737_v45 = vmul.f32 %v9192_v39, %v7303_v14  ;;  %v2746_v56 = vmul.f32 %v9193_v41, %v7314_v46 }
 0x4c1   : > { %v3238_v4 = vadd.f32 %v3234_v23, %v3229_v55  ;;  %v3274_v62 = vadd.f32 %v3270_v58, %v3265_v15  ;;  %v3297_v26 = vmul.f32 %v9191_v37, %v7339_v54  ;;  %v2755_v17 = vmul.f32 %v9218_v49, %v7311_v12 }
 0x4c2   : > { %2924 = vrot.lane.b32.xlu0 %v2916_v22, %s9135_s10  ;;  %v3197_v33 = vsel %vm649_vm0, 0.0, %v3189_v51  ;;  %v2741_v36 = vadd.f32 %v2737_v45, %v2732_v34  ;;  %v2764_v6 = vmul.f32 %v9195_v2, %v7319_v20  ;;  %v2798_v0 = vmul.f32 %v9219_v3, %v7228_v42  ;;  %v9220_v34 = vld [vmem:[#allocation152_spill] sm:$0xff] }
 0x4c3   : > { %v3247_v61 = vadd.f32 %v3243_v38, %v3238_v4  ;;  %v3283_v23 = vadd.f32 %v3279_v1, %v3274_v62  ;;  %v2803_v58 = vmul.f32 %v9196_v21, %v7303_v14  ;;  %v2812_v30 = vmul.f32 %v9199_v47, %v7314_v46  ;;  %v9221_v62 = vld [vmem:[#allocation144_spill] sm:$0xff] }
 0x4c4   : > { %v2750_v55 = vadd.f32 %v2746_v56, %v2741_v36  ;;  %v2773_v15 = vmul.f32 %v9198_v9, %v7339_v54  ;;  %v2821_v22 = vmul.f32 %v9220_v34, %v7311_v12  ;;  %v2830_v51 = vmul.f32 %v9201_v59, %v7319_v20  ;;  %v9222_v59 = vld [vmem:[#allocation156_spill] sm:$0xff] }
 0x4c5   : > { %v3251_v45 = vadd.f32 %v3247_v61, %v3197_v33  ;;  %v3292_v7 = vadd.f32 %v3288_v5, %v3283_v23  ;;  %v2807_v38 = vadd.f32 %v2803_v58, %v2798_v0  ;;  %v2839_v1 = vmul.f32 %v9205_v24, %v7339_v54 }
 0x4c6   : > { %v2759_v4 = vadd.f32 %v2755_v17, %v2750_v55  ;;  %v2852_v47 = vmul.f32 %v9221_v62, %v7228_v42  ;;  %v2857_v56 = vmul.f32 %v9203_v16, %v7303_v14  ;;  %v2866_v36 = vmul.f32 %v9204_v43, %v7314_v46 }
 0x4c7   : > { %v3301_v34 = vadd.f32 %v3297_v26, %v3292_v7  ;;  %v2816_v21 = vadd.f32 %v2812_v30, %v2807_v38  ;;  %v2875_v33 = vmul.f32 %v9222_v59, %v7311_v12  ;;  %v2884_v5 = vmul.f32 %v9208_v11, %v7319_v20 }
 0x4c8   : > { %v2768_v0 = vadd.f32 %v2764_v6, %v2759_v4  ;;  %v2861_v61 = vadd.f32 %v2857_v56, %v2852_v47  ;;  %v3137_v17 = vmul.f32 %v9210_v53, %v7303_v14  ;;  %v3142_v23 = vmul.f32 %v9173_v10, %v7314_v46 }
 0x4c9   : > { %v3309_v58 = vrot.slane %v3301_v34, 1  ;;  %v2825_v55 = vadd.f32 %v2821_v22, %v2816_v21  ;;  %v2893_v7 = vmul.f32 %v7140_v60, %v7339_v54  ;;  %v3151_v26 = vmul.f32 %v9177_v52, %v7323_v35 }
 0x4ca   : > { %v2777_v30 = vadd.f32 %v2773_v15, %v2768_v0  ;;  %v2870_v38 = vadd.f32 %v2866_v36, %v2861_v61  ;;  %v3146_v12 = vadd.f32 %v3142_v23, %v3137_v17  ;;  %v3160_v47 = vmul.f32 %v9212_v29, %v7319_v20 }
 0x4cb   : > { %v3317_v6 = vsel %vm656_vm1, %v3309_v58, 0.0  ;;  %v2834_v4 = vadd.f32 %v2830_v51, %v2825_v55  ;;  %v3169_v56 = vmul.f32 %v9179_v27, %v7339_v54  ;;  %v3178_v21 = vmul.f32 %v9181_v28, %v7345_v8 }
 0x4cc   : > { %v3321_v34 = vadd.f32 %v3317_v6, %v3251_v45  ;;  %v2785_v22 = vrot.slane %v2777_v30, 7  ;;  %v2879_v42 = vadd.f32 %v2875_v33, %v2870_v38  ;;  %v3155_v60 = vadd.f32 %v3151_v26, %v3146_v12 }
 0x4cd   : > { %v2843_v52 = vadd.f32 %v2839_v1, %v2834_v4  ;;  %v3203_v15 = vmul.f32 %v9213_v18, %v7303_v14  ;;  %v3208_v36 = vmul.f32 %v9180_v25, %v7314_v46  ;;  %v3217_v51 = vmul.f32 %v9182_v13, %v7323_v35 }
 0x4ce   : > { %3330 = vrot.lane.b32.xlu1 %v3321_v34, %s9134_s24  ;;  %v2793_v0 = vsel %vm649_vm0, 0.0, %v2785_v22  ;;  %v2888_v61 = vadd.f32 %v2884_v5, %v2879_v42  ;;  %v3164_v17 = vadd.f32 %v3160_v47, %v3155_v60  ;;  %v3226_v45 = vmul.f32 %v9214_v32, %v7319_v20 }
 0x4cf   : > { %v2847_v12 = vadd.f32 %v2843_v52, %v2793_v0  ;;  %v3212_v1 = vadd.f32 %v3208_v36, %v3203_v15  ;;  %v3235_v33 = vmul.f32 %v9184_v44, %v7339_v54  ;;  %v3257_v23 = vmul.f32 %v9215_v31, %v7303_v14 }
 0x4d0   : > { %v2897_v58 = vadd.f32 %v2893_v7, %v2888_v61  ;;  %v3173_v55 = vadd.f32 %v3169_v56, %v3164_v17  ;;  %v3262_v26 = vmul.f32 %v9186_v50, %v7314_v46  ;;  %v3271_v42 = vmul.f32 %v9187_v19, %v7323_v35 }
 0x4d1   : > { %v3221_v60 = vadd.f32 %v3217_v51, %v3212_v1  ;;  %v3244_v5 = vmul.f32 %v9185_v40, %v7345_v8  ;;  %v3280_v52 = vmul.f32 %v9216_v48, %v7319_v20  ;;  %v3289_v30 = vmul.f32 %v9189_v57, %v7339_v54 }
 0x4d2   : > { %v2905_v38 = vrot.slane %v2897_v58, 1  ;;  %v3182_v47 = vadd.f32 %v3178_v21, %v3173_v55  ;;  %v3266_v7 = vadd.f32 %v3262_v26, %v3257_v23  ;;  %v3298_v6 = vmul.f32 %v9191_v37, %v7345_v8  ;;  %v9223_v55 = vld [vmem:[#allocation153_spill] sm:$0xff] }
 0x4d3   : > { %v3230_v4 = vadd.f32 %v3226_v45, %v3221_v60  ;;  %v2733_v56 = vmul.f32 %v9217_v63, %v7303_v14  ;;  %v2738_v34 = vmul.f32 %v9192_v39, %v7314_v46  ;;  %v2747_v22 = vmul.f32 %v9193_v41, %v7323_v35  ;;  %v9224_v60 = vld [vmem:[#allocation159_spill] sm:$0xff] }
 0x4d4   : > { %v2913_v15 = vsel %vm656_vm1, %v2905_v38, 0.0  ;;  %v3190_v36 = vrot.slane %v3182_v47, 7  ;;  %v3275_v51 = vadd.f32 %v3271_v42, %v3266_v7  ;;  %v2756_v21 = vmul.f32 %v9218_v49, %v7319_v20  ;;  %v9225_v7 = vld [vmem:[#allocation152_spill] sm:$0xff] }
 0x4d5   : > { %v2917_v0 = vadd.f32 %v2913_v15, %v2847_v12  ;;  %v3239_v61 = vadd.f32 %v3235_v33, %v3230_v4  ;;  %v2742_v17 = vadd.f32 %v2738_v34, %v2733_v56  ;;  %v2765_v45 = vmul.f32 %v9195_v2, %v7339_v54  ;;  %v9226_v56 = vld [vmem:[#allocation164_spill] sm:$0xff] }
 0x4d6   : > { %v3284_v1 = vadd.f32 %v3280_v52, %v3275_v51  ;;  %v2774_v23 = vmul.f32 %v9198_v9, %v7345_v8  ;;  %v2799_v58 = vmul.f32 %v9219_v3, %v7303_v14  ;;  %v2804_v26 = vmul.f32 %v9223_v55, %v7314_v46 }
 0x4d7   : > { %2926 = vrot.lane.b32.xlu0 %v2917_v0, %s9135_s10  ;;  %v3198_v42 = vsel %vm649_vm0, 0.0, %v3190_v36  ;;  %v3248_v12 = vadd.f32 %v3244_v5, %v3239_v61  ;;  %v2751_v33 = vadd.f32 %v2747_v22, %v2742_v17  ;;  %v2813_v38 = vmul.f32 %v9224_v60, %v7323_v35 }
 0x4d8   : > { %v3293_v47 = vadd.f32 %v3289_v30, %v3284_v1  ;;  %v2808_v52 = vadd.f32 %v2804_v26, %v2799_v58  ;;  %v2822_v4 = vmul.f32 %v9225_v7, %v7319_v20  ;;  %v2831_v34 = vmul.f32 %v9226_v56, %v7339_v54 }
 0x4d9   : > { %v2760_v15 = vadd.f32 %v2756_v21, %v2751_v33  ;;  %v2840_v51 = vmul.f32 %v9205_v24, %v7345_v8  ;;  %v2853_v36 = vmul.f32 %v9221_v62, %v7303_v14  ;;  %v2858_v5 = vmul.f32 %v9203_v16, %v7314_v46 }
 0x4da   : > { %v3252_v22 = vadd.f32 %v3248_v12, %v3198_v42  ;;  %v3302_v0 = vadd.f32 %v3298_v6, %v3293_v47  ;;  %v2817_v30 = vadd.f32 %v2813_v38, %v2808_v52  ;;  %v2867_v61 = vmul.f32 %v9204_v43, %v7323_v35  ;;  %v9227_v38 = vld [vmem:[#allocation102_spill] sm:$0xff]  ;;  %v9228_v47 = vld [vmem:[#allocation129_spill] sm:$0xff] }
 0x4db   : > { %v2769_v17 = vadd.f32 %v2765_v45, %v2760_v15  ;;  %v2862_v1 = vadd.f32 %v2858_v5, %v2853_v36  ;;  %v2876_v21 = vmul.f32 %v9222_v59, %v7319_v20  ;;  %v2885_v58 = vmul.f32 %v9208_v11, %v7339_v54 }
 0x4dc   : > { %v3310_v26 = vrot.slane %v3302_v0, 1  ;;  %v2826_v33 = vadd.f32 %v2822_v4, %v2817_v30  ;;  %v3138_v14 = vmul.f32 %v9210_v53, %v7314_v46  ;;  %v3143_v6 = vmul.f32 %v9173_v10, %v7323_v35 }
 0x4dd   : > { %v2778_v42 = vadd.f32 %v2774_v23, %v2769_v17  ;;  %v2871_v12 = vadd.f32 %v2867_v61, %v2862_v1  ;;  %v2894_v45 = vmul.f32 %v9227_v38, %v7345_v8  ;;  %v3152_v52 = vmul.f32 0.0, %v9228_v47 }
 0x4de   : > { %v3318_v15 = vsel %vm656_vm1, %v3310_v26, 0.0  ;;  %v2835_v36 = vadd.f32 %v2831_v34, %v2826_v33  ;;  %v3147_v5 = vadd.f32 %v3143_v6, %v3138_v14  ;;  %v3161_v4 = vmul.f32 %v9212_v29, %v7339_v54 }
 0x4df   : > { %v3322_v0 = vadd.f32 %v3318_v15, %v3252_v22  ;;  %v2786_v30 = vrot.slane %v2778_v42, 7  ;;  %v2880_v53 = vadd.f32 %v2876_v21, %v2871_v12  ;;  %v3170_v10 = vmul.f32 %v9179_v27, %v7345_v8 }
 0x4e0   : > { %v2844_v23 = vadd.f32 %v2840_v51, %v2835_v36  ;;  %v3156_v61 = vadd.f32 %v3152_v52, %v3147_v5  ;;  %v3204_v17 = vmul.f32 %v9213_v18, %v7314_v46  ;;  %v3209_v1 = vmul.f32 %v9180_v25, %v7323_v35 }
 0x4e1   : > { %3332 = vrot.lane.b32.xlu1 %v3322_v0, %s9134_s24  ;;  %v2794_v14 = vsel %vm649_vm0, 0.0, %v2786_v30  ;;  %v2889_v34 = vadd.f32 %v2885_v58, %v2880_v53  ;;  %v3179_v29 = vmul.f32 0.0, %v9181_v28  ;;  %v3218_v22 = vmul.f32 0.0, %v9182_v13 }
 0x4e2   : > { %v2848_v27 = vadd.f32 %v2844_v23, %v2794_v14  ;;  %v3165_v51 = vadd.f32 %v3161_v4, %v3156_v61  ;;  %v3213_v21 = vadd.f32 %v3209_v1, %v3204_v17  ;;  %v3227_v18 = vmul.f32 %v9214_v32, %v7339_v54 }
 0x4e3   : > { %v2898_v26 = vadd.f32 %v2894_v45, %v2889_v34  ;;  %v3236_v25 = vmul.f32 %v9184_v44, %v7345_v8  ;;  %v3258_v33 = vmul.f32 %v9215_v31, %v7314_v46  ;;  %v3263_v28 = vmul.f32 %v9186_v50, %v7323_v35 }
 0x4e4   : > { %v3174_v58 = vadd.f32 %v3170_v10, %v3165_v51  ;;  %v3222_v13 = vadd.f32 %v3218_v22, %v3213_v21  ;;  %v3245_v6 = vmul.f32 0.0, %v9185_v40  ;;  %v3272_v42 = vmul.f32 0.0, %v9187_v19 }
 0x4e5   : > { %v2906_v12 = vrot.slane %v2898_v26, 1  ;;  %v3267_v47 = vadd.f32 %v3263_v28, %v3258_v33  ;;  %v3281_v32 = vmul.f32 %v9216_v48, %v7339_v54  ;;  %v3290_v44 = vmul.f32 %v9189_v57, %v7345_v8 }
 0x4e6   : > { %v3183_v45 = vadd.f32 %v3179_v29, %v3174_v58  ;;  %v3231_v52 = vadd.f32 %v3227_v18, %v3222_v13  ;;  %v2734_v50 = vmul.f32 %v9217_v63, %v7314_v46  ;;  %v2739_v31 = vmul.f32 %v9192_v39, %v7323_v35  ;;  %v9230_v13 = vld [vmem:[#allocation148_spill] sm:$0xff] }
 0x4e7   : > { %v2914_v40 = vsel %vm656_vm1, %v2906_v12, 0.0  ;;  %v3276_v19 = vadd.f32 %v3272_v42, %v3267_v47  ;;  %v2748_v15 = vmul.f32 0.0, %v9193_v41  ;;  %v2757_v48 = vmul.f32 %v9218_v49, %v7339_v54  ;;  %v9231_v12 = vld [vmem:[#allocation169_spill] sm:$0xff] }
 0x4e8   : > { %v2918_v36 = vadd.f32 %v2914_v40, %v2848_v27  ;;  %v3191_v5 = vrot.slane %v3183_v45, 7  ;;  %v3240_v57 = vadd.f32 %v3236_v25, %v3231_v52  ;;  %v2743_v4 = vadd.f32 %v2739_v31, %v2734_v50  ;;  %v9232_v31 = vld [vmem:[#allocation26_spill] sm:$0xff]  ;;  %v9233_v40 = vld [vmem:[#allocation52_spill] sm:$0xff] }
 0x4e9   : > { %v3285_v0 = vadd.f32 %v3281_v32, %v3276_v19  ;;  %v3299_v30 = vmul.f32 0.0, %v9191_v37  ;;  %v2766_v63 = vmul.f32 %v9195_v2, %v7345_v8  ;;  %v7603_v39 = vstv %s7571_s27  ;;  %s7954_s27 = sld [smem:[#allocation4 + $0x13]] }
 0x4ea   : > { %2928 = vrot.lane.b32.xlu0 %v2918_v36, %s9135_s10  ;;  %v2752_v41 = vadd.f32 %v2748_v15, %v2743_v4  ;;  %v2775_v49 = vmul.f32 0.0, %v9198_v9  ;;  %v2800_v53 = vmul.f32 %v9219_v3, %v7314_v46  ;;  %v2805_v37 = vmul.f32 %v9223_v55, %v7323_v35  ;;  %v9234_v36 = vld [vmem:[#allocation172_spill] sm:$0xff]  ;;  %v9235_v4 = vld [vmem:[#allocation173_spill] sm:$0xff] }
 0x4eb   : > { %v3199_v10 = vsel %vm649_vm0, 0.0, %v3191_v5  ;;  %v3249_v2 = vadd.f32 %v3245_v6, %v3240_v57  ;;  %v3294_v23 = vadd.f32 %v3290_v44, %v3285_v0  ;;  %v2814_v61 = vmul.f32 0.0, %v9224_v60 }
 0x4ec   : > { %v2761_v17 = vadd.f32 %v2757_v48, %v2752_v41  ;;  %v2809_v1 = vadd.f32 %v2805_v37, %v2800_v53  ;;  %v2823_v14 = vmul.f32 %v9225_v7, %v7339_v54  ;;  %v2832_v9 = vmul.f32 %v9226_v56, %v7345_v8 }
 0x4ed   : > { %v3303_v3 = vadd.f32 %v3299_v30, %v3294_v23  ;;  %v2854_v55 = vmul.f32 %v9221_v62, %v7314_v46  ;;  %v2859_v34 = vmul.f32 %v9203_v16, %v7323_v35  ;;  %v2868_v60 = vmul.f32 0.0, %v9204_v43 }
 0x4ee   : > { %v3253_v29 = vadd.f32 %v3249_v2, %v3199_v10  ;;  %v2770_v22 = vadd.f32 %v2766_v63, %v2761_v17  ;;  %v2818_v27 = vadd.f32 %v2814_v61, %v2809_v1  ;;  %v2841_v7 = vmul.f32 0.0, %v9205_v24  ;;  %v9229_v24 = vld [vmem:[#allocation161_spill] sm:$0xff] }
 0x4ef   : > { %v3311_v56 = vrot.slane %v3303_v3, 1  ;;  %v2863_v62 = vadd.f32 %v2859_v34, %v2854_v55  ;;  %v2877_v16 = vmul.f32 %v9222_v59, %v7339_v54  ;;  %v2886_v43 = vmul.f32 %v9208_v11, %v7345_v8 }
 0x4f0   : > { %v2779_v51 = vadd.f32 %v2775_v49, %v2770_v22  ;;  %v2827_v21 = vadd.f32 %v2823_v14, %v2818_v27  ;;  %v2895_v18 = vmul.f32 0.0, %v9227_v38  ;;  %v3585_v26 = vmul.f32 %v9229_v24, %v7603_v39  ;;  %v3968_v22 = vpop.permute.xlu1 %3967 }
 0x4f1   : > { %v3319_v25 = vsel %vm656_vm1, %v3311_v56, 0.0  ;;  %v2872_v33 = vadd.f32 %v2868_v60, %v2863_v62  ;;  %v7648_v59 = vstv %s7598_s26  ;;  %v7651_v11 = vstv %s7600_s8  ;;  %s7958_s26 = sld [smem:[#allocation4 + $0x1c]]  ;;  %s7971_s8 = sld [smem:[#allocation4 + $0x7]] }
 0x4f2   : > { %v3323_v28 = vadd.f32 %v3319_v25, %v3253_v29  ;;  %v2787_v38 = vrot.slane %v2779_v51, 7  ;;  %v2836_v58 = vadd.f32 %v2832_v9, %v2827_v21  ;;  %v3589_v6 = vadd.f32 %v3585_v26, %v9230_v13  ;;  %v9236_v13 = vld [vmem:[#allocation27_spill] sm:$0xff] }
 0x4f3   : > { %v2881_v42 = vadd.f32 %v2877_v16, %v2872_v33  ;;  %v3594_v47 = vmul.f32 %v9231_v12, %v7648_v59  ;;  %v3603_v32 = vmul.f32 0.0, %v7651_v11  ;;  %v7664_v44 = vstv %s7613_s9  ;;  %v3564_v33 = vpop.permute.xlu0 %3563  ;;  %s9275_s9 = sld [smem:[#allocation61_spill]] }
 0x4f4   : > { %3334 = vrot.lane.b32.xlu1 %v3323_v28, %s9134_s24  ;;  %v2795_v45 = vsel %vm649_vm0, 0.0, %v2787_v38  ;;  %v2845_v52 = vadd.f32 %v2841_v7, %v2836_v58  ;;  %v7673_v50 = vstv %s7619_s20  ;;  %v7677_v19 = vmul.f32 %v9233_v40, %v9232_v31  ;;  %s7984_s20 = sld [smem:[#allocation4 + $0x2e]] }
 0x4f5   : > { %v2890_v15 = vadd.f32 %v2886_v43, %v2881_v42  ;;  %v3598_v48 = vadd.f32 %v3594_v47, %v3589_v6  ;;  %v3612_v5 = vmul.f32 %v9234_v36, %v7664_v44  ;;  %v7682_v57 = vstv %s7626_s18  ;;  %s7996_s18 = sld [smem:[#allocation4 + $0x2b]] }
 0x4f6   : > { %v3621_v0 = vmul.f32 %v9235_v4, %v7673_v50  ;;  %v3646_v30 = vmul.f32 0.0, %v7682_v57  ;;  %v7690_v63 = vstv %s7629_s29  ;;  %v7693_v41 = vstv %s7631_s11  ;;  %s8013_s29 = sld [smem:[#allocation4 + $0x19]]  ;;  %s8039_s11 = sld [smem:[#allocation4 + $0x22]] }
 0x4f7   : > { %v2899_v49 = vadd.f32 %v2895_v18, %v2890_v15  ;;  %v3607_v53 = vadd.f32 %v3603_v32, %v3598_v48  ;;  %v3651_v37 = vmul.f32 %v9229_v24, %v7690_v63  ;;  %v3660_v10 = vmul.f32 %v9231_v12, %v7693_v41  ;;  %v9237_v15 = vld [vmem:[#allocation136_spill] sm:$0xff] }
 0x4f8   : > { %v2849_v2 = vadd.f32 %v2845_v52, %v2795_v45  ;;  %v7700_v23 = vstv %s7640_s2  ;;  %v7703_v61 = vstv %s7638_s19  ;;  %v7706_v9 = vstv %s7645_s17  ;;  %s8089_s19 = sld [smem:[#allocation6 + $0x1]]  ;;  %s8091_s2 = sld [smem:[#allocation6 + $0xa]] }
 0x4f9   : > { %v2907_v17 = vrot.slane %v2899_v49, 1  ;;  %v3616_v1 = vadd.f32 %v3612_v5, %v3607_v53  ;;  %v3655_v14 = vadd.f32 %v3651_v37, %v3646_v30  ;;  %v3669_v3 = vmul.f32 0.0, %v7700_v23  ;;  %s8109_s17 = sld [smem:[#allocation6 + $0x13]] }
 0x4fa   : > { %v7710_v55 = vstv %s7655_s23  ;;  %v3700_v34 = vmul.f32 0.0, %v7703_v61  ;;  %v7714_v60 = vstv %s7653_s14  ;;  %v7720_v16 = vstv %s7658_s22  ;;  %s8125_s14 = sld [smem:[#allocation6 + $0x1c]]  ;;  %s9290_s23 = smov 112  }
 0x4fb   : > { %v2915_v29 = vsel %vm656_vm1, %v2907_v17, 0.0  ;;  %v3625_v27 = vadd.f32 %v3621_v0, %v3616_v1  ;;  %v3664_v7 = vadd.f32 %v3660_v10, %v3655_v14  ;;  %v3705_v56 = vmul.f32 %v9229_v24, %v7714_v60  ;;  %v9238_v0 = vld [vmem:[#allocation170_spill] sm:$0xff]  ;;  %s8138_s22 = sld [smem:[#allocation6 + $0x7]] }
 0x4fc   : > { %v2919_v62 = vadd.f32 %v2915_v29, %v2849_v2  ;;  %v7723_v43 = vstv %s7668_s25  ;;  %v7726_v51 = vstv %s7670_s30  ;;  %v3678_v18 = vmul.f32 %v9234_v36, %v7706_v9  ;;  %s8145_s25 = sld [smem:[#allocation6 + $0x10]]  ;;  %s8147_s30 = sld [smem:[#allocation6 + $0x25]] }
 0x4fd   : > { %v3633_v21 = vrot.slane %v3625_v27, 7  ;;  %v3709_v26 = vadd.f32 %v3705_v56, %v3700_v34  ;;  %v3714_v25 = vmul.f32 %v9231_v12, %v7720_v16  ;;  %v7734_v28 = vsel %vm3340_vm13, %v3968_v22, 0.0 }
 0x4fe   : > { %2930 = vrot.lane.b32.xlu0 %v2919_v62, %s9135_s10  ;;  %v3723_v38 = vmul.f32 0.0, %v7723_v43  ;;  %v7738_v58 = vstv %s7684_s12  ;;  %v7742_v6 = vmul.f32 %v9233_v40, %v9236_v13  ;;  %v3673_v42 = vadd.f32 %v3669_v3, %v3664_v7  ;;  %v9239_v7 = vld [vmem:[#allocation100_spill] sm:$0xff]  ;;  %s8159_s12 = sld [smem:[#allocation6 + $0x4]] }
 0x4ff   : > { %v3687_v47 = vmul.f32 %v9235_v4, %v7710_v55  ;;  %v3718_v32 = vadd.f32 %v3714_v25, %v3709_v26  ;;  %v3732_v45 = vmul.f32 %v9234_v36, %v7726_v51  ;;  %v3575_v52 = vsel %vm818_vm4, 0.0, %v3564_v33 }
 0x500   : > { %v3581_v48 = vmul.f32 %v9229_v24, %v9237_v15  ;;  %v3586_v5 = vmul.f32 %v9231_v12, %v7603_v39  ;;  %v3595_v30 = vmul.f32 %v9238_v0, %v7648_v59  ;;  %v3641_v49 = vsel %vm649_vm0, 0.0, %v3633_v21 }
 0x501   : > { %v3682_v53 = vadd.f32 %v3678_v18, %v3673_v42  ;;  %v3727_v37 = vadd.f32 %v3723_v38, %v3718_v32  ;;  %v3741_v10 = vmul.f32 %v9235_v4, %v7738_v58  ;;  %v3604_v17 = vmul.f32 %v9234_v36, %v7651_v11 }
 0x502   : > { %v3590_v2 = vadd.f32 %v3586_v5, %v3581_v48  ;;  %v3647_v1 = vmul.f32 %v9229_v24, %v7682_v57  ;;  %v3652_v14 = vmul.f32 %v9231_v12, %v7690_v63  ;;  %v3613_v29 = vmul.f32 %v9235_v4, %v7664_v44 }
 0x503   : > { %v3691_v3 = vadd.f32 %v3687_v47, %v3682_v53  ;;  %v3736_v34 = vadd.f32 %v3732_v45, %v3727_v37  ;;  %v3661_v22 = vmul.f32 %v9238_v0, %v7693_v41  ;;  %v3622_v56 = vmul.f32 %v9239_v7, %v7673_v50 }
 0x504   : > { %v3599_v27 = vadd.f32 %v3595_v30, %v3590_v2  ;;  %v3656_v62 = vadd.f32 %v3652_v14, %v3647_v1  ;;  %v3670_v21 = vmul.f32 %v9234_v36, %v7700_v23  ;;  %v3701_v26 = vmul.f32 %v9229_v24, %v7703_v61  ;;  %v3566_v30 = vpop.permute.xlu0 %3565  ;;  %v9240_v14 = vld [vmem:[#allocation171_spill] sm:$0xff] }
 0x505   : > { %v3745_v18 = vadd.f32 %v3741_v10, %v3736_v34  ;;  %v3706_v25 = vmul.f32 %v9231_v12, %v7714_v60  ;;  %v3715_v33 = vmul.f32 %v9238_v0, %v7720_v16  ;;  %v3695_v38 = vadd.f32 %v3691_v3, %v3641_v49 }
 0x506   : > { %v3608_v42 = vadd.f32 %v3604_v17, %v3599_v27  ;;  %v3665_v47 = vadd.f32 %v3661_v22, %v3656_v62  ;;  %v3679_v32 = vmul.f32 %v9235_v4, %v7706_v9  ;;  %v3688_v48 = vmul.f32 %v9239_v7, %v7710_v55 }
 0x507   : > { %v3753_v45 = vrot.slane %v3745_v18, 1  ;;  %v3710_v5 = vadd.f32 %v3706_v25, %v3701_v26  ;;  %v3724_v24 = vmul.f32 %v9234_v36, %v7723_v43  ;;  %v3733_v10 = vmul.f32 %v9235_v4, %v7726_v51 }
 0x508   : > { %v3617_v53 = vadd.f32 %v3613_v29, %v3608_v42  ;;  %v3674_v37 = vadd.f32 %v3670_v21, %v3665_v47  ;;  %v3582_v49 = vmul.f32 %v9231_v12, %v9237_v15  ;;  %v3587_v1 = vmul.f32 %v9238_v0, %v7603_v39  ;;  %v9241_v42 = vld [vmem:[#allocation101_spill] sm:$0xff] }
 0x509   : > { %v3761_v2 = vsel %vm656_vm1, %v3753_v45, 0.0  ;;  %v3719_v17 = vadd.f32 %v3715_v33, %v3710_v5  ;;  %v3596_v3 = vmul.f32 %v9240_v14, %v7648_v59  ;;  %v3742_v29 = vmul.f32 %v9239_v7, %v7738_v58 }
 0x50a   : > { %v3765_v34 = vadd.f32 %v3761_v2, %v3695_v38  ;;  %v3626_v36 = vadd.f32 %v3622_v56, %v3617_v53  ;;  %v3576_v22 = vsel %vm818_vm4, 0.0, %v3566_v30  ;;  %v3683_v27 = vadd.f32 %v3679_v32, %v3674_v37 }
 0x50b   : > { %v3728_v62 = vadd.f32 %v3724_v24, %v3719_v17  ;;  %v3591_v21 = vadd.f32 %v3587_v1, %v3582_v49  ;;  %v3605_v18 = vmul.f32 %v9235_v4, %v7651_v11  ;;  %v3614_v33 = vmul.f32 %v9239_v7, %v7664_v44 }
 0x50c   : > { %v3769_v26 = vadd.f32 %v3765_v34, %v3575_v52  ;;  %v3634_v25 = vrot.slane %v3626_v36, 7  ;;  %v3623_v38 = vmul.f32 %v9241_v42, %v7673_v50  ;;  %v3692_v56 = vadd.f32 %v3688_v48, %v3683_v27 }
 0x50d   : > { %v3737_v47 = vadd.f32 %v3733_v10, %v3728_v62  ;;  %v3600_v45 = vadd.f32 %v3596_v3, %v3591_v21  ;;  %v3653_v5 = vmul.f32 %v9238_v0, %v7690_v63  ;;  %v3648_v52 = vmul.f32 %v9231_v12, %v7682_v57 }
 0x50e   : > { %v3983_v32 = vadd.f32 %v7734_v28, %v3769_v26  ;;  %v3642_v24 = vsel %vm649_vm0, 0.0, %v3634_v25  ;;  %v3662_v30 = vmul.f32 %v9240_v14, %v7693_v41  ;;  %v3671_v48 = vmul.f32 %v9235_v4, %v7700_v23 }
 0x50f   : > { %v3696_v53 = vadd.f32 %v3692_v56, %v3642_v24  ;;  %v3746_v37 = vadd.f32 %v3742_v29, %v3737_v47  ;;  %v3609_v49 = vadd.f32 %v3605_v18, %v3600_v45  ;;  %v3657_v2 = vadd.f32 %v3653_v5, %v3648_v52  ;;  %v3568_v5 = vpop.permute.xlu0 %3567 }
 0x510   : > { %v3987_v10 = vsub.f32 0.0, %v3983_v32  ;;  %v3702_v17 = vmul.f32 %v9231_v12, %v7703_v61  ;;  %v3707_v28 = vmul.f32 %v9238_v0, %v7714_v60  ;;  %v3680_v34 = vmul.f32 %v9239_v7, %v7706_v9 }
 0x511   : > { %v3754_v1 = vrot.slane %v3746_v37, 1  ;;  %v3618_v3 = vadd.f32 %v3614_v33, %v3609_v49  ;;  %v3716_v36 = vmul.f32 %v9240_v14, %v7720_v16  ;;  %v3666_v27 = vadd.f32 %v3662_v30, %v3657_v2  ;;  %v3970_v33 = vpop.permute.xlu1 %3969 }
 0x512   : > { %v3991_v29 = vmul.f32 1.442695, %v3987_v10  ;;  %v3711_v62 = vadd.f32 %v3707_v28, %v3702_v17  ;;  %v3725_v21 = vmul.f32 %v9235_v4, %v7723_v43  ;;  %v3689_v26 = vmul.f32 %v9241_v42, %v7710_v55 }
 0x513   : > { %v3762_v18 = vsel %vm656_vm1, %v3754_v1, 0.0  ;;  %v3627_v12 = vadd.f32 %v3623_v38, %v3618_v3  ;;  %v3734_v25 = vmul.f32 %v9239_v7, %v7726_v51  ;;  %v3675_v47 = vadd.f32 %v3671_v48, %v3666_v27 }
 0x514   : > { %4804 = vpow2.f32 %v3991_v29  ;;  %v3766_v56 = vadd.f32 %v3762_v18, %v3696_v53  ;;  %v3720_v45 = vadd.f32 %v3716_v36, %v3711_v62  ;;  %v3743_v24 = vmul.f32 %v9241_v42, %v7738_v58 }
 0x515   : > { %v3635_v32 = vrot.slane %v3627_v12, 7  ;;  %v3583_v4 = vmul.f32 %v9238_v0, %v9237_v15  ;;  %v3588_v38 = vmul.f32 %v9240_v14, %v7603_v39  ;;  %v3684_v30 = vadd.f32 %v3680_v34, %v3675_v47 }
 0x516   : > { %v3770_v52 = vadd.f32 %v3766_v56, %v3576_v22  ;;  %v3729_v37 = vadd.f32 %v3725_v21, %v3720_v45  ;;  %v3597_v49 = vmul.f32 0.0, %v7648_v59  ;;  %v3980_v53 = vsel %vm3340_vm13, %v3970_v33, 0.0 }
 0x517   : > { %v3577_v48 = vsel %vm818_vm4, 0.0, %v3568_v5  ;;  %v3592_v10 = vadd.f32 %v3588_v38, %v3583_v4  ;;  %v3606_v2 = vmul.f32 %v9239_v7, %v7651_v11  ;;  %v3643_v28 = vsel %vm649_vm0, 0.0, %v3635_v32  ;;  %v9242_v32 = vld [vmem:[#allocation40_spill] sm:$0xff] }
 0x518   : > { %v3984_v17 = vadd.f32 %v3980_v53, %v3770_v52  ;;  %v3693_v15 = vadd.f32 %v3689_v26, %v3684_v30  ;;  %v3738_v1 = vadd.f32 %v3734_v25, %v3729_v37  ;;  %v3615_v39 = vmul.f32 %v9241_v42, %v7664_v44  ;;  %v9244_v37 = vld [vmem:[#allocation73_spill] sm:$0xff]  ;;  %v9245_v53 = vld [vmem:[#allocation79_spill] sm:$0xff] }
 0x519   : > { %v3601_v3 = vadd.f32 %v3597_v49, %v3592_v10  ;;  %v3649_v59 = vmul.f32 %v9238_v0, %v7682_v57  ;;  %v3654_v22 = vmul.f32 %v9240_v14, %v7690_v63  ;;  %v3624_v29 = vmul.f32 0.0, %v7673_v50 }
 0x51a   : > { %v3988_v34 = vsub.f32 0.0, %v3984_v17  ;;  %v3747_v36 = vadd.f32 %v3743_v24, %v3738_v1  ;;  %v3663_v11 = vmul.f32 0.0, %v7693_v41  ;;  %v3697_v27 = vadd.f32 %v3693_v15, %v3643_v28  ;;  %v9250_v15 = vld [vmem:[#allocation36_spill] sm:$0xff] }
 0x51b   : > { %v3610_v62 = vadd.f32 %v3606_v2, %v3601_v3  ;;  %v3658_v21 = vadd.f32 %v3654_v22, %v3649_v59  ;;  %v3672_v18 = vmul.f32 %v9239_v7, %v7700_v23  ;;  %v3703_v57 = vmul.f32 %v9238_v0, %v7703_v61  ;;  %v3972_v0 = vpop.permute.xlu1 %3971  ;;  %v9251_v1 = vld [vmem:[#allocation84_spill] sm:$0xff]  ;;  %v9252_v22 = vld [vmem:[#allocation38_spill] sm:$0xff] }
 0x51c   : > { %v3993_v44 = vmul.f32 1.442695, %v3988_v34  ;;  %v3755_v12 = vrot.slane %v3747_v36, 1  ;;  %v3708_v63 = vmul.f32 %v9240_v14, %v7714_v60  ;;  %v3681_v41 = vmul.f32 %v9241_v42, %v7706_v9 }
 0x51d   : > { %v3619_v26 = vadd.f32 %v3615_v39, %v3610_v62  ;;  %v3667_v50 = vadd.f32 %v3663_v11, %v3658_v21  ;;  %v3717_v25 = vmul.f32 0.0, %v7720_v16  ;;  %v3726_v47 = vmul.f32 %v9239_v7, %v7723_v43  ;;  %v9253_v11 = vld [vmem:[#allocation55_spill] sm:$0xff]  ;;  %v9254_v21 = vld [vmem:[#allocation44_spill] sm:$0xff] }
 0x51e   : > { %v4805_v33 = vpop.eup %4804  ;;  %4806 = vpow2.f32 %v3993_v44  ;;  %v3763_v23 = vsel %vm656_vm1, %v3755_v12, 0.0  ;;  %v3712_v56 = vadd.f32 %v3708_v63, %v3703_v57  ;;  %v3690_v5 = vmul.f32 0.0, %v7710_v55  ;;  %v9255_v63 = vld [vmem:[#allocation77_spill] sm:$0xff] }
 0x51f   : > { %v3999_v61 = vadd.f32 1.0, %v4805_v33  ;;  %v3767_v60 = vadd.f32 %v3763_v23, %v3697_v27  ;;  %v3628_v14 = vadd.f32 %v3624_v29, %v3619_v26  ;;  %v3676_v45 = vadd.f32 %v3672_v18, %v3667_v50  ;;  %v9256_v50 = vld [vmem:[#allocation51_spill] sm:$0xff] }
 0x520   : > { %v3721_v9 = vadd.f32 %v3717_v25, %v3712_v56  ;;  %v3735_v16 = vmul.f32 %v9241_v42, %v7726_v51  ;;  %v1782_v24 = vmul.f32 %v9233_v40, %v9242_v32  ;;  %v3981_v38 = vsel %vm3340_vm13, %v3972_v0, 0.0  ;;  %v9243_v42 = vld [vmem:[#allocation82_spill] sm:$0xff]  ;;  %v3570_v57 = vpop.permute.xlu0 %3569 }
 0x521   : > { %4808 = vrcp.f32 %v3999_v61  ;;  %v3771_v4 = vadd.f32 %v3767_v60, %v3577_v48  ;;  %v3636_v43 = vrot.slane %v3628_v14, 7  ;;  %v3685_v7 = vadd.f32 %v3681_v41, %v3676_v45  ;;  %v9246_v48 = vld [vmem:[#allocation74_spill] sm:$0xff]  ;;  %v9259_v60 = vld [vmem:[#allocation58_spill] sm:$0xff] }
 0x522   : > { %v3730_v52 = vadd.f32 %v3726_v47, %v3721_v9  ;;  %v3744_v30 = vmul.f32 0.0, %v7738_v58  ;;  %v1794_v55 = vsel %vm1233_vm10, %v7742_v6, %v7677_v19  ;;  %v1465_v49 = vadd.f32 %v9244_v37, %v9243_v42  ;;  %v9248_v19 = vld [vmem:[#allocation83_spill] sm:$0xff]  ;;  %v9258_v47 = vld [vmem:[#allocation41_spill] sm:$0xff] }
 0x523   : > { %v3985_v51 = vadd.f32 %v3981_v38, %v3771_v4  ;;  %v1487_v10 = vsel %vm1221_vm9, %v9246_v48, %v9245_v53  ;;  %v1963_v2 = vstv %s7849_s16  ;;  %v3644_v58 = vsel %vm649_vm0, 0.0, %v3636_v43  ;;  %v9249_v6 = vld [vmem:[#allocation87_spill] sm:$0xff]  ;;  %v3974_v43 = vpop.permute.xlu1 %3973  ;;  %s8161_s16 = sld [smem:[#allocation6 + $0xd]] }
 0x524   : > { %v3739_v17 = vadd.f32 %v3735_v16, %v3730_v52  ;;  %v1961_v28 = vadd.f32 %v9249_v6, %v9248_v19  ;;  %v1974_v3 = vmul.f32 %v9251_v1, %v9250_v15  ;;  %v3694_v59 = vadd.f32 %v3690_v5, %v3685_v7 }
 0x525   : > { %v3989_v39 = vsub.f32 0.0, %v3985_v51  ;;  %v1976_v34 = vmul.f32 %v9251_v1, %v9252_v22  ;;  %v1795_v36 = vsel %vm1221_vm9, %v1782_v24, %v1794_v55  ;;  %v1964_v27 = vmul.f32 %v1963_v2, %v9253_v11  ;;  %v9262_v51 = vld [vmem:[#allocation62_spill] sm:$0xff] }
 0x526   : > { %v3748_v29 = vadd.f32 %v3744_v30, %v3739_v17  ;;  %v1968_v62 = vstv %s7861_s0  ;;  %v1784_v18 = vmul.f32 %v9233_v40, %v9254_v21  ;;  %v3698_v12 = vadd.f32 %v3694_v59, %v3644_v58  ;;  %v9266_v17 = vld [vmem:[#allocation30_spill] sm:$0xff]  ;;  %v9269_v59 = vld [vmem:[#allocation80_spill] sm:$0xff]  ;;  %s8172_s0 = sld [smem:[#allocation6 + $0x19]] }
 0x527   : > { %v3995_v44 = vmul.f32 1.442695, %v3989_v39  ;;  %v1488_v26 = vsel %vm1223_vm11, %v9255_v63, %v1487_v10  ;;  %v9257_v41 = vstv %s9247_s5  ;;  %v1966_v56 = vadd.f32 %v1964_v27, %v1961_v28  ;;  %v9265_v10 = vld [vmem:[#allocation28_spill] sm:$0xff]  ;;  %s8241_s5 = sld [smem:[#allocation6 + $0x2b]] }
 0x528   : > { %v1775_v25 = vmul.f32 %v9257_v41, %v9256_v50  ;;  %v4807_v33 = vpop.eup %4806  ;;  %v3756_v23 = vrot.slane %v3748_v29, 1  ;;  %v1978_v61 = vmul.f32 %v9251_v1, %v9258_v47  ;;  %v1796_v0 = vsel %vm1223_vm11, %v1784_v18, %v1795_v36  ;;  %v9267_v28 = vld [vmem:[#allocation76_spill] sm:$0xff]  ;;  %v9270_v36 = vld [vmem:[#allocation50_spill] sm:$0xff]  ;;  %v9271_v18 = vld [vmem:[#allocation63_spill] sm:$0xff] }
 0x529   : > { %v4000_v40 = vadd.f32 1.0, %v4807_v33  ;;  %4810 = vpow2.f32 %v3995_v44  ;;  %v1969_v14 = vmul.f32 %v1968_v62, %v9259_v60  ;;  %v1990_v45 = vsel %vm1233_vm10, %v1976_v34, %v1974_v3  ;;  %v9268_v3 = vld [vmem:[#allocation71_spill] sm:$0xff] }
 0x52a   : > { %v3764_v5 = vsel %vm656_vm1, %v3756_v23, 0.0  ;;  %v3578_v9 = vsel %vm818_vm4, 0.0, %v3570_v57  ;;  %v1492_v16 = vadd.f32 %v1488_v26, %v1465_v49  ;;  %v7916_v24 = vstv %s7873_s21  ;;  %v9273_v33 = vld [vmem:[#allocation32_spill] sm:$0xff]  ;;  %s8174_s21 = sld [smem:[#allocation6 + $0x2e]] }
 0x52b   : > { %v4809_v4 = vpop.eup %4808  ;;  %4812 = vrcp.f32 %v4000_v40  ;;  %v3768_v7 = vadd.f32 %v3764_v5, %v3698_v12  ;;  %v8911_v38 = vstv %s7880_s28  ;;  %v1802_v52 = vadd.f32 %v1796_v0, %v1775_v25  ;;  %v9274_v5 = vld [vmem:[#allocation64_spill] sm:$0xff] }
 0x52c   : > { %4011 = vrot.lane.b32.xlu0 %v4809_v4, %s9261_s1  ;;  %v1971_v30 = vadd.f32 %v1969_v14, %v1966_v56  ;;  %v1991_v55 = vsel %vm1221_vm9, %v1978_v61, %v1990_v45  ;;  %v1815_v42 = vmul.f32 %v9262_v51, %v9250_v15  ;;  %v1817_v37 = vmul.f32 %v9262_v51, %v9252_v22 }
 0x52d   : > { %v3772_v49 = vadd.f32 %v3768_v7, %v3578_v9  ;;  %v9264_v53 = vstv %s9260_s6  ;;  %v1531_v58 = vmul.f32 %v7916_v24, %v9265_v10  ;;  %v1533_v19 = vmul.f32 %v7916_v24, %v9266_v17  ;;  %s9296_s6 = sld [smem:[#allocation176_spill]] }
 0x52e   : > { %v1805_v48 = vmul.f32 %v9264_v53, %v9253_v11  ;;  %v3982_v6 = vsel %vm3340_vm13, %v3974_v43, 0.0  ;;  %v7937_v39 = vadd.f32 %v9268_v3, %v9267_v28  ;;  %v7940_v34 = vadd.f32 %v9269_v59, %v1492_v16  ;;  %v9277_v28 = vld [vmem:[#allocation43_spill] sm:$0xff] }
 0x52f   : > { %v1980_v29 = vmul.f32 %v9251_v1, %v9270_v36  ;;  %v3986_v27 = vadd.f32 %v3982_v6, %v3772_v49  ;;  %v2001_v44 = vmul.f32 %v8911_v38, %v9271_v18  ;;  %v1819_v57 = vmul.f32 %v9262_v51, %v9258_v47 }
 0x530   : > { %v1807_v12 = vadd.f32 %v1805_v48, %v1802_v52  ;;  %v9272_v26 = vstv %s9263_s13  ;;  %v1831_v25 = vsel %vm1233_vm10, %v1817_v37, %v1815_v42  ;;  %v1535_v23 = vmul.f32 %v7916_v24, %v9273_v33  ;;  %v9276_v48 = vld [vmem:[#allocation34_spill] sm:$0xff]  ;;  %s8518_s13 = sld [smem:[#allocation4 + $0x20]] }
 0x531   : > { %v1992_v63 = vsel %vm1223_vm11, %v1980_v29, %v1991_v55  ;;  %v1810_v41 = vmul.f32 %v9272_v26, %v9259_v60  ;;  %v3990_v56 = vsub.f32 0.0, %v3986_v27  ;;  %v1549_v0 = vsel %vm1233_vm10, %v1533_v19, %v1531_v58  ;;  %v9278_v27 = vld [vmem:[#allocation29_spill] sm:$0xff] }
 0x532   : > { %v1998_v61 = vadd.f32 %v1992_v63, %v1971_v30  ;;  %v7962_v40 = vstv %s7909_s3  ;;  %v1821_v14 = vmul.f32 %v9262_v51, %v9270_v36  ;;  %v1526_v45 = vstv %s7913_s4 }
 0x533   : > { %v1938_v9 = vmul.f32 %v9274_v5, %v9265_v10  ;;  %v1940_v16 = vmul.f32 %v9274_v5, %v9266_v17  ;;  %v4811_v4 = vpop.eup %4810  ;;  %v3997_v43 = vmul.f32 1.442695, %v3990_v56  ;;  %v1812_v7 = vadd.f32 %v1810_v41, %v1807_v12  ;;  %v9279_v12 = vld [vmem:[#allocation31_spill] sm:$0xff] }
 0x534   : > { %v1832_v52 = vsel %vm1221_vm9, %v1819_v57, %v1831_v25  ;;  %v7975_v30 = vstv %s7919_s7  ;;  %v4001_v55 = vadd.f32 1.0, %v4811_v4  ;;  %v1550_v51 = vsel %vm1221_vm9, %v1535_v23, %v1549_v0  ;;  %v9281_v4 = vld [vmem:[#allocation35_spill] sm:$0xff]  ;;  %s8256_s7 = sld [smem:[#allocation6 + $0x28]] }
 0x535   : > { %v1689_v42 = vmul.f32 %v7962_v40, %v9232_v31  ;;  %v1691_v37 = vmul.f32 %v7962_v40, %v9236_v13  ;;  %v4813_v49 = vpop.eup %4812  ;;  %4814 = vpow2.f32 %v3997_v43  ;;  %v7982_v53 = vadd.f32 %v2001_v44, %v1998_v61 }
 0x536   : > { %v1537_v58 = vmul.f32 %v7916_v24, %v9276_v48  ;;  %v1942_v19 = vmul.f32 %v9274_v5, %v9273_v33  ;;  %4816 = vrcp.f32 %v4001_v55  ;;  %4013 = vrot.lane.b32.xlu1 %v4813_v49, %s9261_s1  ;;  %v1833_v6 = vsel %vm1223_vm11, %v1821_v14, %v1832_v52  ;;  %v9282_v55 = vld [vmem:[#allocation45_spill] sm:$0xff] }
 0x537   : > { %v1528_v3 = vmul.f32 %v1526_v45, %v9277_v28  ;;  %v1956_v59 = vsel %vm1233_vm10, %v1940_v16, %v1938_v9  ;;  %v1568_v44 = vmul.f32 %v7975_v30, %v9278_v27  ;;  %v1570_v57 = vmul.f32 %v7975_v30, %v9279_v12 }
 0x538   : > { %v1551_v29 = vsel %vm1223_vm11, %v1537_v58, %v1550_v51  ;;  %v1693_v63 = vmul.f32 %v7962_v40, %v9242_v32  ;;  %v8005_v26 = vadd.f32 %v1833_v6, %v1812_v7  ;;  %v9280_v41 = vstv %s9275_s9  ;;  %s4418_s9 = sld [smem:[#allocation4 + $0x16]] }
 0x539   : > { %v8010_v25 = vmul.f32 %v9280_v41, %v9271_v18  ;;  %v8913_v23 = vstv %s7954_s27  ;;  %v1705_v56 = vsel %vm1233_vm10, %v1691_v37, %v1689_v42  ;;  %v8912_v61 = vstv %s7958_s26 }
 0x53a   : > { %v1957_v0 = vsel %vm1221_vm9, %v1942_v19, %v1956_v59  ;;  %v1530_v14 = vmul.f32 %v7916_v24, %v9232_v31  ;;  %v1532_v9 = vmul.f32 %v7916_v24, %v9236_v13  ;;  %v1555_v16 = vadd.f32 %v1551_v29, %v1528_v3  ;;  %v9284_v19 = vld [vmem:[#allocation46_spill] sm:$0xff]  ;;  %v9285_v29 = vld [vmem:[#allocation39_spill] sm:$0xff] }
 0x53b   : > { %v1572_v43 = vmul.f32 %v7975_v30, %v9281_v4  ;;  %v1944_v7 = vmul.f32 %v9274_v5, %v9276_v48  ;;  %v8914_v52 = vstv %s7971_s8  ;;  %v1558_v51 = vmul.f32 %v8913_v23, %v9282_v55 }
 0x53c   : > { %v1586_v42 = vsel %vm1233_vm10, %v1570_v57, %v1568_v44  ;;  %v9283_v37 = vstv %s6349_s15  ;;  %v1706_v58 = vsel %vm1221_vm9, %v1693_v63, %v1705_v56  ;;  %v1563_v6 = vmul.f32 %v8912_v61, %v9284_v19  ;;  %s8075_s15 = sld [smem:[#allocation4 + $0x34]] }
 0x53d   : > { %v1935_v49 = vmul.f32 %v9283_v37, %v9277_v28  ;;  %v1958_v3 = vsel %vm1223_vm11, %v1944_v7, %v1957_v0  ;;  %v1695_v5 = vmul.f32 %v7962_v40, %v9254_v21  ;;  %v1534_v59 = vmul.f32 %v7916_v24, %v9242_v32 }
 0x53e   : > { %v1574_v44 = vmul.f32 %v7975_v30, %v9285_v29  ;;  %v1686_v63 = vmul.f32 %v8914_v52, %v9256_v50  ;;  %v1546_v41 = vsel %vm1233_vm10, %v1532_v9, %v1530_v14  ;;  %v1560_v56 = vadd.f32 %v1558_v51, %v1555_v16 }
 0x53f   : > { %v1587_v0 = vsel %vm1221_vm9, %v1572_v43, %v1586_v42  ;;  %v1707_v7 = vsel %vm1223_vm11, %v1695_v5, %v1706_v58  ;;  %v8055_v37 = vstv %s7996_s18  ;;  %v4815_v38 = vpop.eup %4814  ;;  %v1962_v61 = vadd.f32 %v1958_v3, %v1935_v49  ;;  %s9323_s18 = sld [smem:[#allocation14_spill]] }
 0x540   : > { %v1965_v23 = vmul.f32 %v1963_v2, %v9282_v55  ;;  %v1975_v57 = vmul.f32 %v9251_v1, %v9278_v27  ;;  %v1977_v52 = vmul.f32 %v9251_v1, %v9279_v12  ;;  %v4817_v14 = vpop.eup %4816  ;;  %v4002_v9 = vadd.f32 1.0, %v4815_v38 }
 0x541   : > { %v1979_v16 = vmul.f32 %v9251_v1, %v9281_v4  ;;  %v1715_v43 = vstv %s8013_s29  ;;  %v1547_v51 = vsel %vm1221_vm9, %v1534_v59, %v1546_v41  ;;  %4015 = vrot.lane.b32.xlu0 %v4817_v14, %s9261_s1  ;;  %v1713_v42 = vadd.f32 %v1707_v7, %v1686_v63  ;;  %s9324_s29 = sld [smem:[#allocation13_spill]] }
 0x542   : > { %v1726_v2 = vmul.f32 %v8055_v37, %v9250_v15  ;;  %v1728_v49 = vmul.f32 %v8055_v37, %v9252_v22  ;;  %v1536_v38 = vmul.f32 %v7916_v24, %v9254_v21  ;;  %4818 = vrcp.f32 %v4002_v9 }
 0x543   : > { %v1527_v58 = vmul.f32 %v1526_v45, %v9256_v50  ;;  %v1690_v3 = vmul.f32 %v7962_v40, %v9265_v10  ;;  %v1692_v5 = vmul.f32 %v7962_v40, %v9266_v17  ;;  %v1967_v59 = vadd.f32 %v1965_v23, %v1962_v61  ;;  %v9286_v23 = vld [vmem:[#allocation65_spill] sm:$0xff] }
 0x544   : > { %v1993_v63 = vsel %vm1233_vm10, %v1977_v52, %v1975_v57  ;;  %v1716_v41 = vmul.f32 %v1715_v43, %v9253_v11  ;;  %v1548_v24 = vsel %vm1223_vm11, %v1536_v38, %v1547_v51  ;;  %v1565_v45 = vadd.f32 %v1563_v6, %v1560_v56 }
 0x545   : > { %v1588_v7 = vsel %vm1223_vm11, %v1574_v44, %v1587_v0  ;;  %v8916_v14 = vstv %s8039_s11  ;;  %v1730_v9 = vmul.f32 %v8055_v37, %v9258_v47  ;;  %1340 = vrot.lane.b32.xlu0 %v9286_v23, %s9261_s1  ;;  %v1970_v61 = vmul.f32 %v1968_v62, %v9284_v19 }
 0x546   : > { %v1718_v52 = vadd.f32 %v1716_v41, %v1713_v42  ;;  %v1742_v57 = vsel %vm1233_vm10, %v1728_v49, %v1726_v2  ;;  %v1694_v6 = vmul.f32 %v7962_v40, %v9273_v33  ;;  %v1981_v44 = vmul.f32 %v9251_v1, %v9285_v29  ;;  %v9287_v1 = vld [vmem:[#allocation48_spill] sm:$0xff] }
 0x547   : > { %v1994_v56 = vsel %vm1221_vm9, %v1979_v16, %v1993_v63  ;;  %v1554_v0 = vadd.f32 %v1548_v24, %v1527_v58  ;;  %v1708_v51 = vsel %vm1233_vm10, %v1692_v5, %v1690_v3  ;;  %v1972_v38 = vadd.f32 %v1970_v61, %v1967_v59  ;;  %v9291_v59 = vld [vmem:[#allocation69_spill] sm:$0xff] }
 0x548   : > { %v1721_v62 = vmul.f32 %v8916_v14, %v9259_v60  ;;  %v1567_v42 = vmul.f32 %v7975_v30, %v9250_v15  ;;  %v1569_v2 = vmul.f32 %v7975_v30, %v9252_v22  ;;  %v1592_v49 = vadd.f32 %v1588_v7, %v1565_v45 }
 0x549   : > { %v9288_v41 = vstv %s7984_s20  ;;  %v1743_v58 = vsel %vm1221_vm9, %v1730_v9, %v1742_v57  ;;  %v9289_v3 = vstv %s7954_s27  ;;  %1500 = vrot.lane.b32.xlu0 %v9291_v59, %s9290_s23  ;;  %v1995_v63 = vsel %vm1223_vm11, %v1981_v44, %v1994_v56  ;;  %s8534_s27 = sld [smem:[#allocation4 + $0x32]] }
 0x54a   : > { %v1595_v16 = vmul.f32 %v9288_v41, %v9287_v1  ;;  %v1557_v5 = vmul.f32 %v9289_v3, %v9253_v11  ;;  %v1723_v24 = vadd.f32 %v1721_v62, %v1718_v52  ;;  %v1732_v45 = vmul.f32 %v8055_v37, %v9270_v36 }
 0x54b   : > { %v1709_v7 = vsel %vm1221_vm9, %v1694_v6, %v1708_v51  ;;  %v8915_v9 = vstv %s8075_s15  ;;  %v1571_v61 = vmul.f32 %v7975_v30, %v9258_v47  ;;  %v1696_v57 = vmul.f32 %v7962_v40, %v9276_v48 }
 0x54c   : > { %v1559_v23 = vadd.f32 %v1557_v5, %v1554_v0  ;;  %v1999_v44 = vadd.f32 %v1995_v63, %v1972_v38  ;;  %v1744_v52 = vsel %vm1223_vm11, %v1732_v45, %v1743_v58  ;;  %v1583_v56 = vsel %vm1233_vm10, %v1569_v2, %v1567_v42  ;;  %v4819_v51 = vpop.eup %4818 }
 0x54d   : > { %v9292_v62 = vstv %s7971_s8  ;;  %v8150_v0 = vstv %s8089_s19  ;;  %v8153_v40 = vstv %s8091_s2  ;;  %v9293_v41 = vstv %s7958_s26  ;;  %s8219_s26 = sld [smem:[#allocation6 + $0x22]]  ;;  %s8236_s2 = sld [smem:[#allocation6 + $0x1f]] }
 0x54e   : > { %v1687_v6 = vmul.f32 %v9292_v62, %v9277_v28  ;;  %v1562_v38 = vmul.f32 %v9293_v41, %v9259_v60  ;;  %v1710_v58 = vsel %vm1223_vm11, %v1696_v57, %v1709_v7  ;;  %4017 = vrot.lane.b32.xlu1 %v4819_v51, %s9261_s1  ;;  %1847 = vrot.lane.b32.xlu0 %v7937_v39, %s9261_s1  ;;  %v9294_v42 = vstv %s7880_s28  ;;  %s8181_s28 = sld [smem:[#allocation6 + $0x16]]  ;;  %v9295_v7 = vld [vmem:[#allocation107_spill] sm:$0xff]  ;;  %v366_v41 = vld [vmem:[%s9296_s6 + $0x8] sm:$0xff]  ;;  %s4436_s8 = sld [smem:[#allocation4 + $0x28]] }
 0x54f   : > { %v2002_v2 = vmul.f32 %v9294_v42, %v9287_v1  ;;  %v1750_v3 = vadd.f32 %v1744_v52, %v1723_v24  ;;  %v1753_v5 = vmul.f32 %v8915_v9, %v9271_v18  ;;  %v1584_v63 = vsel %vm1221_vm9, %v1571_v61, %v1583_v56  ;;  %s9328_s19 = sshll.u32 %s9324_s29, 6 }
 0x550   : > { %v1564_v59 = vadd.f32 %v1562_v38, %v1559_v23  ;;  %v1727_v45 = vmul.f32 %v8055_v37, %v9278_v27  ;;  %v1729_v39 = vmul.f32 %v8055_v37, %v9279_v12  ;;  %v2941_v24 = vmul.f32 0.0, %v8150_v0  ;;  %v368_v38 = vld [vmem:[%s9296_s6 + $0x18] sm:$0xff] }
 0x551   : > { %v2946_v57 = vmul.f32 %v8153_v40, %v9295_v7  ;;  %v8187_v52 = vstv %s8109_s17  ;;  %v1714_v23 = vadd.f32 %v1710_v58, %v1687_v6  ;;  %v1844_v61 = vadd.f32 %v8010_v25, %v8005_v26  ;;  %v9297_v6 = vld [vmem:[#allocation70_spill] sm:$0xff] }
 0x552   : > { %v1597_v56 = vadd.f32 %v1595_v16, %v1592_v49  ;;  %v8191_v62 = vadd.f32 %v2002_v2, %v1999_v44  ;;  %v1573_v51 = vmul.f32 %v7975_v30, %v9270_v36  ;;  %v8202_v42 = vstv %s8125_s14  ;;  %1344 = vrot.lane.b32.xlu1 %v9297_v6, %s9261_s1  ;;  %2007 = vrot.lane.b32.xlu0 %v7982_v53, %s9290_s23  ;;  %v365_v16 = vld [vmem:[%s9296_s6] sm:$0xff]  ;;  %v9299_v44 = vld [vmem:[#allocation110_spill] sm:$0xff]  ;;  %s9329_s14 = sld [smem:[#allocation182_spill]] }
 0x553   : > { %v1755_v26 = vadd.f32 %v1753_v5, %v1750_v3  ;;  %v9298_v25 = vstv %s7984_s20  ;;  %v1717_v49 = vmul.f32 %v1715_v43, %v9282_v55  ;;  %v2955_v58 = vmul.f32 %v8187_v52, %v9299_v44  ;;  %v367_v43 = vld [vmem:[%s9296_s6 + $0x10] sm:$0xff]  ;;  %v370_v5 = vld [vmem:[%s9296_s6 + $0x28] sm:$0xff]  ;;  %s8605_s20 = sld [smem:[#allocation4 + $0x31]] }
 0x554   : > { %v8211_v30 = vmul.f32 %v9298_v25, %v9271_v18  ;;  %v1585_v53 = vsel %vm1223_vm11, %v1573_v51, %v1584_v63  ;;  %v1731_v2 = vmul.f32 %v8055_v37, %v9281_v4  ;;  %v1745_v3 = vsel %vm1233_vm10, %v1729_v39, %v1727_v45  ;;  %v372_v63 = vld [vmem:[%s9296_s6 + $0x38] sm:$0xff]  ;;  %v369_v39 = vld [vmem:[%s9296_s6 + $0x20] sm:$0xff] }
 0x555   : > { %v2950_v51 = vadd.f32 %v2946_v57, %v2941_v24  ;;  %v1591_v6 = vadd.f32 %v1585_v53, %v1564_v59  ;;  %v1719_v25 = vadd.f32 %v1717_v49, %v1714_v23  ;;  %v4652_v45 = vpack.c.bf16 %v368_v38, %v366_v41  ;;  %v371_v59 = vld [vmem:[%s9296_s6 + $0x30] sm:$0xff] }
 0x556   : > { %v2964_v9 = vmul.f32 0.0, %v8202_v42  ;;  %v8245_v14 = vstv %s8147_s30  ;;  %v8248_v18 = vstv %s8138_s22  ;;  %v8251_v36 = vstv %s8145_s25  ;;  %1502 = vrot.lane.b32.xlu1 %v7940_v34, %s9290_s23  ;;  %s8267_s22 = sld [smem:[#allocation6 + $0x34]]  ;;  %s8282_s25 = sld [smem:[#allocation6 + $0x31]] }
 0x557   : > { %v8259_v24 = vstv %s8159_s12  ;;  %v8262_v57 = vstv %s8161_s16  ;;  %1599 = vrot.lane.b32.xlu0 %v1597_v56, %s9261_s1  ;;  %v4654_v23 = vpack.c.bf16 %v367_v43, %v365_v16  ;;  %v4656_v41 = vpack.c.bf16 %v372_v63, %v370_v5  ;;  %4653 = vmatprep.subr.bf16.mxu1 %v4652_v45  ;;  %s8469_s30 = sld [smem:[#allocation4 + $0x15]]  ;;  %s8472_s12 = sld [smem:[#allocation4 + $0x1e]] }
 0x558   : > { %v2959_v38 = vadd.f32 %v2955_v58, %v2950_v51  ;;  %v8270_v49 = vstv %s8174_s21  ;;  %v8273_v53 = vstv %s8172_s0  ;;  %v8276_v4 = vstv %s8181_s28  ;;  %v9300_v58 = vld [vmem:[#allocation118_spill] sm:$0xff]  ;;  %s8481_s16 = sld [smem:[#allocation4 + $0x5]]  ;;  %s8494_s0 = sld [smem:[#allocation4 + $0x29]] }
 0x559   : > { %v3061_v47 = vmul.f32 0.0, %v8248_v18  ;;  %v3066_v34 = vmul.f32 %v8251_v36, %v9295_v7  ;;  %4655 = vmatpush1.bf16.msra.mxu1 %v4654_v23  ;;  %v4658_v56 = vpack.c.bf16 %v371_v59, %v369_v39  ;;  %v8921_v16 = vmov 0.0   ;;  %s8497_s21 = sld [smem:[#allocation4 + $0x30]]  ;;  %s8503_s28 = sld [smem:[#allocation4 + $0x17]] }
 0x55a   : > { %4104 = vmatprep.mubr.f32.mxu1 %v8921_v16  ;;  %v2973_v43 = vmul.f32 %v8245_v14, %v9300_v58  ;;  %v3007_v5 = vmul.f32 0.0, %v8259_v24  ;;  %v3012_v63 = vmul.f32 %v8262_v57, %v9295_v7  ;;  %v1746_v51 = vsel %vm1221_vm9, %v1731_v2, %v1745_v3  ;;  %4657 = vmatprep.subr.bf16.mxu1 %v4656_v41 }
 0x55b   : > { %v3075_v45 = vmul.f32 %v8273_v53, %v9299_v44  ;;  %1851 = vrot.lane.b32.xlu1 %v1844_v61, %s9261_s1  ;;  %1759 = vrot.lane.b32.xlu0 %v1755_v26, %s9290_s23  ;;  %v9301_v39 = vstv %s8039_s11  ;;  %v1733_v23 = vmul.f32 %v8055_v37, %v9285_v29  ;;  %v2968_v16 = vadd.f32 %v2964_v9, %v2959_v38  ;;  %s4399_s11 = sld [smem:[#allocation4 + $0x3]] }
 0x55c   : > { %v1722_v59 = vmul.f32 %v9301_v39, %v9284_v19  ;;  %v2982_v2 = vmul.f32 %v8270_v49, %v7319_v20  ;;  %v3021_v3 = vmul.f32 %v8276_v4, %v9299_v44  ;;  %v8304_v41 = vstv %s8219_s26  ;;  %s4400_s26 = sld [smem:[#allocation4 + $0x4]] }
 0x55d   : > { %v8307_v60 = vstv %s8236_s2  ;;  %v3070_v61 = vadd.f32 %v3066_v34, %v3061_v47  ;;  %v1747_v55 = vsel %vm1223_vm11, %v1733_v23, %v1746_v51  ;;  %4659 = vmatpush1.bf16.msra.mxu1 %v4658_v56  ;;  %v2977_v39 = vadd.f32 %v2973_v43, %v2968_v16 }
 0x55e   : > { %v1724_v26 = vadd.f32 %v1722_v59, %v1719_v25  ;;  %v3016_v19 = vadd.f32 %v3012_v63, %v3007_v5  ;;  %v8311_v37 = vstv %s8241_s5  ;;  %v1596_v9 = vadd.f32 %v8211_v30, %v1591_v6  ;;  %s8649_s5 = scalar_lea.vmem %s9329_s14, %s9328_s19 }
 0x55f   : > { %v8315_v38 = vstv %s8256_s7  ;;  %v3079_v29 = vadd.f32 %v3075_v45, %v3070_v61  ;;  %v3084_v12 = vmul.f32 0.0, %v8304_v41  ;;  %v2947_v47 = vmul.f32 %v8153_v40, %v9299_v44  ;;  %2009 = vrot.lane.b32.xlu1 %v8191_v62, %s9290_s23 }
 0x560   : > { %v2986_v25 = vadd.f32 %v2982_v2, %v2977_v39  ;;  %v3025_v34 = vadd.f32 %v3021_v3, %v3016_v19  ;;  %v3030_v56 = vmul.f32 0.0, %v8307_v60  ;;  %v8324_v16 = vstv %s8267_s22 }
 0x561   : > { %v3093_v30 = vmul.f32 %v8311_v37, %v9300_v58  ;;  %v2942_v6 = vmul.f32 %v8150_v0, %v9295_v7  ;;  %v2956_v43 = vmul.f32 %v8187_v52, %v7314_v46  ;;  %v1751_v5 = vadd.f32 %v1747_v55, %v1724_v26 }
 0x562   : > { %v3039_v63 = vmul.f32 %v8315_v38, %v9300_v58  ;;  %v8335_v62 = vstv %s8282_s25  ;;  %v3088_v19 = vadd.f32 %v3084_v12, %v3079_v29  ;;  %v3102_v51 = vmul.f32 %v8324_v16, %v7319_v20 }
 0x563   : > { %v2951_v45 = vadd.f32 %v2947_v47, %v2942_v6  ;;  %1603 = vrot.lane.b32.xlu1 %v1596_v9, %s9261_s1  ;;  %v9302_v59 = vstv %s8075_s15  ;;  %v2994_v2 = vrot.slane %v2986_v25, 7  ;;  %v3034_v3 = vadd.f32 %v3030_v56, %v3025_v34  ;;  %s4408_s1 = sld [smem:[#allocation4 + $0xc]]  ;;  %s4410_s15 = sld [smem:[#allocation4 + $0xe]] }
 0x564   : > { %v1754_v23 = vmul.f32 %v9302_v59, %v9287_v1  ;;  %v3067_v55 = vmul.f32 %v8251_v36, %v9299_v44  ;;  %v3048_v61 = vmul.f32 %v8335_v62, %v7319_v20  ;;  %v3097_v26 = vadd.f32 %v3093_v30, %v3088_v19 }
 0x565   : > { %v2960_v39 = vadd.f32 %v2956_v43, %v2951_v45  ;;  %v3043_v29 = vadd.f32 %v3039_v63, %v3034_v3  ;;  %v3062_v47 = vmul.f32 %v8248_v18, %v9295_v7  ;;  %v3076_v9 = vmul.f32 %v8273_v53, %v7314_v46 }
 0x566   : > { %v1756_v12 = vadd.f32 %v1754_v23, %v1751_v5  ;;  %v3106_v6 = vadd.f32 %v3102_v51, %v3097_v26  ;;  %v2965_v25 = vmul.f32 %v8202_v42, %v9300_v58  ;;  %v2974_v34 = vmul.f32 %v8245_v14, %v7319_v20 }
 0x567   : > { %v3013_v56 = vmul.f32 %v8262_v57, %v9299_v44  ;;  %v3002_v30 = vsel %vm649_vm0, 0.0, %v2994_v2  ;;  %v3071_v43 = vadd.f32 %v3067_v55, %v3062_v47  ;;  %v3052_v5 = vadd.f32 %v3048_v61, %v3043_v29  ;;  %v2925_v55 = vpop.permute.xlu0 %2924 }
 0x568   : > { %1761 = vrot.lane.b32.xlu1 %v1756_v12, %s9290_s23  ;;  %v2969_v63 = vadd.f32 %v2965_v25, %v2960_v39  ;;  %v2983_v19 = vmul.f32 %v8270_v49, %v7339_v54  ;;  %v3008_v51 = vmul.f32 %v8259_v24, %v9295_v7  ;;  %v3022_v45 = vmul.f32 %v8276_v4, %v7314_v46  ;;  %s4435_s23 = sld [smem:[#allocation4 + $0x27]] }
 0x569   : > { %v3080_v59 = vadd.f32 %v3076_v9, %v3071_v43  ;;  %v2948_v23 = vmul.f32 %v8153_v40, %v7314_v46  ;;  %v3056_v3 = vadd.f32 %v3052_v5, %v3002_v30  ;;  %v3114_v26 = vrot.slane %v3106_v6, 1  ;;  %v3329_v5 = vpop.permute.xlu1 %3328 }
 0x56a   : > { %v2978_v12 = vadd.f32 %v2974_v34, %v2969_v63  ;;  %v3017_v2 = vadd.f32 %v3013_v56, %v3008_v51  ;;  %v3085_v61 = vmul.f32 %v8304_v41, %v9300_v58  ;;  %v3094_v39 = vmul.f32 %v8311_v37, %v7319_v20 }
 0x56b   : > { %v2943_v7 = vmul.f32 %v8150_v0, %v9299_v44  ;;  %v2957_v29 = vmul.f32 %v8187_v52, %v7323_v35  ;;  %v3103_v6 = vmul.f32 %v8324_v16, %v7339_v54  ;;  %v3122_v56 = vsel %vm656_vm1, %v3114_v26, 0.0 }
 0x56c   : > { %v2987_v47 = vadd.f32 %v2983_v19, %v2978_v12  ;;  %v3026_v9 = vadd.f32 %v3022_v45, %v3017_v2  ;;  %v3089_v25 = vadd.f32 %v3085_v61, %v3080_v59  ;;  %v2936_v30 = vsel %vm818_vm4, 0.0, %v2925_v55 }
 0x56d   : > { %v2952_v34 = vadd.f32 %v2948_v23, %v2943_v7  ;;  %v3031_v43 = vmul.f32 %v8307_v60, %v9300_v58  ;;  %v3126_v63 = vadd.f32 %v3122_v56, %v3056_v3  ;;  %v3040_v51 = vmul.f32 %v8315_v38, %v7319_v20 }
 0x56e   : > { %v3098_v1 = vadd.f32 %v3094_v39, %v3089_v25  ;;  %v2995_v45 = vrot.slane %v2987_v47, 7  ;;  %v3049_v59 = vmul.f32 %v8335_v62, %v7339_v54  ;;  %v2966_v23 = vmul.f32 %v8202_v42, %v7319_v20 }
 0x56f   : > { %v2961_v19 = vadd.f32 %v2957_v29, %v2952_v34  ;;  %v3068_v26 = vmul.f32 %v8251_v36, %v7314_v46  ;;  %v3130_v12 = vadd.f32 %v3126_v63, %v2936_v30  ;;  %v3035_v2 = vadd.f32 %v3031_v43, %v3026_v9 }
 0x570   : > { %v3107_v58 = vadd.f32 %v3103_v6, %v3098_v1  ;;  %v2975_v3 = vmul.f32 %v8245_v14, %v7339_v54  ;;  %v3341_v55 = vsel %vm3340_vm13, %v3329_v5, 0.0  ;;  %v2984_v61 = vmul.f32 %v8270_v49, %v7345_v8 }
 0x571   : > { %v3063_v39 = vmul.f32 %v8248_v18, %v9299_v44  ;;  %v3077_v7 = vmul.f32 %v8273_v53, %v7323_v35  ;;  %v3044_v29 = vadd.f32 %v3040_v51, %v3035_v2  ;;  %v2970_v47 = vadd.f32 %v2966_v23, %v2961_v19  ;;  %v2927_v23 = vpop.permute.xlu0 %2926 }
 0x572   : > { %v3009_v9 = vmul.f32 %v8259_v24, %v9299_v44  ;;  %v3014_v1 = vmul.f32 %v8262_v57, %v7314_v46  ;;  %v3003_v25 = vsel %vm649_vm0, 0.0, %v2995_v45  ;;  %v3023_v6 = vmul.f32 %v8276_v4, %v7323_v35 }
 0x573   : > { %v3072_v34 = vadd.f32 %v3068_v26, %v3063_v39  ;;  %v2949_v56 = vmul.f32 %v8153_v40, %v7323_v35  ;;  %v3345_v30 = vadd.f32 %v3341_v55, %v3130_v12  ;;  %v3053_v43 = vadd.f32 %v3049_v59, %v3044_v29 }
 0x574   : > { %v3115_v5 = vrot.slane %v3107_v58, 1  ;;  %v2979_v63 = vadd.f32 %v2975_v3, %v2970_v47  ;;  %v2944_v44 = vmul.f32 %v8150_v0, %v7314_v46  ;;  %v3018_v27 = vadd.f32 %v3014_v1, %v3009_v9  ;;  %v3331_v9 = vpop.permute.xlu1 %3330 }
 0x575   : > { %v3081_v51 = vadd.f32 %v3077_v7, %v3072_v34  ;;  %v3057_v19 = vadd.f32 %v3053_v43, %v3003_v25  ;;  %v3086_v45 = vmul.f32 %v8304_v41, %v7319_v20  ;;  %v3095_v26 = vmul.f32 %v8311_v37, %v7339_v54 }
 0x576   : > { %v2988_v2 = vadd.f32 %v2984_v61, %v2979_v63  ;;  %v2953_v39 = vadd.f32 %v2949_v56, %v2944_v44  ;;  %v2958_v40 = vmul.f32 0.0, %v8187_v52  ;;  %v3349_v59 = vsub.f32 0.0, %v3345_v30 }
 0x577   : > { %v3123_v12 = vsel %vm656_vm1, %v3115_v5, 0.0  ;;  %v3027_v58 = vadd.f32 %v3023_v6, %v3018_v27  ;;  %v3104_v0 = vmul.f32 %v8324_v16, %v7345_v8  ;;  %v2937_v3 = vsel %vm818_vm4, 0.0, %v2927_v23 }
 0x578   : > { %v3090_v55 = vadd.f32 %v3086_v45, %v3081_v51  ;;  %v2967_v61 = vmul.f32 %v8202_v42, %v7339_v54  ;;  %v3069_v7 = vmul.f32 %v8251_v36, %v7323_v35  ;;  %v3127_v29 = vadd.f32 %v3123_v12, %v3057_v19 }
 0x579   : > { %v2996_v47 = vrot.slane %v2988_v2, 7  ;;  %v3032_v52 = vmul.f32 %v8307_v60, %v7319_v20  ;;  %v3041_v27 = vmul.f32 %v8315_v38, %v7339_v54  ;;  %v2962_v25 = vadd.f32 %v2958_v40, %v2953_v39 }
 0x57a   : > { %v3099_v1 = vadd.f32 %v3095_v26, %v3090_v55  ;;  %v2976_v6 = vmul.f32 %v8245_v14, %v7345_v8  ;;  %v3064_v42 = vmul.f32 %v8248_v18, %v7314_v46  ;;  %v3131_v34 = vadd.f32 %v3127_v29, %v2937_v3 }
 0x57b   : > { %v3036_v56 = vadd.f32 %v3032_v52, %v3027_v58  ;;  %v3050_v36 = vmul.f32 %v8335_v62, %v7345_v8  ;;  %v3015_v20 = vmul.f32 %v8262_v57, %v7323_v35  ;;  %v2971_v43 = vadd.f32 %v2967_v61, %v2962_v25  ;;  %v3333_v52 = vpop.permute.xlu1 %3332 }
 0x57c   : > { %v3108_v30 = vadd.f32 %v3104_v0, %v3099_v1  ;;  %v3073_v5 = vadd.f32 %v3069_v7, %v3064_v42  ;;  %v3078_v63 = vmul.f32 0.0, %v8273_v53  ;;  %v3353_v51 = vmul.f32 1.442695, %v3349_v59 }
 0x57d   : > { %v3342_v44 = vsel %vm3340_vm13, %v3331_v9, 0.0  ;;  %v3045_v14 = vadd.f32 %v3041_v27, %v3036_v56  ;;  %v3010_v18 = vmul.f32 %v8259_v24, %v7314_v46  ;;  %v3004_v19 = vsel %vm649_vm0, 0.0, %v2996_v47  ;;  %v2929_v46 = vpop.permute.xlu0 %2928 }
 0x57e   : > { %v2980_v23 = vadd.f32 %v2976_v6, %v2971_v43  ;;  %v2985_v2 = vmul.f32 0.0, %v8270_v49  ;;  %v3087_v35 = vmul.f32 %v8304_v41, %v7339_v54  ;;  %v3346_v57 = vadd.f32 %v3342_v44, %v3131_v34 }
 0x57f   : > { %v3054_v45 = vadd.f32 %v3050_v36, %v3045_v14  ;;  %v3019_v26 = vadd.f32 %v3015_v20, %v3010_v18  ;;  %v3024_v53 = vmul.f32 0.0, %v8276_v4  ;;  %v3116_v39 = vrot.slane %v3108_v30, 1 }
 0x580   : > { %v3082_v40 = vadd.f32 %v3078_v63, %v3073_v5  ;;  %v3096_v59 = vmul.f32 %v8311_v37, %v7345_v8  ;;  %v3033_v24 = vmul.f32 %v8307_v60, %v7339_v54  ;;  %4820 = vpow2.f32 %v3353_v51  ;;  %v3335_v63 = vpop.permute.xlu1 %3334 }
 0x581   : > { %v3058_v12 = vadd.f32 %v3054_v45, %v3004_v19  ;;  %v2989_v49 = vadd.f32 %v2985_v2, %v2980_v23  ;;  %v3350_v0 = vsub.f32 0.0, %v3346_v57  ;;  %v3028_v41 = vadd.f32 %v3024_v53, %v3019_v26  ;;  %v2931_v56 = vpop.permute.xlu0 %2930 }
 0x582   : > { %v3091_v58 = vadd.f32 %v3087_v35, %v3082_v40  ;;  %v3042_v3 = vmul.f32 %v8315_v38, %v7345_v8  ;;  %v3124_v4 = vsel %vm656_vm1, %v3116_v39, 0.0  ;;  %v2938_v55 = vsel %vm818_vm4, 0.0, %v2929_v46 }
 0x583   : > { %v3105_v37 = vmul.f32 0.0, %v8324_v16  ;;  %v3128_v7 = vadd.f32 %v3124_v4, %v3058_v12  ;;  %v3037_v29 = vadd.f32 %v3033_v24, %v3028_v41  ;;  %v2997_v47 = vrot.slane %v2989_v49, 7 }
 0x584   : > { %v3100_v61 = vadd.f32 %v3096_v59, %v3091_v58  ;;  %v3051_v27 = vmul.f32 0.0, %v8335_v62  ;;  %v3355_v9 = vmul.f32 1.442695, %v3350_v0  ;;  %v3343_v25 = vsel %vm3340_vm13, %v3333_v52, 0.0 }
 0x585   : > { %v3132_v54 = vadd.f32 %v3128_v7, %v2938_v55  ;;  %v3046_v60 = vadd.f32 %v3042_v3, %v3037_v29  ;;  %v3005_v8 = vsel %vm649_vm0, 0.0, %v2997_v47  ;;  %v2939_v43 = vsel %vm818_vm4, 0.0, %v2931_v56 }
 0x586   : > { %v3109_v1 = vadd.f32 %v3105_v37, %v3100_v61  ;;  %4822 = vpow2.f32 %v3355_v9  ;;  %v3344_v14 = vsel %vm3340_vm13, %v3335_v63, 0.0  ;;  %v9303_v26 = vmov 0.0  }
 0x587   : > { %v3347_v38 = vadd.f32 %v3343_v25, %v3132_v54  ;;  %v3055_v6 = vadd.f32 %v3051_v27, %v3046_v60  ;;  %v1355_v39 = vstv %s4408_s1  ;;  %v1352_v55 = vstv %s4399_s11 }
 0x588   : > { %v3117_v34 = vrot.slane %v3109_v1, 1  ;;  %v1356_v59 = vmul.f32 %v1355_v39, %v9232_v31  ;;  %v1358_v12 = vmul.f32 %v1355_v39, %v9236_v13  ;;  %v1357_v58 = vmul.f32 %v1355_v39, %v9265_v10 }
 0x589   : > { %v3059_v16 = vadd.f32 %v3055_v6, %v3005_v8  ;;  %v3351_v20 = vsub.f32 0.0, %v3347_v38  ;;  %v1359_v0 = vmul.f32 %v1355_v39, %v9266_v17  ;;  %v1360_v41 = vmul.f32 %v1355_v39, %v9242_v32 }
 0x58a   : > { %v4821_v42 = vpop.eup %4820  ;;  %v3125_v30 = vsel %vm656_vm1, %v3117_v34, 0.0  ;;  %v1372_v3 = vsel %vm1233_vm10, %v1358_v12, %v1356_v59  ;;  %v1361_v4 = vmul.f32 %v1355_v39, %v9273_v33  ;;  %v1362_v29 = vmul.f32 %v1355_v39, %v9254_v21  ;;  %v9308_v59 = vld [vmem:[#allocation41_spill] sm:$0xff] }
 0x58b   : > { %v3361_v36 = vadd.f32 1.0, %v4821_v42  ;;  %v3129_v62 = vadd.f32 %v3125_v30, %v3059_v16  ;;  %v3357_v5 = vmul.f32 1.442695, %v3351_v20  ;;  %v1375_v61 = vsel %vm1233_vm10, %v1359_v0, %v1357_v58 }
 0x58c   : > { %v1373_v7 = vsel %vm1221_vm9, %v1360_v41, %v1372_v3  ;;  %v1862_v47 = vstv %s4410_s15  ;;  %v1353_v52 = vmul.f32 %v1352_v55, %v9256_v50  ;;  %v1354_v54 = vmul.f32 %v1352_v55, %v9277_v28  ;;  %v9309_v41 = vld [vmem:[#allocation35_spill] sm:$0xff] }
 0x58d   : > { %4824 = vrcp.f32 %v3361_v36  ;;  %v3133_v51 = vadd.f32 %v3129_v62, %v2939_v43  ;;  %v1376_v60 = vsel %vm1221_vm9, %v1361_v4, %v1375_v61  ;;  %v1363_v9 = vmul.f32 %v1355_v39, %v9276_v48  ;;  %v9307_v39 = vld [vmem:[#allocation58_spill] sm:$0xff]  ;;  %v9310_v61 = vld [vmem:[#allocation46_spill] sm:$0xff] }
 0x58e   : > { %4826 = vpow2.f32 %v3357_v5  ;;  %v1374_v1 = vsel %vm1223_vm11, %v1362_v29, %v1373_v7  ;;  %v1392_v25 = vstv %s4435_s23  ;;  %v1863_v8 = vmul.f32 %v1862_v47, %v9232_v31 }
 0x58f   : > { %v3348_v18 = vadd.f32 %v3344_v14, %v3133_v51  ;;  %v1864_v38 = vmul.f32 %v1862_v47, %v9265_v10  ;;  %v1865_v6 = vmul.f32 %v1862_v47, %v9236_v13  ;;  %v1866_v42 = vmul.f32 %v1862_v47, %v9266_v17 }
 0x590   : > { %v4823_v44 = vpop.eup %4822  ;;  %v1377_v56 = vsel %vm1223_vm11, %v1363_v9, %v1376_v60  ;;  %v1382_v36 = vstv %s8469_s30  ;;  %v1380_v30 = vadd.f32 %v1374_v1, %v1353_v52  ;;  %v1387_v43 = vstv %s8472_s12 }
 0x591   : > { %v3362_v19 = vadd.f32 1.0, %v4823_v44  ;;  %v3352_v23 = vsub.f32 0.0, %v3348_v18  ;;  %v1393_v62 = vmul.f32 %v1392_v25, %v9250_v15  ;;  %v1395_v5 = vmul.f32 %v1392_v25, %v9252_v22 }
 0x592   : > { %v1867_v63 = vmul.f32 %v1862_v47, %v9242_v32  ;;  %v1868_v51 = vmul.f32 %v1862_v47, %v9273_v33  ;;  %v1381_v44 = vadd.f32 %v1377_v56, %v1354_v54  ;;  %v1879_v14 = vsel %vm1233_vm10, %v1865_v6, %v1863_v8  ;;  %v9311_v8 = vld [vmem:[#allocation50_spill] sm:$0xff] }
 0x593   : > { %4828 = vrcp.f32 %v3362_v19  ;;  %v3359_v45 = vmul.f32 1.442695, %v3352_v23  ;;  %v1882_v18 = vsel %vm1233_vm10, %v1866_v42, %v1864_v38  ;;  %v1383_v19 = vmul.f32 %v1382_v36, %v9253_v11  ;;  %v9304_v23 = vld [vmem:[#allocation29_spill] sm:$0xff] }
 0x594   : > { %v1397_v12 = vmul.f32 %v1392_v25, %v9308_v59  ;;  %v1883_v58 = vsel %vm1221_vm9, %v1868_v51, %v1882_v18  ;;  %v1398_v3 = vmul.f32 %v1392_v25, %v9309_v41  ;;  %v1869_v4 = vmul.f32 %v1862_v47, %v9254_v21 }
 0x595   : > { %4830 = vpow2.f32 %v3359_v45  ;;  %v9306_v45 = vld [vmem:[#allocation45_spill] sm:$0xff]  ;;  %v1870_v55 = vmul.f32 %v1862_v47, %v9276_v48  ;;  %v1899_v9 = vstv %s8494_s0  ;;  %v1399_v38 = vmul.f32 %v1392_v25, %v9311_v8  ;;  %v9312_v47 = vld [vmem:[#allocation39_spill] sm:$0xff] }
 0x596   : > { %v1400_v6 = vmul.f32 %v1392_v25, %v9312_v47  ;;  %v1419_v42 = vstv %s8497_s21 }
 0x597   : > { %v4825_v2 = vpop.eup %4824 }
 0x598   : > { %v4827_v53 = vpop.eup %4826 }
 0x599   : > { %v3363_v40 = vadd.f32 1.0, %v4827_v53  ;;  %v1384_v53 = vmul.f32 %v1382_v36, %v9306_v45  ;;  %v1889_v36 = vstv %s8503_s28 }
 0x59b   : > { %4832 = vrcp.f32 %v3363_v40  ;;  %v1388_v40 = vmul.f32 %v1387_v43, %v9307_v39  ;;  %v1386_v0 = vadd.f32 %v1384_v53, %v1381_v44  ;;  %v1902_v44 = vmul.f32 %v1899_v9, %v9252_v22 }
 0x59c   : > { %v1891_v53 = vmul.f32 %v1889_v36, %v9306_v45 }
 0x59d   : > { %v4829_v46 = vpop.eup %4828 }
 0x59e   : > { %v4012_v35 = vpop.permute.xlu0 %4011 }
 0x59f   : > { %v4023_v57 = vsel %vm708_vm2, %v4825_v2, %v4012_v35  ;;  %v4831_v37 = vpop.eup %4830  ;;  %v1394_v2 = vmul.f32 %v1392_v25, %v9304_v23  ;;  %v9305_v35 = vld [vmem:[#allocation31_spill] sm:$0xff] }
 0x5a0   : > { %4556 = vmatmul.mubr.msk.f32.vlgmr.msra.gmra.mrb[4].mxu1 %vm4027_vm14, %v4023_v57  ;;  %v3364_v27 = vadd.f32 1.0, %v4831_v37  ;;  %v1396_v57 = vmul.f32 %v1392_v25, %v9305_v35  ;;  %v1389_v37 = vmul.f32 %v1387_v43, %v9310_v61  ;;  %v1901_v25 = vmul.f32 %v1899_v9, %v9304_v23 }
 0x5a1   : > { %4110 = vmatprep.mubr.f32.mxu1 %v9303_v26 }
 0x5a2   : > { %4834 = vrcp.f32 %v3364_v27  ;;  %v1412_v7 = vsel %vm1233_vm10, %v1396_v57, %v1394_v2  ;;  %v1884_v27 = vsel %vm1223_vm11, %v1870_v55, %v1883_v58  ;;  %v1890_v57 = vmul.f32 %v1889_v36, %v9253_v11 }
 0x5a3   : > { %v1413_v56 = vsel %vm1221_vm9, %v1398_v3, %v1412_v7  ;;  %v1905_v55 = vmul.f32 %v1899_v9, %v9309_v41 }
 0x5a4   : > { %v1414_v18 = vsel %vm1223_vm11, %v1400_v6, %v1413_v56  ;;  %v1926_v56 = vstv %s8534_s27 }
 0x5a5   : > { %v4833_v34 = vpop.eup %4832 }
 0x5a8   : > { %v4014_v24 = vpop.permute.xlu1 %4013 }
 0x5a9   : > { %v4024_v49 = vsel %vm708_vm2, %v4829_v46, %v4014_v24  ;;  %v1385_v46 = vadd.f32 %v1383_v19, %v1380_v30  ;;  %v1409_v24 = vsel %vm1233_vm10, %v1395_v5, %v1393_v62  ;;  %v9313_v19 = vld [vmem:[#allocation63_spill] sm:$0xff] }
 0x5aa   : > { %4557 = vmatmul.mubr.msk.f32.gmra.mrb[6].mxu1 %vm4027_vm14, %v4024_v49  ;;  %v1880_v49 = vsel %vm1221_vm9, %v1867_v63, %v1879_v14  ;;  %v1410_v54 = vsel %vm1221_vm9, %v1397_v12, %v1409_v24  ;;  %v1900_v63 = vmul.f32 %v1899_v9, %v9250_v15  ;;  %v1903_v14 = vmul.f32 %v1899_v9, %v9305_v35 }
 0x5ab   : > { %4116 = vmatprep.mubr.f32.mxu1 %v9303_v26  ;;  %v1881_v60 = vsel %vm1223_vm11, %v1869_v4, %v1880_v49  ;;  %v1411_v43 = vsel %vm1223_vm11, %v1399_v38, %v1410_v54  ;;  %v1420_v2 = vmul.f32 %v1419_v42, %v9313_v19  ;;  %v1894_v24 = vstv %s8518_s13  ;;  %v9315_v54 = vld [vmem:[#allocation18_spill] sm:$0xff] }
 0x5ac   : > { %v1904_v4 = vmul.f32 %v1899_v9, %v9308_v59  ;;  %v1895_v6 = vmul.f32 %v1894_v24, %v9307_v39 }
 0x5b3   : > { %v4016_v16 = vpop.permute.xlu0 %4015 }
 0x5b4   : > { %v4025_v20 = vsel %vm708_vm2, %v4833_v34, %v4016_v16  ;;  %v1390_v34 = vadd.f32 %v1388_v40, %v1385_v46  ;;  %v1391_v16 = vadd.f32 %v1389_v37, %v1386_v0 }
 0x5b5   : > { %4558 = vmatmul.mubr.msk.f32.gmra.mrb[8].mxu1 %vm4027_vm14, %v4025_v20  ;;  %v4835_v20 = vpop.eup %4834 }
 0x5b6   : > { %4122 = vmatprep.mubr.f32.mxu1 %v9303_v26  ;;  %v1859_v26 = vstv %s8481_s16  ;;  %v1417_v40 = vadd.f32 %v1411_v43, %v1390_v34  ;;  %v1418_v12 = vadd.f32 %v1414_v18, %v1391_v16  ;;  %v9317_v18 = vld [vmem:[#allocation20_spill] sm:$0xff] }
 0x5b7   : > { %v1860_v29 = vmul.f32 %v1859_v26, %v9256_v50  ;;  %v1861_v52 = vmul.f32 %v1859_v26, %v9277_v28  ;;  %v1341_v1 = vpop.permute.xlu0 %1340  ;;  %v9314_v26 = vld [vmem:[#allocation48_spill] sm:$0xff] }
 0x5b8   : > { %v1421_v46 = vmul.f32 %v1419_v42, %v9314_v26  ;;  %v1896_v42 = vmul.f32 %v1894_v24, %v9310_v61  ;;  %v1422_v34 = vadd.f32 %v1420_v2, %v1417_v40 }
 0x5b9   : > { %v1887_v62 = vadd.f32 %v1881_v60, %v1860_v29  ;;  %v1888_v5 = vadd.f32 %v1884_v27, %v1861_v52  ;;  %v1916_v29 = vsel %vm1233_vm10, %v1902_v44, %v1900_v63  ;;  %v1919_v52 = vsel %vm1233_vm10, %v1903_v14, %v1901_v25  ;;  %v9316_v27 = vld [vmem:[#allocation19_spill] sm:$0xff] }
 0x5ba   : > { %v1423_v16 = vadd.f32 %v1421_v46, %v1418_v12  ;;  %v1920_v43 = vsel %vm1221_vm9, %v1905_v55, %v1919_v52  ;;  %v1906_v63 = vmul.f32 %v1899_v9, %v9311_v8  ;;  %v1928_v55 = vmul.f32 %v1926_v56, %v9314_v26 }
 0x5bb   : > { %v1501_v49 = vpop.permute.xlu0 %1500  ;;  %v1892_v0 = vadd.f32 %v1890_v57, %v1887_v62  ;;  %v1893_v3 = vadd.f32 %v1891_v53, %v1888_v5  ;;  %v9318_v57 = vld [vmem:[#allocation21_spill] sm:$0xff] }
 0x5c0   : > { %v4018_v30 = vpop.permute.xlu1 %4017  ;;  %v1848_v14 = vpop.permute.xlu0 %1847 }
 0x5c1   : > { %v4026_v51 = vsel %vm708_vm2, %v4835_v20, %v4018_v30  ;;  %v1897_v20 = vadd.f32 %v1895_v6, %v1892_v0  ;;  %v1898_v30 = vadd.f32 %v1896_v42, %v1893_v3  ;;  %v1927_v3 = vmul.f32 %v1926_v56, %v9313_v19 }
 0x5c2   : > { %4559 = vmatmul.mubr.msk.f32.gmra.mrb[10].mxu1 %vm4027_vm14, %v4026_v51  ;;  %v1907_v51 = vmul.f32 %v1899_v9, %v9312_v47 }
 0x5c4   : > { %v1345_v58 = vpop.permute.xlu1 %1344  ;;  %v1921_v12 = vsel %vm1223_vm11, %v1907_v51, %v1920_v43 }
 0x5c5   : > { %v1346_v37 = vsel %vm708_vm2, %v1345_v58, %v1341_v1  ;;  %v1349_v7 = vsel %vm708_vm2, %v1341_v1, %v1345_v58  ;;  %v1917_v1 = vsel %vm1221_vm9, %v1904_v4, %v1916_v29  ;;  %v1925_v0 = vadd.f32 %v1921_v12, %v1898_v30  ;;  %v2008_v29 = vpop.permute.xlu0 %2007 }
 0x5c6   : > { %v1350_v60 = vmul.f32 %v1349_v7, %v9315_v54  ;;  %v1351_v38 = vmul.f32 %v1346_v37, %v9316_v27  ;;  %v1918_v40 = vsel %vm1223_vm11, %v1906_v63, %v1917_v1  ;;  %v1651_v12 = vstv %s4436_s8 }
 0x5c7   : > { %v1924_v58 = vadd.f32 %v1918_v40, %v1897_v20 }
 0x5c8   : > { %v1503_v36 = vpop.permute.xlu1 %1502  ;;  %v1424_v25 = vadd.f32 %v1422_v34, %v1350_v60  ;;  %v1425_v44 = vadd.f32 %v1423_v16, %v1351_v38  ;;  %v1930_v60 = vadd.f32 %v1928_v55, %v1925_v0  ;;  %v1652_v0 = vmul.f32 %v1651_v12, %v9250_v15 }
 0x5c9   : > { %v1504_v62 = vsel %vm790_vm3, %v1501_v49, %v1503_v36  ;;  %v1508_v5 = vsel %vm790_vm3, %v1503_v36, %v1501_v49  ;;  %v1929_v52 = vadd.f32 %v1927_v3, %v1924_v58  ;;  %v1600_v3 = vpop.permute.xlu0 %1599  ;;  %v1656_v15 = vmul.f32 %v1651_v12, %v9308_v59 }
 0x5ca   : > { %v1509_v2 = vmul.f32 %v1504_v62, %v9317_v18  ;;  %v1510_v53 = vmul.f32 %v1508_v5, %v9318_v57  ;;  %v1658_v59 = vmul.f32 %v1651_v12, %v9311_v8 }
 0x5cc   : > { %v1511_v46 = vadd.f32 %v1509_v2, %v1424_v25  ;;  %v1512_v24 = vadd.f32 %v1510_v53, %v1425_v44  ;;  %v1611_v2 = vstv %s4400_s26 }
 0x5cd   : > { %v1852_v49 = vpop.permute.xlu1 %1851 }
 0x5ce   : > { %v1853_v9 = vsel %vm708_vm2, %v1852_v49, %v1848_v14  ;;  %v1856_v4 = vsel %vm708_vm2, %v1848_v14, %v1852_v49  ;;  %1514 = vrot.lane.b32.xlu0 %v1512_v24, %s9135_s10  ;;  %1518 = vrot.lane.b32.xlu1 %v1511_v46, %s9135_s10  ;;  %s4409_s10 = sld [smem:[#allocation4 + $0xd]]  ;;  %v1641_v46 = vstv %s4418_s9  ;;  %v1653_v49 = vmul.f32 %v1651_v12, %v9304_v23 }
 0x5cf   : > { %v1857_v37 = vmul.f32 %v1856_v4, %v9315_v54  ;;  %v1858_v7 = vmul.f32 %v1853_v9, %v9316_v27  ;;  %v1657_v23 = vmul.f32 %v1651_v12, %v9309_v41  ;;  %v1659_v41 = vmul.f32 %v1651_v12, %v9312_v47 }
 0x5d1   : > { %v2010_v38 = vpop.permute.xlu1 %2009  ;;  %v1931_v34 = vadd.f32 %v1929_v52, %v1857_v37  ;;  %v1932_v16 = vadd.f32 %v1930_v60, %v1858_v7 }
 0x5d2   : > { %v2011_v6 = vsel %vm790_vm3, %v2008_v29, %v2010_v38  ;;  %v2015_v42 = vsel %vm790_vm3, %v2010_v38, %v2008_v29 }
 0x5d3   : > { %v2016_v56 = vmul.f32 %v2011_v6, %v9317_v18  ;;  %v2017_v36 = vmul.f32 %v2015_v42, %v9318_v57  ;;  %v1678_v42 = vstv %s8605_s20 }
 0x5d4   : > { %v1614_v1 = vstv %s4409_s10  ;;  %v1679_v8 = vmul.f32 %v1678_v42, %v9313_v19  ;;  %v1680_v47 = vmul.f32 %v1678_v42, %v9314_v26 }
 0x5d5   : > { %v2018_v20 = vadd.f32 %v2016_v56, %v1931_v34  ;;  %v2019_v30 = vadd.f32 %v2017_v36, %v1932_v16  ;;  %v1615_v43 = vmul.f32 %v1614_v1, %v9232_v31  ;;  %v1616_v62 = vmul.f32 %v1614_v1, %v9265_v10  ;;  %v1604_v9 = vpop.permute.xlu1 %1603 }
 0x5d6   : > { %v1617_v5 = vmul.f32 %v1614_v1, %v9236_v13  ;;  %v1618_v63 = vmul.f32 %v1614_v1, %v9266_v17  ;;  %v1619_v51 = vmul.f32 %v1614_v1, %v9242_v32  ;;  %v1620_v25 = vmul.f32 %v1614_v1, %v9273_v33 }
 0x5d7   : > { %2024 = vrot.lane.b32.xlu1 %v2019_v30, %s9134_s24  ;;  %2022 = vrot.lane.b32.xlu0 %v2018_v20, %s9134_s24  ;;  %s4427_s24 = sld [smem:[#allocation4 + $0x1f]]  ;;  %v1621_v13 = vmul.f32 %v1614_v1, %v9254_v21  ;;  %v1622_v10 = vmul.f32 %v1614_v1, %v9276_v48  ;;  %v1612_v17 = vmul.f32 %v1611_v2, %v9256_v50 }
 0x5d8   : > { %v1631_v44 = vsel %vm1233_vm10, %v1617_v5, %v1615_v43  ;;  %v1634_v14 = vsel %vm1233_vm10, %v1618_v63, %v1616_v62  ;;  %v1613_v32 = vmul.f32 %v1611_v2, %v9277_v28  ;;  %v1654_v21 = vmul.f32 %v1651_v12, %v9252_v22 }
 0x5d9   : > { %v1632_v53 = vsel %vm1221_vm9, %v1619_v51, %v1631_v44  ;;  %v1635_v31 = vsel %vm1221_vm9, %v1620_v25, %v1634_v14  ;;  %v1655_v48 = vmul.f32 %v1651_v12, %v9305_v35  ;;  %v1642_v50 = vmul.f32 %v1641_v46, %v9253_v11  ;;  %v1760_v11 = vpop.permute.xlu0 %1759 }
 0x5da   : > { %v1633_v33 = vsel %vm1223_vm11, %v1621_v13, %v1632_v53  ;;  %v1636_v40 = vsel %vm1223_vm11, %v1622_v10, %v1635_v31  ;;  %v1643_v28 = vmul.f32 %v1641_v46, %v9306_v45  ;;  %v1668_v22 = vsel %vm1233_vm10, %v1654_v21, %v1652_v0  ;;  %v1762_v6 = vpop.permute.xlu1 %1761  ;;  %v9319_v13 = vld [vmem:[#allocation22_spill] sm:$0xff]  ;;  %v9320_v10 = vld [vmem:[#allocation23_spill] sm:$0xff] }
 0x5db   : > { %v1639_v24 = vadd.f32 %v1633_v33, %v1612_v17  ;;  %v1640_v58 = vadd.f32 %v1636_v40, %v1613_v32  ;;  %v1671_v35 = vsel %vm1233_vm10, %v1655_v48, %v1653_v49  ;;  %v1669_v60 = vsel %vm1221_vm9, %v1656_v15, %v1668_v22 }
 0x5dc   : > { %v1672_v38 = vsel %vm1221_vm9, %v1657_v23, %v1671_v35  ;;  %v1670_v34 = vsel %vm1223_vm11, %v1658_v59, %v1669_v60  ;;  %v1763_v1 = vsel %vm790_vm3, %v1760_v11, %v1762_v6  ;;  %v1767_v43 = vsel %vm790_vm3, %v1762_v6, %v1760_v11  ;;  %v9325_v35 = vld [vmem:[#allocation15_spill] sm:$0xff]  ;;  %v9326_v60 = vld [vmem:[#allocation16_spill] sm:$0xff]  ;;  %v9327_v59 = vld [vmem:[#allocation17_spill] sm:$0xff] }
 0x5dd   : > { %v1646_v4 = vstv %s4427_s24  ;;  %v1644_v55 = vadd.f32 %v1642_v50, %v1639_v24  ;;  %v1645_v37 = vadd.f32 %v1643_v28, %v1640_v58  ;;  %v1673_v16 = vsel %vm1223_vm11, %v1659_v41, %v1672_v38  ;;  %v9321_v24 = vld [vmem:[#allocation24_spill] sm:$0xff]  ;;  %v9322_v58 = vld [vmem:[#allocation25_spill] sm:$0xff] }
 0x5de   : > { %v1647_v7 = vmul.f32 %v1646_v4, %v9307_v39  ;;  %v1648_v29 = vmul.f32 %v1646_v4, %v9310_v61  ;;  %v1605_v39 = vsel %vm708_vm2, %v1604_v9, %v1600_v3  ;;  %v1608_v61 = vsel %vm708_vm2, %v1600_v3, %v1604_v9 }
 0x5df   : > { %v1609_v62 = vmul.f32 %v1608_v61, %v9315_v54  ;;  %v1610_v5 = vmul.f32 %v1605_v39, %v9316_v27  ;;  %v1768_v14 = vmul.f32 %v1763_v1, %v9317_v18  ;;  %v1769_v2 = vmul.f32 %v1767_v43, %v9318_v57  ;;  %v4844_v61 = vld [vmem:[%s9323_s18] sm:$0xff] }
 0x5e0   : > { %v1649_v52 = vadd.f32 %v1647_v7, %v1644_v55  ;;  %v1650_v45 = vadd.f32 %v1648_v29, %v1645_v37  ;;  %v4946_v37 = vmov 1966171168  }
 0x5e1   : > { %v4133_v15 = vunpack.c.l.s4 %v4946_v37 }
 0x5e2   : > { %v1676_v56 = vadd.f32 %v1670_v34, %v1649_v52  ;;  %v1677_v36 = vadd.f32 %v1673_v16, %v1650_v45 }
 0x5e3   : > { %v4134_v23 = vunpack.c.0.s8 %v4133_v15 }
 0x5e4   : > { %v1681_v25 = vadd.f32 %v1679_v8, %v1676_v56  ;;  %v1682_v44 = vadd.f32 %v1680_v47, %v1677_v36  ;;  %v4845_v36 = vld [vmem:[%s9323_s18 + $0x8] sm:$0xff] }
 0x5e5   : > { %v4137_v7 = vsub.s32 %v4134_v23, %v9325_v35 }
 0x5e6   : > { %v1683_v53 = vadd.f32 %v1681_v25, %v1609_v62  ;;  %v1684_v31 = vadd.f32 %v1682_v44, %v1610_v5  ;;  %v4846_v25 = vld [vmem:[%s9323_s18 + $0x10] sm:$0xff] }
 0x5e8   : > { %v1770_v17 = vadd.f32 %v1768_v14, %v1683_v53  ;;  %v1771_v54 = vadd.f32 %v1769_v2, %v1684_v31  ;;  %v4847_v14 = vld [vmem:[%s9323_s18 + $0x18] sm:$0xff] }
 0x640   : > { %v1515_v20 = vpop.permute.xlu0 %1514  ;;  %v1519_v30 = vpop.permute.xlu1 %1518 }
 0x641   : > { %v1520_v63 = vsel %vm818_vm4, %v1519_v30, %v1515_v20  ;;  %v1523_v51 = vsel %vm818_vm4, %v1515_v20, %v1519_v30 }
 0x642   : > { %v1524_v19 = vmul.f32 %v1523_v51, %v9319_v13  ;;  %v1525_v26 = vmul.f32 %v1520_v63, %v9320_v10 }
 0x644   : > { %v1772_v12 = vadd.f32 %v1770_v17, %v1524_v19  ;;  %v1773_v46 = vadd.f32 %v1771_v54, %v1525_v26 }
 0x649   : > { %v2023_v32 = vpop.permute.xlu0 %2022  ;;  %v2025_v27 = vpop.permute.xlu1 %2024 }
 0x64a   : > { %v2026_v33 = vsel %vm1072_vm5, %v2023_v32, %v2025_v27  ;;  %v2030_v40 = vsel %vm1072_vm5, %v2025_v27, %v2023_v32  ;;  %v4848_v27 = vld [vmem:[%s9323_s18 + $0x20] sm:$0xff] }
 0x64b   : > { %v2031_v18 = vmul.f32 %v2026_v33, %v9321_v24  ;;  %v2032_v57 = vmul.f32 %v2030_v40, %v9322_v58  ;;  %v4849_v40 = vld [vmem:[%s9323_s18 + $0x28] sm:$0xff] }
 0x64d   : > { %v2033_v0 = vadd.f32 %v2031_v18, %v1772_v12  ;;  %v2034_v49 = vadd.f32 %v2032_v57, %v1773_v46 }
 0x64f   : > { %v2035_v21 = vsub.f32 0.0, %v2033_v0  ;;  %v2036_v48 = vsub.f32 0.0, %v2034_v49 }
 0x651   : > { %v2037_v3 = vmul.f32 1.442695, %v2035_v21  ;;  %v2039_v50 = vmul.f32 1.442695, %v2036_v48 }
 0x653   : > { %4836 = vpow2.f32 %v2037_v3  ;;  %v4850_v3 = vld [vmem:[%s9323_s18 + $0x30] sm:$0xff] }
 0x654   : > { %4838 = vpow2.f32 %v2039_v50 }
 0x65d   : > { %v4837_v28 = vpop.eup %4836 }
 0x65e   : > { %v4839_v9 = vpop.eup %4838  ;;  %v2041_v4 = vadd.f32 1.0, %v4837_v28  ;;  %v4851_v28 = vld [vmem:[%s9323_s18 + $0x38] sm:$0xff] }
 0x65f   : > { %v2042_v55 = vadd.f32 1.0, %v4839_v9 }
 0x660   : > { %4840 = vrcp.f32 %v2041_v4 }
 0x661   : > { %4842 = vrcp.f32 %v2042_v55 }
 0x66a   : > { %v4841_v22 = vpop.eup %4840 }
 0x66b   : > { %v4843_v29 = vpop.eup %4842 }
 0x66c   : > { %v4131_v11 = vcombine.low %v4841_v22, %v4843_v29 }
 0x66e   : > { %v4138_v52 = vrot.slane %v4131_v11, %v4137_v7 }
 0x670   : > { %v4146_v45 = vrot.slane %v4138_v52, %v4137_v7  ;;  %v4139_v16 = vcombine.high %v4138_v52, %v4138_v52 }
 0x672   : > { %v4159_v38 = vrot.slane %v4146_v45, %v9326_v60  ;;  %v4163_v41 = vrot.slane %v4146_v45, %v9327_v59  ;;  %v4153_v1 = vrot.slane %v4139_v16, %v4137_v7  ;;  %v4154_v13 = vcombine.high %v4146_v45, %v4146_v45 }
 0x673   : > { %v4106_v6 = vpop.f32.mrb[4].mxu1 }
 0x674   : > { %v4196_v42 = vadd.f32 %v4159_v38, %v4106_v6  ;;  %v4108_v34 = vpop.f32.mrb[5].mxu1  ;;  %v4167_v8 = vrot.slane %v4153_v1, %v9326_v60  ;;  %v4171_v62 = vrot.slane %v4153_v1, %v9327_v59  ;;  %v4175_v19 = vrot.slane %v4154_v13, %v9326_v60 }
 0x675   : > { %v4197_v39 = vadd.f32 %v4163_v41, %v4108_v34  ;;  %v4179_v26 = vrot.slane %v4154_v13, %v9327_v59  ;;  %v4155_v18 = vcombine.high %v4153_v1, %v4153_v1 }
 0x676   : > { %v4204_v56 = vmul.f32 %v4844_v61, %v4196_v42 }
 0x677   : > { %v4205_v20 = vmul.f32 %v4845_v36, %v4197_v39  ;;  %v4183_v58 = vrot.slane %v4155_v18, %v9326_v60  ;;  %v4187_v0 = vrot.slane %v4155_v18, %v9327_v59 }
 0x678   : > { %v4212_v30 = vmul.f32 0.33333334, %v4204_v56 }
 0x679   : > { %v4213_v43 = vmul.f32 0.33333334, %v4205_v20 }
 0x67a   : > { %4220 = vst [vmem:[%s8649_s5] sm:$0xff] %v4212_v30 }
 0x67b   : > { %4221 = vst [vmem:[%s8649_s5 + $0x8] sm:$0xff] %v4213_v43 }
 0x67d   : > { %v4112_v47 = vpop.f32.mrb[6].mxu1 }
 0x67e   : > { %v4198_v5 = vadd.f32 %v4167_v8, %v4112_v47  ;;  %v4114_v63 = vpop.f32.mrb[7].mxu1 }
 0x67f   : > { %v4199_v51 = vadd.f32 %v4171_v62, %v4114_v63 }
 0x680   : > { %v4206_v44 = vmul.f32 %v4846_v25, %v4198_v5 }
 0x681   : > { %v4207_v2 = vmul.f32 %v4847_v14, %v4199_v51 }
 0x682   : > { %v4214_v53 = vmul.f32 0.33333334, %v4206_v44 }
 0x683   : > { %v4215_v31 = vmul.f32 0.33333334, %v4207_v2 }
 0x684   : > { %4222 = vst [vmem:[%s8649_s5 + $0x10] sm:$0xff] %v4214_v53 }
 0x685   : > { %4223 = vst [vmem:[%s8649_s5 + $0x18] sm:$0xff] %v4215_v31 }
 0x688   : > { %v4118_v10 = vpop.f32.mrb[8].mxu1 }
 0x689   : > { %v4200_v17 = vadd.f32 %v4175_v19, %v4118_v10  ;;  %v4120_v54 = vpop.f32.mrb[9].mxu1 }
 0x68a   : > { %v4201_v32 = vadd.f32 %v4179_v26, %v4120_v54 }
 0x68b   : > { %v4208_v33 = vmul.f32 %v4848_v27, %v4200_v17 }
 0x68c   : > { %v4209_v12 = vmul.f32 %v4849_v40, %v4201_v32 }
 0x68d   : > { %v4216_v46 = vmul.f32 0.33333334, %v4208_v33 }
 0x68e   : > { %v4217_v24 = vmul.f32 0.33333334, %v4209_v12 }
 0x68f   : > { %4224 = vst [vmem:[%s8649_s5 + $0x20] sm:$0xff] %v4216_v46 }
 0x690   : > { %4225 = vst [vmem:[%s8649_s5 + $0x28] sm:$0xff] %v4217_v24 }
 0x695   : > { %v4124_v57 = vpop.f32.mrb[10].mxu1 }
 0x696   : > { %v4202_v49 = vadd.f32 %v4183_v58, %v4124_v57  ;;  %v4126_v21 = vpop.f32.mrb[11].mxu1 }
 0x697   : > { %v4203_v48 = vadd.f32 %v4187_v0, %v4126_v21 }
 0x698   : > { %v4210_v50 = vmul.f32 %v4850_v3, %v4202_v49 }
 0x699   : > { %v4211_v9 = vmul.f32 %v4851_v28, %v4203_v48 }
 0x69a   : > { %v4218_v4 = vmul.f32 0.33333334, %v4210_v50 }
 0x69b   : > { %v4219_v55 = vmul.f32 0.33333334, %v4211_v9 }
 0x69c   : > { %4226 = vst [vmem:[%s8649_s5 + $0x30] sm:$0xff] %v4218_v4 }
 0x69d   : > { %4227 = vst [vmem:[%s8649_s5 + $0x38] sm:$0xff] %v4219_v55 }
 0x69e PF: > { %s9330_s3 = sld [smem:[#allocation12_spill]] }
 0x6a4   : > { %s21_s27 = sadd.s32 1, %s9330_s3  }
 0x6a5   : > { %p18_p2 = scmp.ge.s32.totalorder %s21_s27, 4  }
 0x6a7   :  { %20 = sbr.rel (!%p18_p2) target bundleno = 13 (0xd), region = 102 }
 0x6ae   :  { %4249 = vsyncpa [#allocation3], 1 }
 0x6af   :  { %4251 = vsyncpa [#allocation3 + $0x1], 1 }
 0x6b0   :  { %4252 = vsyncpa [#allocation5], 1 }
 0x6b1   :  { %4253 = vsyncpa [#allocation8], 1 }

</bundles_post_ra>
